<compile_context>
chip_gen: v7x
topology: tpu7x:2x2x1
jax: 0.10.0
libtpu: 0.0.40
codegen_flags: <defaults>
</compile_context>

<pallas_src>
import functools

import jax
import jax.numpy as jnp
from jax.experimental import pallas as pl
from jax.experimental.pallas import tpu as pltpu

VMEM_LIMIT = 32 * 1024 * 1024


def _cparams(semantics):
    return pltpu.CompilerParams(dimension_semantics=semantics,
                                vmem_limit_bytes=VMEM_LIMIT)


# ----------------------------------------------------------------------------
# 1) Composite image + hole/valid L1 sums on lane-dense (rows, 128) tiles
# ----------------------------------------------------------------------------

def _mask_losses_kernel(gt_ref, m_ref, o_ref, comp_ref, hole_ref, valid_ref):
    @pl.when(pl.program_id(0) == 0)
    def _init():
        hole_ref[...] = jnp.zeros_like(hole_ref)
        valid_ref[...] = jnp.zeros_like(valid_ref)

    gt = gt_ref[...]
    m = m_ref[...]
    o = o_ref[...]
    inv = 1.0 - m
    comp_ref[...] = o * inv + gt * m
    hole_ref[...] += jnp.sum(jnp.abs(inv * o - inv * gt), keepdims=True)
    valid_ref[...] += jnp.sum(jnp.abs(m * o - m * gt), keepdims=True)


def masked_losses_and_comp(gt, mask, out_img):
    """Returns (i_comp, loss_hole, loss_valid); all inputs share one shape."""
    shape = gt.shape
    n = gt.size
    cols = 128
    rows = pl.cdiv(n, cols)
    tr = min(512, ((rows + 7) // 8) * 8)          # sublane-aligned row tile
    rows_pad = ((rows + tr - 1) // tr) * tr
    n_pad = rows_pad * cols

    def prep(x):
        x = x.reshape(-1).astype(jnp.float32)
        return jnp.pad(x, (0, n_pad - n)).reshape(rows_pad, cols)

    comp, hole, valid = pl.pallas_call(
        _mask_losses_kernel,
        grid=(rows_pad // tr,),
        in_specs=[pl.BlockSpec((tr, cols), lambda i: (i, 0))] * 3,
        out_specs=(pl.BlockSpec((tr, cols), lambda i: (i, 0)),
                   pl.BlockSpec((1, 1), lambda i: (0, 0)),
                   pl.BlockSpec((1, 1), lambda i: (0, 0))),
        out_shape=(jax.ShapeDtypeStruct((rows_pad, cols), jnp.float32),
                   jax.ShapeDtypeStruct((1, 1), jnp.float32),
                   jax.ShapeDtypeStruct((1, 1), jnp.float32)),
        compiler_params=_cparams(("arbitrary",)),
    )(prep(gt), prep(mask), prep(out_img))
    comp = comp.reshape(-1)[:n].reshape(shape)
    return comp, hole[0, 0] / n, valid[0, 0] / n


# ----------------------------------------------------------------------------
# 2) Fused 3x3 conv (pad=1) + bias + ReLU -- no im2col.
#    The padded image is flattened with row pitch W+3; the conv becomes 9
#    shifted matmuls on contiguous row windows; extra columns are discarded.
# ----------------------------------------------------------------------------

def _conv3x3_kernel(x_ref, w_ref, b_ref, o_ref, *, pitch, out_rows):
    cout = o_ref.shape[-1]
    acc = jnp.zeros((out_rows, cout), jnp.float32)
    for k in range(9):                      # static unroll -> 9 MXU pushes
        dy, dx = divmod(k, 3)
        s = dy * pitch + dx
        acc = acc + jnp.dot(x_ref[0, s:s + out_rows, :], w_ref[k],
                            preferred_element_type=jnp.float32)
    o_ref[0] = jnp.maximum(acc + b_ref[...], 0.0)


def conv3x3_relu(x, w, b):
    """x: (B, H, W, Cin) NHWC; w: (3,3,Cin,Cout); zero padding 1, stride 1."""
    bsz, h, wid, cin = x.shape
    cout = w.shape[-1]
    pitch = wid + 3                      # 1 col left pad + 2 right (halo slack)
    out_rows = h * pitch
    xp = jnp.pad(x, ((0, 0), (1, 2), (1, 2), (0, 0)))
    xflat = xp.reshape(bsz, (h + 3) * pitch, cin)
    yflat = pl.pallas_call(
        functools.partial(_conv3x3_kernel, pitch=pitch, out_rows=out_rows),
        grid=(bsz,),
        in_specs=[pl.BlockSpec((1, (h + 3) * pitch, cin), lambda i: (i, 0, 0)),
                  pl.BlockSpec((9, cin, cout), lambda i: (0, 0, 0)),
                  pl.BlockSpec((1, cout), lambda i: (0, 0))],
        out_specs=pl.BlockSpec((1, out_rows, cout), lambda i: (i, 0, 0)),
        out_shape=jax.ShapeDtypeStruct((bsz, out_rows, cout), jnp.float32),
        compiler_params=_cparams(("parallel",)),
    )(xflat, w.reshape(9, cin, cout), b.reshape(1, cout))
    return yflat.reshape(bsz, h, pitch, cout)[:, :, :wid, :]


def avg_pool2(x):
    n, h, w, c = x.shape
    return x.reshape(n, h // 2, 2, w // 2, 2, c).mean(axis=(2, 4))


def init_extractor_params(key, c_in=3, widths=(16, 32, 64)):
    # Deterministic synthetic VGG-like extractor (weights generated in-script).
    params = []
    cin = c_in
    for cout in widths:
        key, k1, k2 = jax.random.split(key, 3)
        w = jax.random.normal(k1, (3, 3, cin, cout), jnp.float32) / jnp.sqrt(9.0 * cin)
        b = 0.01 * jax.random.normal(k2, (cout,), jnp.float32)
        params.append((w, b))
        cin = cout
    return params


def extractor_features(x, params):
    feats = []
    h = x
    for (w, b) in params:
        h = avg_pool2(conv3x3_relu(h, w, b))
        feats.append(h)
    return feats


# ----------------------------------------------------------------------------
# 3) Fused perceptual + style(Gram) losses for one layer.
#    Features are stacked as (3N, HW, C) = [out; comp; gt]; one kernel reads
#    each (HW, C) block once and accumulates 4 scalar sums across the batch.
# ----------------------------------------------------------------------------

def _feat_losses_kernel(fo_ref, fc_ref, fg_ref, po_ref, pc_ref, so_ref, sc_ref,
                        *, gram_scale):
    @pl.when(pl.program_id(0) == 0)
    def _init():
        po_ref[...] = jnp.zeros_like(po_ref)
        pc_ref[...] = jnp.zeros_like(pc_ref)
        so_ref[...] = jnp.zeros_like(so_ref)
        sc_ref[...] = jnp.zeros_like(sc_ref)

    xo = fo_ref[0]
    xc = fc_ref[0]
    xg = fg_ref[0]
    po_ref[...] += jnp.sum(jnp.abs(xo - xg), keepdims=True)
    pc_ref[...] += jnp.sum(jnp.abs(xc - xg), keepdims=True)

    dims = (((0,), (0,)), ((), ()))        # X^T X contraction over HW
    go = jax.lax.dot_general(xo, xo, dims, preferred_element_type=jnp.float32) * gram_scale
    gc = jax.lax.dot_general(xc, xc, dims, preferred_element_type=jnp.float32) * gram_scale
    gg = jax.lax.dot_general(xg, xg, dims, preferred_element_type=jnp.float32) * gram_scale
    so_ref[...] += jnp.sum(jnp.abs(go - gg), keepdims=True)
    sc_ref[...] += jnp.sum(jnp.abs(gc - gg), keepdims=True)


def feature_losses(feat_stacked, n):
    """feat_stacked: (3N, HW, C) with [out; comp; gt] along the batch axis."""
    _, hw, c = feat_stacked.shape
    sums = pl.pallas_call(
        functools.partial(_feat_losses_kernel, gram_scale=1.0 / (c * hw)),
        grid=(n,),
        in_specs=[pl.BlockSpec((1, hw, c), lambda i: (i, 0, 0)),
                  pl.BlockSpec((1, hw, c), lambda i: (i + n, 0, 0)),
                  pl.BlockSpec((1, hw, c), lambda i: (i + 2 * n, 0, 0))],
        out_specs=tuple(pl.BlockSpec((1, 1), lambda i: (0, 0)) for _ in range(4)),
        out_shape=tuple(jax.ShapeDtypeStruct((1, 1), jnp.float32) for _ in range(4)),
        compiler_params=_cparams(("arbitrary",)),
    )(feat_stacked, feat_stacked, feat_stacked)
    po, pc, so, sc = (s[0, 0] for s in sums)
    perceptual = (po + pc) / (n * hw * c)
    cc = c * c
    style = (so + sc) / (n * cc * cc)       # /(N*C*C) for the L1 mean, then /cc
    return perceptual, style


# ----------------------------------------------------------------------------
# 4) Fused dilation (ones-conv via shifted adds) + masking + total variation
# ----------------------------------------------------------------------------

def _tv_kernel(invp_ref, ic_ref, tvh_ref, tvw_ref, *, h, w):
    @pl.when(pl.program_id(0) == 0)
    def _init():
        tvh_ref[...] = jnp.zeros_like(tvh_ref)
        tvw_ref[...] = jnp.zeros_like(tvw_ref)

    inv = invp_ref[0]                                    # (h+2, w+2, c), zero-padded (1-mask)
    s = jnp.sum(inv, axis=-1, keepdims=True)             # channel sum  (h+2, w+2, 1)
    rows = s[0:h, :, :] + s[1:h + 1, :, :] + s[2:h + 2, :, :]          # (h, w+2, 1)
    box = rows[:, 0:w, :] + rows[:, 1:w + 1, :] + rows[:, 2:w + 2, :]  # 3x3 box sum
    dmask = jnp.clip(box, 0.0, 1.0)
    ic = ic_ref[0] * dmask                               # (h, w, c)

    dh = jnp.abs(ic[1:, :, :] - ic[:-1, :, :])
    dw = jnp.abs(ic[:, 1:, :] - ic[:, :-1, :])
    tvh_ref[...] += jnp.sum(jnp.sum(dh, axis=0), keepdims=True)
    tvw_ref[...] += jnp.sum(jnp.sum(dw, axis=0), keepdims=True)


def total_variation(i_comp, mask):
    n, h, w, c = i_comp.shape
    invpad = jnp.pad(1.0 - mask, ((0, 0), (1, 1), (1, 1), (0, 0)))
    tvh, tvw = pl.pallas_call(
        functools.partial(_tv_kernel, h=h, w=w),
        grid=(n,),
        in_specs=[pl.BlockSpec((1, h + 2, w + 2, c), lambda i: (i, 0, 0, 0)),
                  pl.BlockSpec((1, h, w, c), lambda i: (i, 0, 0, 0))],
        out_specs=(pl.BlockSpec((1, 1), lambda i: (0, 0)),
                   pl.BlockSpec((1, 1), lambda i: (0, 0))),
        out_shape=(jax.ShapeDtypeStruct((1, 1), jnp.float32),
                   jax.ShapeDtypeStruct((1, 1), jnp.float32)),
        compiler_params=_cparams(("arbitrary",)),
    )(invpad, i_comp)
    return (tvh[0, 0] / (n * (h - 1) * w * c)
            + tvw[0, 0] / (n * h * (w - 1) * c))


# ----------------------------------------------------------------------------
# Forward pass (matches the PyTorch Loss.forward semantics)
# ----------------------------------------------------------------------------

def loss_forward(gt, in_mask, out_img, ext_params):
    # Inputs are NCHW (PyTorch convention); convert to NHWC (channels -> lanes).
    to_nhwc = lambda x: jnp.transpose(x, (0, 2, 3, 1)).astype(jnp.float32)
    gt_h, m_h, out_h = to_nhwc(gt), to_nhwc(in_mask), to_nhwc(out_img)
    n = gt_h.shape[0]

    i_comp, loss_hole, loss_valid = masked_losses_and_comp(gt_h, m_h, out_h)

    # One batched extractor pass over [out; comp; gt]  (3N images).
    x_all = jnp.concatenate([out_h, i_comp, gt_h], axis=0)
    feats = extractor_features(x_all, ext_params)

    loss_perceptual = 0.0
    loss_style = 0.0
    for f in feats:
        b3, fh, fw, fc = f.shape
        perc, style = feature_losses(f.reshape(b3, fh * fw, fc), n)
        loss_perceptual = loss_perceptual + perc
        loss_style = loss_style + style

    loss_tv = total_variation(i_comp, m_h)

    return (loss_valid * 1.0 + loss_hole * 6.0 + loss_perceptual * 0.05
            + loss_style * 120.0 + loss_tv * 0.1)


# ----------------------------------------------------------------------------
# Pure-JAX reference (same math, no Pallas) for verification.
# Matmuls use HIGHEST precision to match the in-kernel f32 MXU path.
# ----------------------------------------------------------------------------

_HI = jax.lax.Precision.HIGHEST


def _im2col_3x3(x):
    n, h, w, c = x.shape
    xp = jnp.pad(x, ((0, 0), (1, 1), (1, 1), (0, 0)))
    cols = [xp[:, dy:dy + h, dx:dx + w, :] for dy in range(3) for dx in range(3)]
    return jnp.stack(cols, axis=3).reshape(n * h * w, 9 * c)


def _ref_conv3x3(x, w, b, relu):
    n, h, wid, c = x.shape
    y = jnp.dot(_im2col_3x3(x), w.reshape(9 * c, -1), precision=_HI) + b
    if relu:
        y = jnp.maximum(y, 0.0)
    return y.reshape(n, h, wid, -1)


def _ref_forward(gt, in_mask, out_img, params):
    to = lambda x: jnp.transpose(x, (0, 2, 3, 1)).astype(jnp.float32)
    gt_h, m_h, o_h = to(gt), to(in_mask), to(out_img)
    l1 = lambda a, b: jnp.mean(jnp.abs(a - b))

    i_comp = o_h * (1 - m_h) + gt_h * m_h
    loss_hole = l1((1 - m_h) * o_h, (1 - m_h) * gt_h)
    loss_valid = l1(m_h * o_h, m_h * gt_h)

    def ext(x):
        feats, h = [], x
        for (w, b) in params:
            h = avg_pool2(_ref_conv3x3(h, w, b, True))
            feats.append(h)
        return feats

    fo, fc, fg = ext(o_h), ext(i_comp), ext(gt_h)
    lp = sum(l1(a, g) + l1(c, g) for a, c, g in zip(fo, fc, fg))

    def gram(f):
        n, h, w, c = f.shape
        x = f.reshape(n, h * w, c)
        return jnp.einsum('npc,npd->ncd', x, x, precision=_HI) / (c * h * w)

    ls = 0.0
    for a, c, g in zip(fo, fc, fg):
        cc = a.shape[-1] ** 2
        ls = ls + l1(gram(a), gram(g)) / cc + l1(gram(c), gram(g)) / cc

    C = m_h.shape[-1]
    dm = jnp.clip(_ref_conv3x3(1 - m_h, jnp.ones((3, 3, C, C), jnp.float32),
                               jnp.zeros((C,), jnp.float32), False), 0.0, 1.0)
    ic = i_comp * dm
    ltv = l1(ic[:, 1:], ic[:, :-1]) + l1(ic[:, :, 1:], ic[:, :, :-1])

    return loss_valid + 6.0 * loss_hole + 0.05 * lp + 120.0 * ls + 0.1 * ltv


# ----------------------------------------------------------------------------

if __name__ == "__main__":
    key = jax.random.PRNGKey(0)
    k1, k2, k3, kp = jax.random.split(key, 4)

    N, C, H, W = 2, 3, 16, 16
    gt = jax.random.uniform(k1, (N, C, H, W), jnp.float32)
    out_img = jax.random.uniform(k2, (N, C, H, W), jnp.float32)
    in_mask = (jax.random.uniform(k3, (N, C, H, W)) > 0.5).astype(jnp.float32)
    ext_params = init_extractor_params(kp)

    loss = jax.jit(loss_forward)(gt, in_mask, out_img, ext_params)
    loss = jax.block_until_ready(loss)

    ref = _ref_forward(gt, in_mask, out_img, ext_params)
    assert bool(jnp.isfinite(loss)), f"non-finite loss: {loss}"
    assert bool(jnp.allclose(loss, ref, rtol=5e-3, atol=5e-3)), (loss, ref)

    print("KERNEL_OK")
</pallas_src>

<mosaic_0001>
module attributes {stable_mosaic.version = 11 : i64} {
  func.func @_mask_losses_kernel(%arg0: i32, %arg1: memref<16x128xf32, #tpu.memory_space<vmem>>, %arg2: memref<16x128xf32, #tpu.memory_space<vmem>>, %arg3: memref<16x128xf32, #tpu.memory_space<vmem>>, %arg4: memref<16x128xf32, #tpu.memory_space<vmem>>, %arg5: memref<1x1xf32, #tpu.memory_space<vmem>>, %arg6: memref<1x1xf32, #tpu.memory_space<vmem>>) attributes {dimension_semantics = [#tpu.dimension_semantics<arbitrary>], iteration_bounds = array<i64: 1>, scalar_prefetch = 0 : i64, scratch_operands = 0 : i64, tpu.core_type = #tpu.core_type<tc>, window_params = [{transform_indices = @transform_0, window_bounds = array<i64: 16, 128>}, {transform_indices = @transform_1, window_bounds = array<i64: 16, 128>}, {transform_indices = @transform_2, window_bounds = array<i64: 16, 128>}, {transform_indices = @transform_3, window_bounds = array<i64: 16, 128>}, {pipeline_mode = #tpu.pipeline_mode<synchronous>, transform_indices = @transform_4, window_bounds = array<i64: 1, 1>}, {pipeline_mode = #tpu.pipeline_mode<synchronous>, transform_indices = @transform_5, window_bounds = array<i64: 1, 1>}]} {
    %c0_i32 = arith.constant 0 : i32
    %0 = arith.cmpi eq, %arg0, %c0_i32 : i32
    %1 = arith.extui %0 : i1 to i32
    %c0_i32_0 = arith.constant 0 : i32
    %2 = arith.cmpi ne, %1, %c0_i32_0 : i32
    scf.if %2 {
      %cst_18 = arith.constant 0.000000e+00 : f32
      %36 = vector.broadcast %cst_18 : f32 to vector<1x1xf32>
      %c0_19 = arith.constant 0 : index
      %c0_20 = arith.constant 0 : index
      %37 = vector.load %arg5[%c0_19, %c0_20] : memref<1x1xf32, #tpu.memory_space<vmem>>, vector<1x1xf32>
      tpu.vector_store %arg5[%c0_19, %c0_20], %36 {strides = array<i32>} : memref<1x1xf32, #tpu.memory_space<vmem>>, vector<1x1xf32>,
      %cst_21 = arith.constant 0.000000e+00 : f32
      %38 = vector.broadcast %cst_21 : f32 to vector<1x1xf32>
      %c0_22 = arith.constant 0 : index
      %c0_23 = arith.constant 0 : index
      %39 = vector.load %arg6[%c0_22, %c0_23] : memref<1x1xf32, #tpu.memory_space<vmem>>, vector<1x1xf32>
      tpu.vector_store %arg6[%c0_22, %c0_23], %38 {strides = array<i32>} : memref<1x1xf32, #tpu.memory_space<vmem>>, vector<1x1xf32>,
    } else {
    }
    %c0 = arith.constant 0 : index
    %c0_1 = arith.constant 0 : index
    %3 = vector.load %arg1[%c0, %c0_1] : memref<16x128xf32, #tpu.memory_space<vmem>>, vector<16x128xf32>
    %c0_2 = arith.constant 0 : index
    %c0_3 = arith.constant 0 : index
    %4 = vector.load %arg2[%c0_2, %c0_3] : memref<16x128xf32, #tpu.memory_space<vmem>>, vector<16x128xf32>
    %c0_4 = arith.constant 0 : index
    %c0_5 = arith.constant 0 : index
    %5 = vector.load %arg3[%c0_4, %c0_5] : memref<16x128xf32, #tpu.memory_space<vmem>>, vector<16x128xf32>
    %cst = arith.constant 1.000000e+00 : f32
    %6 = vector.broadcast %cst : f32 to vector<16x128xf32>
    %7 = arith.subf %6, %4 : vector<16x128xf32>
    %8 = arith.mulf %5, %7 : vector<16x128xf32>
    %9 = arith.mulf %3, %4 : vector<16x128xf32>
    %10 = arith.addf %8, %9 : vector<16x128xf32>
    %c0_6 = arith.constant 0 : index
    %c0_7 = arith.constant 0 : index
    %11 = vector.load %arg4[%c0_6, %c0_7] : memref<16x128xf32, #tpu.memory_space<vmem>>, vector<16x128xf32>
    tpu.vector_store %arg4[%c0_6, %c0_7], %10 {strides = array<i32>} : memref<16x128xf32, #tpu.memory_space<vmem>>, vector<16x128xf32>,
    %c0_8 = arith.constant 0 : index
    %c0_9 = arith.constant 0 : index
    %12 = vector.load %arg5[%c0_8, %c0_9] : memref<1x1xf32, #tpu.memory_space<vmem>>, vector<1x1xf32>
    %13 = arith.mulf %7, %5 : vector<16x128xf32>
    %14 = arith.mulf %7, %3 : vector<16x128xf32>
    %15 = arith.subf %13, %14 : vector<16x128xf32>
    %16 = math.absf %15 : vector<16x128xf32>
    %17 = vector.shape_cast %16 : vector<16x128xf32> to vector<1x16x128xf32>
    %cst_10 = arith.constant dense<0.000000e+00> : vector<1xf32>
    %18 = vector.multi_reduction <add>, %17, %cst_10 [1, 2] : vector<1x16x128xf32> to vector<1xf32>
    %19 = vector.shape_cast %18 : vector<1xf32> to vector<1x1x1xf32>
    %20 = vector.extract %19[0, 0, 0] : f32 from vector<1x1x1xf32>
    %21 = vector.broadcast %20 : f32 to vector<1x1xf32>
    %22 = arith.addf %12, %21 : vector<1x1xf32>
    %c0_11 = arith.constant 0 : index
    %c0_12 = arith.constant 0 : index
    %23 = vector.load %arg5[%c0_11, %c0_12] : memref<1x1xf32, #tpu.memory_space<vmem>>, vector<1x1xf32>
    tpu.vector_store %arg5[%c0_11, %c0_12], %22 {strides = array<i32>} : memref<1x1xf32, #tpu.memory_space<vmem>>, vector<1x1xf32>,
    %c0_13 = arith.constant 0 : index
    %c0_14 = arith.constant 0 : index
    %24 = vector.load %arg6[%c0_13, %c0_14] : memref<1x1xf32, #tpu.memory_space<vmem>>, vector<1x1xf32>
    %25 = arith.mulf %4, %5 : vector<16x128xf32>
    %26 = arith.mulf %4, %3 : vector<16x128xf32>
    %27 = arith.subf %25, %26 : vector<16x128xf32>
    %28 = math.absf %27 : vector<16x128xf32>
    %29 = vector.shape_cast %28 : vector<16x128xf32> to vector<1x16x128xf32>
    %cst_15 = arith.constant dense<0.000000e+00> : vector<1xf32>
    %30 = vector.multi_reduction <add>, %29, %cst_15 [1, 2] : vector<1x16x128xf32> to vector<1xf32>
    %31 = vector.shape_cast %30 : vector<1xf32> to vector<1x1x1xf32>
    %32 = vector.extract %31[0, 0, 0] : f32 from vector<1x1x1xf32>
    %33 = vector.broadcast %32 : f32 to vector<1x1xf32>
    %34 = arith.addf %24, %33 : vector<1x1xf32>
    %c0_16 = arith.constant 0 : index
    %c0_17 = arith.constant 0 : index
    %35 = vector.load %arg6[%c0_16, %c0_17] : memref<1x1xf32, #tpu.memory_space<vmem>>, vector<1x1xf32>
    tpu.vector_store %arg6[%c0_16, %c0_17], %34 {strides = array<i32>} : memref<1x1xf32, #tpu.memory_space<vmem>>, vector<1x1xf32>,
    return
  }
  func.func @transform_0(%arg0: i32) -> (i32, i32) {
    %c0_i32 = arith.constant 0 : i32
    %c0_i32_0 = arith.constant 0 : i32
    return %arg0, %c0_i32 : i32, i32
  }
  func.func @transform_1(%arg0: i32) -> (i32, i32) {
    %c0_i32 = arith.constant 0 : i32
    %c0_i32_0 = arith.constant 0 : i32
    return %arg0, %c0_i32 : i32, i32
  }
  func.func @transform_2(%arg0: i32) -> (i32, i32) {
    %c0_i32 = arith.constant 0 : i32
    %c0_i32_0 = arith.constant 0 : i32
    return %arg0, %c0_i32 : i32, i32
  }
  func.func @transform_3(%arg0: i32) -> (i32, i32) {
    %c0_i32 = arith.constant 0 : i32
    %c0_i32_0 = arith.constant 0 : i32
    return %arg0, %c0_i32 : i32, i32
  }
  func.func @transform_4(%arg0: i32) -> (i32, i32) {
    %c0_i32 = arith.constant 0 : i32
    %c0_i32_0 = arith.constant 0 : i32
    %c0_i32_1 = arith.constant 0 : i32
    return %c0_i32, %c0_i32_0 : i32, i32
  }
  func.func @transform_5(%arg0: i32) -> (i32, i32) {
    %c0_i32 = arith.constant 0 : i32
    %c0_i32_0 = arith.constant 0 : i32
    %c0_i32_1 = arith.constant 0 : i32
    return %c0_i32, %c0_i32_0 : i32, i32
  }
}

module attributes {stable_mosaic.version = 11 : i64} {
  func.func @_tv_kernel(%arg0: i32, %arg1: memref<1x18x18x3xf32, #tpu.memory_space<vmem>>, %arg2: memref<1x16x16x3xf32, #tpu.memory_space<vmem>>, %arg3: memref<1x1xf32, #tpu.memory_space<vmem>>, %arg4: memref<1x1xf32, #tpu.memory_space<vmem>>) attributes {dimension_semantics = [#tpu.dimension_semantics<arbitrary>], iteration_bounds = array<i64: 2>, scalar_prefetch = 0 : i64, scratch_operands = 0 : i64, tpu.core_type = #tpu.core_type<tc>, window_params = [{transform_indices = @transform_0, window_bounds = array<i64: 1, 18, 18, 3>}, {transform_indices = @transform_1, window_bounds = array<i64: 1, 16, 16, 3>}, {pipeline_mode = #tpu.pipeline_mode<synchronous>, transform_indices = @transform_2, window_bounds = array<i64: 1, 1>}, {pipeline_mode = #tpu.pipeline_mode<synchronous>, transform_indices = @transform_3, window_bounds = array<i64: 1, 1>}]} {
    %c0_i32 = arith.constant 0 : i32
    %0 = arith.cmpi eq, %arg0, %c0_i32 : i32
    %1 = arith.extui %0 : i1 to i32
    %c0_i32_0 = arith.constant 0 : i32
    %2 = arith.cmpi ne, %1, %c0_i32_0 : i32
    scf.if %2 {
      %cst_22 = arith.constant 0.000000e+00 : f32
      %51 = vector.broadcast %cst_22 : f32 to vector<1x1xf32>
      %c0_23 = arith.constant 0 : index
      %c0_24 = arith.constant 0 : index
      %52 = vector.load %arg3[%c0_23, %c0_24] : memref<1x1xf32, #tpu.memory_space<vmem>>, vector<1x1xf32>
      tpu.vector_store %arg3[%c0_23, %c0_24], %51 {strides = array<i32>} : memref<1x1xf32, #tpu.memory_space<vmem>>, vector<1x1xf32>,
      %cst_25 = arith.constant 0.000000e+00 : f32
      %53 = vector.broadcast %cst_25 : f32 to vector<1x1xf32>
      %c0_26 = arith.constant 0 : index
      %c0_27 = arith.constant 0 : index
      %54 = vector.load %arg4[%c0_26, %c0_27] : memref<1x1xf32, #tpu.memory_space<vmem>>, vector<1x1xf32>
      tpu.vector_store %arg4[%c0_26, %c0_27], %53 {strides = array<i32>} : memref<1x1xf32, #tpu.memory_space<vmem>>, vector<1x1xf32>,
    } else {
    }
    %c0 = arith.constant 0 : index
    %c0_1 = arith.constant 0 : index
    %c0_2 = arith.constant 0 : index
    %c0_3 = arith.constant 0 : index
    %3 = vector.load %arg1[%c0, %c0_1, %c0_2, %c0_3] : memref<1x18x18x3xf32, #tpu.memory_space<vmem>>, vector<1x18x18x3xf32>
    %4 = vector.shape_cast %3 : vector<1x18x18x3xf32> to vector<18x18x3xf32>
    %cst = arith.constant dense<0.000000e+00> : vector<18x18xf32>
    %5 = vector.multi_reduction <add>, %4, %cst [2] : vector<18x18x3xf32> to vector<18x18xf32>
    %6 = vector.shape_cast %5 : vector<18x18xf32> to vector<18x18x1xf32>
    %7 = vector.extract_strided_slice %6 {offsets = [0, 0, 0], sizes = [16, 18, 1], strides = [1, 1, 1]} : vector<18x18x1xf32> to vector<16x18x1xf32>
    %8 = vector.extract_strided_slice %6 {offsets = [1, 0, 0], sizes = [16, 18, 1], strides = [1, 1, 1]} : vector<18x18x1xf32> to vector<16x18x1xf32>
    %9 = arith.addf %7, %8 : vector<16x18x1xf32>
    %10 = vector.extract_strided_slice %6 {offsets = [2, 0, 0], sizes = [16, 18, 1], strides = [1, 1, 1]} : vector<18x18x1xf32> to vector<16x18x1xf32>
    %11 = arith.addf %9, %10 : vector<16x18x1xf32>
    %12 = vector.extract_strided_slice %11 {offsets = [0, 0, 0], sizes = [16, 16, 1], strides = [1, 1, 1]} : vector<16x18x1xf32> to vector<16x16x1xf32>
    %13 = vector.extract_strided_slice %11 {offsets = [0, 1, 0], sizes = [16, 16, 1], strides = [1, 1, 1]} : vector<16x18x1xf32> to vector<16x16x1xf32>
    %14 = arith.addf %12, %13 : vector<16x16x1xf32>
    %15 = vector.extract_strided_slice %11 {offsets = [0, 2, 0], sizes = [16, 16, 1], strides = [1, 1, 1]} : vector<16x18x1xf32> to vector<16x16x1xf32>
    %16 = arith.addf %14, %15 : vector<16x16x1xf32>
    %cst_4 = arith.constant 0.000000e+00 : f32
    %cst_5 = arith.constant 1.000000e+00 : f32
    %17 = vector.broadcast %cst_4 : f32 to vector<16x16x1xf32>
    %18 = arith.maximumf %17, %16 : vector<16x16x1xf32>
    %19 = vector.broadcast %cst_5 : f32 to vector<16x16x1xf32>
    %20 = arith.minimumf %19, %18 : vector<16x16x1xf32>
    %c0_6 = arith.constant 0 : index
    %c0_7 = arith.constant 0 : index
    %c0_8 = arith.constant 0 : index
    %c0_9 = arith.constant 0 : index
    %21 = vector.load %arg2[%c0_6, %c0_7, %c0_8, %c0_9] : memref<1x16x16x3xf32, #tpu.memory_space<vmem>>, vector<1x16x16x3xf32>
    %22 = vector.shape_cast %21 : vector<1x16x16x3xf32> to vector<16x16x3xf32>
    %23 = vector.broadcast %20 : vector<16x16x1xf32> to vector<16x16x3xf32>
    %24 = arith.mulf %22, %23 : vector<16x16x3xf32>
    %25 = vector.extract_strided_slice %24 {offsets = [1, 0, 0], sizes = [15, 16, 3], strides = [1, 1, 1]} : vector<16x16x3xf32> to vector<15x16x3xf32>
    %26 = vector.extract_strided_slice %24 {offsets = [0, 0, 0], sizes = [15, 16, 3], strides = [1, 1, 1]} : vector<16x16x3xf32> to vector<15x16x3xf32>
    %27 = arith.subf %25, %26 : vector<15x16x3xf32>
    %28 = math.absf %27 : vector<15x16x3xf32>
    %29 = vector.extract_strided_slice %24 {offsets = [0, 1, 0], sizes = [16, 15, 3], strides = [1, 1, 1]} : vector<16x16x3xf32> to vector<16x15x3xf32>
    %30 = vector.extract_strided_slice %24 {offsets = [0, 0, 0], sizes = [16, 15, 3], strides = [1, 1, 1]} : vector<16x16x3xf32> to vector<16x15x3xf32>
    %31 = arith.subf %29, %30 : vector<16x15x3xf32>
    %32 = math.absf %31 : vector<16x15x3xf32>
    %c0_10 = arith.constant 0 : index
    %c0_11 = arith.constant 0 : index
    %33 = vector.load %arg3[%c0_10, %c0_11] : memref<1x1xf32, #tpu.memory_space<vmem>>, vector<1x1xf32>
    %cst_12 = arith.constant dense<0.000000e+00> : vector<16x3xf32>
    %34 = vector.multi_reduction <add>, %28, %cst_12 [0] : vector<15x16x3xf32> to vector<16x3xf32>
    %35 = vector.shape_cast %34 : vector<16x3xf32> to vector<1x16x3xf32>
    %cst_13 = arith.constant dense<0.000000e+00> : vector<1xf32>
    %36 = vector.multi_reduction <add>, %35, %cst_13 [1, 2] : vector<1x16x3xf32> to vector<1xf32>
    %37 = vector.shape_cast %36 : vector<1xf32> to vector<1x1x1xf32>
    %38 = vector.extract %37[0, 0, 0] : f32 from vector<1x1x1xf32>
    %39 = vector.broadcast %38 : f32 to vector<1x1xf32>
    %40 = arith.addf %33, %39 : vector<1x1xf32>
    %c0_14 = arith.constant 0 : index
    %c0_15 = arith.constant 0 : index
    %41 = vector.load %arg3[%c0_14, %c0_15] : memref<1x1xf32, #tpu.memory_space<vmem>>, vector<1x1xf32>
    tpu.vector_store %arg3[%c0_14, %c0_15], %40 {strides = array<i32>} : memref<1x1xf32, #tpu.memory_space<vmem>>, vector<1x1xf32>,
    %c0_16 = arith.constant 0 : index
    %c0_17 = arith.constant 0 : index
    %42 = vector.load %arg4[%c0_16, %c0_17] : memref<1x1xf32, #tpu.memory_space<vmem>>, vector<1x1xf32>
    %cst_18 = arith.constant dense<0.000000e+00> : vector<15x3xf32>
    %43 = vector.multi_reduction <add>, %32, %cst_18 [0] : vector<16x15x3xf32> to vector<15x3xf32>
    %44 = vector.shape_cast %43 : vector<15x3xf32> to vector<1x15x3xf32>
    %cst_19 = arith.constant dense<0.000000e+00> : vector<1xf32>
    %45 = vector.multi_reduction <add>, %44, %cst_19 [1, 2] : vector<1x15x3xf32> to vector<1xf32>
    %46 = vector.shape_cast %45 : vector<1xf32> to vector<1x1x1xf32>
    %47 = vector.extract %46[0, 0, 0] : f32 from vector<1x1x1xf32>
    %48 = vector.broadcast %47 : f32 to vector<1x1xf32>
    %49 = arith.addf %42, %48 : vector<1x1xf32>
    %c0_20 = arith.constant 0 : index
    %c0_21 = arith.constant 0 : index
    %50 = vector.load %arg4[%c0_20, %c0_21] : memref<1x1xf32, #tpu.memory_space<vmem>>, vector<1x1xf32>
    tpu.vector_store %arg4[%c0_20, %c0_21], %49 {strides = array<i32>} : memref<1x1xf32, #tpu.memory_space<vmem>>, vector<1x1xf32>,
    return
  }
  func.func @transform_0(%arg0: i32) -> (i32, i32, i32, i32) {
    %c0_i32 = arith.constant 0 : i32
    %c0_i32_0 = arith.constant 0 : i32
    %c0_i32_1 = arith.constant 0 : i32
    %c0_i32_2 = arith.constant 0 : i32
    return %arg0, %c0_i32, %c0_i32_0, %c0_i32_1 : i32, i32, i32, i32
  }
  func.func @transform_1(%arg0: i32) -> (i32, i32, i32, i32) {
    %c0_i32 = arith.constant 0 : i32
    %c0_i32_0 = arith.constant 0 : i32
    %c0_i32_1 = arith.constant 0 : i32
    %c0_i32_2 = arith.constant 0 : i32
    return %arg0, %c0_i32, %c0_i32_0, %c0_i32_1 : i32, i32, i32, i32
  }
  func.func @transform_2(%arg0: i32) -> (i32, i32) {
    %c0_i32 = arith.constant 0 : i32
    %c0_i32_0 = arith.constant 0 : i32
    %c0_i32_1 = arith.constant 0 : i32
    return %c0_i32, %c0_i32_0 : i32, i32
  }
  func.func @transform_3(%arg0: i32) -> (i32, i32) {
    %c0_i32 = arith.constant 0 : i32
    %c0_i32_0 = arith.constant 0 : i32
    %c0_i32_1 = arith.constant 0 : i32
    return %c0_i32, %c0_i32_0 : i32, i32
  }
}

module attributes {stable_mosaic.version = 11 : i64} {
  func.func @_conv3x3_kernel(%arg0: i32, %arg1: memref<1x361x3xf32, #tpu.memory_space<vmem>>, %arg2: memref<9x3x16xf32, #tpu.memory_space<vmem>>, %arg3: memref<1x16xf32, #tpu.memory_space<vmem>>, %arg4: memref<1x304x16xf32, #tpu.memory_space<vmem>>) attributes {dimension_semantics = [#tpu.dimension_semantics<parallel>], iteration_bounds = array<i64: 6>, scalar_prefetch = 0 : i64, scratch_operands = 0 : i64, tpu.core_type = #tpu.core_type<tc>, window_params = [{transform_indices = @transform_0, window_bounds = array<i64: 1, 361, 3>}, {pipeline_mode = #tpu.pipeline_mode<synchronous>, transform_indices = @transform_1, window_bounds = array<i64: 9, 3, 16>}, {pipeline_mode = #tpu.pipeline_mode<synchronous>, transform_indices = @transform_2, window_bounds = array<i64: 1, 16>}, {transform_indices = @transform_3, window_bounds = array<i64: 1, 304, 16>}]} {
    %cst = arith.constant 0.000000e+00 : f32
    %0 = vector.broadcast %cst : f32 to vector<304x16xf32>
    %c0 = arith.constant 0 : index
    %c0_0 = arith.constant 0 : index
    %c0_1 = arith.constant 0 : index
    %1 = vector.load %arg1[%c0, %c0_0, %c0_1] : memref<1x361x3xf32, #tpu.memory_space<vmem>>, vector<1x304x3xf32>
    %2 = vector.shape_cast %1 : vector<1x304x3xf32> to vector<304x3xf32>
    %c0_2 = arith.constant 0 : index
    %c0_3 = arith.constant 0 : index
    %c0_4 = arith.constant 0 : index
    %3 = vector.load %arg2[%c0_2, %c0_3, %c0_4] : memref<9x3x16xf32, #tpu.memory_space<vmem>>, vector<1x3x16xf32>
    %4 = vector.shape_cast %3 : vector<1x3x16xf32> to vector<3x16xf32>
    %cst_5 = arith.constant dense<0.000000e+00> : vector<304x16xf32>
    %5 = tpu.matmul %2, %4, %cst_5 {dimension_numbers = #tpu.dot_dimension_numbers<[1], [0], [0], [1], [0, 0, 1, 1], [], []>} : vector<304x3xf32>, vector<3x16xf32>, vector<304x16xf32> -> vector<304x16xf32>
    %6 = arith.addf %0, %5 : vector<304x16xf32>
    %c0_6 = arith.constant 0 : index
    %c1 = arith.constant 1 : index
    %c0_7 = arith.constant 0 : index
    %7 = vector.load %arg1[%c0_6, %c1, %c0_7] : memref<1x361x3xf32, #tpu.memory_space<vmem>>, vector<1x304x3xf32>
    %8 = vector.shape_cast %7 : vector<1x304x3xf32> to vector<304x3xf32>
    %c1_8 = arith.constant 1 : index
    %c0_9 = arith.constant 0 : index
    %c0_10 = arith.constant 0 : index
    %9 = vector.load %arg2[%c1_8, %c0_9, %c0_10] : memref<9x3x16xf32, #tpu.memory_space<vmem>>, vector<1x3x16xf32>
    %10 = vector.shape_cast %9 : vector<1x3x16xf32> to vector<3x16xf32>
    %cst_11 = arith.constant dense<0.000000e+00> : vector<304x16xf32>
    %11 = tpu.matmul %8, %10, %cst_11 {dimension_numbers = #tpu.dot_dimension_numbers<[1], [0], [0], [1], [0, 0, 1, 1], [], []>} : vector<304x3xf32>, vector<3x16xf32>, vector<304x16xf32> -> vector<304x16xf32>
    %12 = arith.addf %6, %11 : vector<304x16xf32>
    %c0_12 = arith.constant 0 : index
    %c2 = arith.constant 2 : index
    %c0_13 = arith.constant 0 : index
    %13 = vector.load %arg1[%c0_12, %c2, %c0_13] : memref<1x361x3xf32, #tpu.memory_space<vmem>>, vector<1x304x3xf32>
    %14 = vector.shape_cast %13 : vector<1x304x3xf32> to vector<304x3xf32>
    %c2_14 = arith.constant 2 : index
    %c0_15 = arith.constant 0 : index
    %c0_16 = arith.constant 0 : index
    %15 = vector.load %arg2[%c2_14, %c0_15, %c0_16] : memref<9x3x16xf32, #tpu.memory_space<vmem>>, vector<1x3x16xf32>
    %16 = vector.shape_cast %15 : vector<1x3x16xf32> to vector<3x16xf32>
    %cst_17 = arith.constant dense<0.000000e+00> : vector<304x16xf32>
    %17 = tpu.matmul %14, %16, %cst_17 {dimension_numbers = #tpu.dot_dimension_numbers<[1], [0], [0], [1], [0, 0, 1, 1], [], []>} : vector<304x3xf32>, vector<3x16xf32>, vector<304x16xf32> -> vector<304x16xf32>
    %18 = arith.addf %12, %17 : vector<304x16xf32>
    %c0_18 = arith.constant 0 : index
    %c19 = arith.constant 19 : index
    %c0_19 = arith.constant 0 : index
    %19 = vector.load %arg1[%c0_18, %c19, %c0_19] : memref<1x361x3xf32, #tpu.memory_space<vmem>>, vector<1x304x3xf32>
    %20 = vector.shape_cast %19 : vector<1x304x3xf32> to vector<304x3xf32>
    %c3 = arith.constant 3 : index
    %c0_20 = arith.constant 0 : index
    %c0_21 = arith.constant 0 : index
    %21 = vector.load %arg2[%c3, %c0_20, %c0_21] : memref<9x3x16xf32, #tpu.memory_space<vmem>>, vector<1x3x16xf32>
    %22 = vector.shape_cast %21 : vector<1x3x16xf32> to vector<3x16xf32>
    %cst_22 = arith.constant dense<0.000000e+00> : vector<304x16xf32>
    %23 = tpu.matmul %20, %22, %cst_22 {dimension_numbers = #tpu.dot_dimension_numbers<[1], [0], [0], [1], [0, 0, 1, 1], [], []>} : vector<304x3xf32>, vector<3x16xf32>, vector<304x16xf32> -> vector<304x16xf32>
    %24 = arith.addf %18, %23 : vector<304x16xf32>
    %c0_23 = arith.constant 0 : index
    %c20 = arith.constant 20 : index
    %c0_24 = arith.constant 0 : index
    %25 = vector.load %arg1[%c0_23, %c20, %c0_24] : memref<1x361x3xf32, #tpu.memory_space<vmem>>, vector<1x304x3xf32>
    %26 = vector.shape_cast %25 : vector<1x304x3xf32> to vector<304x3xf32>
    %c4 = arith.constant 4 : index
    %c0_25 = arith.constant 0 : index
    %c0_26 = arith.constant 0 : index
    %27 = vector.load %arg2[%c4, %c0_25, %c0_26] : memref<9x3x16xf32, #tpu.memory_space<vmem>>, vector<1x3x16xf32>
    %28 = vector.shape_cast %27 : vector<1x3x16xf32> to vector<3x16xf32>
    %cst_27 = arith.constant dense<0.000000e+00> : vector<304x16xf32>
    %29 = tpu.matmul %26, %28, %cst_27 {dimension_numbers = #tpu.dot_dimension_numbers<[1], [0], [0], [1], [0, 0, 1, 1], [], []>} : vector<304x3xf32>, vector<3x16xf32>, vector<304x16xf32> -> vector<304x16xf32>
    %30 = arith.addf %24, %29 : vector<304x16xf32>
    %c0_28 = arith.constant 0 : index
    %c21 = arith.constant 21 : index
    %c0_29 = arith.constant 0 : index
    %31 = vector.load %arg1[%c0_28, %c21, %c0_29] : memref<1x361x3xf32, #tpu.memory_space<vmem>>, vector<1x304x3xf32>
    %32 = vector.shape_cast %31 : vector<1x304x3xf32> to vector<304x3xf32>
    %c5 = arith.constant 5 : index
    %c0_30 = arith.constant 0 : index
    %c0_31 = arith.constant 0 : index
    %33 = vector.load %arg2[%c5, %c0_30, %c0_31] : memref<9x3x16xf32, #tpu.memory_space<vmem>>, vector<1x3x16xf32>
    %34 = vector.shape_cast %33 : vector<1x3x16xf32> to vector<3x16xf32>
    %cst_32 = arith.constant dense<0.000000e+00> : vector<304x16xf32>
    %35 = tpu.matmul %32, %34, %cst_32 {dimension_numbers = #tpu.dot_dimension_numbers<[1], [0], [0], [1], [0, 0, 1, 1], [], []>} : vector<304x3xf32>, vector<3x16xf32>, vector<304x16xf32> -> vector<304x16xf32>
    %36 = arith.addf %30, %35 : vector<304x16xf32>
    %c0_33 = arith.constant 0 : index
    %c38 = arith.constant 38 : index
    %c0_34 = arith.constant 0 : index
    %37 = vector.load %arg1[%c0_33, %c38, %c0_34] : memref<1x361x3xf32, #tpu.memory_space<vmem>>, vector<1x304x3xf32>
    %38 = vector.shape_cast %37 : vector<1x304x3xf32> to vector<304x3xf32>
    %c6 = arith.constant 6 : index
    %c0_35 = arith.constant 0 : index
    %c0_36 = arith.constant 0 : index
    %39 = vector.load %arg2[%c6, %c0_35, %c0_36] : memref<9x3x16xf32, #tpu.memory_space<vmem>>, vector<1x3x16xf32>
    %40 = vector.shape_cast %39 : vector<1x3x16xf32> to vector<3x16xf32>
    %cst_37 = arith.constant dense<0.000000e+00> : vector<304x16xf32>
    %41 = tpu.matmul %38, %40, %cst_37 {dimension_numbers = #tpu.dot_dimension_numbers<[1], [0], [0], [1], [0, 0, 1, 1], [], []>} : vector<304x3xf32>, vector<3x16xf32>, vector<304x16xf32> -> vector<304x16xf32>
    %42 = arith.addf %36, %41 : vector<304x16xf32>
    %c0_38 = arith.constant 0 : index
    %c39 = arith.constant 39 : index
    %c0_39 = arith.constant 0 : index
    %43 = vector.load %arg1[%c0_38, %c39, %c0_39] : memref<1x361x3xf32, #tpu.memory_space<vmem>>, vector<1x304x3xf32>
    %44 = vector.shape_cast %43 : vector<1x304x3xf32> to vector<304x3xf32>
    %c7 = arith.constant 7 : index
    %c0_40 = arith.constant 0 : index
    %c0_41 = arith.constant 0 : index
    %45 = vector.load %arg2[%c7, %c0_40, %c0_41] : memref<9x3x16xf32, #tpu.memory_space<vmem>>, vector<1x3x16xf32>
    %46 = vector.shape_cast %45 : vector<1x3x16xf32> to vector<3x16xf32>
    %cst_42 = arith.constant dense<0.000000e+00> : vector<304x16xf32>
    %47 = tpu.matmul %44, %46, %cst_42 {dimension_numbers = #tpu.dot_dimension_numbers<[1], [0], [0], [1], [0, 0, 1, 1], [], []>} : vector<304x3xf32>, vector<3x16xf32>, vector<304x16xf32> -> vector<304x16xf32>
    %48 = arith.addf %42, %47 : vector<304x16xf32>
    %c0_43 = arith.constant 0 : index
    %c40 = arith.constant 40 : index
    %c0_44 = arith.constant 0 : index
    %49 = vector.load %arg1[%c0_43, %c40, %c0_44] : memref<1x361x3xf32, #tpu.memory_space<vmem>>, vector<1x304x3xf32>
    %50 = vector.shape_cast %49 : vector<1x304x3xf32> to vector<304x3xf32>
    %c8 = arith.constant 8 : index
    %c0_45 = arith.constant 0 : index
    %c0_46 = arith.constant 0 : index
    %51 = vector.load %arg2[%c8, %c0_45, %c0_46] : memref<9x3x16xf32, #tpu.memory_space<vmem>>, vector<1x3x16xf32>
    %52 = vector.shape_cast %51 : vector<1x3x16xf32> to vector<3x16xf32>
    %cst_47 = arith.constant dense<0.000000e+00> : vector<304x16xf32>
    %53 = tpu.matmul %50, %52, %cst_47 {dimension_numbers = #tpu.dot_dimension_numbers<[1], [0], [0], [1], [0, 0, 1, 1], [], []>} : vector<304x3xf32>, vector<3x16xf32>, vector<304x16xf32> -> vector<304x16xf32>
    %54 = arith.addf %48, %53 : vector<304x16xf32>
    %c0_48 = arith.constant 0 : index
    %c0_49 = arith.constant 0 : index
    %55 = vector.load %arg3[%c0_48, %c0_49] : memref<1x16xf32, #tpu.memory_space<vmem>>, vector<1x16xf32>
    %56 = vector.broadcast %55 : vector<1x16xf32> to vector<304x16xf32>
    %57 = arith.addf %54, %56 : vector<304x16xf32>
    %cst_50 = arith.constant 0.000000e+00 : f32
    %58 = vector.broadcast %cst_50 : f32 to vector<304x16xf32>
    %59 = arith.maximumf %57, %58 : vector<304x16xf32>
    %c0_51 = arith.constant 0 : index
    %c0_52 = arith.constant 0 : index
    %c0_53 = arith.constant 0 : index
    %60 = vector.load %arg4[%c0_51, %c0_52, %c0_53] : memref<1x304x16xf32, #tpu.memory_space<vmem>>, vector<1x304x16xf32>
    %61 = vector.shape_cast %60 : vector<1x304x16xf32> to vector<304x16xf32>
    %62 = vector.shape_cast %59 : vector<304x16xf32> to vector<1x304x16xf32>
    tpu.vector_store %arg4[%c0_51, %c0_52, %c0_53], %62 {strides = array<i32>} : memref<1x304x16xf32, #tpu.memory_space<vmem>>, vector<1x304x16xf32>,
    return
  }
  func.func @transform_0(%arg0: i32) -> (i32, i32, i32) {
    %c0_i32 = arith.constant 0 : i32
    %c0_i32_0 = arith.constant 0 : i32
    %c0_i32_1 = arith.constant 0 : i32
    return %arg0, %c0_i32, %c0_i32_0 : i32, i32, i32
  }
  func.func @transform_1(%arg0: i32) -> (i32, i32, i32) {
    %c0_i32 = arith.constant 0 : i32
    %c0_i32_0 = arith.constant 0 : i32
    %c0_i32_1 = arith.constant 0 : i32
    %c0_i32_2 = arith.constant 0 : i32
    return %c0_i32, %c0_i32_0, %c0_i32_1 : i32, i32, i32
  }
  func.func @transform_2(%arg0: i32) -> (i32, i32) {
    %c0_i32 = arith.constant 0 : i32
    %c0_i32_0 = arith.constant 0 : i32
    %c0_i32_1 = arith.constant 0 : i32
    return %c0_i32, %c0_i32_0 : i32, i32
  }
  func.func @transform_3(%arg0: i32) -> (i32, i32, i32) {
    %c0_i32 = arith.constant 0 : i32
    %c0_i32_0 = arith.constant 0 : i32
    %c0_i32_1 = arith.constant 0 : i32
    return %arg0, %c0_i32, %c0_i32_0 : i32, i32, i32
  }
}

module attributes {stable_mosaic.version = 11 : i64} {
  func.func @_feat_losses_kernel(%arg0: i32, %arg1: memref<1x64x16xf32, #tpu.memory_space<vmem>>, %arg2: memref<1x64x16xf32, #tpu.memory_space<vmem>>, %arg3: memref<1x64x16xf32, #tpu.memory_space<vmem>>, %arg4: memref<1x1xf32, #tpu.memory_space<vmem>>, %arg5: memref<1x1xf32, #tpu.memory_space<vmem>>, %arg6: memref<1x1xf32, #tpu.memory_space<vmem>>, %arg7: memref<1x1xf32, #tpu.memory_space<vmem>>) attributes {dimension_semantics = [#tpu.dimension_semantics<arbitrary>], iteration_bounds = array<i64: 2>, scalar_prefetch = 0 : i64, scratch_operands = 0 : i64, tpu.core_type = #tpu.core_type<tc>, window_params = [{transform_indices = @transform_0, window_bounds = array<i64: 1, 64, 16>}, {transform_indices = @transform_1, window_bounds = array<i64: 1, 64, 16>}, {transform_indices = @transform_2, window_bounds = array<i64: 1, 64, 16>}, {pipeline_mode = #tpu.pipeline_mode<synchronous>, transform_indices = @transform_3, window_bounds = array<i64: 1, 1>}, {pipeline_mode = #tpu.pipeline_mode<synchronous>, transform_indices = @transform_4, window_bounds = array<i64: 1, 1>}, {pipeline_mode = #tpu.pipeline_mode<synchronous>, transform_indices = @transform_5, window_bounds = array<i64: 1, 1>}, {pipeline_mode = #tpu.pipeline_mode<synchronous>, transform_indices = @transform_6, window_bounds = array<i64: 1, 1>}]} {
    %c0_i32 = arith.constant 0 : i32
    %0 = arith.cmpi eq, %arg0, %c0_i32 : i32
    %1 = arith.extui %0 : i1 to i32
    %c0_i32_0 = arith.constant 0 : i32
    %2 = arith.cmpi ne, %1, %c0_i32_0 : i32
    scf.if %2 {
      %cst_34 = arith.constant 0.000000e+00 : f32
      %58 = vector.broadcast %cst_34 : f32 to vector<1x1xf32>
      %c0_35 = arith.constant 0 : index
      %c0_36 = arith.constant 0 : index
      %59 = vector.load %arg4[%c0_35, %c0_36] : memref<1x1xf32, #tpu.memory_space<vmem>>, vector<1x1xf32>
      tpu.vector_store %arg4[%c0_35, %c0_36], %58 {strides = array<i32>} : memref<1x1xf32, #tpu.memory_space<vmem>>, vector<1x1xf32>,
      %cst_37 = arith.constant 0.000000e+00 : f32
      %60 = vector.broadcast %cst_37 : f32 to vector<1x1xf32>
      %c0_38 = arith.constant 0 : index
      %c0_39 = arith.constant 0 : index
      %61 = vector.load %arg5[%c0_38, %c0_39] : memref<1x1xf32, #tpu.memory_space<vmem>>, vector<1x1xf32>
      tpu.vector_store %arg5[%c0_38, %c0_39], %60 {strides = array<i32>} : memref<1x1xf32, #tpu.memory_space<vmem>>, vector<1x1xf32>,
      %cst_40 = arith.constant 0.000000e+00 : f32
      %62 = vector.broadcast %cst_40 : f32 to vector<1x1xf32>
      %c0_41 = arith.constant 0 : index
      %c0_42 = arith.constant 0 : index
      %63 = vector.load %arg6[%c0_41, %c0_42] : memref<1x1xf32, #tpu.memory_space<vmem>>, vector<1x1xf32>
      tpu.vector_store %arg6[%c0_41, %c0_42], %62 {strides = array<i32>} : memref<1x1xf32, #tpu.memory_space<vmem>>, vector<1x1xf32>,
      %cst_43 = arith.constant 0.000000e+00 : f32
      %64 = vector.broadcast %cst_43 : f32 to vector<1x1xf32>
      %c0_44 = arith.constant 0 : index
      %c0_45 = arith.constant 0 : index
      %65 = vector.load %arg7[%c0_44, %c0_45] : memref<1x1xf32, #tpu.memory_space<vmem>>, vector<1x1xf32>
      tpu.vector_store %arg7[%c0_44, %c0_45], %64 {strides = array<i32>} : memref<1x1xf32, #tpu.memory_space<vmem>>, vector<1x1xf32>,
    } else {
    }
    %c0 = arith.constant 0 : index
    %c0_1 = arith.constant 0 : index
    %c0_2 = arith.constant 0 : index
    %3 = vector.load %arg1[%c0, %c0_1, %c0_2] : memref<1x64x16xf32, #tpu.memory_space<vmem>>, vector<1x64x16xf32>
    %4 = vector.shape_cast %3 : vector<1x64x16xf32> to vector<64x16xf32>
    %c0_3 = arith.constant 0 : index
    %c0_4 = arith.constant 0 : index
    %c0_5 = arith.constant 0 : index
    %5 = vector.load %arg2[%c0_3, %c0_4, %c0_5] : memref<1x64x16xf32, #tpu.memory_space<vmem>>, vector<1x64x16xf32>
    %6 = vector.shape_cast %5 : vector<1x64x16xf32> to vector<64x16xf32>
    %c0_6 = arith.constant 0 : index
    %c0_7 = arith.constant 0 : index
    %c0_8 = arith.constant 0 : index
    %7 = vector.load %arg3[%c0_6, %c0_7, %c0_8] : memref<1x64x16xf32, #tpu.memory_space<vmem>>, vector<1x64x16xf32>
    %8 = vector.shape_cast %7 : vector<1x64x16xf32> to vector<64x16xf32>
    %c0_9 = arith.constant 0 : index
    %c0_10 = arith.constant 0 : index
    %9 = vector.load %arg4[%c0_9, %c0_10] : memref<1x1xf32, #tpu.memory_space<vmem>>, vector<1x1xf32>
    %10 = arith.subf %4, %8 : vector<64x16xf32>
    %11 = math.absf %10 : vector<64x16xf32>
    %12 = vector.shape_cast %11 : vector<64x16xf32> to vector<1x64x16xf32>
    %cst = arith.constant dense<0.000000e+00> : vector<1xf32>
    %13 = vector.multi_reduction <add>, %12, %cst [1, 2] : vector<1x64x16xf32> to vector<1xf32>
    %14 = vector.shape_cast %13 : vector<1xf32> to vector<1x1x1xf32>
    %15 = vector.extract %14[0, 0, 0] : f32 from vector<1x1x1xf32>
    %16 = vector.broadcast %15 : f32 to vector<1x1xf32>
    %17 = arith.addf %9, %16 : vector<1x1xf32>
    %c0_11 = arith.constant 0 : index
    %c0_12 = arith.constant 0 : index
    %18 = vector.load %arg4[%c0_11, %c0_12] : memref<1x1xf32, #tpu.memory_space<vmem>>, vector<1x1xf32>
    tpu.vector_store %arg4[%c0_11, %c0_12], %17 {strides = array<i32>} : memref<1x1xf32, #tpu.memory_space<vmem>>, vector<1x1xf32>,
    %c0_13 = arith.constant 0 : index
    %c0_14 = arith.constant 0 : index
    %19 = vector.load %arg5[%c0_13, %c0_14] : memref<1x1xf32, #tpu.memory_space<vmem>>, vector<1x1xf32>
    %20 = arith.subf %6, %8 : vector<64x16xf32>
    %21 = math.absf %20 : vector<64x16xf32>
    %22 = vector.shape_cast %21 : vector<64x16xf32> to vector<1x64x16xf32>
    %cst_15 = arith.constant dense<0.000000e+00> : vector<1xf32>
    %23 = vector.multi_reduction <add>, %22, %cst_15 [1, 2] : vector<1x64x16xf32> to vector<1xf32>
    %24 = vector.shape_cast %23 : vector<1xf32> to vector<1x1x1xf32>
    %25 = vector.extract %24[0, 0, 0] : f32 from vector<1x1x1xf32>
    %26 = vector.broadcast %25 : f32 to vector<1x1xf32>
    %27 = arith.addf %19, %26 : vector<1x1xf32>
    %c0_16 = arith.constant 0 : index
    %c0_17 = arith.constant 0 : index
    %28 = vector.load %arg5[%c0_16, %c0_17] : memref<1x1xf32, #tpu.memory_space<vmem>>, vector<1x1xf32>
    tpu.vector_store %arg5[%c0_16, %c0_17], %27 {strides = array<i32>} : memref<1x1xf32, #tpu.memory_space<vmem>>, vector<1x1xf32>,
    %cst_18 = arith.constant dense<0.000000e+00> : vector<16x16xf32>
    %29 = tpu.matmul %4, %4, %cst_18 {dimension_numbers = #tpu.dot_dimension_numbers<[0], [0], [1], [1], [0, 1, 1, 1], [], []>} : vector<64x16xf32>, vector<64x16xf32>, vector<16x16xf32> -> vector<16x16xf32>
    %cst_19 = arith.constant 9.765625E-4 : f32
    %30 = vector.broadcast %cst_19 : f32 to vector<16x16xf32>
    %31 = arith.mulf %29, %30 : vector<16x16xf32>
    %cst_20 = arith.constant dense<0.000000e+00> : vector<16x16xf32>
    %32 = tpu.matmul %6, %6, %cst_20 {dimension_numbers = #tpu.dot_dimension_numbers<[0], [0], [1], [1], [0, 1, 1, 1], [], []>} : vector<64x16xf32>, vector<64x16xf32>, vector<16x16xf32> -> vector<16x16xf32>
    %cst_21 = arith.constant 9.765625E-4 : f32
    %33 = vector.broadcast %cst_21 : f32 to vector<16x16xf32>
    %34 = arith.mulf %32, %33 : vector<16x16xf32>
    %cst_22 = arith.constant dense<0.000000e+00> : vector<16x16xf32>
    %35 = tpu.matmul %8, %8, %cst_22 {dimension_numbers = #tpu.dot_dimension_numbers<[0], [0], [1], [1], [0, 1, 1, 1], [], []>} : vector<64x16xf32>, vector<64x16xf32>, vector<16x16xf32> -> vector<16x16xf32>
    %cst_23 = arith.constant 9.765625E-4 : f32
    %36 = vector.broadcast %cst_23 : f32 to vector<16x16xf32>
    %37 = arith.mulf %35, %36 : vector<16x16xf32>
    %c0_24 = arith.constant 0 : index
    %c0_25 = arith.constant 0 : index
    %38 = vector.load %arg6[%c0_24, %c0_25] : memref<1x1xf32, #tpu.memory_space<vmem>>, vector<1x1xf32>
    %39 = arith.subf %31, %37 : vector<16x16xf32>
    %40 = math.absf %39 : vector<16x16xf32>
    %41 = vector.shape_cast %40 : vector<16x16xf32> to vector<1x16x16xf32>
    %cst_26 = arith.constant dense<0.000000e+00> : vector<1xf32>
    %42 = vector.multi_reduction <add>, %41, %cst_26 [1, 2] : vector<1x16x16xf32> to vector<1xf32>
    %43 = vector.shape_cast %42 : vector<1xf32> to vector<1x1x1xf32>
    %44 = vector.extract %43[0, 0, 0] : f32 from vector<1x1x1xf32>
    %45 = vector.broadcast %44 : f32 to vector<1x1xf32>
    %46 = arith.addf %38, %45 : vector<1x1xf32>
    %c0_27 = arith.constant 0 : index
    %c0_28 = arith.constant 0 : index
    %47 = vector.load %arg6[%c0_27, %c0_28] : memref<1x1xf32, #tpu.memory_space<vmem>>, vector<1x1xf32>
    tpu.vector_store %arg6[%c0_27, %c0_28], %46 {strides = array<i32>} : memref<1x1xf32, #tpu.memory_space<vmem>>, vector<1x1xf32>,
    %c0_29 = arith.constant 0 : index
    %c0_30 = arith.constant 0 : index
    %48 = vector.load %arg7[%c0_29, %c0_30] : memref<1x1xf32, #tpu.memory_space<vmem>>, vector<1x1xf32>
    %49 = arith.subf %34, %37 : vector<16x16xf32>
    %50 = math.absf %49 : vector<16x16xf32>
    %51 = vector.shape_cast %50 : vector<16x16xf32> to vector<1x16x16xf32>
    %cst_31 = arith.constant dense<0.000000e+00> : vector<1xf32>
    %52 = vector.multi_reduction <add>, %51, %cst_31 [1, 2] : vector<1x16x16xf32> to vector<1xf32>
    %53 = vector.shape_cast %52 : vector<1xf32> to vector<1x1x1xf32>
    %54 = vector.extract %53[0, 0, 0] : f32 from vector<1x1x1xf32>
    %55 = vector.broadcast %54 : f32 to vector<1x1xf32>
    %56 = arith.addf %48, %55 : vector<1x1xf32>
    %c0_32 = arith.constant 0 : index
    %c0_33 = arith.constant 0 : index
    %57 = vector.load %arg7[%c0_32, %c0_33] : memref<1x1xf32, #tpu.memory_space<vmem>>, vector<1x1xf32>
    tpu.vector_store %arg7[%c0_32, %c0_33], %56 {strides = array<i32>} : memref<1x1xf32, #tpu.memory_space<vmem>>, vector<1x1xf32>,
    return
  }
  func.func @transform_0(%arg0: i32) -> (i32, i32, i32) {
    %c0_i32 = arith.constant 0 : i32
    %c0_i32_0 = arith.constant 0 : i32
    %c0_i32_1 = arith.constant 0 : i32
    return %arg0, %c0_i32, %c0_i32_0 : i32, i32, i32
  }
  func.func @transform_1(%arg0: i32) -> (i32, i32, i32) {
    %c2_i32 = arith.constant 2 : i32
    %0 = arith.addi %arg0, %c2_i32 : i32
    %c0_i32 = arith.constant 0 : i32
    %c0_i32_0 = arith.constant 0 : i32
    %c0_i32_1 = arith.constant 0 : i32
    return %0, %c0_i32, %c0_i32_0 : i32, i32, i32
  }
  func.func @transform_2(%arg0: i32) -> (i32, i32, i32) {
    %c4_i32 = arith.constant 4 : i32
    %0 = arith.addi %arg0, %c4_i32 : i32
    %c0_i32 = arith.constant 0 : i32
    %c0_i32_0 = arith.constant 0 : i32
    %c0_i32_1 = arith.constant 0 : i32
    return %0, %c0_i32, %c0_i32_0 : i32, i32, i32
  }
  func.func @transform_3(%arg0: i32) -> (i32, i32) {
    %c0_i32 = arith.constant 0 : i32
    %c0_i32_0 = arith.constant 0 : i32
    %c0_i32_1 = arith.constant 0 : i32
    return %c0_i32, %c0_i32_0 : i32, i32
  }
  func.func @transform_4(%arg0: i32) -> (i32, i32) {
    %c0_i32 = arith.constant 0 : i32
    %c0_i32_0 = arith.constant 0 : i32
    %c0_i32_1 = arith.constant 0 : i32
    return %c0_i32, %c0_i32_0 : i32, i32
  }
  func.func @transform_5(%arg0: i32) -> (i32, i32) {
    %c0_i32 = arith.constant 0 : i32
    %c0_i32_0 = arith.constant 0 : i32
    %c0_i32_1 = arith.constant 0 : i32
    return %c0_i32, %c0_i32_0 : i32, i32
  }
  func.func @transform_6(%arg0: i32) -> (i32, i32) {
    %c0_i32 = arith.constant 0 : i32
    %c0_i32_0 = arith.constant 0 : i32
    %c0_i32_1 = arith.constant 0 : i32
    return %c0_i32, %c0_i32_0 : i32, i32
  }
}

module attributes {stable_mosaic.version = 11 : i64} {
  func.func @_conv3x3_kernel(%arg0: i32, %arg1: memref<1x121x16xf32, #tpu.memory_space<vmem>>, %arg2: memref<9x16x32xf32, #tpu.memory_space<vmem>>, %arg3: memref<1x32xf32, #tpu.memory_space<vmem>>, %arg4: memref<1x88x32xf32, #tpu.memory_space<vmem>>) attributes {dimension_semantics = [#tpu.dimension_semantics<parallel>], iteration_bounds = array<i64: 6>, scalar_prefetch = 0 : i64, scratch_operands = 0 : i64, tpu.core_type = #tpu.core_type<tc>, window_params = [{transform_indices = @transform_0, window_bounds = array<i64: 1, 121, 16>}, {pipeline_mode = #tpu.pipeline_mode<synchronous>, transform_indices = @transform_1, window_bounds = array<i64: 9, 16, 32>}, {pipeline_mode = #tpu.pipeline_mode<synchronous>, transform_indices = @transform_2, window_bounds = array<i64: 1, 32>}, {transform_indices = @transform_3, window_bounds = array<i64: 1, 88, 32>}]} {
    %cst = arith.constant 0.000000e+00 : f32
    %0 = vector.broadcast %cst : f32 to vector<88x32xf32>
    %c0 = arith.constant 0 : index
    %c0_0 = arith.constant 0 : index
    %c0_1 = arith.constant 0 : index
    %1 = vector.load %arg1[%c0, %c0_0, %c0_1] : memref<1x121x16xf32, #tpu.memory_space<vmem>>, vector<1x88x16xf32>
    %2 = vector.shape_cast %1 : vector<1x88x16xf32> to vector<88x16xf32>
    %c0_2 = arith.constant 0 : index
    %c0_3 = arith.constant 0 : index
    %c0_4 = arith.constant 0 : index
    %3 = vector.load %arg2[%c0_2, %c0_3, %c0_4] : memref<9x16x32xf32, #tpu.memory_space<vmem>>, vector<1x16x32xf32>
    %4 = vector.shape_cast %3 : vector<1x16x32xf32> to vector<16x32xf32>
    %cst_5 = arith.constant dense<0.000000e+00> : vector<88x32xf32>
    %5 = tpu.matmul %2, %4, %cst_5 {dimension_numbers = #tpu.dot_dimension_numbers<[1], [0], [0], [1], [0, 0, 1, 1], [], []>} : vector<88x16xf32>, vector<16x32xf32>, vector<88x32xf32> -> vector<88x32xf32>
    %6 = arith.addf %0, %5 : vector<88x32xf32>
    %c0_6 = arith.constant 0 : index
    %c1 = arith.constant 1 : index
    %c0_7 = arith.constant 0 : index
    %7 = vector.load %arg1[%c0_6, %c1, %c0_7] : memref<1x121x16xf32, #tpu.memory_space<vmem>>, vector<1x88x16xf32>
    %8 = vector.shape_cast %7 : vector<1x88x16xf32> to vector<88x16xf32>
    %c1_8 = arith.constant 1 : index
    %c0_9 = arith.constant 0 : index
    %c0_10 = arith.constant 0 : index
    %9 = vector.load %arg2[%c1_8, %c0_9, %c0_10] : memref<9x16x32xf32, #tpu.memory_space<vmem>>, vector<1x16x32xf32>
    %10 = vector.shape_cast %9 : vector<1x16x32xf32> to vector<16x32xf32>
    %cst_11 = arith.constant dense<0.000000e+00> : vector<88x32xf32>
    %11 = tpu.matmul %8, %10, %cst_11 {dimension_numbers = #tpu.dot_dimension_numbers<[1], [0], [0], [1], [0, 0, 1, 1], [], []>} : vector<88x16xf32>, vector<16x32xf32>, vector<88x32xf32> -> vector<88x32xf32>
    %12 = arith.addf %6, %11 : vector<88x32xf32>
    %c0_12 = arith.constant 0 : index
    %c2 = arith.constant 2 : index
    %c0_13 = arith.constant 0 : index
    %13 = vector.load %arg1[%c0_12, %c2, %c0_13] : memref<1x121x16xf32, #tpu.memory_space<vmem>>, vector<1x88x16xf32>
    %14 = vector.shape_cast %13 : vector<1x88x16xf32> to vector<88x16xf32>
    %c2_14 = arith.constant 2 : index
    %c0_15 = arith.constant 0 : index
    %c0_16 = arith.constant 0 : index
    %15 = vector.load %arg2[%c2_14, %c0_15, %c0_16] : memref<9x16x32xf32, #tpu.memory_space<vmem>>, vector<1x16x32xf32>
    %16 = vector.shape_cast %15 : vector<1x16x32xf32> to vector<16x32xf32>
    %cst_17 = arith.constant dense<0.000000e+00> : vector<88x32xf32>
    %17 = tpu.matmul %14, %16, %cst_17 {dimension_numbers = #tpu.dot_dimension_numbers<[1], [0], [0], [1], [0, 0, 1, 1], [], []>} : vector<88x16xf32>, vector<16x32xf32>, vector<88x32xf32> -> vector<88x32xf32>
    %18 = arith.addf %12, %17 : vector<88x32xf32>
    %c0_18 = arith.constant 0 : index
    %c11 = arith.constant 11 : index
    %c0_19 = arith.constant 0 : index
    %19 = vector.load %arg1[%c0_18, %c11, %c0_19] : memref<1x121x16xf32, #tpu.memory_space<vmem>>, vector<1x88x16xf32>
    %20 = vector.shape_cast %19 : vector<1x88x16xf32> to vector<88x16xf32>
    %c3 = arith.constant 3 : index
    %c0_20 = arith.constant 0 : index
    %c0_21 = arith.constant 0 : index
    %21 = vector.load %arg2[%c3, %c0_20, %c0_21] : memref<9x16x32xf32, #tpu.memory_space<vmem>>, vector<1x16x32xf32>
    %22 = vector.shape_cast %21 : vector<1x16x32xf32> to vector<16x32xf32>
    %cst_22 = arith.constant dense<0.000000e+00> : vector<88x32xf32>
    %23 = tpu.matmul %20, %22, %cst_22 {dimension_numbers = #tpu.dot_dimension_numbers<[1], [0], [0], [1], [0, 0, 1, 1], [], []>} : vector<88x16xf32>, vector<16x32xf32>, vector<88x32xf32> -> vector<88x32xf32>
    %24 = arith.addf %18, %23 : vector<88x32xf32>
    %c0_23 = arith.constant 0 : index
    %c12 = arith.constant 12 : index
    %c0_24 = arith.constant 0 : index
    %25 = vector.load %arg1[%c0_23, %c12, %c0_24] : memref<1x121x16xf32, #tpu.memory_space<vmem>>, vector<1x88x16xf32>
    %26 = vector.shape_cast %25 : vector<1x88x16xf32> to vector<88x16xf32>
    %c4 = arith.constant 4 : index
    %c0_25 = arith.constant 0 : index
    %c0_26 = arith.constant 0 : index
    %27 = vector.load %arg2[%c4, %c0_25, %c0_26] : memref<9x16x32xf32, #tpu.memory_space<vmem>>, vector<1x16x32xf32>
    %28 = vector.shape_cast %27 : vector<1x16x32xf32> to vector<16x32xf32>
    %cst_27 = arith.constant dense<0.000000e+00> : vector<88x32xf32>
    %29 = tpu.matmul %26, %28, %cst_27 {dimension_numbers = #tpu.dot_dimension_numbers<[1], [0], [0], [1], [0, 0, 1, 1], [], []>} : vector<88x16xf32>, vector<16x32xf32>, vector<88x32xf32> -> vector<88x32xf32>
    %30 = arith.addf %24, %29 : vector<88x32xf32>
    %c0_28 = arith.constant 0 : index
    %c13 = arith.constant 13 : index
    %c0_29 = arith.constant 0 : index
    %31 = vector.load %arg1[%c0_28, %c13, %c0_29] : memref<1x121x16xf32, #tpu.memory_space<vmem>>, vector<1x88x16xf32>
    %32 = vector.shape_cast %31 : vector<1x88x16xf32> to vector<88x16xf32>
    %c5 = arith.constant 5 : index
    %c0_30 = arith.constant 0 : index
    %c0_31 = arith.constant 0 : index
    %33 = vector.load %arg2[%c5, %c0_30, %c0_31] : memref<9x16x32xf32, #tpu.memory_space<vmem>>, vector<1x16x32xf32>
    %34 = vector.shape_cast %33 : vector<1x16x32xf32> to vector<16x32xf32>
    %cst_32 = arith.constant dense<0.000000e+00> : vector<88x32xf32>
    %35 = tpu.matmul %32, %34, %cst_32 {dimension_numbers = #tpu.dot_dimension_numbers<[1], [0], [0], [1], [0, 0, 1, 1], [], []>} : vector<88x16xf32>, vector<16x32xf32>, vector<88x32xf32> -> vector<88x32xf32>
    %36 = arith.addf %30, %35 : vector<88x32xf32>
    %c0_33 = arith.constant 0 : index
    %c22 = arith.constant 22 : index
    %c0_34 = arith.constant 0 : index
    %37 = vector.load %arg1[%c0_33, %c22, %c0_34] : memref<1x121x16xf32, #tpu.memory_space<vmem>>, vector<1x88x16xf32>
    %38 = vector.shape_cast %37 : vector<1x88x16xf32> to vector<88x16xf32>
    %c6 = arith.constant 6 : index
    %c0_35 = arith.constant 0 : index
    %c0_36 = arith.constant 0 : index
    %39 = vector.load %arg2[%c6, %c0_35, %c0_36] : memref<9x16x32xf32, #tpu.memory_space<vmem>>, vector<1x16x32xf32>
    %40 = vector.shape_cast %39 : vector<1x16x32xf32> to vector<16x32xf32>
    %cst_37 = arith.constant dense<0.000000e+00> : vector<88x32xf32>
    %41 = tpu.matmul %38, %40, %cst_37 {dimension_numbers = #tpu.dot_dimension_numbers<[1], [0], [0], [1], [0, 0, 1, 1], [], []>} : vector<88x16xf32>, vector<16x32xf32>, vector<88x32xf32> -> vector<88x32xf32>
    %42 = arith.addf %36, %41 : vector<88x32xf32>
    %c0_38 = arith.constant 0 : index
    %c23 = arith.constant 23 : index
    %c0_39 = arith.constant 0 : index
    %43 = vector.load %arg1[%c0_38, %c23, %c0_39] : memref<1x121x16xf32, #tpu.memory_space<vmem>>, vector<1x88x16xf32>
    %44 = vector.shape_cast %43 : vector<1x88x16xf32> to vector<88x16xf32>
    %c7 = arith.constant 7 : index
    %c0_40 = arith.constant 0 : index
    %c0_41 = arith.constant 0 : index
    %45 = vector.load %arg2[%c7, %c0_40, %c0_41] : memref<9x16x32xf32, #tpu.memory_space<vmem>>, vector<1x16x32xf32>
    %46 = vector.shape_cast %45 : vector<1x16x32xf32> to vector<16x32xf32>
    %cst_42 = arith.constant dense<0.000000e+00> : vector<88x32xf32>
    %47 = tpu.matmul %44, %46, %cst_42 {dimension_numbers = #tpu.dot_dimension_numbers<[1], [0], [0], [1], [0, 0, 1, 1], [], []>} : vector<88x16xf32>, vector<16x32xf32>, vector<88x32xf32> -> vector<88x32xf32>
    %48 = arith.addf %42, %47 : vector<88x32xf32>
    %c0_43 = arith.constant 0 : index
    %c24 = arith.constant 24 : index
    %c0_44 = arith.constant 0 : index
    %49 = vector.load %arg1[%c0_43, %c24, %c0_44] : memref<1x121x16xf32, #tpu.memory_space<vmem>>, vector<1x88x16xf32>
    %50 = vector.shape_cast %49 : vector<1x88x16xf32> to vector<88x16xf32>
    %c8 = arith.constant 8 : index
    %c0_45 = arith.constant 0 : index
    %c0_46 = arith.constant 0 : index
    %51 = vector.load %arg2[%c8, %c0_45, %c0_46] : memref<9x16x32xf32, #tpu.memory_space<vmem>>, vector<1x16x32xf32>
    %52 = vector.shape_cast %51 : vector<1x16x32xf32> to vector<16x32xf32>
    %cst_47 = arith.constant dense<0.000000e+00> : vector<88x32xf32>
    %53 = tpu.matmul %50, %52, %cst_47 {dimension_numbers = #tpu.dot_dimension_numbers<[1], [0], [0], [1], [0, 0, 1, 1], [], []>} : vector<88x16xf32>, vector<16x32xf32>, vector<88x32xf32> -> vector<88x32xf32>
    %54 = arith.addf %48, %53 : vector<88x32xf32>
    %c0_48 = arith.constant 0 : index
    %c0_49 = arith.constant 0 : index
    %55 = vector.load %arg3[%c0_48, %c0_49] : memref<1x32xf32, #tpu.memory_space<vmem>>, vector<1x32xf32>
    %56 = vector.broadcast %55 : vector<1x32xf32> to vector<88x32xf32>
    %57 = arith.addf %54, %56 : vector<88x32xf32>
    %cst_50 = arith.constant 0.000000e+00 : f32
    %58 = vector.broadcast %cst_50 : f32 to vector<88x32xf32>
    %59 = arith.maximumf %57, %58 : vector<88x32xf32>
    %c0_51 = arith.constant 0 : index
    %c0_52 = arith.constant 0 : index
    %c0_53 = arith.constant 0 : index
    %60 = vector.load %arg4[%c0_51, %c0_52, %c0_53] : memref<1x88x32xf32, #tpu.memory_space<vmem>>, vector<1x88x32xf32>
    %61 = vector.shape_cast %60 : vector<1x88x32xf32> to vector<88x32xf32>
    %62 = vector.shape_cast %59 : vector<88x32xf32> to vector<1x88x32xf32>
    tpu.vector_store %arg4[%c0_51, %c0_52, %c0_53], %62 {strides = array<i32>} : memref<1x88x32xf32, #tpu.memory_space<vmem>>, vector<1x88x32xf32>,
    return
  }
  func.func @transform_0(%arg0: i32) -> (i32, i32, i32) {
    %c0_i32 = arith.constant 0 : i32
    %c0_i32_0 = arith.constant 0 : i32
    %c0_i32_1 = arith.constant 0 : i32
    return %arg0, %c0_i32, %c0_i32_0 : i32, i32, i32
  }
  func.func @transform_1(%arg0: i32) -> (i32, i32, i32) {
    %c0_i32 = arith.constant 0 : i32
    %c0_i32_0 = arith.constant 0 : i32
    %c0_i32_1 = arith.constant 0 : i32
    %c0_i32_2 = arith.constant 0 : i32
    return %c0_i32, %c0_i32_0, %c0_i32_1 : i32, i32, i32
  }
  func.func @transform_2(%arg0: i32) -> (i32, i32) {
    %c0_i32 = arith.constant 0 : i32
    %c0_i32_0 = arith.constant 0 : i32
    %c0_i32_1 = arith.constant 0 : i32
    return %c0_i32, %c0_i32_0 : i32, i32
  }
  func.func @transform_3(%arg0: i32) -> (i32, i32, i32) {
    %c0_i32 = arith.constant 0 : i32
    %c0_i32_0 = arith.constant 0 : i32
    %c0_i32_1 = arith.constant 0 : i32
    return %arg0, %c0_i32, %c0_i32_0 : i32, i32, i32
  }
}

module attributes {stable_mosaic.version = 11 : i64} {
  func.func @_feat_losses_kernel(%arg0: i32, %arg1: memref<1x16x32xf32, #tpu.memory_space<vmem>>, %arg2: memref<1x16x32xf32, #tpu.memory_space<vmem>>, %arg3: memref<1x16x32xf32, #tpu.memory_space<vmem>>, %arg4: memref<1x1xf32, #tpu.memory_space<vmem>>, %arg5: memref<1x1xf32, #tpu.memory_space<vmem>>, %arg6: memref<1x1xf32, #tpu.memory_space<vmem>>, %arg7: memref<1x1xf32, #tpu.memory_space<vmem>>) attributes {dimension_semantics = [#tpu.dimension_semantics<arbitrary>], iteration_bounds = array<i64: 2>, scalar_prefetch = 0 : i64, scratch_operands = 0 : i64, tpu.core_type = #tpu.core_type<tc>, window_params = [{transform_indices = @transform_0, window_bounds = array<i64: 1, 16, 32>}, {transform_indices = @transform_1, window_bounds = array<i64: 1, 16, 32>}, {transform_indices = @transform_2, window_bounds = array<i64: 1, 16, 32>}, {pipeline_mode = #tpu.pipeline_mode<synchronous>, transform_indices = @transform_3, window_bounds = array<i64: 1, 1>}, {pipeline_mode = #tpu.pipeline_mode<synchronous>, transform_indices = @transform_4, window_bounds = array<i64: 1, 1>}, {pipeline_mode = #tpu.pipeline_mode<synchronous>, transform_indices = @transform_5, window_bounds = array<i64: 1, 1>}, {pipeline_mode = #tpu.pipeline_mode<synchronous>, transform_indices = @transform_6, window_bounds = array<i64: 1, 1>}]} {
    %c0_i32 = arith.constant 0 : i32
    %0 = arith.cmpi eq, %arg0, %c0_i32 : i32
    %1 = arith.extui %0 : i1 to i32
    %c0_i32_0 = arith.constant 0 : i32
    %2 = arith.cmpi ne, %1, %c0_i32_0 : i32
    scf.if %2 {
      %cst_34 = arith.constant 0.000000e+00 : f32
      %58 = vector.broadcast %cst_34 : f32 to vector<1x1xf32>
      %c0_35 = arith.constant 0 : index
      %c0_36 = arith.constant 0 : index
      %59 = vector.load %arg4[%c0_35, %c0_36] : memref<1x1xf32, #tpu.memory_space<vmem>>, vector<1x1xf32>
      tpu.vector_store %arg4[%c0_35, %c0_36], %58 {strides = array<i32>} : memref<1x1xf32, #tpu.memory_space<vmem>>, vector<1x1xf32>,
      %cst_37 = arith.constant 0.000000e+00 : f32
      %60 = vector.broadcast %cst_37 : f32 to vector<1x1xf32>
      %c0_38 = arith.constant 0 : index
      %c0_39 = arith.constant 0 : index
      %61 = vector.load %arg5[%c0_38, %c0_39] : memref<1x1xf32, #tpu.memory_space<vmem>>, vector<1x1xf32>
      tpu.vector_store %arg5[%c0_38, %c0_39], %60 {strides = array<i32>} : memref<1x1xf32, #tpu.memory_space<vmem>>, vector<1x1xf32>,
      %cst_40 = arith.constant 0.000000e+00 : f32
      %62 = vector.broadcast %cst_40 : f32 to vector<1x1xf32>
      %c0_41 = arith.constant 0 : index
      %c0_42 = arith.constant 0 : index
      %63 = vector.load %arg6[%c0_41, %c0_42] : memref<1x1xf32, #tpu.memory_space<vmem>>, vector<1x1xf32>
      tpu.vector_store %arg6[%c0_41, %c0_42], %62 {strides = array<i32>} : memref<1x1xf32, #tpu.memory_space<vmem>>, vector<1x1xf32>,
      %cst_43 = arith.constant 0.000000e+00 : f32
      %64 = vector.broadcast %cst_43 : f32 to vector<1x1xf32>
      %c0_44 = arith.constant 0 : index
      %c0_45 = arith.constant 0 : index
      %65 = vector.load %arg7[%c0_44, %c0_45] : memref<1x1xf32, #tpu.memory_space<vmem>>, vector<1x1xf32>
      tpu.vector_store %arg7[%c0_44, %c0_45], %64 {strides = array<i32>} : memref<1x1xf32, #tpu.memory_space<vmem>>, vector<1x1xf32>,
    } else {
    }
    %c0 = arith.constant 0 : index
    %c0_1 = arith.constant 0 : index
    %c0_2 = arith.constant 0 : index
    %3 = vector.load %arg1[%c0, %c0_1, %c0_2] : memref<1x16x32xf32, #tpu.memory_space<vmem>>, vector<1x16x32xf32>
    %4 = vector.shape_cast %3 : vector<1x16x32xf32> to vector<16x32xf32>
    %c0_3 = arith.constant 0 : index
    %c0_4 = arith.constant 0 : index
    %c0_5 = arith.constant 0 : index
    %5 = vector.load %arg2[%c0_3, %c0_4, %c0_5] : memref<1x16x32xf32, #tpu.memory_space<vmem>>, vector<1x16x32xf32>
    %6 = vector.shape_cast %5 : vector<1x16x32xf32> to vector<16x32xf32>
    %c0_6 = arith.constant 0 : index
    %c0_7 = arith.constant 0 : index
    %c0_8 = arith.constant 0 : index
    %7 = vector.load %arg3[%c0_6, %c0_7, %c0_8] : memref<1x16x32xf32, #tpu.memory_space<vmem>>, vector<1x16x32xf32>
    %8 = vector.shape_cast %7 : vector<1x16x32xf32> to vector<16x32xf32>
    %c0_9 = arith.constant 0 : index
    %c0_10 = arith.constant 0 : index
    %9 = vector.load %arg4[%c0_9, %c0_10] : memref<1x1xf32, #tpu.memory_space<vmem>>, vector<1x1xf32>
    %10 = arith.subf %4, %8 : vector<16x32xf32>
    %11 = math.absf %10 : vector<16x32xf32>
    %12 = vector.shape_cast %11 : vector<16x32xf32> to vector<1x16x32xf32>
    %cst = arith.constant dense<0.000000e+00> : vector<1xf32>
    %13 = vector.multi_reduction <add>, %12, %cst [1, 2] : vector<1x16x32xf32> to vector<1xf32>
    %14 = vector.shape_cast %13 : vector<1xf32> to vector<1x1x1xf32>
    %15 = vector.extract %14[0, 0, 0] : f32 from vector<1x1x1xf32>
    %16 = vector.broadcast %15 : f32 to vector<1x1xf32>
    %17 = arith.addf %9, %16 : vector<1x1xf32>
    %c0_11 = arith.constant 0 : index
    %c0_12 = arith.constant 0 : index
    %18 = vector.load %arg4[%c0_11, %c0_12] : memref<1x1xf32, #tpu.memory_space<vmem>>, vector<1x1xf32>
    tpu.vector_store %arg4[%c0_11, %c0_12], %17 {strides = array<i32>} : memref<1x1xf32, #tpu.memory_space<vmem>>, vector<1x1xf32>,
    %c0_13 = arith.constant 0 : index
    %c0_14 = arith.constant 0 : index
    %19 = vector.load %arg5[%c0_13, %c0_14] : memref<1x1xf32, #tpu.memory_space<vmem>>, vector<1x1xf32>
    %20 = arith.subf %6, %8 : vector<16x32xf32>
    %21 = math.absf %20 : vector<16x32xf32>
    %22 = vector.shape_cast %21 : vector<16x32xf32> to vector<1x16x32xf32>
    %cst_15 = arith.constant dense<0.000000e+00> : vector<1xf32>
    %23 = vector.multi_reduction <add>, %22, %cst_15 [1, 2] : vector<1x16x32xf32> to vector<1xf32>
    %24 = vector.shape_cast %23 : vector<1xf32> to vector<1x1x1xf32>
    %25 = vector.extract %24[0, 0, 0] : f32 from vector<1x1x1xf32>
    %26 = vector.broadcast %25 : f32 to vector<1x1xf32>
    %27 = arith.addf %19, %26 : vector<1x1xf32>
    %c0_16 = arith.constant 0 : index
    %c0_17 = arith.constant 0 : index
    %28 = vector.load %arg5[%c0_16, %c0_17] : memref<1x1xf32, #tpu.memory_space<vmem>>, vector<1x1xf32>
    tpu.vector_store %arg5[%c0_16, %c0_17], %27 {strides = array<i32>} : memref<1x1xf32, #tpu.memory_space<vmem>>, vector<1x1xf32>,
    %cst_18 = arith.constant dense<0.000000e+00> : vector<32x32xf32>
    %29 = tpu.matmul %4, %4, %cst_18 {dimension_numbers = #tpu.dot_dimension_numbers<[0], [0], [1], [1], [0, 1, 1, 1], [], []>} : vector<16x32xf32>, vector<16x32xf32>, vector<32x32xf32> -> vector<32x32xf32>
    %cst_19 = arith.constant 0.001953125 : f32
    %30 = vector.broadcast %cst_19 : f32 to vector<32x32xf32>
    %31 = arith.mulf %29, %30 : vector<32x32xf32>
    %cst_20 = arith.constant dense<0.000000e+00> : vector<32x32xf32>
    %32 = tpu.matmul %6, %6, %cst_20 {dimension_numbers = #tpu.dot_dimension_numbers<[0], [0], [1], [1], [0, 1, 1, 1], [], []>} : vector<16x32xf32>, vector<16x32xf32>, vector<32x32xf32> -> vector<32x32xf32>
    %cst_21 = arith.constant 0.001953125 : f32
    %33 = vector.broadcast %cst_21 : f32 to vector<32x32xf32>
    %34 = arith.mulf %32, %33 : vector<32x32xf32>
    %cst_22 = arith.constant dense<0.000000e+00> : vector<32x32xf32>
    %35 = tpu.matmul %8, %8, %cst_22 {dimension_numbers = #tpu.dot_dimension_numbers<[0], [0], [1], [1], [0, 1, 1, 1], [], []>} : vector<16x32xf32>, vector<16x32xf32>, vector<32x32xf32> -> vector<32x32xf32>
    %cst_23 = arith.constant 0.001953125 : f32
    %36 = vector.broadcast %cst_23 : f32 to vector<32x32xf32>
    %37 = arith.mulf %35, %36 : vector<32x32xf32>
    %c0_24 = arith.constant 0 : index
    %c0_25 = arith.constant 0 : index
    %38 = vector.load %arg6[%c0_24, %c0_25] : memref<1x1xf32, #tpu.memory_space<vmem>>, vector<1x1xf32>
    %39 = arith.subf %31, %37 : vector<32x32xf32>
    %40 = math.absf %39 : vector<32x32xf32>
    %41 = vector.shape_cast %40 : vector<32x32xf32> to vector<1x32x32xf32>
    %cst_26 = arith.constant dense<0.000000e+00> : vector<1xf32>
    %42 = vector.multi_reduction <add>, %41, %cst_26 [1, 2] : vector<1x32x32xf32> to vector<1xf32>
    %43 = vector.shape_cast %42 : vector<1xf32> to vector<1x1x1xf32>
    %44 = vector.extract %43[0, 0, 0] : f32 from vector<1x1x1xf32>
    %45 = vector.broadcast %44 : f32 to vector<1x1xf32>
    %46 = arith.addf %38, %45 : vector<1x1xf32>
    %c0_27 = arith.constant 0 : index
    %c0_28 = arith.constant 0 : index
    %47 = vector.load %arg6[%c0_27, %c0_28] : memref<1x1xf32, #tpu.memory_space<vmem>>, vector<1x1xf32>
    tpu.vector_store %arg6[%c0_27, %c0_28], %46 {strides = array<i32>} : memref<1x1xf32, #tpu.memory_space<vmem>>, vector<1x1xf32>,
    %c0_29 = arith.constant 0 : index
    %c0_30 = arith.constant 0 : index
    %48 = vector.load %arg7[%c0_29, %c0_30] : memref<1x1xf32, #tpu.memory_space<vmem>>, vector<1x1xf32>
    %49 = arith.subf %34, %37 : vector<32x32xf32>
    %50 = math.absf %49 : vector<32x32xf32>
    %51 = vector.shape_cast %50 : vector<32x32xf32> to vector<1x32x32xf32>
    %cst_31 = arith.constant dense<0.000000e+00> : vector<1xf32>
    %52 = vector.multi_reduction <add>, %51, %cst_31 [1, 2] : vector<1x32x32xf32> to vector<1xf32>
    %53 = vector.shape_cast %52 : vector<1xf32> to vector<1x1x1xf32>
    %54 = vector.extract %53[0, 0, 0] : f32 from vector<1x1x1xf32>
    %55 = vector.broadcast %54 : f32 to vector<1x1xf32>
    %56 = arith.addf %48, %55 : vector<1x1xf32>
    %c0_32 = arith.constant 0 : index
    %c0_33 = arith.constant 0 : index
    %57 = vector.load %arg7[%c0_32, %c0_33] : memref<1x1xf32, #tpu.memory_space<vmem>>, vector<1x1xf32>
    tpu.vector_store %arg7[%c0_32, %c0_33], %56 {strides = array<i32>} : memref<1x1xf32, #tpu.memory_space<vmem>>, vector<1x1xf32>,
    return
  }
  func.func @transform_0(%arg0: i32) -> (i32, i32, i32) {
    %c0_i32 = arith.constant 0 : i32
    %c0_i32_0 = arith.constant 0 : i32
    %c0_i32_1 = arith.constant 0 : i32
    return %arg0, %c0_i32, %c0_i32_0 : i32, i32, i32
  }
  func.func @transform_1(%arg0: i32) -> (i32, i32, i32) {
    %c2_i32 = arith.constant 2 : i32
    %0 = arith.addi %arg0, %c2_i32 : i32
    %c0_i32 = arith.constant 0 : i32
    %c0_i32_0 = arith.constant 0 : i32
    %c0_i32_1 = arith.constant 0 : i32
    return %0, %c0_i32, %c0_i32_0 : i32, i32, i32
  }
  func.func @transform_2(%arg0: i32) -> (i32, i32, i32) {
    %c4_i32 = arith.constant 4 : i32
    %0 = arith.addi %arg0, %c4_i32 : i32
    %c0_i32 = arith.constant 0 : i32
    %c0_i32_0 = arith.constant 0 : i32
    %c0_i32_1 = arith.constant 0 : i32
    return %0, %c0_i32, %c0_i32_0 : i32, i32, i32
  }
  func.func @transform_3(%arg0: i32) -> (i32, i32) {
    %c0_i32 = arith.constant 0 : i32
    %c0_i32_0 = arith.constant 0 : i32
    %c0_i32_1 = arith.constant 0 : i32
    return %c0_i32, %c0_i32_0 : i32, i32
  }
  func.func @transform_4(%arg0: i32) -> (i32, i32) {
    %c0_i32 = arith.constant 0 : i32
    %c0_i32_0 = arith.constant 0 : i32
    %c0_i32_1 = arith.constant 0 : i32
    return %c0_i32, %c0_i32_0 : i32, i32
  }
  func.func @transform_5(%arg0: i32) -> (i32, i32) {
    %c0_i32 = arith.constant 0 : i32
    %c0_i32_0 = arith.constant 0 : i32
    %c0_i32_1 = arith.constant 0 : i32
    return %c0_i32, %c0_i32_0 : i32, i32
  }
  func.func @transform_6(%arg0: i32) -> (i32, i32) {
    %c0_i32 = arith.constant 0 : i32
    %c0_i32_0 = arith.constant 0 : i32
    %c0_i32_1 = arith.constant 0 : i32
    return %c0_i32, %c0_i32_0 : i32, i32
  }
}

module attributes {stable_mosaic.version = 11 : i64} {
  func.func @_conv3x3_kernel(%arg0: i32, %arg1: memref<1x49x32xf32, #tpu.memory_space<vmem>>, %arg2: memref<9x32x64xf32, #tpu.memory_space<vmem>>, %arg3: memref<1x64xf32, #tpu.memory_space<vmem>>, %arg4: memref<1x28x64xf32, #tpu.memory_space<vmem>>) attributes {dimension_semantics = [#tpu.dimension_semantics<parallel>], iteration_bounds = array<i64: 6>, scalar_prefetch = 0 : i64, scratch_operands = 0 : i64, tpu.core_type = #tpu.core_type<tc>, window_params = [{transform_indices = @transform_0, window_bounds = array<i64: 1, 49, 32>}, {pipeline_mode = #tpu.pipeline_mode<synchronous>, transform_indices = @transform_1, window_bounds = array<i64: 9, 32, 64>}, {pipeline_mode = #tpu.pipeline_mode<synchronous>, transform_indices = @transform_2, window_bounds = array<i64: 1, 64>}, {transform_indices = @transform_3, window_bounds = array<i64: 1, 28, 64>}]} {
    %cst = arith.constant 0.000000e+00 : f32
    %0 = vector.broadcast %cst : f32 to vector<28x64xf32>
    %c0 = arith.constant 0 : index
    %c0_0 = arith.constant 0 : index
    %c0_1 = arith.constant 0 : index
    %1 = vector.load %arg1[%c0, %c0_0, %c0_1] : memref<1x49x32xf32, #tpu.memory_space<vmem>>, vector<1x28x32xf32>
    %2 = vector.shape_cast %1 : vector<1x28x32xf32> to vector<28x32xf32>
    %c0_2 = arith.constant 0 : index
    %c0_3 = arith.constant 0 : index
    %c0_4 = arith.constant 0 : index
    %3 = vector.load %arg2[%c0_2, %c0_3, %c0_4] : memref<9x32x64xf32, #tpu.memory_space<vmem>>, vector<1x32x64xf32>
    %4 = vector.shape_cast %3 : vector<1x32x64xf32> to vector<32x64xf32>
    %cst_5 = arith.constant dense<0.000000e+00> : vector<28x64xf32>
    %5 = tpu.matmul %2, %4, %cst_5 {dimension_numbers = #tpu.dot_dimension_numbers<[1], [0], [0], [1], [0, 0, 1, 1], [], []>} : vector<28x32xf32>, vector<32x64xf32>, vector<28x64xf32> -> vector<28x64xf32>
    %6 = arith.addf %0, %5 : vector<28x64xf32>
    %c0_6 = arith.constant 0 : index
    %c1 = arith.constant 1 : index
    %c0_7 = arith.constant 0 : index
    %7 = vector.load %arg1[%c0_6, %c1, %c0_7] : memref<1x49x32xf32, #tpu.memory_space<vmem>>, vector<1x28x32xf32>
    %8 = vector.shape_cast %7 : vector<1x28x32xf32> to vector<28x32xf32>
    %c1_8 = arith.constant 1 : index
    %c0_9 = arith.constant 0 : index
    %c0_10 = arith.constant 0 : index
    %9 = vector.load %arg2[%c1_8, %c0_9, %c0_10] : memref<9x32x64xf32, #tpu.memory_space<vmem>>, vector<1x32x64xf32>
    %10 = vector.shape_cast %9 : vector<1x32x64xf32> to vector<32x64xf32>
    %cst_11 = arith.constant dense<0.000000e+00> : vector<28x64xf32>
    %11 = tpu.matmul %8, %10, %cst_11 {dimension_numbers = #tpu.dot_dimension_numbers<[1], [0], [0], [1], [0, 0, 1, 1], [], []>} : vector<28x32xf32>, vector<32x64xf32>, vector<28x64xf32> -> vector<28x64xf32>
    %12 = arith.addf %6, %11 : vector<28x64xf32>
    %c0_12 = arith.constant 0 : index
    %c2 = arith.constant 2 : index
    %c0_13 = arith.constant 0 : index
    %13 = vector.load %arg1[%c0_12, %c2, %c0_13] : memref<1x49x32xf32, #tpu.memory_space<vmem>>, vector<1x28x32xf32>
    %14 = vector.shape_cast %13 : vector<1x28x32xf32> to vector<28x32xf32>
    %c2_14 = arith.constant 2 : index
    %c0_15 = arith.constant 0 : index
    %c0_16 = arith.constant 0 : index
    %15 = vector.load %arg2[%c2_14, %c0_15, %c0_16] : memref<9x32x64xf32, #tpu.memory_space<vmem>>, vector<1x32x64xf32>
    %16 = vector.shape_cast %15 : vector<1x32x64xf32> to vector<32x64xf32>
    %cst_17 = arith.constant dense<0.000000e+00> : vector<28x64xf32>
    %17 = tpu.matmul %14, %16, %cst_17 {dimension_numbers = #tpu.dot_dimension_numbers<[1], [0], [0], [1], [0, 0, 1, 1], [], []>} : vector<28x32xf32>, vector<32x64xf32>, vector<28x64xf32> -> vector<28x64xf32>
    %18 = arith.addf %12, %17 : vector<28x64xf32>
    %c0_18 = arith.constant 0 : index
    %c7 = arith.constant 7 : index
    %c0_19 = arith.constant 0 : index
    %19 = vector.load %arg1[%c0_18, %c7, %c0_19] : memref<1x49x32xf32, #tpu.memory_space<vmem>>, vector<1x28x32xf32>
    %20 = vector.shape_cast %19 : vector<1x28x32xf32> to vector<28x32xf32>
    %c3 = arith.constant 3 : index
    %c0_20 = arith.constant 0 : index
    %c0_21 = arith.constant 0 : index
    %21 = vector.load %arg2[%c3, %c0_20, %c0_21] : memref<9x32x64xf32, #tpu.memory_space<vmem>>, vector<1x32x64xf32>
    %22 = vector.shape_cast %21 : vector<1x32x64xf32> to vector<32x64xf32>
    %cst_22 = arith.constant dense<0.000000e+00> : vector<28x64xf32>
    %23 = tpu.matmul %20, %22, %cst_22 {dimension_numbers = #tpu.dot_dimension_numbers<[1], [0], [0], [1], [0, 0, 1, 1], [], []>} : vector<28x32xf32>, vector<32x64xf32>, vector<28x64xf32> -> vector<28x64xf32>
    %24 = arith.addf %18, %23 : vector<28x64xf32>
    %c0_23 = arith.constant 0 : index
    %c8 = arith.constant 8 : index
    %c0_24 = arith.constant 0 : index
    %25 = vector.load %arg1[%c0_23, %c8, %c0_24] : memref<1x49x32xf32, #tpu.memory_space<vmem>>, vector<1x28x32xf32>
    %26 = vector.shape_cast %25 : vector<1x28x32xf32> to vector<28x32xf32>
    %c4 = arith.constant 4 : index
    %c0_25 = arith.constant 0 : index
    %c0_26 = arith.constant 0 : index
    %27 = vector.load %arg2[%c4, %c0_25, %c0_26] : memref<9x32x64xf32, #tpu.memory_space<vmem>>, vector<1x32x64xf32>
    %28 = vector.shape_cast %27 : vector<1x32x64xf32> to vector<32x64xf32>
    %cst_27 = arith.constant dense<0.000000e+00> : vector<28x64xf32>
    %29 = tpu.matmul %26, %28, %cst_27 {dimension_numbers = #tpu.dot_dimension_numbers<[1], [0], [0], [1], [0, 0, 1, 1], [], []>} : vector<28x32xf32>, vector<32x64xf32>, vector<28x64xf32> -> vector<28x64xf32>
    %30 = arith.addf %24, %29 : vector<28x64xf32>
    %c0_28 = arith.constant 0 : index
    %c9 = arith.constant 9 : index
    %c0_29 = arith.constant 0 : index
    %31 = vector.load %arg1[%c0_28, %c9, %c0_29] : memref<1x49x32xf32, #tpu.memory_space<vmem>>, vector<1x28x32xf32>
    %32 = vector.shape_cast %31 : vector<1x28x32xf32> to vector<28x32xf32>
    %c5 = arith.constant 5 : index
    %c0_30 = arith.constant 0 : index
    %c0_31 = arith.constant 0 : index
    %33 = vector.load %arg2[%c5, %c0_30, %c0_31] : memref<9x32x64xf32, #tpu.memory_space<vmem>>, vector<1x32x64xf32>
    %34 = vector.shape_cast %33 : vector<1x32x64xf32> to vector<32x64xf32>
    %cst_32 = arith.constant dense<0.000000e+00> : vector<28x64xf32>
    %35 = tpu.matmul %32, %34, %cst_32 {dimension_numbers = #tpu.dot_dimension_numbers<[1], [0], [0], [1], [0, 0, 1, 1], [], []>} : vector<28x32xf32>, vector<32x64xf32>, vector<28x64xf32> -> vector<28x64xf32>
    %36 = arith.addf %30, %35 : vector<28x64xf32>
    %c0_33 = arith.constant 0 : index
    %c14 = arith.constant 14 : index
    %c0_34 = arith.constant 0 : index
    %37 = vector.load %arg1[%c0_33, %c14, %c0_34] : memref<1x49x32xf32, #tpu.memory_space<vmem>>, vector<1x28x32xf32>
    %38 = vector.shape_cast %37 : vector<1x28x32xf32> to vector<28x32xf32>
    %c6 = arith.constant 6 : index
    %c0_35 = arith.constant 0 : index
    %c0_36 = arith.constant 0 : index
    %39 = vector.load %arg2[%c6, %c0_35, %c0_36] : memref<9x32x64xf32, #tpu.memory_space<vmem>>, vector<1x32x64xf32>
    %40 = vector.shape_cast %39 : vector<1x32x64xf32> to vector<32x64xf32>
    %cst_37 = arith.constant dense<0.000000e+00> : vector<28x64xf32>
    %41 = tpu.matmul %38, %40, %cst_37 {dimension_numbers = #tpu.dot_dimension_numbers<[1], [0], [0], [1], [0, 0, 1, 1], [], []>} : vector<28x32xf32>, vector<32x64xf32>, vector<28x64xf32> -> vector<28x64xf32>
    %42 = arith.addf %36, %41 : vector<28x64xf32>
    %c0_38 = arith.constant 0 : index
    %c15 = arith.constant 15 : index
    %c0_39 = arith.constant 0 : index
    %43 = vector.load %arg1[%c0_38, %c15, %c0_39] : memref<1x49x32xf32, #tpu.memory_space<vmem>>, vector<1x28x32xf32>
    %44 = vector.shape_cast %43 : vector<1x28x32xf32> to vector<28x32xf32>
    %c7_40 = arith.constant 7 : index
    %c0_41 = arith.constant 0 : index
    %c0_42 = arith.constant 0 : index
    %45 = vector.load %arg2[%c7_40, %c0_41, %c0_42] : memref<9x32x64xf32, #tpu.memory_space<vmem>>, vector<1x32x64xf32>
    %46 = vector.shape_cast %45 : vector<1x32x64xf32> to vector<32x64xf32>
    %cst_43 = arith.constant dense<0.000000e+00> : vector<28x64xf32>
    %47 = tpu.matmul %44, %46, %cst_43 {dimension_numbers = #tpu.dot_dimension_numbers<[1], [0], [0], [1], [0, 0, 1, 1], [], []>} : vector<28x32xf32>, vector<32x64xf32>, vector<28x64xf32> -> vector<28x64xf32>
    %48 = arith.addf %42, %47 : vector<28x64xf32>
    %c0_44 = arith.constant 0 : index
    %c16 = arith.constant 16 : index
    %c0_45 = arith.constant 0 : index
    %49 = vector.load %arg1[%c0_44, %c16, %c0_45] : memref<1x49x32xf32, #tpu.memory_space<vmem>>, vector<1x28x32xf32>
    %50 = vector.shape_cast %49 : vector<1x28x32xf32> to vector<28x32xf32>
    %c8_46 = arith.constant 8 : index
    %c0_47 = arith.constant 0 : index
    %c0_48 = arith.constant 0 : index
    %51 = vector.load %arg2[%c8_46, %c0_47, %c0_48] : memref<9x32x64xf32, #tpu.memory_space<vmem>>, vector<1x32x64xf32>
    %52 = vector.shape_cast %51 : vector<1x32x64xf32> to vector<32x64xf32>
    %cst_49 = arith.constant dense<0.000000e+00> : vector<28x64xf32>
    %53 = tpu.matmul %50, %52, %cst_49 {dimension_numbers = #tpu.dot_dimension_numbers<[1], [0], [0], [1], [0, 0, 1, 1], [], []>} : vector<28x32xf32>, vector<32x64xf32>, vector<28x64xf32> -> vector<28x64xf32>
    %54 = arith.addf %48, %53 : vector<28x64xf32>
    %c0_50 = arith.constant 0 : index
    %c0_51 = arith.constant 0 : index
    %55 = vector.load %arg3[%c0_50, %c0_51] : memref<1x64xf32, #tpu.memory_space<vmem>>, vector<1x64xf32>
    %56 = vector.broadcast %55 : vector<1x64xf32> to vector<28x64xf32>
    %57 = arith.addf %54, %56 : vector<28x64xf32>
    %cst_52 = arith.constant 0.000000e+00 : f32
    %58 = vector.broadcast %cst_52 : f32 to vector<28x64xf32>
    %59 = arith.maximumf %57, %58 : vector<28x64xf32>
    %c0_53 = arith.constant 0 : index
    %c0_54 = arith.constant 0 : index
    %c0_55 = arith.constant 0 : index
    %60 = vector.load %arg4[%c0_53, %c0_54, %c0_55] : memref<1x28x64xf32, #tpu.memory_space<vmem>>, vector<1x28x64xf32>
    %61 = vector.shape_cast %60 : vector<1x28x64xf32> to vector<28x64xf32>
    %62 = vector.shape_cast %59 : vector<28x64xf32> to vector<1x28x64xf32>
    tpu.vector_store %arg4[%c0_53, %c0_54, %c0_55], %62 {strides = array<i32>} : memref<1x28x64xf32, #tpu.memory_space<vmem>>, vector<1x28x64xf32>,
    return
  }
  func.func @transform_0(%arg0: i32) -> (i32, i32, i32) {
    %c0_i32 = arith.constant 0 : i32
    %c0_i32_0 = arith.constant 0 : i32
    %c0_i32_1 = arith.constant 0 : i32
    return %arg0, %c0_i32, %c0_i32_0 : i32, i32, i32
  }
  func.func @transform_1(%arg0: i32) -> (i32, i32, i32) {
    %c0_i32 = arith.constant 0 : i32
    %c0_i32_0 = arith.constant 0 : i32
    %c0_i32_1 = arith.constant 0 : i32
    %c0_i32_2 = arith.constant 0 : i32
    return %c0_i32, %c0_i32_0, %c0_i32_1 : i32, i32, i32
  }
  func.func @transform_2(%arg0: i32) -> (i32, i32) {
    %c0_i32 = arith.constant 0 : i32
    %c0_i32_0 = arith.constant 0 : i32
    %c0_i32_1 = arith.constant 0 : i32
    return %c0_i32, %c0_i32_0 : i32, i32
  }
  func.func @transform_3(%arg0: i32) -> (i32, i32, i32) {
    %c0_i32 = arith.constant 0 : i32
    %c0_i32_0 = arith.constant 0 : i32
    %c0_i32_1 = arith.constant 0 : i32
    return %arg0, %c0_i32, %c0_i32_0 : i32, i32, i32
  }
}

module attributes {stable_mosaic.version = 11 : i64} {
  func.func @_feat_losses_kernel(%arg0: i32, %arg1: memref<1x4x64xf32, #tpu.memory_space<vmem>>, %arg2: memref<1x4x64xf32, #tpu.memory_space<vmem>>, %arg3: memref<1x4x64xf32, #tpu.memory_space<vmem>>, %arg4: memref<1x1xf32, #tpu.memory_space<vmem>>, %arg5: memref<1x1xf32, #tpu.memory_space<vmem>>, %arg6: memref<1x1xf32, #tpu.memory_space<vmem>>, %arg7: memref<1x1xf32, #tpu.memory_space<vmem>>) attributes {dimension_semantics = [#tpu.dimension_semantics<arbitrary>], iteration_bounds = array<i64: 2>, scalar_prefetch = 0 : i64, scratch_operands = 0 : i64, tpu.core_type = #tpu.core_type<tc>, window_params = [{transform_indices = @transform_0, window_bounds = array<i64: 1, 4, 64>}, {transform_indices = @transform_1, window_bounds = array<i64: 1, 4, 64>}, {transform_indices = @transform_2, window_bounds = array<i64: 1, 4, 64>}, {pipeline_mode = #tpu.pipeline_mode<synchronous>, transform_indices = @transform_3, window_bounds = array<i64: 1, 1>}, {pipeline_mode = #tpu.pipeline_mode<synchronous>, transform_indices = @transform_4, window_bounds = array<i64: 1, 1>}, {pipeline_mode = #tpu.pipeline_mode<synchronous>, transform_indices = @transform_5, window_bounds = array<i64: 1, 1>}, {pipeline_mode = #tpu.pipeline_mode<synchronous>, transform_indices = @transform_6, window_bounds = array<i64: 1, 1>}]} {
    %c0_i32 = arith.constant 0 : i32
    %0 = arith.cmpi eq, %arg0, %c0_i32 : i32
    %1 = arith.extui %0 : i1 to i32
    %c0_i32_0 = arith.constant 0 : i32
    %2 = arith.cmpi ne, %1, %c0_i32_0 : i32
    scf.if %2 {
      %cst_34 = arith.constant 0.000000e+00 : f32
      %58 = vector.broadcast %cst_34 : f32 to vector<1x1xf32>
      %c0_35 = arith.constant 0 : index
      %c0_36 = arith.constant 0 : index
      %59 = vector.load %arg4[%c0_35, %c0_36] : memref<1x1xf32, #tpu.memory_space<vmem>>, vector<1x1xf32>
      tpu.vector_store %arg4[%c0_35, %c0_36], %58 {strides = array<i32>} : memref<1x1xf32, #tpu.memory_space<vmem>>, vector<1x1xf32>,
      %cst_37 = arith.constant 0.000000e+00 : f32
      %60 = vector.broadcast %cst_37 : f32 to vector<1x1xf32>
      %c0_38 = arith.constant 0 : index
      %c0_39 = arith.constant 0 : index
      %61 = vector.load %arg5[%c0_38, %c0_39] : memref<1x1xf32, #tpu.memory_space<vmem>>, vector<1x1xf32>
      tpu.vector_store %arg5[%c0_38, %c0_39], %60 {strides = array<i32>} : memref<1x1xf32, #tpu.memory_space<vmem>>, vector<1x1xf32>,
      %cst_40 = arith.constant 0.000000e+00 : f32
      %62 = vector.broadcast %cst_40 : f32 to vector<1x1xf32>
      %c0_41 = arith.constant 0 : index
      %c0_42 = arith.constant 0 : index
      %63 = vector.load %arg6[%c0_41, %c0_42] : memref<1x1xf32, #tpu.memory_space<vmem>>, vector<1x1xf32>
      tpu.vector_store %arg6[%c0_41, %c0_42], %62 {strides = array<i32>} : memref<1x1xf32, #tpu.memory_space<vmem>>, vector<1x1xf32>,
      %cst_43 = arith.constant 0.000000e+00 : f32
      %64 = vector.broadcast %cst_43 : f32 to vector<1x1xf32>
      %c0_44 = arith.constant 0 : index
      %c0_45 = arith.constant 0 : index
      %65 = vector.load %arg7[%c0_44, %c0_45] : memref<1x1xf32, #tpu.memory_space<vmem>>, vector<1x1xf32>
      tpu.vector_store %arg7[%c0_44, %c0_45], %64 {strides = array<i32>} : memref<1x1xf32, #tpu.memory_space<vmem>>, vector<1x1xf32>,
    } else {
    }
    %c0 = arith.constant 0 : index
    %c0_1 = arith.constant 0 : index
    %c0_2 = arith.constant 0 : index
    %3 = vector.load %arg1[%c0, %c0_1, %c0_2] : memref<1x4x64xf32, #tpu.memory_space<vmem>>, vector<1x4x64xf32>
    %4 = vector.shape_cast %3 : vector<1x4x64xf32> to vector<4x64xf32>
    %c0_3 = arith.constant 0 : index
    %c0_4 = arith.constant 0 : index
    %c0_5 = arith.constant 0 : index
    %5 = vector.load %arg2[%c0_3, %c0_4, %c0_5] : memref<1x4x64xf32, #tpu.memory_space<vmem>>, vector<1x4x64xf32>
    %6 = vector.shape_cast %5 : vector<1x4x64xf32> to vector<4x64xf32>
    %c0_6 = arith.constant 0 : index
    %c0_7 = arith.constant 0 : index
    %c0_8 = arith.constant 0 : index
    %7 = vector.load %arg3[%c0_6, %c0_7, %c0_8] : memref<1x4x64xf32, #tpu.memory_space<vmem>>, vector<1x4x64xf32>
    %8 = vector.shape_cast %7 : vector<1x4x64xf32> to vector<4x64xf32>
    %c0_9 = arith.constant 0 : index
    %c0_10 = arith.constant 0 : index
    %9 = vector.load %arg4[%c0_9, %c0_10] : memref<1x1xf32, #tpu.memory_space<vmem>>, vector<1x1xf32>
    %10 = arith.subf %4, %8 : vector<4x64xf32>
    %11 = math.absf %10 : vector<4x64xf32>
    %12 = vector.shape_cast %11 : vector<4x64xf32> to vector<1x4x64xf32>
    %cst = arith.constant dense<0.000000e+00> : vector<1xf32>
    %13 = vector.multi_reduction <add>, %12, %cst [1, 2] : vector<1x4x64xf32> to vector<1xf32>
    %14 = vector.shape_cast %13 : vector<1xf32> to vector<1x1x1xf32>
    %15 = vector.extract %14[0, 0, 0] : f32 from vector<1x1x1xf32>
    %16 = vector.broadcast %15 : f32 to vector<1x1xf32>
    %17 = arith.addf %9, %16 : vector<1x1xf32>
    %c0_11 = arith.constant 0 : index
    %c0_12 = arith.constant 0 : index
    %18 = vector.load %arg4[%c0_11, %c0_12] : memref<1x1xf32, #tpu.memory_space<vmem>>, vector<1x1xf32>
    tpu.vector_store %arg4[%c0_11, %c0_12], %17 {strides = array<i32>} : memref<1x1xf32, #tpu.memory_space<vmem>>, vector<1x1xf32>,
    %c0_13 = arith.constant 0 : index
    %c0_14 = arith.constant 0 : index
    %19 = vector.load %arg5[%c0_13, %c0_14] : memref<1x1xf32, #tpu.memory_space<vmem>>, vector<1x1xf32>
    %20 = arith.subf %6, %8 : vector<4x64xf32>
    %21 = math.absf %20 : vector<4x64xf32>
    %22 = vector.shape_cast %21 : vector<4x64xf32> to vector<1x4x64xf32>
    %cst_15 = arith.constant dense<0.000000e+00> : vector<1xf32>
    %23 = vector.multi_reduction <add>, %22, %cst_15 [1, 2] : vector<1x4x64xf32> to vector<1xf32>
    %24 = vector.shape_cast %23 : vector<1xf32> to vector<1x1x1xf32>
    %25 = vector.extract %24[0, 0, 0] : f32 from vector<1x1x1xf32>
    %26 = vector.broadcast %25 : f32 to vector<1x1xf32>
    %27 = arith.addf %19, %26 : vector<1x1xf32>
    %c0_16 = arith.constant 0 : index
    %c0_17 = arith.constant 0 : index
    %28 = vector.load %arg5[%c0_16, %c0_17] : memref<1x1xf32, #tpu.memory_space<vmem>>, vector<1x1xf32>
    tpu.vector_store %arg5[%c0_16, %c0_17], %27 {strides = array<i32>} : memref<1x1xf32, #tpu.memory_space<vmem>>, vector<1x1xf32>,
    %cst_18 = arith.constant dense<0.000000e+00> : vector<64x64xf32>
    %29 = tpu.matmul %4, %4, %cst_18 {dimension_numbers = #tpu.dot_dimension_numbers<[0], [0], [1], [1], [0, 1, 1, 1], [], []>} : vector<4x64xf32>, vector<4x64xf32>, vector<64x64xf32> -> vector<64x64xf32>
    %cst_19 = arith.constant 3.906250e-03 : f32
    %30 = vector.broadcast %cst_19 : f32 to vector<64x64xf32>
    %31 = arith.mulf %29, %30 : vector<64x64xf32>
    %cst_20 = arith.constant dense<0.000000e+00> : vector<64x64xf32>
    %32 = tpu.matmul %6, %6, %cst_20 {dimension_numbers = #tpu.dot_dimension_numbers<[0], [0], [1], [1], [0, 1, 1, 1], [], []>} : vector<4x64xf32>, vector<4x64xf32>, vector<64x64xf32> -> vector<64x64xf32>
    %cst_21 = arith.constant 3.906250e-03 : f32
    %33 = vector.broadcast %cst_21 : f32 to vector<64x64xf32>
    %34 = arith.mulf %32, %33 : vector<64x64xf32>
    %cst_22 = arith.constant dense<0.000000e+00> : vector<64x64xf32>
    %35 = tpu.matmul %8, %8, %cst_22 {dimension_numbers = #tpu.dot_dimension_numbers<[0], [0], [1], [1], [0, 1, 1, 1], [], []>} : vector<4x64xf32>, vector<4x64xf32>, vector<64x64xf32> -> vector<64x64xf32>
    %cst_23 = arith.constant 3.906250e-03 : f32
    %36 = vector.broadcast %cst_23 : f32 to vector<64x64xf32>
    %37 = arith.mulf %35, %36 : vector<64x64xf32>
    %c0_24 = arith.constant 0 : index
    %c0_25 = arith.constant 0 : index
    %38 = vector.load %arg6[%c0_24, %c0_25] : memref<1x1xf32, #tpu.memory_space<vmem>>, vector<1x1xf32>
    %39 = arith.subf %31, %37 : vector<64x64xf32>
    %40 = math.absf %39 : vector<64x64xf32>
    %41 = vector.shape_cast %40 : vector<64x64xf32> to vector<1x64x64xf32>
    %cst_26 = arith.constant dense<0.000000e+00> : vector<1xf32>
    %42 = vector.multi_reduction <add>, %41, %cst_26 [1, 2] : vector<1x64x64xf32> to vector<1xf32>
    %43 = vector.shape_cast %42 : vector<1xf32> to vector<1x1x1xf32>
    %44 = vector.extract %43[0, 0, 0] : f32 from vector<1x1x1xf32>
    %45 = vector.broadcast %44 : f32 to vector<1x1xf32>
    %46 = arith.addf %38, %45 : vector<1x1xf32>
    %c0_27 = arith.constant 0 : index
    %c0_28 = arith.constant 0 : index
    %47 = vector.load %arg6[%c0_27, %c0_28] : memref<1x1xf32, #tpu.memory_space<vmem>>, vector<1x1xf32>
    tpu.vector_store %arg6[%c0_27, %c0_28], %46 {strides = array<i32>} : memref<1x1xf32, #tpu.memory_space<vmem>>, vector<1x1xf32>,
    %c0_29 = arith.constant 0 : index
    %c0_30 = arith.constant 0 : index
    %48 = vector.load %arg7[%c0_29, %c0_30] : memref<1x1xf32, #tpu.memory_space<vmem>>, vector<1x1xf32>
    %49 = arith.subf %34, %37 : vector<64x64xf32>
    %50 = math.absf %49 : vector<64x64xf32>
    %51 = vector.shape_cast %50 : vector<64x64xf32> to vector<1x64x64xf32>
    %cst_31 = arith.constant dense<0.000000e+00> : vector<1xf32>
    %52 = vector.multi_reduction <add>, %51, %cst_31 [1, 2] : vector<1x64x64xf32> to vector<1xf32>
    %53 = vector.shape_cast %52 : vector<1xf32> to vector<1x1x1xf32>
    %54 = vector.extract %53[0, 0, 0] : f32 from vector<1x1x1xf32>
    %55 = vector.broadcast %54 : f32 to vector<1x1xf32>
    %56 = arith.addf %48, %55 : vector<1x1xf32>
    %c0_32 = arith.constant 0 : index
    %c0_33 = arith.constant 0 : index
    %57 = vector.load %arg7[%c0_32, %c0_33] : memref<1x1xf32, #tpu.memory_space<vmem>>, vector<1x1xf32>
    tpu.vector_store %arg7[%c0_32, %c0_33], %56 {strides = array<i32>} : memref<1x1xf32, #tpu.memory_space<vmem>>, vector<1x1xf32>,
    return
  }
  func.func @transform_0(%arg0: i32) -> (i32, i32, i32) {
    %c0_i32 = arith.constant 0 : i32
    %c0_i32_0 = arith.constant 0 : i32
    %c0_i32_1 = arith.constant 0 : i32
    return %arg0, %c0_i32, %c0_i32_0 : i32, i32, i32
  }
  func.func @transform_1(%arg0: i32) -> (i32, i32, i32) {
    %c2_i32 = arith.constant 2 : i32
    %0 = arith.addi %arg0, %c2_i32 : i32
    %c0_i32 = arith.constant 0 : i32
    %c0_i32_0 = arith.constant 0 : i32
    %c0_i32_1 = arith.constant 0 : i32
    return %0, %c0_i32, %c0_i32_0 : i32, i32, i32
  }
  func.func @transform_2(%arg0: i32) -> (i32, i32, i32) {
    %c4_i32 = arith.constant 4 : i32
    %0 = arith.addi %arg0, %c4_i32 : i32
    %c0_i32 = arith.constant 0 : i32
    %c0_i32_0 = arith.constant 0 : i32
    %c0_i32_1 = arith.constant 0 : i32
    return %0, %c0_i32, %c0_i32_0 : i32, i32, i32
  }
  func.func @transform_3(%arg0: i32) -> (i32, i32) {
    %c0_i32 = arith.constant 0 : i32
    %c0_i32_0 = arith.constant 0 : i32
    %c0_i32_1 = arith.constant 0 : i32
    return %c0_i32, %c0_i32_0 : i32, i32
  }
  func.func @transform_4(%arg0: i32) -> (i32, i32) {
    %c0_i32 = arith.constant 0 : i32
    %c0_i32_0 = arith.constant 0 : i32
    %c0_i32_1 = arith.constant 0 : i32
    return %c0_i32, %c0_i32_0 : i32, i32
  }
  func.func @transform_5(%arg0: i32) -> (i32, i32) {
    %c0_i32 = arith.constant 0 : i32
    %c0_i32_0 = arith.constant 0 : i32
    %c0_i32_1 = arith.constant 0 : i32
    return %c0_i32, %c0_i32_0 : i32, i32
  }
  func.func @transform_6(%arg0: i32) -> (i32, i32) {
    %c0_i32 = arith.constant 0 : i32
    %c0_i32_0 = arith.constant 0 : i32
    %c0_i32_1 = arith.constant 0 : i32
    return %c0_i32, %c0_i32_0 : i32, i32
  }
}

</mosaic_0001>

<bundles_post_ra>
// kernel: loss_forward.8
= control target key start
LH: loop header
LB: loop body
LE: loop exit
PB: predicated region body
PF: predicated region fallthrough
CT: control target
= control target key end

     0   :  { %11 = vsyncpa [#allocation3], 0  ;;  %s255_s0 = inlined_call_operand.vmem [shape: f32[16,128], index: 0, kind: input, shape index: {}]   ;;  %s256_s1 = inlined_call_operand.vmem [shape: f32[16,128], index: 1, kind: input, shape index: {}]   ;;  %s257_s2 = inlined_call_operand.vmem [shape: f32[16,128], index: 2, kind: input, shape index: {}]   ;;  %s258_s3 = inlined_call_operand.vmem [shape: f32[16,128], index: 3, kind: output, shape index: {0}]   ;;  %s259_s4 = inlined_call_operand.hbm [shape: f32[1,1], index: 4, kind: output, shape index: {1}]   ;;  %s260_s5 = inlined_call_operand.hbm [shape: f32[1,1], index: 5, kind: output, shape index: {2}]  }
   0x1   :  { %v26_v0 = vld [vmem:[%s255_s0] sm:$0xff]  ;;  %v27_v1 = vld [vmem:[%s255_s0 + $0x8] sm:$0xff] }
   0x2   :  { %v28_v2 = vld [vmem:[%s256_s1] sm:$0xff]  ;;  %v29_v3 = vld [vmem:[%s256_s1 + $0x8] sm:$0xff] }
   0x3   :  { %v30_v4 = vld [vmem:[%s257_s2] sm:$0xff]  ;;  %v31_v5 = vld [vmem:[%s257_s2 + $0x8] sm:$0xff]  ;;  %v32_v6 = vsub.f32 1.0, %v28_v2  ;;  %v36_v7 = vmul.f32 %v28_v2, %v26_v0  ;;  %v33_v8 = vsub.f32 1.0, %v29_v3  ;;  %v37_v9 = vmul.f32 %v29_v3, %v27_v1 }
   0x4   :  { %v64_v10 = vmul.f32 %v30_v4, %v28_v2  ;;  %v65_v11 = vmul.f32 %v31_v5, %v29_v3 }
   0x5   :  { %12 = vsyncpa [#allocation5], 0  ;;  %v34_v12 = vmul.f32 %v32_v6, %v30_v4  ;;  %v43_v13 = vmul.f32 %v32_v6, %v26_v0  ;;  %v35_v14 = vmul.f32 %v33_v8, %v31_v5  ;;  %v44_v15 = vmul.f32 %v33_v8, %v27_v1  ;;  %s172_s8 = smov [#allocation4]  }
   0x6   :  { %v66_v16 = vsub.f32 %v64_v10, %v36_v7  ;;  %v67_v17 = vsub.f32 %v65_v11, %v37_v9  ;;  %vm23_vm0 = vcmask 0   ;;  %v170_v28 = vmov 0.0   ;;  %s101_s9 = sshll.u32 %s172_s8, 4  ;;  %s102_s9 = int_to_ptr.vmem [resolvable:$true] %s101_s9 }
   0x7   :  { %v45_v18 = vsub.f32 %v34_v12, %v43_v13  ;;  %v38_v19 = vadd.f32 %v36_v7, %v34_v12  ;;  %v46_v20 = vsub.f32 %v35_v14, %v44_v15  ;;  %v39_v21 = vadd.f32 %v37_v9, %v35_v14  ;;  %24 = vst.msk [vmem:[#allocation2] sm:$0x1] %vm23_vm0, %v170_v28 }
   0x8   :  { %v68_v24 = vand.u32 2147483647, %v66_v16  ;;  %v69_v25 = vand.u32 2147483647, %v67_v17  ;;  %25 = vst.msk [vmem:[#allocation4] sm:$0x1] %vm23_vm0, %v170_v28 }
   0x9   :  { %v47_v22 = vand.u32 2147483647, %v45_v18  ;;  %40 = vst [vmem:[%s258_s3] sm:$0xff] %v38_v19  ;;  %v48_v23 = vand.u32 2147483647, %v46_v20  ;;  %41 = vst [vmem:[%s258_s3 + $0x8] sm:$0xff] %v39_v21  ;;  %s171_s3 = smov [#allocation2]  }
   0xa   :  { %v70_v27 = vadd.f32 %v69_v25, %v68_v24  ;;  %s91_s6 = sshll.u32 %s171_s3, 4  ;;  %s92_s6 = int_to_ptr.vmem [resolvable:$true] %s91_s6 }
   0xb   :  { %v49_v26 = vadd.f32 %v48_v23, %v47_v22  ;;  %s122_s11 = scalar_lea.vmem %s92_s6, 16  ;;  %s126_s12 = scalar_lea.vmem %s92_s6, 32 }
   0xc   :  { %p123_p0 = scmp.ne.s32.totalorder %s92_s6, %s122_s11  ;;  %p127_p1 = scmp.lt.s32.totalorder %s92_s6, %s92_s6 }
   0xd   :  { %50 = vadd.xlane.f32.xlu0 %v49_v26  ;;  %p128_p2 = scmp.lt.s32.totalorder %s126_s12, %s122_s11 }
   0xe   :  { %v42_v43 = vld [vmem:[#allocation2] sm:$0x1] }
   0xf   :  { %v63_v46 = vld [vmem:[#allocation4] sm:$0x1]  ;;  %p129_p3 = por %p128_p2, %p127_p1 }
  0x11   :  { %71 = vadd.xlane.f32.xlu0 %v70_v27  ;;  %p130_p4 = pnand %p129_p3, %p123_p0 }
  0x9a   :  { %v51_v29 = vpop.xlane.xlu0 %50 }
  0x9b   :  { %v52_v30 = vrot.slane %v51_v29, 4 }
  0x9d   :  { %v53_v31 = vadd.f32 %v52_v30, %v51_v29 }
  0x9e   :  { %v72_v32 = vpop.xlane.xlu0 %71 }
  0x9f   :  { %v54_v33 = vrot.slane %v53_v31, 2  ;;  %v73_v34 = vrot.slane %v72_v32, 4 }
  0xa1   :  { %v74_v35 = vadd.f32 %v73_v34, %v72_v32  ;;  %v55_v36 = vadd.f32 %v54_v33, %v53_v31 }
  0xa3   :  { %v75_v37 = vrot.slane %v74_v35, 2  ;;  %v56_v38 = vrot.slane %v55_v36, 1 }
  0xa5   :  { %v76_v39 = vadd.f32 %v75_v37, %v74_v35  ;;  %v57_v40 = vadd.f32 %v56_v38, %v55_v36 }
  0xa7   :  { %115 = vpush %v57_v40  ;;  %v77_v41 = vrot.slane %v76_v39, 1 }
  0xa9   :  { %v78_v42 = vadd.f32 %v77_v41, %v76_v39 }
  0xab   :  { %117 = vpush %v78_v42 }
  0xd8   :  { %s116_s7 = spop %115 }
  0xd9   :  { %v59_v44 = vstv %s116_s7 }
  0xda   :  { %v60_v45 = vadd.f32 %v59_v44, %v42_v43 }
  0xdc   :  { %62 = vst.msk [vmem:[#allocation2] sm:$0x1] %vm23_vm0, %v60_v45  ;;  %s118_s10 = spop %117 }
  0xdd   :  { %v80_v47 = vstv %s118_s10 }
  0xde   :  { %133 = shalt.err (!%p130_p4)
}
  0xdf   :  { %s134_s15 = scalar_lea.hbm %s259_s4, 16 }
  0xe0   :  { %p135_p5 = scmp.ne.s32.totalorder %s259_s4, %s134_s15  ;;  %p138_p6 = scmp.lt.u32.totalorder %s134_s15, %s259_s4 }
  0xe2   :  { %p140_p7 = pnand %p138_p6, %p135_p5 }
  0xe4   :  { %143 = shalt.err (!%p140_p7)
}
  0xe5   :  { %94 = dma.vmem_to_hbm [thread:$0]  %s92_s6, 16, %s259_s4, [#allocation3]   ;;  %v81_v48 = vadd.f32 %v80_v47, %v63_v46 }
  0xe6   :  { %s144_s22 = scalar_lea.vmem %s102_s9, 16  ;;  %s148_s23 = scalar_lea.vmem %s102_s9, 32 }
  0xe7   :  { %82 = vst.msk [vmem:[#allocation4] sm:$0x1] %vm23_vm0, %v81_v48  ;;  %p145_p8 = scmp.ne.s32.totalorder %s102_s9, %s144_s22  ;;  %p149_p9 = scmp.lt.s32.totalorder %s102_s9, %s102_s9 }
  0xe8   :  { %p150_p10 = scmp.lt.s32.totalorder %s148_s23, %s144_s22 }
  0xea   :  { %p151_p11 = por %p150_p10, %p149_p9 }
  0xec   :  { %p152_p12 = pnand %p151_p11, %p145_p8 }
  0xee   :  { %155 = shalt.err (!%p152_p12)
}
  0xef   :  { %s156_s26 = scalar_lea.hbm %s260_s5, 16 }
  0xf0   :  { %p157_p13 = scmp.ne.s32.totalorder %s260_s5, %s156_s26  ;;  %p160_p0 = scmp.lt.u32.totalorder %s156_s26, %s260_s5 }
  0xf2   :  { %p162_p1 = pnand %p160_p0, %p157_p13 }
  0xf4   :  { %165 = shalt.err (!%p162_p1)
}
  0xf5   :  { %104 = dma.vmem_to_hbm [thread:$0]  %s102_s9, 16, %s260_s5, [#allocation5]  }
  0xf6   :  { %166 = dma.done.wait [#allocation3], 16  }
  0xf7   :  { %167 = vsyncadd [#allocation3], 4294967280 }
  0xf8   :  { %168 = dma.done.wait [#allocation5], 16  }
  0xf9   :  { %169 = vsyncadd [#allocation5], 4294967280 }
  0xfa   :  { %113 = vsyncpa [#allocation3], 1 }
  0xfb   :  { %114 = vsyncpa [#allocation5], 1 }

// kernel: loss_forward.15
= control target key start
LH: loop header
LB: loop body
LE: loop exit
PB: predicated region body
PF: predicated region fallthrough
CT: control target
= control target key end

     0   :  { %9 = vsyncpa [#allocation3], 0  ;;  %s2214_s0 = inlined_call_operand.vmem [shape: f32[2,18,18,3], index: 0, kind: input, shape index: {}]   ;;  %s2215_s1 = inlined_call_operand.vmem [shape: f32[2,16,16,3], index: 1, kind: input, shape index: {}]   ;;  %s2216_s2 = inlined_call_operand.hbm [shape: f32[1,1], index: 2, kind: output, shape index: {0}]   ;;  %s2217_s3 = inlined_call_operand.hbm [shape: f32[1,1], index: 3, kind: output, shape index: {1}]  }
   0x1   :  { %10 = vsyncpa [#allocation5], 0  ;;  %s1740_s12 = smov 0  }
   0x2 LB: > { %s1746_s13 = sadd.s32 4294967295, %s1714_s12   ;;  %p1605_p0 = scmp.ge.s32.totalorder %s1714_s12, 1  ;;  %s1714_s12 = sphi %s1740_s12, %s16_s12  }
   0x3   : > { %p142_p1 = scmp.lt.s32.totalorder %s1714_s12, 3 }
   0x5   : > { %p143_p2 = pnand %p1605_p0, %p142_p1 }
   0x6   : > { %p166_p3 = scmp.lt.s32.totalorder (!%p143_p2), %s1746_s13, 1  ;;  %p1609_p4 = scmp.ne.s32.totalorder (!%p143_p2), %s1746_s13, 0 }
   0x7   : > { %146 = sbr.rel (%p143_p2) target bundleno = 672 (0x2a0), region = 28 }
   0xe   : > { %s167_s14 = scalar_select %p166_p3, %s1746_s13, 1 }
   0xf   : > { %179 = sbr.rel (%p1609_p4) target bundleno = 22 (0x16), region = 32  ;;  %vm180_vm0 = vcmask (!%p1609_p4), 0   ;;  %v1716_v0 = vmov (!%p1609_p4), 0.0  }
  0x10   : > { %s1617_s15 = smul.u32 432, %s167_s14  ;;  %s1616_s16 = sshll.u32 %s167_s14, 8  ;;  %181 = vst.msk [vmem:[#allocation2] sm:$0x1] (!%p1609_p4), %vm180_vm0, %v1716_v0  ;;  %182 = vst.msk [vmem:[#allocation4] sm:$0x1] (!%p1609_p4), %vm180_vm0, %v1716_v0 }
  0x11   : > { %s1755_s19 = scalar_lea.vmem %s2215_s1, %s1616_s16 }
  0x12   : > { %s1760_s22 = scalar_lea.vmem %s2214_s0, %s1617_s15 }
  0x16 PF: > { %v185_v1 = vld [vmem:[%s1760_s22 + $0x10] sm:$0x3]  ;;  %vm244_vm1 = vcmask 17408   ;;  %v183_v2 = vld [vmem:[%s1760_s22] sm:$0xff]  ;;  %vm237_vm2 = vcmask 23552   ;;  %v186_v3 = vld [vmem:[%s1760_s22 + $0x18] sm:$0xff] }
  0x17   : > { %v245_v4 = vsel %vm244_vm1, %v185_v1, 0.0  ;;  %v238_v5 = vsel %vm237_vm2, %v183_v2, 0.0  ;;  %v184_v6 = vld [vmem:[%s1760_s22 + $0x8] sm:$0xff]  ;;  %v248_v7 = vsel %vm237_vm2, %v186_v3, 0.0  ;;  %v187_v10 = vld [vmem:[%s1760_s22 + $0x20] sm:$0xff]  ;;  %v190_v13 = vld [vmem:[%s1760_s22 + $0x38] sm:$0xff] }
  0x18   : > { %246 = vadd.xlane.f32.xlu1 %v245_v4  ;;  %239 = vadd.xlane.f32.xlu0 %v238_v5  ;;  %v241_v8 = vsel %vm237_vm2, %v184_v6, 0.0  ;;  %v188_v9 = vld [vmem:[%s1760_s22 + $0x28] sm:$0x3]  ;;  %v251_v12 = vsel %vm237_vm2, %v187_v10, 0.0  ;;  %v189_v14 = vld [vmem:[%s1760_s22 + $0x30] sm:$0xff]  ;;  %v260_v15 = vsel %vm237_vm2, %v190_v13, 0.0 }
  0x19   : > { %v254_v11 = vsel %vm244_vm1, %v188_v9, 0.0  ;;  %v257_v16 = vsel %vm237_vm2, %v189_v14, 0.0  ;;  %v192_v17 = vld [vmem:[%s1760_s22 + $0x48] sm:$0xff]  ;;  %v191_v18 = vld [vmem:[%s1760_s22 + $0x40] sm:$0x3]  ;;  %v193_v22 = vld [vmem:[%s1760_s22 + $0x50] sm:$0xff] }
  0x1a   : > { %v266_v19 = vsel %vm237_vm2, %v192_v17, 0.0  ;;  %v263_v20 = vsel %vm244_vm1, %v191_v18, 0.0  ;;  %v194_v21 = vld [vmem:[%s1760_s22 + $0x58] sm:$0x3]  ;;  %v269_v24 = vsel %vm237_vm2, %v193_v22, 0.0  ;;  %v196_v25 = vld [vmem:[%s1760_s22 + $0x68] sm:$0xff] }
  0x1b   : > { %v272_v23 = vsel %vm244_vm1, %v194_v21, 0.0  ;;  %v195_v26 = vld [vmem:[%s1760_s22 + $0x60] sm:$0xff]  ;;  %v278_v27 = vsel %vm237_vm2, %v196_v25, 0.0  ;;  %v198_v29 = vld [vmem:[%s1760_s22 + $0x78] sm:$0xff]  ;;  %v197_v30 = vld [vmem:[%s1760_s22 + $0x70] sm:$0x3] }
  0x1c   : > { %249 = vadd.xlane.f32.xlu1 %v248_v7  ;;  %242 = vadd.xlane.f32.xlu0 %v241_v8  ;;  %v275_v28 = vsel %vm237_vm2, %v195_v26, 0.0  ;;  %v284_v31 = vsel %vm237_vm2, %v198_v29, 0.0  ;;  %v281_v32 = vsel %vm244_vm1, %v197_v30, 0.0  ;;  %v200_v33 = vld [vmem:[%s1760_s22 + $0x88] sm:$0x3]  ;;  %v199_v34 = vld [vmem:[%s1760_s22 + $0x80] sm:$0xff] }
  0x1d   : > { %v290_v35 = vsel %vm244_vm1, %v200_v33, 0.0  ;;  %v287_v36 = vsel %vm237_vm2, %v199_v34, 0.0  ;;  %v202_v37 = vld [vmem:[%s1760_s22 + $0x98] sm:$0xff]  ;;  %v201_v38 = vld [vmem:[%s1760_s22 + $0x90] sm:$0xff]  ;;  %v204_v41 = vld [vmem:[%s1760_s22 + $0xa8] sm:$0xff]  ;;  %v1717_v47 = vmov 0  }
  0x1e   : > { %v296_v39 = vsel %vm237_vm2, %v202_v37, 0.0  ;;  %v293_v40 = vsel %vm237_vm2, %v201_v38, 0.0  ;;  %v203_v42 = vld [vmem:[%s1760_s22 + $0xa0] sm:$0x3]  ;;  %v302_v43 = vsel %vm237_vm2, %v204_v41, 0.0  ;;  %v205_v46 = vld [vmem:[%s1760_s22 + $0xb0] sm:$0xff]  ;;  %1646 = vset.pattern.permute.xlu0 %v1717_v47  ;;  %1647 = vset.pattern.permute.xlu1 %v1717_v47 }
  0x1f   : > { %v299_v44 = vsel %vm244_vm1, %v203_v42, 0.0  ;;  %v206_v45 = vld [vmem:[%s1760_s22 + $0xb8] sm:$0x3]  ;;  %v305_v49 = vsel %vm237_vm2, %v205_v46, 0.0  ;;  %v208_v50 = vld [vmem:[%s1760_s22 + $0xc8] sm:$0xff]  ;;  %v207_v51 = vld [vmem:[%s1760_s22 + $0xc0] sm:$0xff] }
  0x20   : > { %255 = vadd.xlane.f32.xlu1 %v254_v11  ;;  %252 = vadd.xlane.f32.xlu0 %v251_v12  ;;  %v308_v48 = vsel %vm244_vm1, %v206_v45, 0.0  ;;  %v314_v52 = vsel %vm237_vm2, %v208_v50, 0.0  ;;  %v311_v53 = vsel %vm237_vm2, %v207_v51, 0.0  ;;  %v210_v54 = vld [vmem:[%s1760_s22 + $0xd8] sm:$0xff]  ;;  %v209_v55 = vld [vmem:[%s1760_s22 + $0xd0] sm:$0x3] }
  0x21   : > { %v320_v56 = vsel %vm237_vm2, %v210_v54, 0.0  ;;  %v317_v57 = vsel %vm244_vm1, %v209_v55, 0.0  ;;  %v212_v58 = vld [vmem:[%s1760_s22 + $0xe8] sm:$0x3]  ;;  %v211_v59 = vld [vmem:[%s1760_s22 + $0xe0] sm:$0xff]  ;;  %v214_v62 = vld [vmem:[%s1760_s22 + $0xf8] sm:$0xff] }
  0x22   : > { %v326_v60 = vsel %vm244_vm1, %v212_v58, 0.0  ;;  %v323_v61 = vsel %vm237_vm2, %v211_v59, 0.0  ;;  %v213_v63 = vld [vmem:[%s1760_s22 + $0xf0] sm:$0xff]  ;;  %v332_v0 = vsel %vm237_vm2, %v214_v62, 0.0  ;;  %v216_v2 = vld [vmem:[%s1760_s22 + $0x108] sm:$0xff]  ;;  %v219_v11 = vld [vmem:[%s1760_s22 + $0x120] sm:$0xff] }
  0x23   : > { %v329_v1 = vsel %vm237_vm2, %v213_v63, 0.0  ;;  %v215_v3 = vld [vmem:[%s1760_s22 + $0x100] sm:$0x3]  ;;  %v338_v4 = vsel %vm237_vm2, %v216_v2, 0.0  ;;  %v218_v6 = vld [vmem:[%s1760_s22 + $0x118] sm:$0x3] }
  0x24   : > { %261 = vadd.xlane.f32.xlu1 %v260_v15  ;;  %258 = vadd.xlane.f32.xlu0 %v257_v16  ;;  %v335_v5 = vsel %vm244_vm1, %v215_v3, 0.0  ;;  %v217_v7 = vld [vmem:[%s1760_s22 + $0x110] sm:$0xff]  ;;  %v344_v8 = vsel %vm244_vm1, %v218_v6, 0.0  ;;  %v220_v10 = vld [vmem:[%s1760_s22 + $0x128] sm:$0xff]  ;;  %v347_v13 = vsel %vm237_vm2, %v219_v11, 0.0  ;;  %v222_v14 = vld [vmem:[%s1760_s22 + $0x138] sm:$0xff] }
  0x25   : > { %v341_v9 = vsel %vm237_vm2, %v217_v7, 0.0  ;;  %v350_v12 = vsel %vm237_vm2, %v220_v10, 0.0  ;;  %v221_v15 = vld [vmem:[%s1760_s22 + $0x130] sm:$0x3]  ;;  %v356_v16 = vsel %vm237_vm2, %v222_v14, 0.0  ;;  %v226_v22 = vld [vmem:[%s1760_s22 + $0x158] sm:$0xff] }
  0x26   : > { %v353_v17 = vsel %vm244_vm1, %v221_v15, 0.0  ;;  %v224_v18 = vld [vmem:[%s1760_s22 + $0x148] sm:$0x3]  ;;  %v230_v30 = vld [vmem:[%s1760_s22 + $0x178] sm:$0x3]  ;;  %vm545_vm3 = vcmask 1046528  }
  0x27   : > { %v228_v26 = vld [vmem:[%s1760_s22 + $0x168] sm:$0xff]  ;;  %v234_v38 = vld [vmem:[%s1760_s22 + $0x198] sm:$0xff]  ;;  %vm690_vm4 = vcmask 1045504   ;;  %vm1215_vm5 = vcmask 1040384   ;;  %vm1436_vm6 = vcmask 23553   ;;  %vm1507_vm7 = vcmask 22528  }
  0x28   : > { %267 = vadd.xlane.f32.xlu1 %v266_v19  ;;  %264 = vadd.xlane.f32.xlu0 %v263_v20  ;;  %v223_v19 = vld [vmem:[%s1760_s22 + $0x140] sm:$0xff]  ;;  %v362_v20 = vsel %vm244_vm1, %v224_v18, 0.0  ;;  %v232_v34 = vld [vmem:[%s1760_s22 + $0x188] sm:$0xff]  ;;  %s1718_s23 = smov [#allocation2]   ;;  %vm1433_vm8 = vcmask 0   ;;  %p1630_p5 = scmp.eq.s32.totalorder %s1746_s13, 1 }
  0x29   : > { %v359_v21 = vsel %vm237_vm2, %v223_v19, 0.0  ;;  %v236_v42 = vld [vmem:[%s1760_s22 + $0x1a8] sm:$0x3]  ;;  %s1529_s24 = sshll.u32 %s1718_s23, 4  ;;  %s1530_s24 = int_to_ptr.vmem [resolvable:$true] %s1529_s24 }
  0x2a   : > { %s1648_s26 = scalar_lea.vmem %s1530_s24, 16  ;;  %s1654_s27 = scalar_lea.vmem %s1530_s24, 32 }
  0x2b   : > { %p1649_p6 = scmp.ne.s32.totalorder %s1530_s24, %s1648_s26  ;;  %p1655_p9 = scmp.lt.s32.totalorder %s1530_s24, %s1530_s24 }
  0x2c   : > { %273 = vadd.xlane.f32.xlu1 %v272_v23  ;;  %270 = vadd.xlane.f32.xlu0 %v269_v24  ;;  %v225_v23 = vld [vmem:[%s1760_s22 + $0x150] sm:$0xff]  ;;  %v368_v24 = vsel %vm237_vm2, %v226_v22, 0.0  ;;  %p1656_p10 = scmp.lt.s32.totalorder %s1654_s27, %s1648_s26 }
  0x2d   : > { %v365_v25 = vsel %vm237_vm2, %v225_v23, 0.0  ;;  %p1650_p7 = pnand %p1649_p6, %p1630_p5 }
  0x2e   : > { %p1657_p11 = por %p1656_p10, %p1655_p9 }
  0x2f   : > { %p1651_p8 = pneg %p1650_p7 }
  0x30   : > { %279 = vadd.xlane.f32.xlu1 %v278_v27  ;;  %276 = vadd.xlane.f32.xlu0 %v275_v28  ;;  %v227_v27 = vld [vmem:[%s1760_s22 + $0x160] sm:$0x3]  ;;  %v374_v28 = vsel %vm237_vm2, %v228_v26, 0.0 }
  0x31   : > { %v371_v29 = vsel %vm244_vm1, %v227_v27, 0.0  ;;  %p1658_p12 = pnand %p1657_p11, %p1651_p8 }
  0x34   : > { %285 = vadd.xlane.f32.xlu1 %v284_v31  ;;  %282 = vadd.xlane.f32.xlu0 %v281_v32  ;;  %v229_v31 = vld [vmem:[%s1760_s22 + $0x170] sm:$0xff]  ;;  %v380_v32 = vsel %vm244_vm1, %v230_v30, 0.0 }
  0x35   : > { %v377_v33 = vsel %vm237_vm2, %v229_v31, 0.0 }
  0x38   : > { %291 = vadd.xlane.f32.xlu1 %v290_v35  ;;  %288 = vadd.xlane.f32.xlu0 %v287_v36  ;;  %v231_v35 = vld [vmem:[%s1760_s22 + $0x180] sm:$0xff]  ;;  %v386_v36 = vsel %vm237_vm2, %v232_v34, 0.0 }
  0x39   : > { %v383_v37 = vsel %vm237_vm2, %v231_v35, 0.0 }
  0x3c   : > { %297 = vadd.xlane.f32.xlu1 %v296_v39  ;;  %294 = vadd.xlane.f32.xlu0 %v293_v40  ;;  %v233_v39 = vld [vmem:[%s1760_s22 + $0x190] sm:$0x3]  ;;  %v392_v40 = vsel %vm237_vm2, %v234_v38, 0.0 }
  0x3d   : > { %v389_v41 = vsel %vm244_vm1, %v233_v39, 0.0 }
  0x40   : > { %303 = vadd.xlane.f32.xlu1 %v302_v43  ;;  %300 = vadd.xlane.f32.xlu0 %v299_v44  ;;  %v235_v43 = vld [vmem:[%s1760_s22 + $0x1a0] sm:$0xff]  ;;  %v398_v44 = vsel %vm244_vm1, %v236_v42, 0.0 }
  0x41   : > { %v395_v45 = vsel %vm237_vm2, %v235_v43, 0.0 }
  0x44   : > { %309 = vadd.xlane.f32.xlu1 %v308_v48  ;;  %306 = vadd.xlane.f32.xlu0 %v305_v49 }
  0x48   : > { %315 = vadd.xlane.f32.xlu1 %v314_v52  ;;  %312 = vadd.xlane.f32.xlu0 %v311_v53 }
  0x4c   : > { %321 = vadd.xlane.f32.xlu1 %v320_v56  ;;  %318 = vadd.xlane.f32.xlu0 %v317_v57 }
  0x50   : > { %327 = vadd.xlane.f32.xlu1 %v326_v60  ;;  %324 = vadd.xlane.f32.xlu0 %v323_v61 }
  0x54   : > { %333 = vadd.xlane.f32.xlu1 %v332_v0  ;;  %330 = vadd.xlane.f32.xlu0 %v329_v1 }
  0x58   : > { %339 = vadd.xlane.f32.xlu1 %v338_v4  ;;  %336 = vadd.xlane.f32.xlu0 %v335_v5 }
  0x5c   : > { %345 = vadd.xlane.f32.xlu1 %v344_v8  ;;  %342 = vadd.xlane.f32.xlu0 %v341_v9 }
  0x60   : > { %351 = vadd.xlane.f32.xlu1 %v350_v12  ;;  %348 = vadd.xlane.f32.xlu0 %v347_v13 }
  0x64   : > { %357 = vadd.xlane.f32.xlu1 %v356_v16  ;;  %354 = vadd.xlane.f32.xlu0 %v353_v17 }
  0x68   : > { %363 = vadd.xlane.f32.xlu1 %v362_v20  ;;  %360 = vadd.xlane.f32.xlu0 %v359_v21 }
  0x6c   : > { %369 = vadd.xlane.f32.xlu1 %v368_v24  ;;  %366 = vadd.xlane.f32.xlu0 %v365_v25 }
  0x70   : > { %375 = vadd.xlane.f32.xlu1 %v374_v28  ;;  %372 = vadd.xlane.f32.xlu0 %v371_v29 }
  0x74   : > { %381 = vadd.xlane.f32.xlu1 %v380_v32  ;;  %378 = vadd.xlane.f32.xlu0 %v377_v33 }
  0x78   : > { %387 = vadd.xlane.f32.xlu1 %v386_v36  ;;  %384 = vadd.xlane.f32.xlu0 %v383_v37 }
  0x7c   : > { %393 = vadd.xlane.f32.xlu1 %v392_v40  ;;  %390 = vadd.xlane.f32.xlu0 %v389_v41 }
  0x80   : > { %399 = vadd.xlane.f32.xlu1 %v398_v44  ;;  %396 = vadd.xlane.f32.xlu0 %v395_v45 }
  0xa5   : > { %v247_v46 = vpop.xlane.xlu1 %246  ;;  %v240_v47 = vpop.xlane.xlu0 %239 }
  0xa9   : > { %v250_v48 = vpop.xlane.xlu1 %249  ;;  %v243_v49 = vpop.xlane.xlu0 %242 }
  0xaa   : > { %v401_v52 = vadd.f32 %v250_v48, %v240_v47 }
  0xad   : > { %v256_v50 = vpop.xlane.xlu1 %255  ;;  %v253_v51 = vpop.xlane.xlu0 %252 }
  0xae   : > { %v402_v53 = vadd.f32 %v253_v51, %v243_v49  ;;  %v403_v58 = vadd.f32 %v256_v50, %v247_v46 }
  0xb1   : > { %v262_v54 = vpop.xlane.xlu1 %261  ;;  %v259_v55 = vpop.xlane.xlu0 %258 }
  0xb2   : > { %v450_v56 = vadd.f32 %v402_v53, %v262_v54  ;;  %v449_v57 = vadd.f32 %v401_v52, %v259_v55  ;;  %v404_v0 = vadd.f32 %v259_v55, %v250_v48  ;;  %v405_v4 = vadd.f32 %v262_v54, %v253_v51 }
  0xb4   : > { %v547_v59 = vrot.slane %v450_v56, 1  ;;  %v546_v60 = vrot.slane %v449_v57, 1  ;;  %v692_v63 = vrot.slane %v450_v56, 2  ;;  %v691_v1 = vrot.slane %v449_v57, 2 }
  0xb5   : > { %v268_v61 = vpop.xlane.xlu1 %267  ;;  %v265_v62 = vpop.xlane.xlu0 %264 }
  0xb6   : > { %v451_v2 = vadd.f32 %v403_v58, %v265_v62  ;;  %v548_v3 = vsel %vm545_vm3, %v546_v60, %v547_v59  ;;  %v452_v5 = vadd.f32 %v404_v0, %v268_v61  ;;  %v406_v6 = vadd.f32 %v265_v62, %v256_v50 }
  0xb7   : > { %v658_v10 = vadd.f32 %v548_v3, %v449_v57  ;;  %v693_v14 = vsel %vm690_vm4, %v691_v1, %v692_v63  ;;  %v407_v15 = vadd.f32 %v268_v61, %v259_v55 }
  0xb8   : > { %v549_v7 = vrot.slane %v451_v2, 1  ;;  %v694_v11 = vrot.slane %v451_v2, 2  ;;  %v551_v18 = vrot.slane %v452_v5, 1  ;;  %v696_v19 = vrot.slane %v452_v5, 2 }
  0xb9   : > { %v274_v8 = vpop.xlane.xlu1 %273  ;;  %v271_v9 = vpop.xlane.xlu0 %270  ;;  %v803_v16 = vadd.f32 %v693_v14, %v658_v10 }
  0xba   : > { %v454_v12 = vadd.f32 %v406_v6, %v274_v8  ;;  %v453_v13 = vadd.f32 %v405_v4, %v271_v9  ;;  %v550_v17 = vsel %vm545_vm3, %v547_v59, %v549_v7  ;;  %v408_v20 = vadd.f32 %v271_v9, %v262_v54 }
  0xbb   : > { %v835_v26 = vmax.f32 %v803_v16, 0.0  ;;  %v659_v27 = vadd.f32 %v550_v17, %v450_v56  ;;  %v409_v28 = vadd.f32 %v274_v8, %v265_v62  ;;  %v695_v31 = vsel %vm690_vm4, %v692_v63, %v694_v11 }
  0xbc   : > { %v552_v21 = vrot.slane %v453_v13, 1  ;;  %v554_v22 = vrot.slane %v454_v12, 1  ;;  %v697_v23 = vrot.slane %v453_v13, 2  ;;  %v699_v32 = vrot.slane %v454_v12, 2 }
  0xbd   : > { %v280_v24 = vpop.xlane.xlu1 %279  ;;  %v277_v25 = vpop.xlane.xlu0 %276  ;;  %v867_v33 = vmin.f32 %v835_v26, 1.0  ;;  %v804_v34 = vadd.f32 %v695_v31, %v659_v27 }
  0xbe   : > { %v456_v29 = vadd.f32 %v408_v20, %v280_v24  ;;  %v455_v30 = vadd.f32 %v407_v15, %v277_v25  ;;  %v553_v35 = vsel %vm545_vm3, %v551_v18, %v552_v21  ;;  %v411_v36 = vadd.f32 %v280_v24, %v271_v9 }
  0xbf   : > { %v410_v38 = vadd.f32 %v277_v25, %v268_v61  ;;  %933 = vperm.xlu0 %1646, %v867_v33   ;;  %v836_v42 = vmax.f32 %v804_v34, 0.0  ;;  %v660_v43 = vadd.f32 %v553_v35, %v452_v5  ;;  %v698_v44 = vsel %vm690_vm4, %v696_v19, %v697_v23 }
  0xc0   : > { %v557_v37 = vrot.slane %v456_v29, 1  ;;  %v556_v39 = vrot.slane %v455_v30, 1  ;;  %v555_v45 = vsel %vm545_vm3, %v552_v21, %v554_v22  ;;  %v702_v46 = vrot.slane %v456_v29, 2 }
  0xc1   : > { %v286_v40 = vpop.xlane.xlu1 %285  ;;  %v283_v41 = vpop.xlane.xlu0 %282  ;;  %v701_v47 = vrot.slane %v455_v30, 2  ;;  %v868_v50 = vmin.f32 %v836_v42, 1.0  ;;  %v805_v51 = vadd.f32 %v698_v44, %v660_v43  ;;  %v661_v52 = vadd.f32 %v555_v45, %v453_v13 }
  0xc2   : > { %v458_v48 = vadd.f32 %v410_v38, %v286_v40  ;;  %v457_v49 = vadd.f32 %v409_v28, %v283_v41  ;;  %v558_v53 = vsel %vm545_vm3, %v556_v39, %v557_v37  ;;  %v413_v54 = vadd.f32 %v286_v40, %v277_v25 }
  0xc3   : > { %v412_v55 = vadd.f32 %v283_v41, %v274_v8  ;;  %v700_v57 = vsel %vm690_vm4, %v697_v23, %v699_v32  ;;  %938 = vperm.xlu1 %1647, %v868_v50   ;;  %v837_v61 = vmax.f32 %v805_v51, 0.0  ;;  %v662_v63 = vadd.f32 %v558_v53, %v455_v30 }
  0xc4   : > { %v559_v56 = vrot.slane %v457_v49, 1  ;;  %v561_v58 = vrot.slane %v458_v48, 1  ;;  %v806_v62 = vadd.f32 %v700_v57, %v661_v52  ;;  %v704_v0 = vrot.slane %v457_v49, 2 }
  0xc5   : > { %v292_v59 = vpop.xlane.xlu1 %291  ;;  %v289_v60 = vpop.xlane.xlu0 %288  ;;  %v703_v3 = vsel %vm690_vm4, %v701_v47, %v702_v46  ;;  %v869_v4 = vmin.f32 %v837_v61, 1.0  ;;  %v706_v8 = vrot.slane %v458_v48, 2 }
  0xc6   : > { %v460_v1 = vadd.f32 %v412_v55, %v292_v59  ;;  %v459_v2 = vadd.f32 %v411_v36, %v289_v60  ;;  %v838_v5 = vmax.f32 %v806_v62, 0.0  ;;  %v807_v6 = vadd.f32 %v703_v3, %v662_v63 }
  0xc7   : > { %v560_v7 = vsel %vm545_vm3, %v557_v37, %v559_v56  ;;  %v415_v9 = vadd.f32 %v292_v59, %v283_v41  ;;  %v414_v10 = vadd.f32 %v289_v60, %v280_v24  ;;  %943 = vperm.xlu1 %1647, %v869_v4   ;;  %v705_v21 = vsel %vm690_vm4, %v702_v46, %v704_v0 }
  0xc8   : > { %v562_v11 = vrot.slane %v459_v2, 1  ;;  %v564_v12 = vrot.slane %v460_v1, 1  ;;  %v707_v13 = vrot.slane %v459_v2, 2  ;;  %v839_v16 = vmax.f32 %v807_v6, 0.0 }
  0xc9   : > { %v298_v14 = vpop.xlane.xlu1 %297  ;;  %v295_v15 = vpop.xlane.xlu0 %294  ;;  %v663_v17 = vadd.f32 %v560_v7, %v456_v29  ;;  %v709_v18 = vrot.slane %v460_v1, 2  ;;  %v870_v23 = vmin.f32 %v838_v5, 1.0 }
  0xca   : > { %v462_v19 = vadd.f32 %v414_v10, %v298_v14  ;;  %v461_v20 = vadd.f32 %v413_v54, %v295_v15  ;;  %v417_v22 = vadd.f32 %v298_v14, %v289_v60  ;;  %v563_v26 = vsel %vm545_vm3, %v561_v58, %v562_v11 }
  0xcb   : > { %v808_v25 = vadd.f32 %v705_v21, %v663_v17  ;;  %v416_v24 = vadd.f32 %v295_v15, %v286_v40  ;;  %v871_v30 = vmin.f32 %v839_v16, 1.0  ;;  %948 = vperm.xlu1 %1647, %v870_v23   ;;  %v664_v34 = vadd.f32 %v563_v26, %v458_v48 }
  0xcc   : > { %v567_v27 = vrot.slane %v462_v19, 1  ;;  %v566_v28 = vrot.slane %v461_v20, 1  ;;  %v708_v29 = vsel %vm690_vm4, %v706_v8, %v707_v13  ;;  %v565_v35 = vsel %vm545_vm3, %v562_v11, %v564_v12 }
  0xcd   : > { %v304_v31 = vpop.xlane.xlu1 %303  ;;  %v301_v32 = vpop.xlane.xlu0 %300  ;;  %v840_v33 = vmax.f32 %v808_v25, 0.0  ;;  %v712_v36 = vrot.slane %v462_v19, 2  ;;  %v711_v37 = vrot.slane %v461_v20, 2  ;;  %v809_v41 = vadd.f32 %v708_v29, %v664_v34 }
  0xce   : > { %v1886_v38 = vadd.f32 %v416_v24, %v304_v31  ;;  %v463_v39 = vadd.f32 %v415_v9, %v301_v32  ;;  %v665_v42 = vadd.f32 %v565_v35, %v459_v2  ;;  %v710_v40 = vsel %vm690_vm4, %v707_v13, %v709_v18 }
  0xcf   : > { %v568_v43 = vsel %vm545_vm3, %v566_v28, %v567_v27  ;;  %v419_v44 = vadd.f32 %v304_v31, %v295_v15  ;;  %v418_v45 = vadd.f32 %v301_v32, %v292_v59  ;;  %v872_v47 = vmin.f32 %v840_v33, 1.0  ;;  %953 = vperm.xlu1 %1647, %v871_v30  }
  0xd0   : > { %v569_v46 = vrot.slane %v463_v39, 1  ;;  %v571_v48 = vrot.slane %v1886_v38, 1  ;;  %v841_v51 = vmax.f32 %v809_v41, 0.0  ;;  %v810_v52 = vadd.f32 %v710_v40, %v665_v42 }
  0xd1   : > { %v310_v49 = vpop.xlane.xlu1 %309  ;;  %v307_v50 = vpop.xlane.xlu0 %306  ;;  %v666_v53 = vadd.f32 %v568_v43, %v461_v20  ;;  %v716_v54 = vrot.slane %v1886_v38, 2  ;;  %v714_v55 = vrot.slane %v463_v39, 2  ;;  %v713_v59 = vsel %vm690_vm4, %v711_v37, %v712_v36 }
  0xd2   : > { %v466_v56 = vadd.f32 %v418_v45, %v310_v49  ;;  %v465_v57 = vadd.f32 %v417_v22, %v307_v50  ;;  %v420_v58 = vadd.f32 %v307_v50, %v298_v14  ;;  %v842_v60 = vmax.f32 %v810_v52, 0.0 }
  0xd3   : > { %v570_v61 = vsel %vm545_vm3, %v567_v27, %v569_v46  ;;  %v421_v2 = vadd.f32 %v310_v49, %v301_v32  ;;  %958 = vperm.xlu1 %1647, %v872_v47   ;;  %v873_v5 = vmin.f32 %v841_v51, 1.0  ;;  %v811_v7 = vadd.f32 %v713_v59, %v666_v53 }
  0xd4   : > { %v574_v62 = vrot.slane %v466_v56, 1  ;;  %v719_v63 = vrot.slane %v466_v56, 2  ;;  %v572_v0 = vrot.slane %v465_v57, 1  ;;  %v717_v1 = vrot.slane %v465_v57, 2 }
  0xd5   : > { %v316_v3 = vpop.xlane.xlu1 %315  ;;  %v313_v4 = vpop.xlane.xlu0 %312  ;;  %v667_v6 = vadd.f32 %v570_v61, %v462_v19  ;;  %v874_v10 = vmin.f32 %v842_v60, 1.0  ;;  %v715_v11 = vsel %vm690_vm4, %v712_v36, %v714_v55  ;;  %v843_v14 = vmax.f32 %v811_v7, 0.0 }
  0xd6   : > { %v1894_v8 = vadd.f32 %v420_v58, %v316_v3  ;;  %v467_v9 = vadd.f32 %v419_v44, %v313_v4  ;;  %v423_v12 = vadd.f32 %v316_v3, %v307_v50  ;;  %v575_v15 = vsel %vm545_vm3, %v572_v0, %v574_v62 }
  0xd7   : > { %v812_v13 = vadd.f32 %v715_v11, %v667_v6  ;;  %v422_v18 = vadd.f32 %v313_v4, %v304_v31  ;;  %v720_v20 = vsel %vm690_vm4, %v717_v1, %v719_v63  ;;  %963 = vperm.xlu1 %1647, %v873_v5   ;;  %v669_v25 = vadd.f32 %v575_v15, %v465_v57 }
  0xd8   : > { %v577_v16 = vrot.slane %v1894_v8, 1  ;;  %v722_v17 = vrot.slane %v1894_v8, 2  ;;  %v576_v19 = vrot.slane %v467_v9, 1  ;;  %v573_v26 = vsel %vm545_vm3, %v571_v48, %v572_v0 }
  0xd9   : > { %v322_v21 = vpop.xlane.xlu1 %321  ;;  %v319_v22 = vpop.xlane.xlu0 %318  ;;  %v844_v23 = vmax.f32 %v812_v13, 0.0  ;;  %v721_v27 = vrot.slane %v467_v9, 2  ;;  %v875_v30 = vmin.f32 %v843_v14, 1.0  ;;  %v814_v34 = vadd.f32 %v720_v20, %v669_v25 }
  0xda   : > { %v1902_v24 = vadd.f32 %v422_v18, %v322_v21  ;;  %v469_v28 = vadd.f32 %v421_v2, %v319_v22  ;;  %v425_v32 = vadd.f32 %v322_v21, %v313_v4  ;;  %v668_v31 = vadd.f32 %v573_v26, %v1886_v38 }
  0xdb   : > { %v876_v33 = vmin.f32 %v844_v23, 1.0  ;;  %v424_v35 = vadd.f32 %v319_v22, %v310_v49  ;;  %v718_v37 = vsel %vm690_vm4, %v716_v54, %v717_v1  ;;  %968 = vperm.xlu1 %1647, %v874_v10   ;;  %v846_v40 = vmax.f32 %v814_v34, 0.0 }
  0xdc   : > { %v581_v29 = vrot.slane %v1902_v24, 1  ;;  %v579_v36 = vrot.slane %v469_v28, 1  ;;  %v724_v39 = vrot.slane %v469_v28, 2  ;;  %v813_v43 = vadd.f32 %v718_v37, %v668_v31 }
  0xdd   : > { %978 = vperm.xlu0 %1646, %v876_v33   ;;  %v328_v41 = vpop.xlane.xlu1 %327  ;;  %v325_v42 = vpop.xlane.xlu0 %324  ;;  %v578_v44 = vsel %vm545_vm3, %v576_v19, %v577_v16  ;;  %v723_v38 = vsel %vm690_vm4, %v721_v27, %v722_v17  ;;  %v878_v48 = vmin.f32 %v846_v40, 1.0  ;;  %v726_v56 = vrot.slane %v1902_v24, 2 }
  0xde   : > { %v472_v45 = vadd.f32 %v424_v35, %v328_v41  ;;  %v426_v46 = vadd.f32 %v325_v42, %v316_v3  ;;  %v471_v47 = vadd.f32 %v423_v12, %v325_v42  ;;  %v845_v50 = vmax.f32 %v813_v43, 0.0 }
  0xdf   : > { %v670_v49 = vadd.f32 %v578_v44, %v467_v9  ;;  %v580_v51 = vsel %vm545_vm3, %v577_v16, %v579_v36  ;;  %v427_v57 = vadd.f32 %v328_v41, %v319_v22  ;;  %973 = vperm.xlu1 %1647, %v875_v30   ;;  %v725_v1 = vsel %vm690_vm4, %v722_v17, %v724_v39 }
  0xe0   : > { %v584_v52 = vrot.slane %v472_v45, 1  ;;  %v729_v53 = vrot.slane %v472_v45, 2  ;;  %v582_v54 = vrot.slane %v471_v47, 1  ;;  %v727_v55 = vrot.slane %v471_v47, 2 }
  0xe1   : > { %988 = vperm.xlu0 %1646, %v878_v48   ;;  %v334_v58 = vpop.xlane.xlu1 %333  ;;  %v331_v60 = vpop.xlane.xlu0 %330  ;;  %v815_v61 = vadd.f32 %v723_v38, %v670_v49  ;;  %v671_v59 = vadd.f32 %v580_v51, %v1894_v8  ;;  %v877_v0 = vmin.f32 %v845_v50, 1.0 }
  0xe2   : > { %v1912_v62 = vadd.f32 %v426_v46, %v334_v58  ;;  %v473_v63 = vadd.f32 %v425_v32, %v331_v60  ;;  %v429_v2 = vadd.f32 %v334_v58, %v325_v42  ;;  %v585_v5 = vsel %vm545_vm3, %v582_v54, %v584_v52 }
  0xe3   : > { %v847_v3 = vmax.f32 %v815_v61, 0.0  ;;  %v816_v4 = vadd.f32 %v725_v1, %v671_v59  ;;  %v428_v9 = vadd.f32 %v331_v60, %v322_v21  ;;  %v730_v10 = vsel %vm690_vm4, %v727_v55, %v729_v53  ;;  %983 = vperm.xlu1 %1647, %v877_v0  }
  0xe4   : > { %v587_v6 = vrot.slane %v1912_v62, 1  ;;  %v732_v7 = vrot.slane %v1912_v62, 2  ;;  %v586_v11 = vrot.slane %v473_v63, 1  ;;  %v673_v14 = vadd.f32 %v585_v5, %v471_v47 }
  0xe5   : > { %v340_v8 = vpop.xlane.xlu1 %339  ;;  %v337_v12 = vpop.xlane.xlu0 %336  ;;  %v848_v13 = vmax.f32 %v816_v4, 0.0  ;;  %v583_v15 = vsel %vm545_vm3, %v581_v29, %v582_v54  ;;  %v731_v16 = vrot.slane %v473_v63, 2  ;;  %v879_v20 = vmin.f32 %v847_v3, 1.0 }
  0xe6   : > { %v1920_v17 = vadd.f32 %v428_v9, %v340_v8  ;;  %v475_v18 = vadd.f32 %v427_v57, %v337_v12  ;;  %v431_v19 = vadd.f32 %v340_v8, %v331_v60  ;;  %v818_v23 = vadd.f32 %v730_v10, %v673_v14 }
  0xe7   : > { %v880_v22 = vmin.f32 %v848_v13, 1.0  ;;  %v672_v21 = vadd.f32 %v583_v15, %v1902_v24  ;;  %v430_v26 = vadd.f32 %v337_v12, %v328_v41  ;;  %v728_v28 = vsel %vm690_vm4, %v726_v56, %v727_v55  ;;  %993 = vperm.xlu1 %1647, %v879_v20  }
  0xe8   : > { %v591_v25 = vrot.slane %v1920_v17, 1  ;;  %v589_v27 = vrot.slane %v475_v18, 1  ;;  %v734_v30 = vrot.slane %v475_v18, 2  ;;  %v850_v34 = vmax.f32 %v818_v23, 0.0 }
  0xe9   : > { %998 = vperm.xlu0 %1646, %v880_v22   ;;  %v346_v32 = vpop.xlane.xlu1 %345  ;;  %v343_v33 = vpop.xlane.xlu0 %342  ;;  %v817_v31 = vadd.f32 %v728_v28, %v672_v21  ;;  %v588_v29 = vsel %vm545_vm3, %v586_v11, %v587_v6  ;;  %v733_v24 = vsel %vm690_vm4, %v731_v16, %v732_v7  ;;  %v736_v47 = vrot.slane %v1920_v17, 2 }
  0xea   : > { %v478_v35 = vadd.f32 %v430_v26, %v346_v32  ;;  %v432_v36 = vadd.f32 %v343_v33, %v334_v58  ;;  %v477_v37 = vadd.f32 %v429_v2, %v343_v33  ;;  %v882_v39 = vmin.f32 %v850_v34, 1.0 }
  0xeb   : > { %v849_v42 = vmax.f32 %v817_v31, 0.0  ;;  %v674_v41 = vadd.f32 %v588_v29, %v473_v63  ;;  %v590_v40 = vsel %vm545_vm3, %v587_v6, %v589_v27  ;;  %v433_v52 = vadd.f32 %v346_v32, %v337_v12 }
  0xec   : > { %v594_v43 = vrot.slane %v478_v35, 1  ;;  %v739_v44 = vrot.slane %v478_v35, 2  ;;  %v592_v45 = vrot.slane %v477_v37, 1  ;;  %v737_v46 = vrot.slane %v477_v37, 2 }
  0xed   : > { %1008 = vperm.xlu0 %1646, %v882_v39   ;;  %v881_v38 = vmin.f32 %v849_v42, 1.0  ;;  %v352_v48 = vpop.xlane.xlu1 %351  ;;  %v349_v50 = vpop.xlane.xlu0 %348  ;;  %v819_v49 = vadd.f32 %v733_v24, %v674_v41  ;;  %v675_v51 = vadd.f32 %v590_v40, %v1912_v62  ;;  %v735_v55 = vsel %vm690_vm4, %v732_v7, %v734_v30 }
  0xee   : > { %v480_v53 = vadd.f32 %v432_v36, %v352_v48  ;;  %v479_v54 = vadd.f32 %v431_v19, %v349_v50  ;;  %v435_v56 = vadd.f32 %v352_v48, %v343_v33  ;;  %v595_v60 = vsel %vm545_vm3, %v592_v45, %v594_v43 }
  0xef   : > { %1003 = vperm.xlu1 %1647, %v881_v38   ;;  %v851_v57 = vmax.f32 %v819_v49, 0.0  ;;  %v820_v58 = vadd.f32 %v735_v55, %v675_v51  ;;  %v434_v59 = vadd.f32 %v349_v50, %v340_v8  ;;  %v740_v0 = vsel %vm690_vm4, %v737_v46, %v739_v44 }
  0xf0   : > { %v597_v61 = vrot.slane %v480_v53, 1  ;;  %v596_v63 = vrot.slane %v479_v54, 1  ;;  %v677_v4 = vadd.f32 %v595_v60, %v477_v37  ;;  %v593_v5 = vsel %vm545_vm3, %v591_v25, %v592_v45 }
  0xf1   : > { %v883_v1 = vmin.f32 %v851_v57, 1.0  ;;  %v358_v2 = vpop.xlane.xlu1 %357  ;;  %v355_v3 = vpop.xlane.xlu0 %354  ;;  %v852_v62 = vmax.f32 %v820_v58, 0.0  ;;  %v742_v6 = vrot.slane %v480_v53, 2  ;;  %v741_v7 = vrot.slane %v479_v54, 2 }
  0xf2   : > { %v1934_v9 = vadd.f32 %v434_v59, %v358_v2  ;;  %v481_v10 = vadd.f32 %v433_v52, %v355_v3  ;;  %v437_v11 = vadd.f32 %v358_v2, %v349_v50  ;;  %v822_v13 = vadd.f32 %v740_v0, %v677_v4 }
  0xf3   : > { %1013 = vperm.xlu1 %1647, %v883_v1   ;;  %v884_v12 = vmin.f32 %v852_v62, 1.0  ;;  %v676_v8 = vadd.f32 %v593_v5, %v1920_v17  ;;  %v436_v15 = vadd.f32 %v355_v3, %v346_v32  ;;  %v738_v18 = vsel %vm690_vm4, %v736_v47, %v737_v46 }
  0xf4   : > { %v601_v14 = vrot.slane %v1934_v9, 1  ;;  %v599_v16 = vrot.slane %v481_v10, 1  ;;  %v744_v20 = vrot.slane %v481_v10, 2  ;;  %v854_v23 = vmax.f32 %v822_v13, 0.0 }
  0xf5   : > { %1018 = vperm.xlu0 %1646, %v884_v12   ;;  %v364_v19 = vpop.xlane.xlu1 %363  ;;  %v361_v22 = vpop.xlane.xlu0 %360  ;;  %v821_v21 = vadd.f32 %v738_v18, %v676_v8  ;;  %v598_v25 = vsel %vm545_vm3, %v596_v63, %v597_v61  ;;  %v743_v30 = vsel %vm690_vm4, %v741_v7, %v742_v6  ;;  %v746_v37 = vrot.slane %v1934_v9, 2 }
  0xf6   : > { %v484_v26 = vadd.f32 %v436_v15, %v364_v19  ;;  %v438_v27 = vadd.f32 %v361_v22, %v352_v48  ;;  %v483_v28 = vadd.f32 %v435_v56, %v361_v22  ;;  %v886_v17 = vmin.f32 %v854_v23, 1.0 }
  0xf7   : > { %v853_v33 = vmax.f32 %v821_v21, 0.0  ;;  %v678_v34 = vadd.f32 %v598_v25, %v479_v54  ;;  %v600_v32 = vsel %vm545_vm3, %v597_v61, %v599_v16  ;;  %v439_v43 = vadd.f32 %v364_v19, %v355_v3 }
  0xf8   : > { %v604_v31 = vrot.slane %v484_v26, 1  ;;  %v749_v29 = vrot.slane %v484_v26, 2  ;;  %v602_v35 = vrot.slane %v483_v28, 1  ;;  %v747_v36 = vrot.slane %v483_v28, 2 }
  0xf9   : > { %1028 = vperm.xlu0 %1646, %v886_v17   ;;  %v885_v24 = vmin.f32 %v853_v33, 1.0  ;;  %v370_v39 = vpop.xlane.xlu1 %369  ;;  %v367_v42 = vpop.xlane.xlu0 %366  ;;  %v823_v41 = vadd.f32 %v743_v30, %v678_v34  ;;  %v679_v40 = vadd.f32 %v600_v32, %v480_v53  ;;  %v745_v46 = vsel %vm690_vm4, %v742_v6, %v744_v20 }
  0xfa   : > { %v486_v44 = vadd.f32 %v438_v27, %v370_v39  ;;  %v485_v45 = vadd.f32 %v437_v11, %v367_v42  ;;  %v441_v47 = vadd.f32 %v370_v39, %v361_v22  ;;  %v605_v50 = vsel %vm545_vm3, %v602_v35, %v604_v31 }
  0xfb   : > { %1023 = vperm.xlu1 %1647, %v885_v24   ;;  %v855_v38 = vmax.f32 %v823_v41, 0.0  ;;  %v824_v48 = vadd.f32 %v745_v46, %v679_v40  ;;  %v440_v51 = vadd.f32 %v367_v42, %v358_v2  ;;  %v750_v54 = vsel %vm690_vm4, %v747_v36, %v749_v29 }
  0xfc   : > { %v607_v49 = vrot.slane %v486_v44, 1  ;;  %v606_v52 = vrot.slane %v485_v45, 1  ;;  %v681_v58 = vadd.f32 %v605_v50, %v483_v28  ;;  %v603_v60 = vsel %vm545_vm3, %v601_v14, %v602_v35 }
  0xfd   : > { %v887_v55 = vmin.f32 %v855_v38, 1.0  ;;  %v376_v56 = vpop.xlane.xlu1 %375  ;;  %v373_v57 = vpop.xlane.xlu0 %372  ;;  %v856_v53 = vmax.f32 %v824_v48, 0.0  ;;  %v752_v61 = vrot.slane %v486_v44, 2  ;;  %v751_v59 = vrot.slane %v485_v45, 2 }
  0xfe   : > { %v1947_v63 = vadd.f32 %v440_v51, %v376_v56  ;;  %v487_v0 = vadd.f32 %v439_v43, %v373_v57  ;;  %v443_v1 = vadd.f32 %v376_v56, %v367_v42  ;;  %v826_v62 = vadd.f32 %v750_v54, %v681_v58 }
  0xff   : > { %1033 = vperm.xlu1 %1647, %v887_v55   ;;  %v888_v3 = vmin.f32 %v856_v53, 1.0  ;;  %v680_v2 = vadd.f32 %v603_v60, %v1934_v9  ;;  %v442_v5 = vadd.f32 %v373_v57, %v364_v19  ;;  %v748_v7 = vsel %vm690_vm4, %v746_v37, %v747_v36 }
 0x100   : > { %v611_v4 = vrot.slane %v1947_v63, 1  ;;  %v609_v6 = vrot.slane %v487_v0, 1  ;;  %v756_v10 = vrot.slane %v1947_v63, 2  ;;  %v858_v13 = vmax.f32 %v826_v62, 0.0 }
 0x101   : > { %1038 = vperm.xlu0 %1646, %v888_v3   ;;  %v382_v11 = vpop.xlane.xlu1 %381  ;;  %v379_v12 = vpop.xlane.xlu0 %378  ;;  %v825_v8 = vadd.f32 %v748_v7, %v680_v2  ;;  %v608_v14 = vsel %vm545_vm3, %v606_v52, %v607_v49  ;;  %v754_v15 = vrot.slane %v487_v0, 2  ;;  %v753_v9 = vsel %vm690_vm4, %v751_v59, %v752_v61 }
 0x102   : > { %v490_v16 = vadd.f32 %v442_v5, %v382_v11  ;;  %v489_v18 = vadd.f32 %v441_v47, %v379_v12  ;;  %v890_v20 = vmin.f32 %v858_v13, 1.0  ;;  %v682_v19 = vadd.f32 %v608_v14, %v485_v45 }
 0x103   : > { %v857_v22 = vmax.f32 %v825_v8, 0.0  ;;  %v610_v23 = vsel %vm545_vm3, %v607_v49, %v609_v6  ;;  %v445_v21 = vadd.f32 %v382_v11, %v373_v57  ;;  %v444_v26 = vadd.f32 %v379_v12, %v370_v39 }
 0x104   : > { %v614_v25 = vrot.slane %v490_v16, 1  ;;  %v612_v27 = vrot.slane %v489_v18, 1  ;;  %v759_v28 = vrot.slane %v490_v16, 2  ;;  %v827_v34 = vadd.f32 %v753_v9, %v682_v19 }
 0x105   : > { %1048 = vperm.xlu0 %1646, %v890_v20   ;;  %v889_v30 = vmin.f32 %v857_v22, 1.0  ;;  %v388_v17 = vpop.xlane.xlu1 %387  ;;  %v385_v33 = vpop.xlane.xlu0 %384  ;;  %v683_v32 = vadd.f32 %v610_v23, %v486_v44  ;;  %v757_v31 = vrot.slane %v489_v18, 2  ;;  %v755_v36 = vsel %vm690_vm4, %v752_v61, %v754_v15 }
 0x106   : > { %v492_v29 = vadd.f32 %v444_v26, %v388_v17  ;;  %v491_v35 = vadd.f32 %v443_v1, %v385_v33  ;;  %v446_v37 = vadd.f32 %v385_v33, %v376_v56  ;;  %v859_v24 = vmax.f32 %v827_v34, 0.0 }
 0x107   : > { %1043 = vperm.xlu1 %1647, %v889_v30   ;;  %v828_v42 = vadd.f32 %v755_v36, %v683_v32  ;;  %v615_v41 = vsel %vm545_vm3, %v612_v27, %v614_v25  ;;  %v613_v50 = vsel %vm545_vm3, %v611_v4, %v612_v27  ;;  %v760_v54 = vsel %vm690_vm4, %v757_v31, %v759_v28 }
 0x108   : > { %v617_v39 = vrot.slane %v492_v29, 1  ;;  %v762_v40 = vrot.slane %v492_v29, 2  ;;  %v616_v43 = vrot.slane %v491_v35, 1  ;;  %v761_v45 = vrot.slane %v491_v35, 2 }
 0x109   : > { %v891_v46 = vmin.f32 %v859_v24, 1.0  ;;  %v394_v47 = vpop.xlane.xlu1 %393  ;;  %v391_v38 = vpop.xlane.xlu0 %390  ;;  %v860_v48 = vmax.f32 %v828_v42, 0.0  ;;  %v685_v44 = vadd.f32 %v615_v41, %v489_v18  ;;  %v684_v53 = vadd.f32 %v613_v50, %v1947_v63  ;;  %v899_v42 = vld [vmem:[%s1755_s19] sm:$0xff] }
 0x10a   : > { %v618_v49 = vsel %vm545_vm3, %v616_v43, %v617_v39  ;;  %v494_v51 = vadd.f32 %v446_v37, %v394_v47  ;;  %v493_v52 = vadd.f32 %v445_v21, %v391_v38  ;;  %v447_v58 = vadd.f32 %v388_v17, %v379_v12  ;;  %v902_v43 = vld [vmem:[%s1755_s19 + $0x18] sm:$0xff] }
 0x10b   : > { %v686_v55 = vadd.f32 %v618_v49, %v491_v35  ;;  %1053 = vperm.xlu1 %1647, %v891_v46   ;;  %v892_v56 = vmin.f32 %v860_v48, 1.0  ;;  %v830_v57 = vadd.f32 %v760_v54, %v685_v44  ;;  %v448_v60 = vadd.f32 %v391_v38, %v382_v11  ;;  %v903_v44 = vld [vmem:[%s1755_s19 + $0x20] sm:$0xff]  ;;  %v904_v54 = vld [vmem:[%s1755_s19 + $0x28] sm:$0xff] }
 0x10c   : > { %v619_v61 = vrot.slane %v493_v52, 1  ;;  %v764_v59 = vrot.slane %v493_v52, 2  ;;  %v758_v62 = vsel %vm690_vm4, %v756_v10, %v757_v31  ;;  %v763_v2 = vsel %vm690_vm4, %v761_v45, %v762_v40 }
 0x10d   : > { %1058 = vperm.xlu0 %1646, %v892_v56   ;;  %v400_v0 = vpop.xlane.xlu1 %399  ;;  %v397_v1 = vpop.xlane.xlu0 %396  ;;  %v862_v3 = vmax.f32 %v830_v57, 0.0  ;;  %v829_v6 = vadd.f32 %v758_v62, %v684_v53  ;;  %v831_v7 = vadd.f32 %v763_v2, %v686_v55  ;;  %v621_v13 = vrot.slane %v494_v51, 1 }
 0x10e   : > { %v496_v4 = vadd.f32 %v448_v60, %v400_v0  ;;  %v495_v5 = vadd.f32 %v447_v58, %v397_v1  ;;  %v620_v11 = vsel %vm545_vm3, %v617_v39, %v619_v61  ;;  %v765_v20 = vsel %vm690_vm4, %v762_v40, %v764_v59  ;;  %v900_v39 = vld [vmem:[%s1755_s19 + $0x8] sm:$0xff]  ;;  %v901_v40 = vld [vmem:[%s1755_s19 + $0x10] sm:$0xff] }
 0x10f   : > { %v894_v8 = vmin.f32 %v862_v3, 1.0  ;;  %v861_v18 = vmax.f32 %v829_v6, 0.0  ;;  %v863_v9 = vmax.f32 %v831_v7, 0.0  ;;  %v687_v63 = vadd.f32 %v620_v11, %v492_v29  ;;  %v905_v59 = vld [vmem:[%s1755_s19 + $0x30] sm:$0xff]  ;;  %v906_v11 = vld [vmem:[%s1755_s19 + $0x38] sm:$0xff] }
 0x110   : > { %v624_v12 = vrot.slane %v496_v4, 1  ;;  %v769_v14 = vrot.slane %v496_v4, 2  ;;  %v622_v15 = vrot.slane %v495_v5, 1  ;;  %v767_v16 = vrot.slane %v495_v5, 2 }
 0x111   : > { %1068 = vperm.xlu0 %1646, %v894_v8   ;;  %v766_v19 = vrot.slane %v494_v51, 2  ;;  %v893_v21 = vmin.f32 %v861_v18, 1.0  ;;  %v832_v25 = vadd.f32 %v765_v20, %v687_v63  ;;  %v895_v28 = vmin.f32 %v863_v9, 1.0 }
 0x112   : > { %v625_v10 = vsel %vm545_vm3, %v622_v15, %v624_v12  ;;  %v623_v22 = vsel %vm545_vm3, %v621_v13, %v622_v15  ;;  %v770_v26 = vsel %vm690_vm4, %v767_v16, %v769_v14 }
 0x113   : > { %v689_v23 = vadd.f32 %v625_v10, %v495_v5  ;;  %v688_v27 = vadd.f32 %v623_v22, %v494_v51  ;;  %1063 = vperm.xlu1 %1647, %v893_v21   ;;  %v864_v30 = vmax.f32 %v832_v25, 0.0  ;;  %v768_v33 = vsel %vm690_vm4, %v766_v19, %v767_v16  ;;  %v908_v22 = vld [vmem:[%s1755_s19 + $0x48] sm:$0xff] }
 0x115   : > { %v834_v17 = vadd.f32 %v770_v26, %v689_v23  ;;  %v833_v34 = vadd.f32 %v768_v33, %v688_v27  ;;  %v896_v32 = vmin.f32 %v864_v30, 1.0  ;;  %v907_v23 = vld [vmem:[%s1755_s19 + $0x40] sm:$0xff] }
 0x117   : > { %v866_v31 = vmax.f32 %v834_v17, 0.0  ;;  %v865_v29 = vmax.f32 %v833_v34, 0.0  ;;  %1073 = vperm.xlu1 %1647, %v895_v28   ;;  %1078 = vperm.xlu0 %1646, %v896_v32  }
 0x119   : > { %v898_v35 = vmin.f32 %v866_v31, 1.0  ;;  %v897_v36 = vmin.f32 %v865_v29, 1.0 }
 0x11b   : > { %1088 = vperm.xlu0 %1646, %v898_v35   ;;  %1083 = vperm.xlu1 %1647, %v897_v36  }
 0x13e   : > { %v934_v41 = vpop.permute.xlu0 %933 }
 0x13f   : > { %v1091_v46 = vmul.f32 %v934_v41, %v899_v42 }
 0x141   : > { %v1216_v49 = vrot.slane %v1091_v46, 7 }
 0x142   : > { %v939_v37 = vpop.permute.xlu1 %938 }
 0x143   : > { %v1092_v47 = vmul.f32 %v939_v37, %v900_v39  ;;  %v1296_v53 = vsub.f32 %v1091_v46, %v1216_v49 }
 0x145   : > { %v1217_v51 = vrot.slane %v1092_v47, 7  ;;  %v1328_v2 = vand.u32 2147483647, %v1296_v53 }
 0x146   : > { %v944_v24 = vpop.permute.xlu1 %943 }
 0x147   : > { %v1093_v38 = vmul.f32 %v944_v24, %v901_v40  ;;  %v1218_v60 = vsel %vm1215_vm5, %v1216_v49, %v1217_v51  ;;  %v1437_v21 = vsel %vm1436_vm6, %v1328_v2, 0.0  ;;  %v911_v2 = vld [vmem:[%s1755_s19 + $0x60] sm:$0xff] }
 0x148   : > { %v1297_v4 = vsub.f32 %v1092_v47, %v1218_v60 }
 0x149   : > { %v1219_v52 = vrot.slane %v1093_v38, 7  ;;  %v1123_v6 = vsub.f32 %v1093_v38, %v1091_v46 }
 0x14a   : > { %v949_v45 = vpop.permute.xlu1 %948  ;;  %v1329_v63 = vand.u32 2147483647, %v1297_v4 }
 0x14b   : > { %v1094_v48 = vmul.f32 %v949_v45, %v902_v43  ;;  %v1298_v61 = vsub.f32 %v1093_v38, %v1219_v52  ;;  %v1153_v25 = vand.u32 2147483647, %v1123_v6 }
 0x14c   : > { %v1468_v42 = vsel %vm237_vm2, %v1329_v63, 0.0 }
 0x14d   : > { %v1220_v55 = vrot.slane %v1094_v48, 7  ;;  %v1330_v7 = vand.u32 2147483647, %v1298_v61  ;;  %v1124_v12 = vsub.f32 %v1094_v48, %v1092_v47  ;;  %v1361_v41 = vsel %vm237_vm2, %v1153_v25, 0.0 }
 0x14e   : > { %v954_v50 = vpop.permute.xlu1 %953 }
 0x14f   : > { %v1095_v56 = vmul.f32 %v954_v50, %v903_v44  ;;  %v1221_v0 = vsel %vm1215_vm5, %v1219_v52, %v1220_v55  ;;  %v1438_v26 = vsel %vm1436_vm6, %v1330_v7, 0.0  ;;  %v1154_v28 = vand.u32 2147483647, %v1124_v12  ;;  %v909_v44 = vld [vmem:[%s1755_s19 + $0x50] sm:$0xff] }
 0x150   : > { %v1299_v13 = vsub.f32 %v1094_v48, %v1221_v0  ;;  %v1439_v39 = vadd.f32 %v1438_v26, %v1437_v21 }
 0x151   : > { %v1222_v1 = vrot.slane %v1095_v56, 7  ;;  %v1125_v14 = vsub.f32 %v1095_v56, %v1093_v38  ;;  %v1390_v43 = vsel %vm237_vm2, %v1154_v28, 0.0  ;;  %v910_v38 = vld [vmem:[%s1755_s19 + $0x58] sm:$0xff]  ;;  %v913_v28 = vld [vmem:[%s1755_s19 + $0x70] sm:$0xff] }
 0x152   : > { %v959_v57 = vpop.permute.xlu1 %958  ;;  %v1331_v27 = vand.u32 2147483647, %v1299_v13 }
 0x153   : > { %v1978_v58 = vmul.f32 %v959_v57, %v904_v54  ;;  %v1300_v15 = vsub.f32 %v1095_v56, %v1222_v1  ;;  %v1155_v30 = vand.u32 2147483647, %v1125_v14 }
 0x154   : > { %v1469_v40 = vsel %vm237_vm2, %v1331_v27, 0.0 }
 0x155   : > { %v1223_v3 = vrot.slane %v1978_v58, 7  ;;  %v1126_v16 = vsub.f32 %v1978_v58, %v1094_v48  ;;  %v1332_v17 = vand.u32 2147483647, %v1300_v15  ;;  %v1362_v45 = vsel %vm237_vm2, %v1155_v30, 0.0  ;;  %v914_v30 = vld [vmem:[%s1755_s19 + $0x78] sm:$0xff] }
 0x156   : > { %v964_v62 = vpop.permute.xlu1 %963  ;;  %v1470_v55 = vadd.f32 %v1469_v40, %v1468_v42  ;;  %v1363_v0 = vadd.f32 %v1362_v45, %v1361_v41 }
 0x157   : > { %v1984_v5 = vmul.f32 %v964_v62, %v905_v59  ;;  %v1224_v8 = vsel %vm1215_vm5, %v1222_v1, %v1223_v3  ;;  %v1156_v33 = vand.u32 2147483647, %v1126_v16  ;;  %v1440_v46 = vsel %vm1436_vm6, %v1332_v17, 0.0 }
 0x158   : > { %v1301_v10 = vsub.f32 %v1978_v58, %v1224_v8  ;;  %v1441_v1 = vadd.f32 %v1440_v46, %v1439_v39 }
 0x159   : > { %v1225_v18 = vrot.slane %v1984_v5, 7  ;;  %v1127_v34 = vsub.f32 %v1984_v5, %v1095_v56  ;;  %v1391_v50 = vsel %vm237_vm2, %v1156_v33, 0.0 }
 0x15a   : > { %v969_v9 = vpop.permute.xlu1 %968  ;;  %v1333_v35 = vand.u32 2147483647, %v1301_v10  ;;  %v1392_v3 = vadd.f32 %v1391_v50, %v1390_v43 }
 0x15b   : > { %v1098_v20 = vmul.f32 %v969_v9, %v906_v11  ;;  %v1302_v32 = vsub.f32 %v1984_v5, %v1225_v18  ;;  %v1157_v49 = vand.u32 2147483647, %v1127_v34  ;;  %v912_v11 = vld [vmem:[%s1755_s19 + $0x68] sm:$0xff] }
 0x15c   : > { %v979_v19 = vpop.permute.xlu0 %978  ;;  %v1471_v56 = vsel %vm237_vm2, %v1333_v35, 0.0 }
 0x15d   : > { %v1226_v31 = vrot.slane %v1098_v20, 7  ;;  %v1128_v36 = vsub.f32 %v1098_v20, %v1978_v58  ;;  %v1998_v37 = vmul.f32 %v979_v19, %v908_v22  ;;  %v1334_v51 = vand.u32 2147483647, %v1302_v32 }
 0x15e   : > { %v974_v29 = vpop.permute.xlu1 %973  ;;  %v1472_v4 = vadd.f32 %v1471_v56, %v1470_v55  ;;  %v1364_v6 = vsel %vm237_vm2, %v1157_v49, 0.0  ;;  %v915_v49 = vld [vmem:[%s1755_s19 + $0x80] sm:$0xff] }
 0x15f   : > { %v2000_v24 = vmul.f32 %v974_v29, %v907_v23  ;;  %v1227_v47 = vsel %vm1215_vm5, %v1225_v18, %v1226_v31  ;;  %v1158_v57 = vand.u32 2147483647, %v1128_v36  ;;  %v1130_v53 = vsub.f32 %v1998_v37, %v1098_v20 }
 0x160   : > { %v989_v48 = vpop.permute.xlu0 %988  ;;  %v1303_v58 = vsub.f32 %v1098_v20, %v1227_v47  ;;  %v1229_v62 = vrot.slane %v1998_v37, 7  ;;  %v1442_v7 = vsel %vm1436_vm6, %v1334_v51, 0.0  ;;  %v1365_v20 = vadd.f32 %v1364_v6, %v1363_v0 }
 0x161   : > { %v1228_v52 = vrot.slane %v2000_v24, 7  ;;  %v1129_v60 = vsub.f32 %v2000_v24, %v1984_v5  ;;  %v2017_v61 = vmul.f32 %v989_v48, %v910_v38  ;;  %v1393_v5 = vsel %vm237_vm2, %v1158_v57, 0.0  ;;  %v916_v57 = vld [vmem:[%s1755_s19 + $0x88] sm:$0xff] }
 0x162   : > { %v984_v54 = vpop.permute.xlu1 %983  ;;  %v1160_v14 = vand.u32 2147483647, %v1130_v53  ;;  %v1335_v18 = vand.u32 2147483647, %v1303_v58  ;;  %v1443_v21 = vadd.f32 %v1442_v7, %v1441_v1  ;;  %v1394_v33 = vadd.f32 %v1393_v5, %v1392_v3 }
 0x163   : > { %v1101_v59 = vmul.f32 %v984_v54, %v909_v44  ;;  %v1304_v13 = vsub.f32 %v2000_v24, %v1228_v52  ;;  %v1230_v15 = vsel %vm1215_vm5, %v1228_v52, %v1229_v62  ;;  %v1159_v9 = vand.u32 2147483647, %v1129_v60 }
 0x164   : > { %v1132_v63 = vsub.f32 %v2017_v61, %v1998_v37  ;;  %v1232_v22 = vrot.slane %v2017_v61, 7  ;;  %v1305_v25 = vsub.f32 %v1998_v37, %v1230_v15  ;;  %v1473_v29 = vsel %vm237_vm2, %v1335_v18, 0.0  ;;  %v918_v18 = vld [vmem:[%s1755_s19 + $0x98] sm:$0xff] }
 0x165   : > { %v1231_v16 = vrot.slane %v1101_v59, 7  ;;  %v1131_v19 = vsub.f32 %v1101_v59, %v2000_v24  ;;  %v1336_v26 = vand.u32 2147483647, %v1304_v13  ;;  %v1395_v35 = vsel %vm237_vm2, %v1160_v14, 0.0 }
 0x166   : > { %v994_v8 = vpop.permute.xlu1 %993  ;;  %v1366_v36 = vsel %vm237_vm2, %v1159_v9, 0.0  ;;  %v1162_v37 = vand.u32 2147483647, %v1132_v63  ;;  %v1337_v43 = vand.u32 2147483647, %v1305_v25  ;;  %v1396_v38 = vadd.f32 %v1395_v35, %v1394_v33 }
 0x167   : > { %v2029_v10 = vmul.f32 %v994_v8, %v911_v2  ;;  %v1306_v27 = vsub.f32 %v1101_v59, %v1231_v16  ;;  %v1233_v34 = vsel %vm1215_vm5, %v1231_v16, %v1232_v22  ;;  %v1161_v42 = vand.u32 2147483647, %v1131_v19 }
 0x168   : > { %v999_v12 = vpop.permute.xlu0 %998  ;;  %v1444_v45 = vsel %vm1436_vm6, %v1336_v26, 0.0  ;;  %v1307_v46 = vsub.f32 %v2017_v61, %v1233_v34  ;;  %v1474_v51 = vadd.f32 %v1473_v29, %v1472_v4  ;;  %v1367_v52 = vadd.f32 %v1366_v36, %v1365_v20 }
 0x169   : > { %v2033_v23 = vmul.f32 %v999_v12, %v912_v11  ;;  %v1133_v32 = vsub.f32 %v2029_v10, %v1101_v59  ;;  %v1234_v31 = vrot.slane %v2029_v10, 7  ;;  %v1338_v47 = vand.u32 2147483647, %v1306_v27  ;;  %v917_v27 = vld [vmem:[%s1755_s19 + $0x90] sm:$0xff] }
 0x16a   : > { %v1397_v54 = vsel %vm237_vm2, %v1162_v37, 0.0  ;;  %v1445_v53 = vadd.f32 %v1444_v45, %v1443_v21  ;;  %v1368_v58 = vsel %vm237_vm2, %v1161_v42, 0.0  ;;  %v1475_v0 = vsel %vm237_vm2, %v1337_v43, 0.0  ;;  %v919_v42 = vld [vmem:[%s1755_s19 + $0xa0] sm:$0xff] }
 0x16b   : > { %v1235_v41 = vrot.slane %v2033_v23, 7  ;;  %v1163_v48 = vand.u32 2147483647, %v1133_v32  ;;  %v1308_v44 = vsub.f32 %v2029_v10, %v1234_v31  ;;  %v1134_v50 = vsub.f32 %v2033_v23, %v2017_v61 }
 0x16c   : > { %v1009_v17 = vpop.permute.xlu0 %1008  ;;  %v1339_v1 = vand.u32 2147483647, %v1307_v46  ;;  %v1446_v61 = vsel %vm1436_vm6, %v1338_v47, 0.0  ;;  %v1369_v13 = vadd.f32 %v1368_v58, %v1367_v52  ;;  %v1398_v5 = vadd.f32 %v1397_v54, %v1396_v38 }
 0x16d   : > { %v2047_v40 = vmul.f32 %v1009_v17, %v914_v30  ;;  %v1236_v60 = vsel %vm1215_vm5, %v1234_v31, %v1235_v41  ;;  %v1340_v2 = vand.u32 2147483647, %v1308_v44  ;;  %v1370_v4 = vsel %vm237_vm2, %v1163_v48, 0.0 }
 0x16e   : > { %v1004_v24 = vpop.permute.xlu1 %1003  ;;  %v1164_v6 = vand.u32 2147483647, %v1134_v50  ;;  %v1309_v8 = vsub.f32 %v2033_v23, %v1236_v60  ;;  %v1476_v14 = vadd.f32 %v1475_v0, %v1474_v51  ;;  %v1447_v9 = vadd.f32 %v1446_v61, %v1445_v53 }
 0x16f   : > { %v2045_v39 = vmul.f32 %v1004_v24, %v913_v28  ;;  %v1238_v59 = vrot.slane %v2047_v40, 7  ;;  %v1136_v16 = vsub.f32 %v2047_v40, %v2033_v23  ;;  %v1371_v63 = vadd.f32 %v1370_v4, %v1369_v13  ;;  %v921_v13 = vld [vmem:[%s1755_s19 + $0xb0] sm:$0xff] }
 0x170   : > { %v1477_v20 = vsel %vm237_vm2, %v1339_v1, 0.0  ;;  %v1399_v21 = vsel %vm237_vm2, %v1164_v6, 0.0  ;;  %v1341_v28 = vand.u32 2147483647, %v1309_v8 }
 0x171   : > { %v1237_v55 = vrot.slane %v2045_v39, 7  ;;  %v1135_v11 = vsub.f32 %v2045_v39, %v2029_v10  ;;  %v1448_v10 = vsel %vm1436_vm6, %v1340_v2, 0.0  ;;  %v1166_v32 = vand.u32 2147483647, %v1136_v16 }
 0x172   : > { %v1014_v56 = vpop.permute.xlu1 %1013  ;;  %v1478_v35 = vadd.f32 %v1477_v20, %v1476_v14  ;;  %v1400_v36 = vadd.f32 %v1399_v21, %v1398_v5  ;;  %v1449_v41 = vadd.f32 %v1448_v10, %v1447_v9  ;;  %v1479_v46 = vsel %vm237_vm2, %v1341_v28, 0.0  ;;  %v922_v14 = vld [vmem:[%s1755_s19 + $0xb8] sm:$0xff] }
 0x173   : > { %v2063_v3 = vmul.f32 %v1014_v56, %v915_v49  ;;  %v1239_v12 = vsel %vm1215_vm5, %v1237_v55, %v1238_v59  ;;  %v1310_v15 = vsub.f32 %v2045_v39, %v1237_v55  ;;  %v1165_v23 = vand.u32 2147483647, %v1135_v11 }
 0x174   : > { %v1019_v62 = vpop.permute.xlu0 %1018  ;;  %v1311_v25 = vsub.f32 %v2047_v40, %v1239_v12  ;;  %v1401_v50 = vsel %vm237_vm2, %v1166_v32, 0.0  ;;  %v1480_v58 = vadd.f32 %v1479_v46, %v1478_v35  ;;  %v923_v32 = vld [vmem:[%s1755_s19 + $0xc0] sm:$0xff] }
 0x175   : > { %v2066_v7 = vmul.f32 %v1019_v62, %v916_v57  ;;  %v1240_v22 = vrot.slane %v2063_v3, 7  ;;  %v1137_v30 = vsub.f32 %v2063_v3, %v2045_v39  ;;  %v1342_v34 = vand.u32 2147483647, %v1310_v15  ;;  %v920_v57 = vld [vmem:[%s1755_s19 + $0xa8] sm:$0xff] }
 0x176   : > { %v1343_v43 = vand.u32 2147483647, %v1311_v25  ;;  %v1372_v47 = vsel %vm237_vm2, %v1165_v23, 0.0  ;;  %v1402_v61 = vadd.f32 %v1401_v50, %v1400_v36 }
 0x177   : > { %v1241_v26 = vrot.slane %v2066_v7, 7  ;;  %v1138_v31 = vsub.f32 %v2066_v7, %v2047_v40  ;;  %v1312_v37 = vsub.f32 %v2063_v3, %v1240_v22  ;;  %v1167_v40 = vand.u32 2147483647, %v1137_v30 }
 0x178   : > { %v1029_v19 = vpop.permute.xlu0 %1028  ;;  %v1450_v44 = vsel %vm1436_vm6, %v1342_v34, 0.0  ;;  %v1481_v60 = vsel %vm237_vm2, %v1343_v43, 0.0  ;;  %v1373_v1 = vadd.f32 %v1372_v47, %v1371_v63 }
 0x179   : > { %v2085_v33 = vmul.f32 %v1029_v19, %v918_v18  ;;  %v1242_v29 = vsel %vm1215_vm5, %v1240_v22, %v1241_v26  ;;  %v1168_v49 = vand.u32 2147483647, %v1138_v31  ;;  %v1344_v52 = vand.u32 2147483647, %v1312_v37 }
 0x17a   : > { %v1024_v17 = vpop.permute.xlu1 %1023  ;;  %v1313_v39 = vsub.f32 %v2066_v7, %v1242_v29  ;;  %v1374_v62 = vsel %vm237_vm2, %v1167_v40, 0.0  ;;  %v1482_v8 = vadd.f32 %v1481_v60, %v1480_v58  ;;  %v926_v58 = vld [vmem:[%s1755_s19 + $0xd8] sm:$0xff] }
 0x17b   : > { %v1109_v24 = vmul.f32 %v1024_v17, %v917_v27  ;;  %v1244_v45 = vrot.slane %v2085_v33, 7  ;;  %v1140_v55 = vsub.f32 %v2085_v33, %v2066_v7  ;;  %v1403_v4 = vsel %vm237_vm2, %v1168_v49, 0.0 }
 0x17c   : > { %v1345_v59 = vand.u32 2147483647, %v1313_v39  ;;  %v1452_v11 = vsel %vm1436_vm6, %v1344_v52, 0.0  ;;  %v1375_v16 = vadd.f32 %v1374_v62, %v1373_v1  ;;  %v1404_v20 = vadd.f32 %v1403_v4, %v1402_v61 }
 0x17d   : > { %v1243_v38 = vrot.slane %v1109_v24, 7  ;;  %v1139_v54 = vsub.f32 %v1109_v24, %v2063_v3  ;;  %v1451_v3 = vadd.f32 %v1450_v44, %v1449_v41  ;;  %v1170_v5 = vand.u32 2147483647, %v1140_v55 }
 0x17e   : > { %v1034_v48 = vpop.permute.xlu1 %1033  ;;  %v1483_v18 = vsel %vm237_vm2, %v1345_v59, 0.0 }
 0x17f   : > { %v1111_v51 = vmul.f32 %v1034_v48, %v919_v42  ;;  %v1245_v56 = vsel %vm1215_vm5, %v1243_v38, %v1244_v45  ;;  %v1314_v0 = vsub.f32 %v1109_v24, %v1243_v38  ;;  %v1169_v12 = vand.u32 2147483647, %v1139_v54  ;;  %v924_v54 = vld [vmem:[%s1755_s19 + $0xc8] sm:$0xff] }
 0x180   : > { %v1039_v53 = vpop.permute.xlu0 %1038  ;;  %v1315_v6 = vsub.f32 %v2085_v33, %v1245_v56  ;;  %v1453_v25 = vadd.f32 %v1452_v11, %v1451_v3  ;;  %v1484_v23 = vadd.f32 %v1483_v18, %v1482_v8  ;;  %v1405_v17 = vsel %vm237_vm2, %v1170_v5, 0.0 }
 0x181   : > { %v1246_v2 = vrot.slane %v1111_v51, 7  ;;  %v1112_v7 = vmul.f32 %v1039_v53, %v920_v57  ;;  %v1346_v9 = vand.u32 2147483647, %v1314_v0  ;;  %v1141_v63 = vsub.f32 %v1111_v51, %v1109_v24 }
 0x182   : > { %v1347_v26 = vand.u32 2147483647, %v1315_v6  ;;  %v1376_v30 = vsel %vm237_vm2, %v1169_v12, 0.0  ;;  %v1406_v47 = vadd.f32 %v1405_v17, %v1404_v20 }
 0x183   : > { %v1316_v22 = vsub.f32 %v1111_v51, %v1246_v2  ;;  %v1142_v19 = vsub.f32 %v1112_v7, %v2085_v33  ;;  %v1247_v10 = vrot.slane %v1112_v7, 7  ;;  %v1454_v31 = vsel %vm1436_vm6, %v1346_v9, 0.0 }
 0x184   : > { %v1049_v15 = vpop.permute.xlu0 %1048  ;;  %v1171_v29 = vand.u32 2147483647, %v1141_v63  ;;  %v1485_v43 = vsel %vm237_vm2, %v1347_v26, 0.0  ;;  %v1377_v50 = vadd.f32 %v1376_v30, %v1375_v16  ;;  %v1455_v55 = vadd.f32 %v1454_v31, %v1453_v25 }
 0x185   : > { %v1114_v28 = vmul.f32 %v1049_v15, %v922_v14  ;;  %v1248_v34 = vsel %vm1215_vm5, %v1246_v2, %v1247_v10  ;;  %v1348_v33 = vand.u32 2147483647, %v1316_v22  ;;  %v1172_v37 = vand.u32 2147483647, %v1142_v19  ;;  %v925_v14 = vld [vmem:[%s1755_s19 + $0xd0] sm:$0xff] }
 0x186   : > { %v1044_v21 = vpop.permute.xlu1 %1043  ;;  %v1317_v35 = vsub.f32 %v1112_v7, %v1248_v34  ;;  %v1378_v49 = vsel %vm237_vm2, %v1171_v29, 0.0  ;;  %v1486_v56 = vadd.f32 %v1485_v43, %v1484_v23 }
 0x187   : > { %v1113_v27 = vmul.f32 %v1044_v21, %v921_v13  ;;  %v1250_v42 = vrot.slane %v1114_v28, 7  ;;  %v1144_v45 = vsub.f32 %v1114_v28, %v1112_v7  ;;  %v1456_v57 = vsel %vm1436_vm6, %v1348_v33, 0.0  ;;  %v928_v33 = vld [vmem:[%s1755_s19 + $0xe8] sm:$0xff] }
 0x188   : > { %v1349_v39 = vand.u32 2147483647, %v1317_v35  ;;  %v1407_v53 = vsel %vm237_vm2, %v1172_v37, 0.0  ;;  %v1379_v61 = vadd.f32 %v1378_v49, %v1377_v50  ;;  %v1457_v6 = vadd.f32 %v1456_v57, %v1455_v55  ;;  %v929_v49 = vld [vmem:[%s1755_s19 + $0xf0] sm:$0xff] }
 0x189   : > { %v1143_v36 = vsub.f32 %v1113_v27, %v1111_v51  ;;  %v1249_v24 = vrot.slane %v1113_v27, 7  ;;  %v1174_v0 = vand.u32 2147483647, %v1144_v45  ;;  %v1408_v7 = vadd.f32 %v1407_v53, %v1406_v47 }
 0x18a   : > { %v1054_v41 = vpop.permute.xlu1 %1053  ;;  %v1487_v60 = vsel %vm237_vm2, %v1349_v39, 0.0 }
 0x18b   : > { %v2118_v46 = vmul.f32 %v1054_v41, %v923_v32  ;;  %v1173_v40 = vand.u32 2147483647, %v1143_v36  ;;  %v1318_v38 = vsub.f32 %v1113_v27, %v1249_v24  ;;  %v1251_v48 = vsel %vm1215_vm5, %v1249_v24, %v1250_v42  ;;  %v927_v36 = vld [vmem:[%s1755_s19 + $0xe0] sm:$0xff] }
 0x18c   : > { %v1059_v44 = vpop.permute.xlu0 %1058  ;;  %v1319_v51 = vsub.f32 %v1114_v28, %v1251_v48  ;;  %v1488_v11 = vadd.f32 %v1487_v60, %v1486_v56  ;;  %v1409_v9 = vsel %vm237_vm2, %v1174_v0, 0.0 }
 0x18d   : > { %v1145_v52 = vsub.f32 %v2118_v46, %v1113_v27  ;;  %v1350_v59 = vand.u32 2147483647, %v1318_v38  ;;  %v1252_v1 = vrot.slane %v2118_v46, 7  ;;  %v1380_v62 = vsel %vm237_vm2, %v1173_v40, 0.0 }
 0x18e   : > { %v1351_v2 = vand.u32 2147483647, %v1319_v51  ;;  %v1116_v3 = vmul.f32 %v1059_v44, %v924_v54  ;;  %v1381_v16 = vadd.f32 %v1380_v62, %v1379_v61  ;;  %v1410_v30 = vadd.f32 %v1409_v9, %v1408_v7  ;;  %v930_v51 = vld [vmem:[%s1755_s19 + $0xf8] sm:$0xff] }
 0x18f   : > { %v1175_v13 = vand.u32 2147483647, %v1145_v52  ;;  %v1320_v8 = vsub.f32 %v2118_v46, %v1252_v1  ;;  %v1458_v18 = vsel %vm1436_vm6, %v1350_v59, 0.0 }
 0x190   : > { %v1069_v4 = vpop.permute.xlu0 %1068  ;;  %v1146_v12 = vsub.f32 %v1116_v3, %v1114_v28  ;;  %v1253_v5 = vrot.slane %v1116_v3, 7  ;;  %v1489_v20 = vsel %vm237_vm2, %v1351_v2, 0.0  ;;  %v1459_v23 = vadd.f32 %v1458_v18, %v1457_v6 }
 0x191   : > { %v1118_v15 = vmul.f32 %v1069_v4, %v926_v58  ;;  %v1352_v63 = vand.u32 2147483647, %v1320_v8  ;;  %v1382_v25 = vsel %vm237_vm2, %v1175_v13, 0.0  ;;  %v1490_v37 = vadd.f32 %v1489_v20, %v1488_v11 }
 0x192   : > { %v1176_v22 = vand.u32 2147483647, %v1146_v12  ;;  %v1254_v19 = vsel %vm1215_vm5, %v1252_v1, %v1253_v5  ;;  %v1064_v10 = vpop.permute.xlu1 %1063  ;;  %v1383_v41 = vadd.f32 %v1382_v25, %v1381_v16 }
 0x193   : > { %v1148_v21 = vsub.f32 %v1118_v15, %v1116_v3  ;;  %v1321_v26 = vsub.f32 %v1116_v3, %v1254_v19  ;;  %v1117_v27 = vmul.f32 %v1064_v10, %v925_v14  ;;  %v1256_v28 = vrot.slane %v1118_v15, 7 }
 0x194   : > { %v1411_v17 = vsel %vm237_vm2, %v1176_v22, 0.0  ;;  %v1460_v32 = vsel %vm1436_vm6, %v1352_v63, 0.0 }
 0x195   : > { %v1178_v34 = vand.u32 2147483647, %v1148_v21  ;;  %v1353_v31 = vand.u32 2147483647, %v1321_v26  ;;  %v1147_v29 = vsub.f32 %v1117_v27, %v2118_v46  ;;  %v1255_v35 = vrot.slane %v1117_v27, 7 }
 0x196   : > { %v1074_v24 = vpop.permute.xlu1 %1073  ;;  %v1079_v42 = vpop.permute.xlu0 %1078  ;;  %v1412_v43 = vadd.f32 %v1411_v17, %v1410_v30  ;;  %v1461_v48 = vadd.f32 %v1460_v32, %v1459_v23 }
 0x197   : > { %v1413_v39 = vsel %vm237_vm2, %v1178_v34, 0.0  ;;  %v1491_v45 = vsel %vm237_vm2, %v1353_v31, 0.0  ;;  %v1177_v47 = vand.u32 2147483647, %v1147_v29  ;;  %v1322_v40 = vsub.f32 %v1117_v27, %v1255_v35 }
 0x198   : > { %v1257_v38 = vsel %vm1215_vm5, %v1255_v35, %v1256_v28  ;;  %v1119_v44 = vmul.f32 %v1074_v24, %v927_v36  ;;  %v1120_v50 = vmul.f32 %v1079_v42, %v928_v33  ;;  %v1414_v55 = vadd.f32 %v1413_v39, %v1412_v43 }
 0x199   : > { %v1323_v46 = vsub.f32 %v1118_v15, %v1257_v38  ;;  %v1354_v52 = vand.u32 2147483647, %v1322_v40  ;;  %v1384_v54 = vsel %vm237_vm2, %v1177_v47, 0.0  ;;  %v1492_v56 = vadd.f32 %v1491_v45, %v1490_v37 }
 0x19a   : > { %v1149_v53 = vsub.f32 %v1119_v44, %v1117_v27  ;;  %v1258_v58 = vrot.slane %v1119_v44, 7  ;;  %v1150_v60 = vsub.f32 %v1120_v50, %v1118_v15  ;;  %v1084_v59 = vpop.permute.xlu1 %1083  ;;  %v1089_v0 = vpop.permute.xlu0 %1088  ;;  %v1259_v61 = vrot.slane %v1120_v50, 7 }
 0x19b   : > { %v1355_v57 = vand.u32 2147483647, %v1323_v46  ;;  %v1462_v1 = vsel %vm1436_vm6, %v1354_v52, 0.0  ;;  %v1121_v62 = vmul.f32 %v1084_v59, %v929_v49  ;;  %v1122_v2 = vmul.f32 %v1089_v0, %v930_v51 }
 0x19c   : > { %v1463_v3 = vadd.f32 %v1462_v1, %v1461_v48  ;;  %v1179_v4 = vand.u32 2147483647, %v1149_v53  ;;  %v1324_v6 = vsub.f32 %v1119_v44, %v1258_v58  ;;  %v1180_v7 = vand.u32 2147483647, %v1150_v60 }
 0x19d   : > { %v1260_v13 = vsel %vm1215_vm5, %v1258_v58, %v1259_v61  ;;  %v1151_v8 = vsub.f32 %v1121_v62, %v1119_v44  ;;  %v1261_v11 = vrot.slane %v1121_v62, 7  ;;  %v1152_v12 = vsub.f32 %v1122_v2, %v1120_v50  ;;  %v1360_v61 = vld [vmem:[#allocation2] sm:$0x1] }
 0x19e   : > { %v1356_v5 = vand.u32 2147483647, %v1324_v6  ;;  %v1325_v14 = vsub.f32 %v1120_v50, %v1260_v13  ;;  %v1262_v16 = vrot.slane %v1122_v2, 7  ;;  %v1385_v15 = vadd.f32 %v1384_v54, %v1383_v41 }
 0x19f   : > { %v1181_v18 = vand.u32 2147483647, %v1151_v8  ;;  %v1326_v9 = vsub.f32 %v1121_v62, %v1261_v11  ;;  %v1182_v63 = vand.u32 2147483647, %v1152_v12  ;;  %v1386_v20 = vsel %vm237_vm2, %v1179_v4, 0.0 }
 0x1a0   : > { %v1464_v22 = vsel %vm1436_vm6, %v1356_v5, 0.0  ;;  %v1357_v19 = vand.u32 2147483647, %v1325_v14  ;;  %v1263_v10 = vsel %vm1215_vm5, %v1261_v11, %v1262_v16  ;;  %v1387_v21 = vadd.f32 %v1386_v20, %v1385_v15 }
 0x1a1   : > { %v1358_v25 = vand.u32 2147483647, %v1326_v9  ;;  %v1327_v26 = vsub.f32 %v1122_v2, %v1263_v10  ;;  %v1388_v27 = vsel %vm237_vm2, %v1181_v18, 0.0  ;;  %v1415_v28 = vsel %vm237_vm2, %v1180_v7, 0.0 }
 0x1a2   : > { %v1389_v23 = vadd.f32 %v1388_v27, %v1387_v21  ;;  %v1416_v30 = vadd.f32 %v1415_v28, %v1414_v55  ;;  %v1417_v17 = vsel %vm237_vm2, %v1182_v63, 0.0  ;;  %v1465_v34 = vadd.f32 %v1464_v22, %v1463_v3 }
 0x1a3   : > { %v1466_v32 = vsel %vm1436_vm6, %v1358_v25, 0.0  ;;  %v1359_v31 = vand.u32 2147483647, %v1327_v26  ;;  %v1493_v29 = vsel %vm237_vm2, %v1355_v57, 0.0  ;;  %v1495_v35 = vsel %vm237_vm2, %v1357_v19, 0.0 }
 0x1a4   : > { %v1418_v36 = vadd.f32 %v1417_v17, %v1416_v30  ;;  %v1419_v33 = vsel %vm237_vm2, %v1389_v23, 0.0  ;;  %v1467_v37 = vadd.f32 %v1466_v32, %v1465_v34  ;;  %v1494_v24 = vadd.f32 %v1493_v29, %v1492_v56 }
 0x1a5   : > { %v1497_v42 = vsel %vm237_vm2, %v1359_v31, 0.0 }
 0x1a6   : > { %v1420_v41 = vsel %vm237_vm2, %v1418_v36, 0.0  ;;  %v1496_v43 = vadd.f32 %v1495_v35, %v1494_v24  ;;  %v1501_v47 = vrot.slane %v1467_v37, 1 }
 0x1a7   : > { %v1421_v39 = vadd.f32 %v1420_v41, %v1419_v33 }
 0x1a8   : > { %v1498_v45 = vadd.f32 %v1497_v42, %v1496_v43 }
 0x1a9   : > { %1422 = vadd.xlane.f32.xlu1 %v1421_v39 }
 0x1aa   : > { %v1502_v40 = vrot.slane %v1498_v45, 1 }
 0x1ac   : > { %v1503_v38 = vsel %vm545_vm3, %v1501_v47, %v1502_v40  ;;  %v1508_v48 = vsel %vm1507_vm7, %v1502_v40, 0.0 }
 0x1ad   : > { %v1506_v46 = vsel %vm237_vm2, %v1503_v38, 0.0 }
 0x1ae   : > { %v1509_v44 = vadd.f32 %v1508_v48, %v1506_v46 }
 0x1b0   : > { %1510 = vadd.xlane.f32.xlu0 %v1509_v44 }
 0x236   : > { %v1423_v50 = vpop.xlane.xlu1 %1422 }
 0x237   : > { %v1424_v49 = vrot.slane %v1423_v50, 4 }
 0x239   : > { %v1425_v51 = vadd.f32 %v1424_v49, %v1423_v50 }
 0x23b   : > { %v1426_v52 = vrot.slane %v1425_v51, 2 }
 0x23d   : > { %v1511_v54 = vpop.xlane.xlu0 %1510  ;;  %v1427_v55 = vadd.f32 %v1426_v52, %v1425_v51 }
 0x23e   : > { %v1512_v56 = vrot.slane %v1511_v54, 4 }
 0x23f   : > { %v1428_v57 = vrot.slane %v1427_v55, 1 }
 0x240   : > { %v1513_v53 = vadd.f32 %v1512_v56, %v1511_v54 }
 0x241   : > { %v1429_v58 = vadd.f32 %v1428_v57, %v1427_v55 }
 0x242   : > { %v1514_v60 = vrot.slane %v1513_v53, 2 }
 0x243   : > { %1618 = vpush %v1429_v58 }
 0x244   : > { %v1515_v59 = vadd.f32 %v1514_v60, %v1513_v53 }
 0x246   : > { %v1516_v0 = vrot.slane %v1515_v59, 1 }
 0x248   : > { %v1517_v1 = vadd.f32 %v1516_v0, %v1515_v59 }
 0x24a   : > { %1620 = vpush %v1517_v1 }
 0x274   : > { %s1619_s25 = spop %1618 }
 0x275   : > { %v1431_v62 = vstv %s1619_s25 }
 0x276   : > { %v1432_v2 = vadd.f32 %v1431_v62, %v1360_v61 }
 0x278   : > { %1434 = vst.msk [vmem:[#allocation2] sm:$0x1] %vm1433_vm8, %v1432_v2 }
 0x279   : > { %1661 = shalt.err (!%p1658_p12)
}
 0x27a   : > { %s1662_s30 = scalar_lea.hbm %s2216_s2, 16 }
 0x27b   : > { %p1663_p13 = scmp.ne.s32.totalorder %s2216_s2, %s1662_s30  ;;  %p1668_p2 = scmp.lt.u32.totalorder %s1662_s30, %s2216_s2 }
 0x27d   : > { %p1664_p0 = pnand %p1663_p13, %p1630_p5 }
 0x27f   : > { %p1665_p1 = pneg %p1664_p0 }
 0x281   : > { %p1670_p3 = pnand %p1668_p2, %p1665_p1 }
 0x283   : > { %1673 = shalt.err (!%p1670_p3)
}
 0x284   : > { %1623 = dma.vmem_to_hbm [thread:$0]  (%p1630_p5), %s1530_s24, 16, %s2216_s2, [#allocation3]   ;;  %v1435_v3 = vld [vmem:[#allocation4] sm:$0x1] }
 0x285   : > { %s1719_s10 = smov [#allocation4]   ;;  %s1621_s14 = spop %1620 }
 0x286   : > { %s1540_s11 = sshll.u32 %s1719_s10, 4  ;;  %v1519_v4 = vstv %s1621_s14  ;;  %s1541_s11 = int_to_ptr.vmem [resolvable:$true] %s1540_s11 }
 0x287   : > { %v1520_v6 = vadd.f32 %v1519_v4, %v1435_v3  ;;  %s1674_s15 = scalar_lea.vmem %s1541_s11, 16  ;;  %s1680_s16 = scalar_lea.vmem %s1541_s11, 32 }
 0x288   : > { %p1675_p4 = scmp.ne.s32.totalorder %s1541_s11, %s1674_s15  ;;  %p1681_p8 = scmp.lt.s32.totalorder %s1541_s11, %s1541_s11 }
 0x289   : > { %1521 = vst.msk [vmem:[#allocation4] sm:$0x1] %vm1433_vm8, %v1520_v6  ;;  %p1682_p9 = scmp.lt.s32.totalorder %s1680_s16, %s1674_s15 }
 0x28a   : > { %p1676_p6 = pnand %p1675_p4, %p1630_p5 }
 0x28b   : > { %p1683_p10 = por %p1682_p9, %p1681_p8 }
 0x28c   : > { %p1677_p7 = pneg %p1676_p6 }
 0x28e   : > { %p1684_p11 = pnand %p1683_p10, %p1677_p7 }
 0x290   : > { %1687 = shalt.err (!%p1684_p11)
}
 0x291   : > { %s1688_s19 = scalar_lea.hbm %s2217_s3, 16 }
 0x292   : > { %p1689_p12 = scmp.ne.s32.totalorder %s2217_s3, %s1688_s19  ;;  %p1694_p1 = scmp.lt.u32.totalorder %s1688_s19, %s2217_s3 }
 0x294   : > { %p1690_p13 = pnand %p1689_p12, %p1630_p5 }
 0x296   : > { %p1691_p0 = pneg %p1690_p13 }
 0x298   : > { %p1696_p2 = pnand %p1694_p1, %p1691_p0 }
 0x29a   : > { %1699 = shalt.err (!%p1696_p2)
}
 0x29b   : > { %1625 = dma.vmem_to_hbm [thread:$0]  (%p1630_p5), %s1541_s11, 16, %s2217_s3, [#allocation5]  }
 0x29c   : > { %1705 = dma.done.wait (%p1630_p5), [#allocation3], 16  }
 0x29d   : > { %1707 = vsyncadd (%p1630_p5), [#allocation3], 4294967280 }
 0x29e   : > { %1709 = dma.done.wait (%p1630_p5), [#allocation5], 16  }
 0x29f   : > { %1711 = vsyncadd (%p1630_p5), [#allocation5], 4294967280 }
 0x2a0 PF: > { %s16_s12 = sadd.s32 1, %s1714_s12  }
 0x2a1   : > { %p13_p3 = scmp.ge.s32.totalorder %s16_s12, 4  }
 0x2a3   :  { %15 = sbr.rel (!%p13_p3) target bundleno = 2 (0x2), region = 70 }
 0x2aa   :  { %1557 = vsyncpa [#allocation3], 1 }
 0x2ab   :  { %1559 = vsyncpa [#allocation3 + $0x1], 1 }
 0x2ac   :  { %1560 = vsyncpa [#allocation5], 1 }

// kernel: loss_forward.9
= control target key start
LH: loop header
LB: loop body
LE: loop exit
PB: predicated region body
PF: predicated region fallthrough
CT: control target
= control target key end

     0   :  { %s5918_s12 = smov 0   ;;  %s6945_s0 = inlined_call_operand.vmem [shape: f32[6,361,3], index: 0, kind: input, shape index: {}]   ;;  %s6946_s1 = inlined_call_operand.vmem [shape: f32[9,3,16], index: 1, kind: input, shape index: {}]   ;;  %s6947_s2 = inlined_call_operand.vmem [shape: f32[1,16], index: 2, kind: input, shape index: {}]   ;;  %s6948_s3 = inlined_call_operand.vmem [shape: f32[6,304,16], index: 3, kind: output, shape index: {}]  }
   0x1 LB: > { %s4323_s13 = sadd.s32 4294967295, %s5896_s12   ;;  %p4327_p0 = scmp.ge.s32.totalorder %s5896_s12, 1  ;;  %s5896_s12 = sphi %s5918_s12, %s13_s12  }
   0x2   : > { %p137_p1 = scmp.lt.s32.totalorder %s5896_s12, 7 }
   0x4   : > { %p138_p2 = pnand %p4327_p0, %p137_p1 }
   0x5   : > { %vm365_vm0 = vcmask (!%p138_p2), 1042432   ;;  %v5929_v0 = vld [vmem:[%s6946_s1 + $0x10] sm:$0x7] (!%p138_p2)  ;;  %v4330_v1 = vld [vmem:[%s6946_s1 + $0x4] sm:$0x7] (!%p138_p2)  ;;  %p161_p3 = scmp.lt.s32.totalorder (!%p138_p2), %s4323_s13, 5 }
   0x6   : > { %141 = sbr.rel (%p138_p2) target bundleno = 579 (0x243), region = 32  ;;  %5279 = vmatprep.subr.msk.mxu0 (!%p138_p2), %vm365_vm0, %v5929_v0  ;;  %5043 = vmatprep.subr.msk.mxu1 (!%p138_p2), %vm365_vm0, %v4330_v1  ;;  %v4529_v2 = vld [vmem:[%s6946_s1 + $0x14] sm:$0x7] (!%p138_p2)  ;;  %v209_v3 = vld [vmem:[%s6946_s1] sm:$0x7] (!%p138_p2)  ;;  %vm250_vm1 = vcmask (!%p138_p2), 23552  }
   0x7   : > { %5280 = vmatpush3.msk.msra.mxu0 (!%p138_p2), %vm365_vm0, %v5929_v0  ;;  %5044 = vmatpush3.msk.msra.mxu1 (!%p138_p2), %vm365_vm0, %v4330_v1  ;;  %v5969_v10 = vld [vmem:[%s6946_s1 + $0x18] sm:$0x7] (!%p138_p2)  ;;  %v5974_v11 = vld [vmem:[%s6946_s1 + $0x8] sm:$0x7] (!%p138_p2)  ;;  %v6063_v52 = vld [vmem:[%s6946_s1 + $0x1c] sm:$0x7] (!%p138_p2) }
   0x8   : > { %5338 = vmatprep.subr.msk.mxu0 (!%p138_p2), %vm365_vm0, %v4529_v2  ;;  %5102 = vmatprep.subr.msk.mxu1 (!%p138_p2), %vm365_vm0, %v209_v3  ;;  %vm4229_vm2 = vcmask (!%p138_p2), 130048  }
   0xd   : > { %s6950_s13 = smov (!%p161_p3, %s4323_s13), 5 }
   0xe   : > { %s5880_s22 = smul.u32 368, %s6950_s13 }
   0xf   : > { %s5881_s9 = smul.u32 304, %s6950_s13 }
  0x10   : > { %s5954_s25 = scalar_lea.vmem %s6945_s0, %s5880_s22 }
  0x11   : > { %v210_v4 = vld [vmem:[%s5954_s25 + $0x1] sm:$0xff]  ;;  %v1896_v5 = vld [vmem:[%s5954_s25 + $0x14] sm:$0xff]  ;;  %v211_v6 = vld [vmem:[%s5954_s25 + $0x9] sm:$0xff]  ;;  %s6818_s16 = scalar_lea.vmem %s6948_s3, %s5881_s9 }
  0x12   : > { %5045 = vmatprep.mubr.msk.f32.mxu1 %vm250_vm1, %v210_v4  ;;  %5281 = vmatprep.mubr.msk.f32.mxu0 %vm250_vm1, %v1896_v5  ;;  %v1897_v7 = vld [vmem:[%s5954_s25 + $0x1c] sm:$0xff]  ;;  %v212_v8 = vld [vmem:[%s5954_s25 + $0x11] sm:$0xff]  ;;  %v1898_v9 = vld [vmem:[%s5954_s25 + $0x24] sm:$0xff] }
  0x13   : > { %5046 = vmatmul.mubr.msk.f32.vlgmr.msra.gmra.mrb[0].mxu1 %vm250_vm1, %v211_v6  ;;  %5282 = vmatmul.mubr.msk.f32.vlgmr.msra.gmra.mrb[0].mxu0 %vm250_vm1, %v1897_v7  ;;  %v213_v12 = vld [vmem:[%s5954_s25 + $0x19] sm:$0xff]  ;;  %v1899_v13 = vld [vmem:[%s5954_s25 + $0x2c] sm:$0xff]  ;;  %v214_v14 = vld [vmem:[%s5954_s25 + $0x21] sm:$0xff] }
  0x14   : > { %5339 = vmatpush3.msk.msra.mxu0 %vm365_vm0, %v4529_v2  ;;  %5048 = vmatprep.mubr.msk.f32.mxu1 %vm250_vm1, %v212_v8  ;;  %v1900_v15 = vld [vmem:[%s5954_s25 + $0x34] sm:$0xff]  ;;  %v215_v16 = vld [vmem:[%s5954_s25 + $0x29] sm:$0xff]  ;;  %v1901_v17 = vld [vmem:[%s5954_s25 + $0x3c] sm:$0xff] }
  0x15   : > { %5284 = vmatprep.mubr.msk.f32.mxu0 %vm250_vm1, %v1898_v9  ;;  %5103 = vmatpush3.msk.msra.mxu1 %vm365_vm0, %v209_v3  ;;  %v216_v18 = vld [vmem:[%s5954_s25 + $0x31] sm:$0xff]  ;;  %v1902_v19 = vld [vmem:[%s5954_s25 + $0x44] sm:$0xff]  ;;  %v217_v20 = vld [vmem:[%s5954_s25 + $0x39] sm:$0xff] }
  0x16   : > { %5397 = vmatprep.subr.msk.mxu0 %vm365_vm0, %v5969_v10  ;;  %5161 = vmatprep.subr.msk.mxu1 %vm365_vm0, %v5974_v11  ;;  %v1903_v21 = vld [vmem:[%s5954_s25 + $0x4c] sm:$0xff]  ;;  %v218_v22 = vld [vmem:[%s5954_s25 + $0x41] sm:$0xff]  ;;  %v1904_v23 = vld [vmem:[%s5954_s25 + $0x54] sm:$0xff] }
  0x17   : > { %5049 = vmatmul.mubr.msk.f32.gmra.mrb[2].mxu1 %vm250_vm1, %v213_v12  ;;  %5285 = vmatmul.mubr.msk.f32.gmra.mrb[2].mxu0 %vm250_vm1, %v1899_v13  ;;  %v219_v24 = vld [vmem:[%s5954_s25 + $0x49] sm:$0xff]  ;;  %v1905_v25 = vld [vmem:[%s5954_s25 + $0x5c] sm:$0xff]  ;;  %v220_v26 = vld [vmem:[%s5954_s25 + $0x51] sm:$0xff] }
  0x18   : > { %5051 = vmatprep.mubr.msk.f32.mxu1 %vm250_vm1, %v214_v14  ;;  %5287 = vmatprep.mubr.msk.f32.mxu0 %vm250_vm1, %v1900_v15  ;;  %v1906_v27 = vld [vmem:[%s5954_s25 + $0x64] sm:$0xff]  ;;  %v221_v28 = vld [vmem:[%s5954_s25 + $0x59] sm:$0xff]  ;;  %v1907_v29 = vld [vmem:[%s5954_s25 + $0x6c] sm:$0xff] }
  0x19   : > { %v222_v30 = vld [vmem:[%s5954_s25 + $0x61] sm:$0xff]  ;;  %v1908_v31 = vld [vmem:[%s5954_s25 + $0x74] sm:$0xff]  ;;  %v223_v32 = vld [vmem:[%s5954_s25 + $0x69] sm:$0xff] }
  0x1a   : > { %v1909_v33 = vld [vmem:[%s5954_s25 + $0x7c] sm:$0xff]  ;;  %v224_v34 = vld [vmem:[%s5954_s25 + $0x71] sm:$0xff]  ;;  %v1910_v35 = vld [vmem:[%s5954_s25 + $0x84] sm:$0xff] }
  0x1b   : > { %5052 = vmatmul.mubr.msk.f32.gmra.mrb[4].mxu1 %vm250_vm1, %v215_v16  ;;  %5288 = vmatmul.mubr.msk.f32.gmra.mrb[4].mxu0 %vm250_vm1, %v1901_v17  ;;  %v225_v36 = vld [vmem:[%s5954_s25 + $0x79] sm:$0xff]  ;;  %v1911_v37 = vld [vmem:[%s5954_s25 + $0x8c] sm:$0xff]  ;;  %v226_v38 = vld [vmem:[%s5954_s25 + $0x81] sm:$0xff] }
  0x1c   : > { %5054 = vmatprep.mubr.msk.f32.mxu1 %vm250_vm1, %v216_v18  ;;  %5290 = vmatprep.mubr.msk.f32.mxu0 %vm250_vm1, %v1902_v19  ;;  %v1912_v39 = vld [vmem:[%s5954_s25 + $0x94] sm:$0xff]  ;;  %v227_v40 = vld [vmem:[%s5954_s25 + $0x89] sm:$0xff]  ;;  %v1913_v41 = vld [vmem:[%s5954_s25 + $0x9c] sm:$0xff] }
  0x1d   : > { %v228_v42 = vld [vmem:[%s5954_s25 + $0x91] sm:$0xff]  ;;  %v1914_v43 = vld [vmem:[%s5954_s25 + $0xa4] sm:$0xff]  ;;  %v229_v44 = vld [vmem:[%s5954_s25 + $0x99] sm:$0xff] }
  0x1e   : > { %v1915_v45 = vld [vmem:[%s5954_s25 + $0xac] sm:$0xff]  ;;  %v230_v46 = vld [vmem:[%s5954_s25 + $0xa1] sm:$0xff]  ;;  %v2346_v47 = vld [vmem:[%s5954_s25 + $0x15] sm:$0xff] }
  0x1f   : > { %5055 = vmatmul.mubr.msk.f32.gmra.mrb[6].mxu1 %vm250_vm1, %v217_v20  ;;  %5291 = vmatmul.mubr.msk.f32.gmra.mrb[6].mxu0 %vm250_vm1, %v1903_v21  ;;  %v231_v48 = vld [vmem:[%s5954_s25 + $0xa9] sm:$0xff]  ;;  %v2347_v49 = vld [vmem:[%s5954_s25 + $0x1d] sm:$0xff]  ;;  %v232_v50 = vld [vmem:[%s5954_s25 + $0xb1] sm:$0xff] }
  0x20   : > { %5057 = vmatprep.mubr.msk.f32.mxu1 %vm250_vm1, %v218_v22  ;;  %5293 = vmatprep.mubr.msk.f32.mxu0 %vm250_vm1, %v1904_v23  ;;  %v2348_v51 = vld [vmem:[%s5954_s25 + $0x25] sm:$0xff]  ;;  %v233_v53 = vld [vmem:[%s5954_s25 + $0xb9] sm:$0xff]  ;;  %v2349_v54 = vld [vmem:[%s5954_s25 + $0x2d] sm:$0xff] }
  0x21   : > { %v234_v55 = vld [vmem:[%s5954_s25 + $0xc1] sm:$0xff]  ;;  %v2350_v56 = vld [vmem:[%s5954_s25 + $0x35] sm:$0xff]  ;;  %v235_v57 = vld [vmem:[%s5954_s25 + $0xc9] sm:$0xff] }
  0x22   : > { %v2351_v58 = vld [vmem:[%s5954_s25 + $0x3d] sm:$0xff]  ;;  %v236_v59 = vld [vmem:[%s5954_s25 + $0xd1] sm:$0xff]  ;;  %v2352_v60 = vld [vmem:[%s5954_s25 + $0x45] sm:$0xff] }
  0x23   : > { %5058 = vmatmul.mubr.msk.f32.gmra.mrb[8].mxu1 %vm250_vm1, %v219_v24  ;;  %5294 = vmatmul.mubr.msk.f32.gmra.mrb[8].mxu0 %vm250_vm1, %v1905_v25  ;;  %v237_v61 = vld [vmem:[%s5954_s25 + $0xd9] sm:$0xff]  ;;  %v2353_v62 = vld [vmem:[%s5954_s25 + $0x4d] sm:$0xff]  ;;  %v238_v63 = vld [vmem:[%s5954_s25 + $0xe1] sm:$0xff] }
  0x24   : > { %5060 = vmatprep.mubr.msk.f32.mxu1 %vm250_vm1, %v220_v26  ;;  %5296 = vmatprep.mubr.msk.f32.mxu0 %vm250_vm1, %v1906_v27  ;;  %v2354_v1 = vld [vmem:[%s5954_s25 + $0x55] sm:$0xff]  ;;  %v239_v2 = vld [vmem:[%s5954_s25 + $0xe9] sm:$0xff]  ;;  %v2355_v3 = vld [vmem:[%s5954_s25 + $0x5d] sm:$0xff] }
  0x25   : > { %v240_v4 = vld [vmem:[%s5954_s25 + $0xf1] sm:$0xff]  ;;  %v2356_v5 = vld [vmem:[%s5954_s25 + $0x65] sm:$0xff]  ;;  %v241_v6 = vld [vmem:[%s5954_s25 + $0xf9] sm:$0xff] }
  0x26   : > { %v2357_v7 = vld [vmem:[%s5954_s25 + $0x6d] sm:$0xff]  ;;  %v242_v8 = vld [vmem:[%s5954_s25 + $0x101] sm:$0xff]  ;;  %v2358_v9 = vld [vmem:[%s5954_s25 + $0x75] sm:$0xff] }
  0x27   : > { %5061 = vmatmul.mubr.msk.f32.gmra.mrb[10].mxu1 %vm250_vm1, %v221_v28  ;;  %5297 = vmatmul.mubr.msk.f32.gmra.mrb[10].mxu0 %vm250_vm1, %v1907_v29  ;;  %v2359_v12 = vld [vmem:[%s5954_s25 + $0x7d] sm:$0xff]  ;;  %v244_v13 = vld [vmem:[%s5954_s25 + $0x111] sm:$0xff]  ;;  %v2360_v14 = vld [vmem:[%s5954_s25 + $0x85] sm:$0xff] }
  0x28   : > { %5063 = vmatprep.mubr.msk.f32.mxu1 %vm250_vm1, %v222_v30  ;;  %5299 = vmatprep.mubr.msk.f32.mxu0 %vm250_vm1, %v1908_v31  ;;  %v245_v15 = vld [vmem:[%s5954_s25 + $0x119] sm:$0xff]  ;;  %v2361_v16 = vld [vmem:[%s5954_s25 + $0x8d] sm:$0xff]  ;;  %v246_v17 = vld [vmem:[%s5954_s25 + $0x121] sm:$0xff] }
  0x29   : > { %v2362_v18 = vld [vmem:[%s5954_s25 + $0x95] sm:$0xff]  ;;  %v247_v19 = vld [vmem:[%s5954_s25 + $0x129] sm:$0xff]  ;;  %v2363_v20 = vld [vmem:[%s5954_s25 + $0x9d] sm:$0xff] }
  0x2a   : > { %v171_v21 = vld [vmem:[%s5954_s25] sm:$0xff]  ;;  %v172_v23 = vld [vmem:[%s5954_s25 + $0x8] sm:$0xff]  ;;  %v173_v25 = vld [vmem:[%s5954_s25 + $0x10] sm:$0xff] }
  0x2b   : > { %5064 = vmatmul.mubr.msk.f32.gmra.mrb[12].mxu1 %vm250_vm1, %v223_v32  ;;  %5300 = vmatmul.mubr.msk.f32.gmra.mrb[12].mxu0 %vm250_vm1, %v1909_v33  ;;  %v2364_v22 = vld [vmem:[%s5954_s25 + $0xa5] sm:$0xff]  ;;  %v2365_v24 = vld [vmem:[%s5954_s25 + $0xad] sm:$0xff]  ;;  %v2366_v26 = vld [vmem:[%s5954_s25 + $0xb5] sm:$0xff] }
  0x2c   : > { %5066 = vmatprep.mubr.msk.f32.mxu1 %vm250_vm1, %v224_v34  ;;  %5302 = vmatprep.mubr.msk.f32.mxu0 %vm250_vm1, %v1910_v35  ;;  %v6146_v27 = vld [vmem:[%s6946_s1 + $0xc] sm:$0x7]  ;;  %v174_v28 = vld [vmem:[%s5954_s25 + $0x18] sm:$0xff]  ;;  %v175_v30 = vld [vmem:[%s5954_s25 + $0x20] sm:$0xff] }
  0x2d   : > { %v2367_v29 = vld [vmem:[%s5954_s25 + $0xbd] sm:$0xff]  ;;  %v2368_v31 = vld [vmem:[%s5954_s25 + $0xc5] sm:$0xff]  ;;  %v6167_v33 = vld [vmem:[%s5954_s25 + $0x30] sm:$0xff] }
  0x2e   : > { %v6163_v32 = vld [vmem:[%s5954_s25 + $0x28] sm:$0xff]  ;;  %v2370_v34 = vld [vmem:[%s5954_s25 + $0xd5] sm:$0xff] }
  0x2f   : > { %5067 = vmatmul.mubr.msk.f32.gmra.mrb[14].mxu1 %vm250_vm1, %v225_v36  ;;  %5303 = vmatmul.mubr.msk.f32.gmra.mrb[14].mxu0 %vm250_vm1, %v1911_v37  ;;  %v6177_v35 = vld [vmem:[%s5954_s25 + $0x38] sm:$0xff]  ;;  %v6181_v37 = vld [vmem:[%s5954_s25 + $0x40] sm:$0xff] }
  0x30   : > { %5069 = vmatprep.mubr.msk.f32.mxu1 %vm250_vm1, %v226_v38  ;;  %5305 = vmatprep.mubr.msk.f32.mxu0 %vm250_vm1, %v1912_v39  ;;  %v2371_v36 = vld [vmem:[%s5954_s25 + $0xdd] sm:$0xff]  ;;  %v2372_v38 = vld [vmem:[%s5954_s25 + $0xe5] sm:$0xff] }
  0x31   : > { %v6191_v39 = vld [vmem:[%s5954_s25 + $0x48] sm:$0xff] }
  0x33   : > { %5070 = vmatmul.mubr.msk.f32.gmra.mrb[16].mxu1 %vm250_vm1, %v227_v40  ;;  %5306 = vmatmul.mubr.msk.f32.gmra.mrb[16].mxu0 %vm250_vm1, %v1913_v41  ;;  %v2373_v40 = vld [vmem:[%s5954_s25 + $0xed] sm:$0xff] }
  0x34   : > { %5072 = vmatprep.mubr.msk.f32.mxu1 %vm250_vm1, %v228_v42  ;;  %5308 = vmatprep.mubr.msk.f32.mxu0 %vm250_vm1, %v1914_v43  ;;  %v6195_v41 = vld [vmem:[%s5954_s25 + $0x50] sm:$0xff]  ;;  %v6205_v43 = vld [vmem:[%s5954_s25 + $0x58] sm:$0xff] }
  0x35   : > { %v2374_v42 = vld [vmem:[%s5954_s25 + $0xf5] sm:$0xff] }
  0x37   : > { %5073 = vmatmul.mubr.msk.f32.gmra.mrb[18].mxu1 %vm250_vm1, %v229_v44  ;;  %5309 = vmatmul.mubr.msk.f32.gmra.mrb[18].mxu0 %vm250_vm1, %v1915_v45  ;;  %v2375_v44 = vld [vmem:[%s5954_s25 + $0xfd] sm:$0xff] }
  0x38   : > { %5075 = vmatprep.mubr.msk.f32.mxu1 %vm250_vm1, %v230_v46  ;;  %5340 = vmatprep.mubr.msk.f32.mxu0 %vm250_vm1, %v2346_v47  ;;  %v6209_v45 = vld [vmem:[%s5954_s25 + $0x60] sm:$0xff]  ;;  %v6219_v47 = vld [vmem:[%s5954_s25 + $0x68] sm:$0xff] }
  0x39   : > { %v2376_v46 = vld [vmem:[%s5954_s25 + $0x105] sm:$0xff] }
  0x3b   : > { %5076 = vmatmul.mubr.msk.f32.gmra.mrb[20].mxu1 %vm250_vm1, %v231_v48  ;;  %5341 = vmatmul.mubr.msk.f32.vlgmr.msra.gmra.mrb[0].mxu0 %vm250_vm1, %v2347_v49  ;;  %v2377_v48 = vld [vmem:[%s5954_s25 + $0x10d] sm:$0xff] }
  0x3c   : > { %5398 = vmatpush3.msk.msra.mxu0 %vm365_vm0, %v5969_v10  ;;  %5078 = vmatprep.mubr.msk.f32.mxu1 %vm250_vm1, %v232_v50  ;;  %v243_v10 = vld [vmem:[%s5954_s25 + $0x109] sm:$0xff]  ;;  %v2378_v50 = vld [vmem:[%s5954_s25 + $0x115] sm:$0xff] }
  0x3d   : > { %5343 = vmatprep.mubr.msk.f32.mxu0 %vm250_vm1, %v2348_v51  ;;  %5456 = vmatprep.subr.msk.mxu0 %vm365_vm0, %v6063_v52  ;;  %v6223_v49 = vld [vmem:[%s5954_s25 + $0x70] sm:$0xff]  ;;  %v6233_v51 = vld [vmem:[%s5954_s25 + $0x78] sm:$0xff] }
  0x3f   : > { %5079 = vmatmul.mubr.msk.f32.gmra.mrb[22].mxu1 %vm250_vm1, %v233_v53  ;;  %5344 = vmatmul.mubr.msk.f32.gmra.mrb[2].mxu0 %vm250_vm1, %v2349_v54  ;;  %v2379_v53 = vld [vmem:[%s5954_s25 + $0x11d] sm:$0xff] }
  0x40   : > { %5081 = vmatprep.mubr.msk.f32.mxu1 %vm250_vm1, %v234_v55  ;;  %5346 = vmatprep.mubr.msk.f32.mxu0 %vm250_vm1, %v2350_v56  ;;  %v6237_v54 = vld [vmem:[%s5954_s25 + $0x80] sm:$0xff]  ;;  %v6247_v56 = vld [vmem:[%s5954_s25 + $0x88] sm:$0xff] }
  0x41   : > { %v2380_v55 = vld [vmem:[%s5954_s25 + $0x125] sm:$0xff] }
  0x43   : > { %5082 = vmatmul.mubr.msk.f32.gmra.mrb[24].mxu1 %vm250_vm1, %v235_v57  ;;  %5347 = vmatmul.mubr.msk.f32.gmra.mrb[4].mxu0 %vm250_vm1, %v2351_v58  ;;  %v2381_v57 = vld [vmem:[%s5954_s25 + $0x12d] sm:$0xff] }
  0x44   : > { %5084 = vmatprep.mubr.msk.f32.mxu1 %vm250_vm1, %v236_v59  ;;  %5349 = vmatprep.mubr.msk.f32.mxu0 %vm250_vm1, %v2352_v60  ;;  %v6251_v58 = vld [vmem:[%s5954_s25 + $0x90] sm:$0xff]  ;;  %v6261_v60 = vld [vmem:[%s5954_s25 + $0x98] sm:$0xff] }
  0x45   : > { %v2382_v59 = vld [vmem:[%s5954_s25 + $0x135] sm:$0xff] }
  0x47   : > { %5085 = vmatmul.mubr.msk.f32.gmra.mrb[26].mxu1 %vm250_vm1, %v237_v61  ;;  %5350 = vmatmul.mubr.msk.f32.gmra.mrb[6].mxu0 %vm250_vm1, %v2353_v62  ;;  %v2383_v61 = vld [vmem:[%s5954_s25 + $0x13d] sm:$0xff] }
  0x48   : > { %5087 = vmatprep.mubr.msk.f32.mxu1 %vm250_vm1, %v238_v63  ;;  %5352 = vmatprep.mubr.msk.f32.mxu0 %vm250_vm1, %v2354_v1  ;;  %v6265_v62 = vld [vmem:[%s5954_s25 + $0xa0] sm:$0xff]  ;;  %v6275_v1 = vld [vmem:[%s5954_s25 + $0xa8] sm:$0xff] }
  0x49   : > { %v2796_v63 = vld [vmem:[%s5954_s25 + $0x26] sm:$0xff] }
  0x4b   : > { %5088 = vmatmul.mubr.msk.f32.gmra.mrb[28].mxu1 %vm250_vm1, %v239_v2  ;;  %5353 = vmatmul.mubr.msk.f32.gmra.mrb[8].mxu0 %vm250_vm1, %v2355_v3  ;;  %v2797_v2 = vld [vmem:[%s5954_s25 + $0x2e] sm:$0xff] }
  0x4c   : > { %5090 = vmatprep.mubr.msk.f32.mxu1 %vm250_vm1, %v240_v4  ;;  %5355 = vmatprep.mubr.msk.f32.mxu0 %vm250_vm1, %v2356_v5  ;;  %v6279_v3 = vld [vmem:[%s5954_s25 + $0xb0] sm:$0xff]  ;;  %v6285_v5 = vld [vmem:[%s6946_s1 + $0x20] sm:$0x7] }
  0x4d   : > { %v2798_v4 = vld [vmem:[%s5954_s25 + $0x36] sm:$0xff] }
  0x4f   : > { %5091 = vmatmul.mubr.msk.f32.gmra.mrb[30].mxu1 %vm250_vm1, %v241_v6  ;;  %5356 = vmatmul.mubr.msk.f32.gmra.mrb[10].mxu0 %vm250_vm1, %v2357_v7  ;;  %v6295_v6 = vld [vmem:[%s5954_s25 + $0xb8] sm:$0xff] }
  0x50   : > { %5093 = vmatprep.mubr.msk.f32.mxu1 %vm250_vm1, %v242_v8  ;;  %5358 = vmatprep.mubr.msk.f32.mxu0 %vm250_vm1, %v2358_v9  ;;  %v2799_v7 = vld [vmem:[%s5954_s25 + $0x3e] sm:$0xff]  ;;  %v2800_v9 = vld [vmem:[%s5954_s25 + $0x46] sm:$0xff] }
  0x51   : > { %v6300_v8 = vld [vmem:[%s5954_s25 + $0xc0] sm:$0xff] }
  0x53   : > { %5094 = vmatmul.mubr.msk.f32.gmra.mrb[32].mxu1 %vm250_vm1, %v243_v10  ;;  %5359 = vmatmul.mubr.msk.f32.gmra.mrb[12].mxu0 %vm250_vm1, %v2359_v12  ;;  %v2801_v10 = vld [vmem:[%s5954_s25 + $0x4e] sm:$0xff] }
  0x54   : > { %5096 = vmatprep.mubr.msk.f32.mxu1 %vm250_vm1, %v244_v13  ;;  %5361 = vmatprep.mubr.msk.f32.mxu0 %vm250_vm1, %v2360_v14  ;;  %v6316_v12 = vld [vmem:[%s5954_s25 + $0xd0] sm:$0xff]  ;;  %v6326_v14 = vld [vmem:[%s5954_s25 + $0xd8] sm:$0xff] }
  0x55   : > { %v2802_v13 = vld [vmem:[%s5954_s25 + $0x56] sm:$0xff] }
  0x57   : > { %5097 = vmatmul.mubr.msk.f32.gmra.mrb[34].mxu1 %vm250_vm1, %v245_v15  ;;  %5362 = vmatmul.mubr.msk.f32.gmra.mrb[14].mxu0 %vm250_vm1, %v2361_v16  ;;  %v2803_v15 = vld [vmem:[%s5954_s25 + $0x5e] sm:$0xff] }
  0x58   : > { %5099 = vmatprep.mubr.msk.f32.mxu1 %vm250_vm1, %v246_v17  ;;  %5364 = vmatprep.mubr.msk.f32.mxu0 %vm250_vm1, %v2362_v18  ;;  %v6330_v16 = vld [vmem:[%s5954_s25 + $0xe0] sm:$0xff]  ;;  %v6340_v18 = vld [vmem:[%s5954_s25 + $0xe8] sm:$0xff] }
  0x59   : > { %v2804_v17 = vld [vmem:[%s5954_s25 + $0x66] sm:$0xff] }
  0x5b   : > { %5100 = vmatmul.mubr.msk.f32.gmra.mrb[36].mxu1 %vm250_vm1, %v247_v19  ;;  %5365 = vmatmul.mubr.msk.f32.gmra.mrb[16].mxu0 %vm250_vm1, %v2363_v20  ;;  %v2805_v19 = vld [vmem:[%s5954_s25 + $0x6e] sm:$0xff] }
  0x5c   : > { %5104 = vmatprep.mubr.msk.f32.mxu1 %vm250_vm1, %v171_v21  ;;  %5367 = vmatprep.mubr.msk.f32.mxu0 %vm250_vm1, %v2364_v22  ;;  %v6344_v20 = vld [vmem:[%s5954_s25 + $0xf0] sm:$0xff]  ;;  %v6354_v22 = vld [vmem:[%s5954_s25 + $0xf8] sm:$0xff] }
  0x5d   : > { %v2806_v21 = vld [vmem:[%s5954_s25 + $0x76] sm:$0xff] }
  0x5f   : > { %5105 = vmatmul.mubr.msk.f32.vlgmr.msra.gmra.mrb[0].mxu1 %vm250_vm1, %v172_v23  ;;  %5368 = vmatmul.mubr.msk.f32.gmra.mrb[18].mxu0 %vm250_vm1, %v2365_v24  ;;  %v2807_v23 = vld [vmem:[%s5954_s25 + $0x7e] sm:$0xff] }
  0x60   : > { %5107 = vmatprep.mubr.msk.f32.mxu1 %vm250_vm1, %v173_v25  ;;  %5370 = vmatprep.mubr.msk.f32.mxu0 %vm250_vm1, %v2366_v26  ;;  %v6358_v24 = vld [vmem:[%s5954_s25 + $0x100] sm:$0xff]  ;;  %v6368_v26 = vld [vmem:[%s5954_s25 + $0x108] sm:$0xff] }
  0x61   : > { %5162 = vmatpush3.msk.msra.mxu1 %vm365_vm0, %v5974_v11  ;;  %v2369_v11 = vld [vmem:[%s5954_s25 + $0xcd] sm:$0xff] }
  0x62   : > { %5220 = vmatprep.subr.msk.mxu1 %vm365_vm0, %v6146_v27  ;;  %v2808_v25 = vld [vmem:[%s5954_s25 + $0x86] sm:$0xff] }
  0x63   : > { %5108 = vmatmul.mubr.msk.f32.gmra.mrb[2].mxu1 %vm250_vm1, %v174_v28  ;;  %5371 = vmatmul.mubr.msk.f32.gmra.mrb[20].mxu0 %vm250_vm1, %v2367_v29  ;;  %v2809_v28 = vld [vmem:[%s5954_s25 + $0x8e] sm:$0xff] }
  0x64   : > { %5110 = vmatprep.mubr.msk.f32.mxu1 %vm250_vm1, %v175_v30  ;;  %5373 = vmatprep.mubr.msk.f32.mxu0 %vm250_vm1, %v2368_v31  ;;  %v6372_v29 = vld [vmem:[%s5954_s25 + $0x110] sm:$0xff]  ;;  %v6382_v31 = vld [vmem:[%s5954_s25 + $0x118] sm:$0xff] }
  0x65   : > { %v2810_v30 = vld [vmem:[%s5954_s25 + $0x96] sm:$0xff] }
  0x67   : > { %5111 = vmatmul.mubr.msk.f32.gmra.mrb[4].mxu1 %vm250_vm1, %v6163_v32  ;;  %5374 = vmatmul.mubr.msk.f32.gmra.mrb[22].mxu0 %vm250_vm1, %v2369_v11  ;;  %v2811_v11 = vld [vmem:[%s5954_s25 + $0x9e] sm:$0xff] }
  0x68   : > { %5113 = vmatprep.mubr.msk.f32.mxu1 %vm250_vm1, %v6167_v33  ;;  %5376 = vmatprep.mubr.msk.f32.mxu0 %vm250_vm1, %v2370_v34  ;;  %v6386_v34 = vld [vmem:[%s5954_s25 + $0x120] sm:$0xff] }
  0x6b   : > { %5114 = vmatmul.mubr.msk.f32.gmra.mrb[6].mxu1 %vm250_vm1, %v6177_v35  ;;  %5377 = vmatmul.mubr.msk.f32.gmra.mrb[24].mxu0 %vm250_vm1, %v2371_v36  ;;  %v2812_v36 = vld [vmem:[%s5954_s25 + $0xa6] sm:$0xff] }
  0x6c   : > { %5116 = vmatprep.mubr.msk.f32.mxu1 %vm250_vm1, %v6181_v37  ;;  %5379 = vmatprep.mubr.msk.f32.mxu0 %vm250_vm1, %v2372_v38  ;;  %v6396_v38 = vld [vmem:[%s5954_s25 + $0x128] sm:$0xff] }
  0x6f   : > { %5117 = vmatmul.mubr.msk.f32.gmra.mrb[8].mxu1 %vm250_vm1, %v6191_v39  ;;  %5380 = vmatmul.mubr.msk.f32.gmra.mrb[26].mxu0 %vm250_vm1, %v2373_v40  ;;  %v2813_v40 = vld [vmem:[%s5954_s25 + $0xae] sm:$0xff] }
  0x70   : > { %5119 = vmatprep.mubr.msk.f32.mxu1 %vm250_vm1, %v6195_v41  ;;  %5382 = vmatprep.mubr.msk.f32.mxu0 %vm250_vm1, %v2374_v42  ;;  %v996_v42 = vld [vmem:[%s5954_s25 + $0x2] sm:$0xff] }
  0x73   : > { %5120 = vmatmul.mubr.msk.f32.gmra.mrb[10].mxu1 %vm250_vm1, %v6205_v43  ;;  %5383 = vmatmul.mubr.msk.f32.gmra.mrb[28].mxu0 %vm250_vm1, %v2375_v44  ;;  %v2814_v44 = vld [vmem:[%s5954_s25 + $0xb6] sm:$0xff] }
  0x74   : > { %5122 = vmatprep.mubr.msk.f32.mxu1 %vm250_vm1, %v6209_v45  ;;  %5385 = vmatprep.mubr.msk.f32.mxu0 %vm250_vm1, %v2376_v46  ;;  %v997_v46 = vld [vmem:[%s5954_s25 + $0xa] sm:$0xff] }
  0x77   : > { %5123 = vmatmul.mubr.msk.f32.gmra.mrb[12].mxu1 %vm250_vm1, %v6219_v47  ;;  %5386 = vmatmul.mubr.msk.f32.gmra.mrb[30].mxu0 %vm250_vm1, %v2377_v48  ;;  %v2815_v48 = vld [vmem:[%s5954_s25 + $0xbe] sm:$0xff] }
  0x78   : > { %5125 = vmatprep.mubr.msk.f32.mxu1 %vm250_vm1, %v6223_v49  ;;  %5388 = vmatprep.mubr.msk.f32.mxu0 %vm250_vm1, %v2378_v50  ;;  %v998_v50 = vld [vmem:[%s5954_s25 + $0x12] sm:$0xff] }
  0x7b   : > { %5126 = vmatmul.mubr.msk.f32.gmra.mrb[14].mxu1 %vm250_vm1, %v6233_v51  ;;  %5389 = vmatmul.mubr.msk.f32.gmra.mrb[32].mxu0 %vm250_vm1, %v2379_v53  ;;  %v2816_v53 = vld [vmem:[%s5954_s25 + $0xc6] sm:$0xff] }
  0x7c   : > { %5128 = vmatprep.mubr.msk.f32.mxu1 %vm250_vm1, %v6237_v54  ;;  %5391 = vmatprep.mubr.msk.f32.mxu0 %vm250_vm1, %v2380_v55  ;;  %v999_v55 = vld [vmem:[%s5954_s25 + $0x1a] sm:$0xff] }
  0x7f   : > { %5129 = vmatmul.mubr.msk.f32.gmra.mrb[16].mxu1 %vm250_vm1, %v6247_v56  ;;  %5392 = vmatmul.mubr.msk.f32.gmra.mrb[34].mxu0 %vm250_vm1, %v2381_v57  ;;  %v2817_v57 = vld [vmem:[%s5954_s25 + $0xce] sm:$0xff] }
  0x80   : > { %5131 = vmatprep.mubr.msk.f32.mxu1 %vm250_vm1, %v6251_v58  ;;  %5394 = vmatprep.mubr.msk.f32.mxu0 %vm250_vm1, %v2382_v59  ;;  %v1000_v59 = vld [vmem:[%s5954_s25 + $0x22] sm:$0xff] }
  0x83   : > { %5132 = vmatmul.mubr.msk.f32.gmra.mrb[18].mxu1 %vm250_vm1, %v6261_v60  ;;  %5395 = vmatmul.mubr.msk.f32.gmra.mrb[36].mxu0 %vm250_vm1, %v2383_v61  ;;  %v2818_v61 = vld [vmem:[%s5954_s25 + $0xd6] sm:$0xff] }
  0x84   : > { %5134 = vmatprep.mubr.msk.f32.mxu1 %vm250_vm1, %v6265_v62  ;;  %5399 = vmatprep.mubr.msk.f32.mxu0 %vm250_vm1, %v2796_v63  ;;  %v1001_v63 = vld [vmem:[%s5954_s25 + $0x2a] sm:$0xff] }
  0x87   : > { %5135 = vmatmul.mubr.msk.f32.gmra.mrb[20].mxu1 %vm250_vm1, %v6275_v1  ;;  %5400 = vmatmul.mubr.msk.f32.vlgmr.msra.gmra.mrb[0].mxu0 %vm250_vm1, %v2797_v2  ;;  %v1002_v2 = vld [vmem:[%s5954_s25 + $0x32] sm:$0xff] }
  0x88   : > { %5457 = vmatpush3.msk.msra.mxu0 %vm365_vm0, %v6063_v52  ;;  %5137 = vmatprep.mubr.msk.f32.mxu1 %vm250_vm1, %v6279_v3  ;;  %v6312_v52 = vld [vmem:[%s5954_s25 + $0xc8] sm:$0xff] }
  0x89   : > { %5402 = vmatprep.mubr.msk.f32.mxu0 %vm250_vm1, %v2798_v4  ;;  %5515 = vmatprep.subr.msk.mxu0 %vm365_vm0, %v6285_v5  ;;  %v2820_v4 = vld [vmem:[%s5954_s25 + $0xe6] sm:$0xff] }
  0x8b   : > { %5138 = vmatmul.mubr.msk.f32.gmra.mrb[22].mxu1 %vm250_vm1, %v6295_v6  ;;  %5403 = vmatmul.mubr.msk.f32.gmra.mrb[2].mxu0 %vm250_vm1, %v2799_v7  ;;  %v1003_v7 = vld [vmem:[%s5954_s25 + $0x3a] sm:$0xff] }
  0x8c   : > { %5140 = vmatprep.mubr.msk.f32.mxu1 %vm250_vm1, %v6300_v8  ;;  %5405 = vmatprep.mubr.msk.f32.mxu0 %vm250_vm1, %v2800_v9  ;;  %v2821_v9 = vld [vmem:[%s5954_s25 + $0xee] sm:$0xff] }
  0x8f   : > { %5141 = vmatmul.mubr.msk.f32.gmra.mrb[24].mxu1 %vm250_vm1, %v6312_v52  ;;  %5406 = vmatmul.mubr.msk.f32.gmra.mrb[4].mxu0 %vm250_vm1, %v2801_v10  ;;  %v1004_v10 = vld [vmem:[%s5954_s25 + $0x42] sm:$0xff] }
  0x90   : > { %5143 = vmatprep.mubr.msk.f32.mxu1 %vm250_vm1, %v6316_v12  ;;  %5408 = vmatprep.mubr.msk.f32.mxu0 %vm250_vm1, %v2802_v13  ;;  %v2822_v13 = vld [vmem:[%s5954_s25 + $0xf6] sm:$0xff] }
  0x93   : > { %5144 = vmatmul.mubr.msk.f32.gmra.mrb[26].mxu1 %vm250_vm1, %v6326_v14  ;;  %5409 = vmatmul.mubr.msk.f32.gmra.mrb[6].mxu0 %vm250_vm1, %v2803_v15  ;;  %v1005_v15 = vld [vmem:[%s5954_s25 + $0x4a] sm:$0xff] }
  0x94   : > { %5146 = vmatprep.mubr.msk.f32.mxu1 %vm250_vm1, %v6330_v16  ;;  %5411 = vmatprep.mubr.msk.f32.mxu0 %vm250_vm1, %v2804_v17  ;;  %v2823_v17 = vld [vmem:[%s5954_s25 + $0xfe] sm:$0xff] }
  0x97   : > { %5147 = vmatmul.mubr.msk.f32.gmra.mrb[28].mxu1 %vm250_vm1, %v6340_v18  ;;  %5412 = vmatmul.mubr.msk.f32.gmra.mrb[8].mxu0 %vm250_vm1, %v2805_v19  ;;  %v1006_v19 = vld [vmem:[%s5954_s25 + $0x52] sm:$0xff] }
  0x98   : > { %5149 = vmatprep.mubr.msk.f32.mxu1 %vm250_vm1, %v6344_v20  ;;  %5414 = vmatprep.mubr.msk.f32.mxu0 %vm250_vm1, %v2806_v21  ;;  %v2824_v21 = vld [vmem:[%s5954_s25 + $0x106] sm:$0xff] }
  0x9b   : > { %5150 = vmatmul.mubr.msk.f32.gmra.mrb[30].mxu1 %vm250_vm1, %v6354_v22  ;;  %5415 = vmatmul.mubr.msk.f32.gmra.mrb[10].mxu0 %vm250_vm1, %v2807_v23  ;;  %v1007_v23 = vld [vmem:[%s5954_s25 + $0x5a] sm:$0xff] }
  0x9c   : > { %5152 = vmatprep.mubr.msk.f32.mxu1 %vm250_vm1, %v6358_v24  ;;  %5417 = vmatprep.mubr.msk.f32.mxu0 %vm250_vm1, %v2808_v25  ;;  %v2825_v25 = vld [vmem:[%s5954_s25 + $0x10e] sm:$0xff] }
  0x9f   : > { %5153 = vmatmul.mubr.msk.f32.gmra.mrb[32].mxu1 %vm250_vm1, %v6368_v26  ;;  %5418 = vmatmul.mubr.msk.f32.gmra.mrb[12].mxu0 %vm250_vm1, %v2809_v28  ;;  %v1008_v28 = vld [vmem:[%s5954_s25 + $0x62] sm:$0xff] }
  0xa0   : > { %5155 = vmatprep.mubr.msk.f32.mxu1 %vm250_vm1, %v6372_v29  ;;  %5420 = vmatprep.mubr.msk.f32.mxu0 %vm250_vm1, %v2810_v30  ;;  %v2826_v30 = vld [vmem:[%s5954_s25 + $0x116] sm:$0xff] }
  0xa3   : > { %5156 = vmatmul.mubr.msk.f32.gmra.mrb[34].mxu1 %vm250_vm1, %v6382_v31  ;;  %5421 = vmatmul.mubr.msk.f32.gmra.mrb[14].mxu0 %vm250_vm1, %v2811_v11  ;;  %v1009_v11 = vld [vmem:[%s5954_s25 + $0x6a] sm:$0xff] }
  0xa4   : > { %5158 = vmatprep.mubr.msk.f32.mxu1 %vm250_vm1, %v6386_v34  ;;  %5423 = vmatprep.mubr.msk.f32.mxu0 %vm250_vm1, %v2812_v36  ;;  %v2827_v36 = vld [vmem:[%s5954_s25 + $0x11e] sm:$0xff] }
  0xa7   : > { %5159 = vmatmul.mubr.msk.f32.gmra.mrb[36].mxu1 %vm250_vm1, %v6396_v38  ;;  %5424 = vmatmul.mubr.msk.f32.gmra.mrb[16].mxu0 %vm250_vm1, %v2813_v40  ;;  %v1010_v40 = vld [vmem:[%s5954_s25 + $0x72] sm:$0xff] }
  0xa8   : > { %5163 = vmatprep.mubr.msk.f32.mxu1 %vm250_vm1, %v996_v42  ;;  %5426 = vmatprep.mubr.msk.f32.mxu0 %vm250_vm1, %v2814_v44  ;;  %v2828_v42 = vld [vmem:[%s5954_s25 + $0x126] sm:$0xff]  ;;  %v1011_v44 = vld [vmem:[%s5954_s25 + $0x7a] sm:$0xff] }
  0xab   : > { %5164 = vmatmul.mubr.msk.f32.vlgmr.msra.gmra.mrb[0].mxu1 %vm250_vm1, %v997_v46  ;;  %5427 = vmatmul.mubr.msk.f32.gmra.mrb[18].mxu0 %vm250_vm1, %v2815_v48  ;;  %v2829_v46 = vld [vmem:[%s5954_s25 + $0x12e] sm:$0xff]  ;;  %v1012_v48 = vld [vmem:[%s5954_s25 + $0x82] sm:$0xff] }
  0xac   : > { %5166 = vmatprep.mubr.msk.f32.mxu1 %vm250_vm1, %v998_v50  ;;  %5429 = vmatprep.mubr.msk.f32.mxu0 %vm250_vm1, %v2816_v53  ;;  %v2830_v50 = vld [vmem:[%s5954_s25 + $0x136] sm:$0xff]  ;;  %v1013_v53 = vld [vmem:[%s5954_s25 + $0x8a] sm:$0xff] }
  0xad   : > { %5221 = vmatpush3.msk.msra.mxu1 %vm365_vm0, %v6146_v27  ;;  %v2819_v27 = vld [vmem:[%s5954_s25 + $0xde] sm:$0xff] }
  0xae   : > { %5574 = vmatprep.subr.msk.mxu1 %vm365_vm0, %v5929_v0 }
  0xaf   : > { %5167 = vmatmul.mubr.msk.f32.gmra.mrb[2].mxu1 %vm250_vm1, %v999_v55  ;;  %5430 = vmatmul.mubr.msk.f32.gmra.mrb[20].mxu0 %vm250_vm1, %v2817_v57  ;;  %v2831_v55 = vld [vmem:[%s5954_s25 + $0x13e] sm:$0xff]  ;;  %v1014_v57 = vld [vmem:[%s5954_s25 + $0x92] sm:$0xff] }
  0xb0   : > { %5169 = vmatprep.mubr.msk.f32.mxu1 %vm250_vm1, %v1000_v59  ;;  %5432 = vmatprep.mubr.msk.f32.mxu0 %vm250_vm1, %v2818_v61  ;;  %v2832_v59 = vld [vmem:[%s5954_s25 + $0x146] sm:$0xff]  ;;  %v1015_v61 = vld [vmem:[%s5954_s25 + $0x9a] sm:$0xff] }
  0xb3   : > { %5170 = vmatmul.mubr.msk.f32.gmra.mrb[4].mxu1 %vm250_vm1, %v1001_v63  ;;  %5433 = vmatmul.mubr.msk.f32.gmra.mrb[22].mxu0 %vm250_vm1, %v2819_v27  ;;  %v2833_v63 = vld [vmem:[%s5954_s25 + $0x14e] sm:$0xff]  ;;  %v1016_v27 = vld [vmem:[%s5954_s25 + $0xa2] sm:$0xff] }
  0xb4   : > { %5172 = vmatprep.mubr.msk.f32.mxu1 %vm250_vm1, %v1002_v2  ;;  %5435 = vmatprep.mubr.msk.f32.mxu0 %vm250_vm1, %v2820_v4  ;;  %v3246_v2 = vld [vmem:[%s5954_s25 + $0x27] sm:$0xff] }
  0xb5   : > { %v1017_v4 = vld [vmem:[%s5954_s25 + $0xaa] sm:$0xff] }
  0xb7   : > { %5173 = vmatmul.mubr.msk.f32.gmra.mrb[6].mxu1 %vm250_vm1, %v1003_v7  ;;  %5436 = vmatmul.mubr.msk.f32.gmra.mrb[24].mxu0 %vm250_vm1, %v2821_v9  ;;  %v3247_v7 = vld [vmem:[%s5954_s25 + $0x2f] sm:$0xff] }
  0xb8   : > { %5175 = vmatprep.mubr.msk.f32.mxu1 %vm250_vm1, %v1004_v10  ;;  %5438 = vmatprep.mubr.msk.f32.mxu0 %vm250_vm1, %v2822_v13  ;;  %v1018_v9 = vld [vmem:[%s5954_s25 + $0xb2] sm:$0xff]  ;;  %v1019_v13 = vld [vmem:[%s5954_s25 + $0xba] sm:$0xff] }
  0xb9   : > { %v3248_v10 = vld [vmem:[%s5954_s25 + $0x37] sm:$0xff] }
  0xbb   : > { %5176 = vmatmul.mubr.msk.f32.gmra.mrb[8].mxu1 %vm250_vm1, %v1005_v15  ;;  %5439 = vmatmul.mubr.msk.f32.gmra.mrb[26].mxu0 %vm250_vm1, %v2823_v17  ;;  %v3249_v15 = vld [vmem:[%s5954_s25 + $0x3f] sm:$0xff] }
  0xbc   : > { %5178 = vmatprep.mubr.msk.f32.mxu1 %vm250_vm1, %v1006_v19  ;;  %5441 = vmatprep.mubr.msk.f32.mxu0 %vm250_vm1, %v2824_v21  ;;  %v1020_v17 = vld [vmem:[%s5954_s25 + $0xc2] sm:$0xff]  ;;  %v3251_v21 = vld [vmem:[%s5954_s25 + $0x4f] sm:$0xff] }
  0xbd   : > { %v3250_v19 = vld [vmem:[%s5954_s25 + $0x47] sm:$0xff] }
  0xbf   : > { %5179 = vmatmul.mubr.msk.f32.gmra.mrb[10].mxu1 %vm250_vm1, %v1007_v23  ;;  %5442 = vmatmul.mubr.msk.f32.gmra.mrb[28].mxu0 %vm250_vm1, %v2825_v25  ;;  %v1022_v23 = vld [vmem:[%s5954_s25 + $0xd2] sm:$0xff] }
  0xc0   : > { %5181 = vmatprep.mubr.msk.f32.mxu1 %vm250_vm1, %v1008_v28  ;;  %5444 = vmatprep.mubr.msk.f32.mxu0 %vm250_vm1, %v2826_v30  ;;  %v3252_v25 = vld [vmem:[%s5954_s25 + $0x57] sm:$0xff]  ;;  %v3253_v30 = vld [vmem:[%s5954_s25 + $0x5f] sm:$0xff] }
  0xc1   : > { %v1023_v28 = vld [vmem:[%s5954_s25 + $0xda] sm:$0xff] }
  0xc3   : > { %5182 = vmatmul.mubr.msk.f32.gmra.mrb[12].mxu1 %vm250_vm1, %v1009_v11  ;;  %5445 = vmatmul.mubr.msk.f32.gmra.mrb[30].mxu0 %vm250_vm1, %v2827_v36  ;;  %v1024_v11 = vld [vmem:[%s5954_s25 + $0xe2] sm:$0xff] }
  0xc4   : > { %5184 = vmatprep.mubr.msk.f32.mxu1 %vm250_vm1, %v1010_v40  ;;  %5447 = vmatprep.mubr.msk.f32.mxu0 %vm250_vm1, %v2828_v42  ;;  %v3254_v36 = vld [vmem:[%s5954_s25 + $0x67] sm:$0xff]  ;;  %v3255_v42 = vld [vmem:[%s5954_s25 + $0x6f] sm:$0xff] }
  0xc5   : > { %v1025_v40 = vld [vmem:[%s5954_s25 + $0xea] sm:$0xff] }
  0xc7   : > { %5185 = vmatmul.mubr.msk.f32.gmra.mrb[14].mxu1 %vm250_vm1, %v1011_v44  ;;  %5448 = vmatmul.mubr.msk.f32.gmra.mrb[32].mxu0 %vm250_vm1, %v2829_v46  ;;  %v1026_v44 = vld [vmem:[%s5954_s25 + $0xf2] sm:$0xff] }
  0xc8   : > { %5187 = vmatprep.mubr.msk.f32.mxu1 %vm250_vm1, %v1012_v48  ;;  %5450 = vmatprep.mubr.msk.f32.mxu0 %vm250_vm1, %v2830_v50  ;;  %v3256_v46 = vld [vmem:[%s5954_s25 + $0x77] sm:$0xff]  ;;  %v3257_v50 = vld [vmem:[%s5954_s25 + $0x7f] sm:$0xff] }
  0xc9   : > { %v1027_v48 = vld [vmem:[%s5954_s25 + $0xfa] sm:$0xff] }
  0xcb   : > { %5188 = vmatmul.mubr.msk.f32.gmra.mrb[16].mxu1 %vm250_vm1, %v1013_v53  ;;  %5451 = vmatmul.mubr.msk.f32.gmra.mrb[34].mxu0 %vm250_vm1, %v2831_v55  ;;  %v1028_v53 = vld [vmem:[%s5954_s25 + $0x102] sm:$0xff] }
  0xcc   : > { %5190 = vmatprep.mubr.msk.f32.mxu1 %vm250_vm1, %v1014_v57  ;;  %5453 = vmatprep.mubr.msk.f32.mxu0 %vm250_vm1, %v2832_v59  ;;  %v3258_v55 = vld [vmem:[%s5954_s25 + $0x87] sm:$0xff]  ;;  %v3259_v59 = vld [vmem:[%s5954_s25 + $0x8f] sm:$0xff] }
  0xcd   : > { %v1029_v57 = vld [vmem:[%s5954_s25 + $0x10a] sm:$0xff] }
  0xcf   : > { %5191 = vmatmul.mubr.msk.f32.gmra.mrb[18].mxu1 %vm250_vm1, %v1015_v61  ;;  %5454 = vmatmul.mubr.msk.f32.gmra.mrb[36].mxu0 %vm250_vm1, %v2833_v63  ;;  %v1030_v61 = vld [vmem:[%s5954_s25 + $0x112] sm:$0xff] }
  0xd0   : > { %5193 = vmatprep.mubr.msk.f32.mxu1 %vm250_vm1, %v1016_v27  ;;  %5458 = vmatprep.mubr.msk.f32.mxu0 %vm250_vm1, %v3246_v2  ;;  %v3260_v63 = vld [vmem:[%s5954_s25 + $0x97] sm:$0xff]  ;;  %v3261_v2 = vld [vmem:[%s5954_s25 + $0x9f] sm:$0xff] }
  0xd1   : > { %v1031_v27 = vld [vmem:[%s5954_s25 + $0x11a] sm:$0xff] }
  0xd3   : > { %5194 = vmatmul.mubr.msk.f32.gmra.mrb[20].mxu1 %vm250_vm1, %v1017_v4  ;;  %5459 = vmatmul.mubr.msk.f32.vlgmr.msra.gmra.mrb[0].mxu0 %vm250_vm1, %v3247_v7  ;;  %v1032_v4 = vld [vmem:[%s5954_s25 + $0x122] sm:$0xff] }
  0xd4   : > { %5516 = vmatpush3.msk.msra.mxu0 %vm365_vm0, %v6285_v5  ;;  %5196 = vmatprep.mubr.msk.f32.mxu1 %vm250_vm1, %v1018_v9  ;;  %v1021_v5 = vld [vmem:[%s5954_s25 + $0xca] sm:$0xff] }
  0xd5   : > { %5461 = vmatprep.mubr.msk.f32.mxu0 %vm250_vm1, %v3248_v10  ;;  %v3262_v7 = vld [vmem:[%s5954_s25 + $0xa7] sm:$0xff]  ;;  %v3263_v10 = vld [vmem:[%s5954_s25 + $0xaf] sm:$0xff] }
  0xd6   : > { %v1033_v9 = vld [vmem:[%s5954_s25 + $0x12a] sm:$0xff] }
  0xd7   : > { %5197 = vmatmul.mubr.msk.f32.gmra.mrb[22].mxu1 %vm250_vm1, %v1019_v13  ;;  %5462 = vmatmul.mubr.msk.f32.gmra.mrb[2].mxu0 %vm250_vm1, %v3249_v15  ;;  %v1446_v13 = vld [vmem:[%s5954_s25 + $0x13] sm:$0xff] }
  0xd8   : > { %5199 = vmatprep.mubr.msk.f32.mxu1 %vm250_vm1, %v1020_v17  ;;  %5464 = vmatprep.mubr.msk.f32.mxu0 %vm250_vm1, %v3250_v19  ;;  %v3264_v15 = vld [vmem:[%s5954_s25 + $0xb7] sm:$0xff]  ;;  %v3265_v19 = vld [vmem:[%s5954_s25 + $0xbf] sm:$0xff] }
  0xd9   : > { %v1447_v17 = vld [vmem:[%s5954_s25 + $0x1b] sm:$0xff] }
  0xdb   : > { %5200 = vmatmul.mubr.msk.f32.gmra.mrb[24].mxu1 %vm250_vm1, %v1021_v5  ;;  %5465 = vmatmul.mubr.msk.f32.gmra.mrb[4].mxu0 %vm250_vm1, %v3251_v21  ;;  %v1448_v5 = vld [vmem:[%s5954_s25 + $0x23] sm:$0xff] }
  0xdc   : > { %5202 = vmatprep.mubr.msk.f32.mxu1 %vm250_vm1, %v1022_v23  ;;  %5467 = vmatprep.mubr.msk.f32.mxu0 %vm250_vm1, %v3252_v25  ;;  %v3266_v21 = vld [vmem:[%s5954_s25 + $0xc7] sm:$0xff]  ;;  %v3267_v25 = vld [vmem:[%s5954_s25 + $0xcf] sm:$0xff] }
  0xdd   : > { %v1449_v23 = vld [vmem:[%s5954_s25 + $0x2b] sm:$0xff] }
  0xdf   : > { %5203 = vmatmul.mubr.msk.f32.gmra.mrb[26].mxu1 %vm250_vm1, %v1023_v28  ;;  %5468 = vmatmul.mubr.msk.f32.gmra.mrb[6].mxu0 %vm250_vm1, %v3253_v30  ;;  %v1450_v28 = vld [vmem:[%s5954_s25 + $0x33] sm:$0xff] }
  0xe0   : > { %5205 = vmatprep.mubr.msk.f32.mxu1 %vm250_vm1, %v1024_v11  ;;  %5470 = vmatprep.mubr.msk.f32.mxu0 %vm250_vm1, %v3254_v36  ;;  %v3268_v30 = vld [vmem:[%s5954_s25 + $0xd7] sm:$0xff]  ;;  %v3269_v36 = vld [vmem:[%s5954_s25 + $0xdf] sm:$0xff] }
  0xe1   : > { %v1451_v11 = vld [vmem:[%s5954_s25 + $0x3b] sm:$0xff] }
  0xe3   : > { %5206 = vmatmul.mubr.msk.f32.gmra.mrb[28].mxu1 %vm250_vm1, %v1025_v40  ;;  %5471 = vmatmul.mubr.msk.f32.gmra.mrb[8].mxu0 %vm250_vm1, %v3255_v42  ;;  %v1452_v40 = vld [vmem:[%s5954_s25 + $0x43] sm:$0xff]  ;;  %v1453_v42 = vld [vmem:[%s5954_s25 + $0x4b] sm:$0xff] }
  0xe4   : > { %5208 = vmatprep.mubr.msk.f32.mxu1 %vm250_vm1, %v1026_v44  ;;  %5473 = vmatprep.mubr.msk.f32.mxu0 %vm250_vm1, %v3256_v46  ;;  %v3271_v44 = vld [vmem:[%s5954_s25 + $0xef] sm:$0xff] }
  0xe5   : > { %v1454_v46 = vld [vmem:[%s5954_s25 + $0x53] sm:$0xff] }
  0xe7   : > { %5209 = vmatmul.mubr.msk.f32.gmra.mrb[30].mxu1 %vm250_vm1, %v1027_v48  ;;  %5474 = vmatmul.mubr.msk.f32.gmra.mrb[10].mxu0 %vm250_vm1, %v3257_v50  ;;  %v3272_v48 = vld [vmem:[%s5954_s25 + $0xf7] sm:$0xff] }
  0xe8   : > { %5211 = vmatprep.mubr.msk.f32.mxu1 %vm250_vm1, %v1028_v53  ;;  %5476 = vmatprep.mubr.msk.f32.mxu0 %vm250_vm1, %v3258_v55  ;;  %v1455_v50 = vld [vmem:[%s5954_s25 + $0x5b] sm:$0xff]  ;;  %v1456_v55 = vld [vmem:[%s5954_s25 + $0x63] sm:$0xff] }
  0xe9   : > { %v3273_v53 = vld [vmem:[%s5954_s25 + $0xff] sm:$0xff] }
  0xeb   : > { %5212 = vmatmul.mubr.msk.f32.gmra.mrb[32].mxu1 %vm250_vm1, %v1029_v57  ;;  %5477 = vmatmul.mubr.msk.f32.gmra.mrb[12].mxu0 %vm250_vm1, %v3259_v59  ;;  %v3274_v57 = vld [vmem:[%s5954_s25 + $0x107] sm:$0xff] }
  0xec   : > { %5214 = vmatprep.mubr.msk.f32.mxu1 %vm250_vm1, %v1030_v61  ;;  %5479 = vmatprep.mubr.msk.f32.mxu0 %vm250_vm1, %v3260_v63  ;;  %v1457_v59 = vld [vmem:[%s5954_s25 + $0x6b] sm:$0xff]  ;;  %v1458_v63 = vld [vmem:[%s5954_s25 + $0x73] sm:$0xff] }
  0xed   : > { %v3275_v61 = vld [vmem:[%s5954_s25 + $0x10f] sm:$0xff] }
  0xef   : > { %5215 = vmatmul.mubr.msk.f32.gmra.mrb[34].mxu1 %vm250_vm1, %v1031_v27  ;;  %5480 = vmatmul.mubr.msk.f32.gmra.mrb[14].mxu0 %vm250_vm1, %v3261_v2  ;;  %v3276_v27 = vld [vmem:[%s5954_s25 + $0x117] sm:$0xff] }
  0xf0   : > { %5217 = vmatprep.mubr.msk.f32.mxu1 %vm250_vm1, %v1032_v4  ;;  %5482 = vmatprep.mubr.msk.f32.mxu0 %vm250_vm1, %v3262_v7  ;;  %v1459_v2 = vld [vmem:[%s5954_s25 + $0x7b] sm:$0xff]  ;;  %v1460_v7 = vld [vmem:[%s5954_s25 + $0x83] sm:$0xff] }
  0xf1   : > { %v3277_v4 = vld [vmem:[%s5954_s25 + $0x11f] sm:$0xff] }
  0xf3   : > { %5218 = vmatmul.mubr.msk.f32.gmra.mrb[36].mxu1 %vm250_vm1, %v1033_v9  ;;  %5483 = vmatmul.mubr.msk.f32.gmra.mrb[16].mxu0 %vm250_vm1, %v3263_v10  ;;  %v3278_v9 = vld [vmem:[%s5954_s25 + $0x127] sm:$0xff] }
  0xf4   : > { %5222 = vmatprep.mubr.msk.f32.mxu1 %vm250_vm1, %v1446_v13  ;;  %5485 = vmatprep.mubr.msk.f32.mxu0 %vm250_vm1, %v3264_v15  ;;  %v1461_v10 = vld [vmem:[%s5954_s25 + $0x8b] sm:$0xff]  ;;  %v1462_v15 = vld [vmem:[%s5954_s25 + $0x93] sm:$0xff] }
  0xf5   : > { %v3279_v13 = vld [vmem:[%s5954_s25 + $0x12f] sm:$0xff] }
  0xf7   : > { %5223 = vmatmul.mubr.msk.f32.vlgmr.msra.gmra.mrb[0].mxu1 %vm250_vm1, %v1447_v17  ;;  %5486 = vmatmul.mubr.msk.f32.gmra.mrb[18].mxu0 %vm250_vm1, %v3265_v19  ;;  %v3280_v17 = vld [vmem:[%s5954_s25 + $0x137] sm:$0xff] }
  0xf8   : > { %5225 = vmatprep.mubr.msk.f32.mxu1 %vm250_vm1, %v1448_v5  ;;  %5488 = vmatprep.mubr.msk.f32.mxu0 %vm250_vm1, %v3266_v21  ;;  %v1463_v19 = vld [vmem:[%s5954_s25 + $0x9b] sm:$0xff]  ;;  %v1464_v21 = vld [vmem:[%s5954_s25 + $0xa3] sm:$0xff] }
  0xf9   : > { %5575 = vmatpush3.msk.msra.mxu1 %vm365_vm0, %v5929_v0  ;;  %v3270_v0 = vld [vmem:[%s5954_s25 + $0xe7] sm:$0xff]  ;;  %v3281_v5 = vld [vmem:[%s5954_s25 + $0x13f] sm:$0xff] }
  0xfb   : > { %5226 = vmatmul.mubr.msk.f32.gmra.mrb[2].mxu1 %vm250_vm1, %v1449_v23  ;;  %5489 = vmatmul.mubr.msk.f32.gmra.mrb[20].mxu0 %vm250_vm1, %v3267_v25  ;;  %v3282_v23 = vld [vmem:[%s5954_s25 + $0x147] sm:$0xff] }
  0xfc   : > { %5228 = vmatprep.mubr.msk.f32.mxu1 %vm250_vm1, %v1450_v28  ;;  %5491 = vmatprep.mubr.msk.f32.mxu0 %vm250_vm1, %v3268_v30  ;;  %v1465_v25 = vld [vmem:[%s5954_s25 + $0xab] sm:$0xff]  ;;  %v1466_v30 = vld [vmem:[%s5954_s25 + $0xb3] sm:$0xff] }
  0xfd   : > { %v3283_v28 = vld [vmem:[%s5954_s25 + $0x14f] sm:$0xff] }
  0xff   : > { %5229 = vmatmul.mubr.msk.f32.gmra.mrb[4].mxu1 %vm250_vm1, %v1451_v11  ;;  %5492 = vmatmul.mubr.msk.f32.gmra.mrb[22].mxu0 %vm250_vm1, %v3269_v36  ;;  %v1467_v11 = vld [vmem:[%s5954_s25 + $0xbb] sm:$0xff]  ;;  %v1468_v36 = vld [vmem:[%s5954_s25 + $0xc3] sm:$0xff] }
 0x100   : > { %5231 = vmatprep.mubr.msk.f32.mxu1 %vm250_vm1, %v1452_v40  ;;  %5494 = vmatprep.mubr.msk.f32.mxu0 %vm250_vm1, %v3270_v0  ;;  %v1469_v40 = vld [vmem:[%s5954_s25 + $0xcb] sm:$0xff]  ;;  %v1470_v0 = vld [vmem:[%s5954_s25 + $0xd3] sm:$0xff] }
 0x103   : > { %5232 = vmatmul.mubr.msk.f32.gmra.mrb[6].mxu1 %vm250_vm1, %v1453_v42  ;;  %5495 = vmatmul.mubr.msk.f32.gmra.mrb[24].mxu0 %vm250_vm1, %v3271_v44  ;;  %v1932_v42 = vld [vmem:[%s5954_s25 + $0x134] sm:$0xff] }
 0x104   : > { %5234 = vmatprep.mubr.msk.f32.mxu1 %vm250_vm1, %v1454_v46  ;;  %5497 = vmatprep.mubr.msk.f32.mxu0 %vm250_vm1, %v3272_v48  ;;  %v3730_v44 = vld [vmem:[%s5954_s25 + $0x138] sm:$0xff]  ;;  %v3732_v46 = vld [vmem:[%s5954_s25 + $0x148] sm:$0xff] }
 0x107   : > { %5235 = vmatmul.mubr.msk.f32.gmra.mrb[8].mxu1 %vm250_vm1, %v1455_v50  ;;  %5498 = vmatmul.mubr.msk.f32.gmra.mrb[26].mxu0 %vm250_vm1, %v3273_v53 }
 0x108   : > { %5237 = vmatprep.mubr.msk.f32.mxu1 %vm250_vm1, %v1456_v55  ;;  %5500 = vmatprep.mubr.msk.f32.mxu0 %vm250_vm1, %v3274_v57 }
 0x10b   : > { %5238 = vmatmul.mubr.msk.f32.gmra.mrb[10].mxu1 %vm250_vm1, %v1457_v59  ;;  %5501 = vmatmul.mubr.msk.f32.gmra.mrb[28].mxu0 %vm250_vm1, %v3275_v61 }
 0x10c   : > { %5240 = vmatprep.mubr.msk.f32.mxu1 %vm250_vm1, %v1458_v63  ;;  %5503 = vmatprep.mubr.msk.f32.mxu0 %vm250_vm1, %v3276_v27 }
 0x10f   : > { %5241 = vmatmul.mubr.msk.f32.gmra.mrb[12].mxu1 %vm250_vm1, %v1459_v2  ;;  %5504 = vmatmul.mubr.msk.f32.gmra.mrb[30].mxu0 %vm250_vm1, %v3277_v4 }
 0x110   : > { %5243 = vmatprep.mubr.msk.f32.mxu1 %vm250_vm1, %v1460_v7  ;;  %5506 = vmatprep.mubr.msk.f32.mxu0 %vm250_vm1, %v3278_v9 }
 0x113   : > { %5244 = vmatmul.mubr.msk.f32.gmra.mrb[14].mxu1 %vm250_vm1, %v1461_v10  ;;  %5507 = vmatmul.mubr.msk.f32.gmra.mrb[32].mxu0 %vm250_vm1, %v3279_v13 }
 0x114   : > { %5246 = vmatprep.mubr.msk.f32.mxu1 %vm250_vm1, %v1462_v15  ;;  %5509 = vmatprep.mubr.msk.f32.mxu0 %vm250_vm1, %v3280_v17 }
 0x117   : > { %5247 = vmatmul.mubr.msk.f32.gmra.mrb[16].mxu1 %vm250_vm1, %v1463_v19  ;;  %5510 = vmatmul.mubr.msk.f32.gmra.mrb[34].mxu0 %vm250_vm1, %v3281_v5 }
 0x118   : > { %5249 = vmatprep.mubr.msk.f32.mxu1 %vm250_vm1, %v1464_v21  ;;  %5512 = vmatprep.mubr.msk.f32.mxu0 %vm250_vm1, %v3282_v23 }
 0x11b   : > { %5250 = vmatmul.mubr.msk.f32.gmra.mrb[18].mxu1 %vm250_vm1, %v1465_v25  ;;  %5513 = vmatmul.mubr.msk.f32.gmra.mrb[36].mxu0 %vm250_vm1, %v3283_v28  ;;  %v6812_v25 = vld [vmem:[%s6947_s2] ss:$0 sm:$0xff] }
 0x11c   : > { %5252 = vmatprep.mubr.msk.f32.mxu1 %vm250_vm1, %v1466_v30  ;;  %5517 = vmatprep.mubr.msk.f32.mxu0 %vm250_vm1, %v6163_v32  ;;  %v1471_v32 = vld [vmem:[%s5954_s25 + $0xdb] sm:$0xff] }
 0x11f   : > { %5253 = vmatmul.mubr.msk.f32.gmra.mrb[20].mxu1 %vm250_vm1, %v1467_v11  ;;  %5518 = vmatmul.mubr.msk.f32.vlgmr.msra.gmra.mrb[0].mxu0 %vm250_vm1, %v6167_v33  ;;  %v1472_v33 = vld [vmem:[%s5954_s25 + $0xe3] sm:$0xff] }
 0x120   : > { %5255 = vmatprep.mubr.msk.f32.mxu1 %vm250_vm1, %v1468_v36  ;;  %5520 = vmatprep.mubr.msk.f32.mxu0 %vm250_vm1, %v6177_v35  ;;  %v1473_v35 = vld [vmem:[%s5954_s25 + $0xeb] sm:$0xff] }
 0x123   : > { %5256 = vmatmul.mubr.msk.f32.gmra.mrb[22].mxu1 %vm250_vm1, %v1469_v40  ;;  %5521 = vmatmul.mubr.msk.f32.gmra.mrb[2].mxu0 %vm250_vm1, %v6181_v37  ;;  %v1474_v37 = vld [vmem:[%s5954_s25 + $0xf3] sm:$0xff] }
 0x124   : > { %5258 = vmatprep.mubr.msk.f32.mxu1 %vm250_vm1, %v1470_v0  ;;  %5523 = vmatprep.mubr.msk.f32.mxu0 %vm250_vm1, %v6191_v39  ;;  %v1475_v39 = vld [vmem:[%s5954_s25 + $0xfb] sm:$0xff] }
 0x127   : > { %5259 = vmatmul.mubr.msk.f32.gmra.mrb[24].mxu1 %vm250_vm1, %v1471_v32  ;;  %5524 = vmatmul.mubr.msk.f32.gmra.mrb[4].mxu0 %vm250_vm1, %v6195_v41  ;;  %v1476_v41 = vld [vmem:[%s5954_s25 + $0x103] sm:$0xff] }
 0x128   : > { %5261 = vmatprep.mubr.msk.f32.mxu1 %vm250_vm1, %v1472_v33  ;;  %5526 = vmatprep.mubr.msk.f32.mxu0 %vm250_vm1, %v6205_v43  ;;  %v1477_v43 = vld [vmem:[%s5954_s25 + $0x10b] sm:$0xff] }
 0x12b   : > { %5262 = vmatmul.mubr.msk.f32.gmra.mrb[26].mxu1 %vm250_vm1, %v1473_v35  ;;  %5527 = vmatmul.mubr.msk.f32.gmra.mrb[6].mxu0 %vm250_vm1, %v6209_v45  ;;  %v1478_v45 = vld [vmem:[%s5954_s25 + $0x113] sm:$0xff] }
 0x12c   : > { %5264 = vmatprep.mubr.msk.f32.mxu1 %vm250_vm1, %v1474_v37  ;;  %5529 = vmatprep.mubr.msk.f32.mxu0 %vm250_vm1, %v6219_v47  ;;  %v1479_v47 = vld [vmem:[%s5954_s25 + $0x11b] sm:$0xff] }
 0x12f   : > { %5265 = vmatmul.mubr.msk.f32.gmra.mrb[28].mxu1 %vm250_vm1, %v1475_v39  ;;  %5530 = vmatmul.mubr.msk.f32.gmra.mrb[8].mxu0 %vm250_vm1, %v6223_v49  ;;  %v1480_v49 = vld [vmem:[%s5954_s25 + $0x123] sm:$0xff] }
 0x130   : > { %5267 = vmatprep.mubr.msk.f32.mxu1 %vm250_vm1, %v1476_v41  ;;  %5532 = vmatprep.mubr.msk.f32.mxu0 %vm250_vm1, %v6233_v51  ;;  %v1481_v51 = vld [vmem:[%s5954_s25 + $0x12b] sm:$0xff] }
 0x133   : > { %5268 = vmatmul.mubr.msk.f32.gmra.mrb[30].mxu1 %vm250_vm1, %v1477_v43  ;;  %5533 = vmatmul.mubr.msk.f32.gmra.mrb[10].mxu0 %vm250_vm1, %v6237_v54  ;;  %v1482_v54 = vld [vmem:[%s5954_s25 + $0x133] sm:$0xff] }
 0x134   : > { %5270 = vmatprep.mubr.msk.f32.mxu1 %vm250_vm1, %v1478_v45  ;;  %5535 = vmatprep.mubr.msk.f32.mxu0 %vm250_vm1, %v6247_v56  ;;  %v1483_v56 = vld [vmem:[%s5954_s25 + $0x13b] sm:$0xff] }
 0x137   : > { %5271 = vmatmul.mubr.msk.f32.gmra.mrb[32].mxu1 %vm250_vm1, %v1479_v47  ;;  %5536 = vmatmul.mubr.msk.f32.gmra.mrb[12].mxu0 %vm250_vm1, %v6251_v58  ;;  %v1916_v58 = vld [vmem:[%s5954_s25 + $0xb4] sm:$0xff] }
 0x138   : > { %5273 = vmatprep.mubr.msk.f32.mxu1 %vm250_vm1, %v1480_v49  ;;  %5538 = vmatprep.mubr.msk.f32.mxu0 %vm250_vm1, %v6261_v60  ;;  %v1917_v60 = vld [vmem:[%s5954_s25 + $0xbc] sm:$0xff] }
 0x13b   : > { %5274 = vmatmul.mubr.msk.f32.gmra.mrb[34].mxu1 %vm250_vm1, %v1481_v51  ;;  %5539 = vmatmul.mubr.msk.f32.gmra.mrb[14].mxu0 %vm250_vm1, %v6265_v62  ;;  %v1918_v62 = vld [vmem:[%s5954_s25 + $0xc4] sm:$0xff] }
 0x13c   : > { %5276 = vmatprep.mubr.msk.f32.mxu1 %vm250_vm1, %v1482_v54  ;;  %5541 = vmatprep.mubr.msk.f32.mxu0 %vm250_vm1, %v6275_v1  ;;  %v1919_v1 = vld [vmem:[%s5954_s25 + $0xcc] sm:$0xff] }
 0x13f   : > { %5277 = vmatmul.mubr.msk.f32.gmra.mrb[36].mxu1 %vm250_vm1, %v1483_v56  ;;  %5542 = vmatmul.mubr.msk.f32.gmra.mrb[16].mxu0 %vm250_vm1, %v6279_v3  ;;  %v1920_v3 = vld [vmem:[%s5954_s25 + $0xd4] sm:$0xff] }
 0x140   : > { %5311 = vmatprep.mubr.msk.f32.mxu1 %vm250_vm1, %v1916_v58  ;;  %5544 = vmatprep.mubr.msk.f32.mxu0 %vm250_vm1, %v6295_v6  ;;  %v1921_v6 = vld [vmem:[%s5954_s25 + $0xdc] sm:$0xff] }
 0x143   : > { %5312 = vmatmul.mubr.msk.f32.vlgmr.msra.gmra.mrb[20].mxu1 %vm250_vm1, %v1917_v60  ;;  %5545 = vmatmul.mubr.msk.f32.gmra.mrb[18].mxu0 %vm250_vm1, %v6300_v8  ;;  %v1922_v8 = vld [vmem:[%s5954_s25 + $0xe4] sm:$0xff] }
 0x144   : > { %5314 = vmatprep.mubr.msk.f32.mxu1 %vm250_vm1, %v1918_v62  ;;  %5547 = vmatprep.mubr.msk.f32.mxu0 %vm250_vm1, %v6312_v52  ;;  %v1923_v52 = vld [vmem:[%s5954_s25 + $0xec] sm:$0xff] }
 0x147   : > { %5315 = vmatmul.mubr.msk.f32.gmra.mrb[22].mxu1 %vm250_vm1, %v1919_v1  ;;  %5548 = vmatmul.mubr.msk.f32.gmra.mrb[20].mxu0 %vm250_vm1, %v6316_v12  ;;  %v1924_v12 = vld [vmem:[%s5954_s25 + $0xf4] sm:$0xff] }
 0x148   : > { %5317 = vmatprep.mubr.msk.f32.mxu1 %vm250_vm1, %v1920_v3  ;;  %5550 = vmatprep.mubr.msk.f32.mxu0 %vm250_vm1, %v6326_v14  ;;  %v1925_v14 = vld [vmem:[%s5954_s25 + $0xfc] sm:$0xff] }
 0x14b   : > { %5318 = vmatmul.mubr.msk.f32.gmra.mrb[24].mxu1 %vm250_vm1, %v1921_v6  ;;  %5551 = vmatmul.mubr.msk.f32.gmra.mrb[22].mxu0 %vm250_vm1, %v6330_v16  ;;  %v1926_v16 = vld [vmem:[%s5954_s25 + $0x104] sm:$0xff] }
 0x14c   : > { %5320 = vmatprep.mubr.msk.f32.mxu1 %vm250_vm1, %v1922_v8  ;;  %5553 = vmatprep.mubr.msk.f32.mxu0 %vm250_vm1, %v6340_v18  ;;  %v1927_v18 = vld [vmem:[%s5954_s25 + $0x10c] sm:$0xff] }
 0x14f   : > { %5321 = vmatmul.mubr.msk.f32.gmra.mrb[26].mxu1 %vm250_vm1, %v1923_v52  ;;  %5554 = vmatmul.mubr.msk.f32.gmra.mrb[24].mxu0 %vm250_vm1, %v6344_v20  ;;  %v1928_v20 = vld [vmem:[%s5954_s25 + $0x114] sm:$0xff] }
 0x150   : > { %5323 = vmatprep.mubr.msk.f32.mxu1 %vm250_vm1, %v1924_v12  ;;  %5556 = vmatprep.mubr.msk.f32.mxu0 %vm250_vm1, %v6354_v22  ;;  %v1929_v22 = vld [vmem:[%s5954_s25 + $0x11c] sm:$0xff] }
 0x153   : > { %5324 = vmatmul.mubr.msk.f32.gmra.mrb[28].mxu1 %vm250_vm1, %v1925_v14  ;;  %5557 = vmatmul.mubr.msk.f32.gmra.mrb[26].mxu0 %vm250_vm1, %v6358_v24  ;;  %v1930_v24 = vld [vmem:[%s5954_s25 + $0x124] sm:$0xff] }
 0x154   : > { %5326 = vmatprep.mubr.msk.f32.mxu1 %vm250_vm1, %v1926_v16  ;;  %5559 = vmatprep.mubr.msk.f32.mxu0 %vm250_vm1, %v6368_v26  ;;  %v1931_v26 = vld [vmem:[%s5954_s25 + $0x12c] sm:$0xff] }
 0x157   : > { %5327 = vmatmul.mubr.msk.f32.gmra.mrb[30].mxu1 %vm250_vm1, %v1927_v18  ;;  %5560 = vmatmul.mubr.msk.f32.gmra.mrb[28].mxu0 %vm250_vm1, %v6372_v29  ;;  %v3729_v29 = vld [vmem:[%s5954_s25 + $0x130] sm:$0xff] }
 0x158   : > { %5329 = vmatprep.mubr.msk.f32.mxu1 %vm250_vm1, %v1928_v20  ;;  %5562 = vmatprep.mubr.msk.f32.mxu0 %vm250_vm1, %v6382_v31  ;;  %v1933_v31 = vld [vmem:[%s5954_s25 + $0x13c] sm:$0xff] }
 0x15b   : > { %5330 = vmatmul.mubr.msk.f32.gmra.mrb[32].mxu1 %vm250_vm1, %v1929_v22  ;;  %5563 = vmatmul.mubr.msk.f32.gmra.mrb[30].mxu0 %vm250_vm1, %v6386_v34  ;;  %v3731_v34 = vld [vmem:[%s5954_s25 + $0x140] sm:$0xff] }
 0x15c   : > { %5332 = vmatprep.mubr.msk.f32.mxu1 %vm250_vm1, %v1930_v24  ;;  %5565 = vmatprep.mubr.msk.f32.mxu0 %vm250_vm1, %v6396_v38  ;;  %v3733_v38 = vld [vmem:[%s5954_s25 + $0x150] sm:$0xff] }
 0x15f   : > { %5333 = vmatmul.mubr.msk.f32.gmra.mrb[34].mxu1 %vm250_vm1, %v1931_v26  ;;  %5566 = vmatmul.mubr.msk.f32.gmra.mrb[32].mxu0 %vm250_vm1, %v3729_v29 }
 0x160   : > { %5335 = vmatprep.mubr.msk.f32.mxu1 %vm250_vm1, %v1932_v42  ;;  %5568 = vmatprep.mubr.msk.f32.mxu0 %vm250_vm1, %v3730_v44 }
 0x163   : > { %5336 = vmatmul.mubr.msk.f32.gmra.mrb[36].mxu1 %vm250_vm1, %v1933_v31  ;;  %5569 = vmatmul.mubr.msk.f32.gmra.mrb[34].mxu0 %vm250_vm1, %v3731_v34 }
 0x164   : > { %5571 = vmatprep.mubr.msk.f32.mxu0 %vm250_vm1, %v3732_v46 }
 0x167   : > { %5572 = vmatmul.mubr.msk.f32.gmra.mrb[36].mxu0 %vm250_vm1, %v3733_v38 }
 0x1ca   : > { %v5224_v48 = vpop.f32.mrb[0].mxu1 }
 0x1cb   : > { %v1669_v50 = vpop.f32.mrb[1].mxu1 }
 0x1ce   : > { %v5227_v53 = vpop.f32.mrb[2].mxu1 }
 0x1cf   : > { %v1679_v55 = vpop.f32.mrb[3].mxu1 }
 0x1d2   : > { %v5230_v57 = vpop.f32.mrb[4].mxu1 }
 0x1d3   : > { %v1689_v59 = vpop.f32.mrb[5].mxu1 }
 0x1d6   : > { %v5233_v61 = vpop.f32.mrb[6].mxu1 }
 0x1d7   : > { %v1699_v63 = vpop.f32.mrb[7].mxu1 }
 0x1da   : > { %v5236_v27 = vpop.f32.mrb[8].mxu1 }
 0x1db   : > { %v1709_v2 = vpop.f32.mrb[9].mxu1 }
 0x1de   : > { %v5239_v4 = vpop.f32.mrb[10].mxu1 }
 0x1df   : > { %v6790_v7 = vpop.f32.mrb[11].mxu1 }
 0x1e2   : > { %v6792_v9 = vpop.f32.mrb[12].mxu1 }
 0x1e3   : > { %v6794_v10 = vpop.f32.mrb[13].mxu1 }
 0x1e6   : > { %v6796_v13 = vpop.f32.mrb[14].mxu1 }
 0x1e7   : > { %v6798_v15 = vpop.f32.mrb[15].mxu1 }
 0x1ea   : > { %v6800_v17 = vpop.f32.mrb[16].mxu1 }
 0x1eb   : > { %v6802_v19 = vpop.f32.mrb[17].mxu1 }
 0x1ee   : > { %v6804_v5 = vpop.f32.mrb[18].mxu1 }
 0x1ef   : > { %v6806_v21 = vpop.f32.mrb[19].mxu1 }
 0x1f2   : > { %v5519_v23 = vpop.f32.mrb[0].mxu0 }
 0x1f3   : > { %v5576_v28 = vadd.f32 %v5519_v23, %v5224_v48  ;;  %v3919_v30 = vpop.f32.mrb[1].mxu0 }
 0x1f4   : > { %v5577_v11 = vadd.f32 %v3919_v30, %v1669_v50 }
 0x1f5   : > { %v4154_v36 = vadd.f32 %v5576_v28, %v6812_v25 }
 0x1f6   : > { %v4153_v40 = vadd.f32 %v5577_v11, %v6812_v25  ;;  %v5522_v0 = vpop.f32.mrb[2].mxu0 }
 0x1f7   : > { %v4192_v32 = vmax.f32 %v4154_v36, 0.0  ;;  %v5578_v33 = vadd.f32 %v5522_v0, %v5227_v53  ;;  %v3929_v35 = vpop.f32.mrb[3].mxu0 }
 0x1f8   : > { %v4191_v37 = vmax.f32 %v4153_v40, 0.0  ;;  %v5579_v39 = vadd.f32 %v3929_v35, %v1679_v55 }
 0x1f9   : > { %4231 = vst.msk [vmem:[%s6818_s16 + $0x8] sm:$0xff] %vm4229_vm2, %v4192_v32  ;;  %v4156_v41 = vadd.f32 %v5578_v33, %v6812_v25 }
 0x1fa   : > { %4230 = vst.msk [vmem:[%s6818_s16] sm:$0xff] %vm4229_vm2, %v4191_v37  ;;  %v4155_v43 = vadd.f32 %v5579_v39, %v6812_v25  ;;  %v5525_v45 = vpop.f32.mrb[4].mxu0 }
 0x1fb   : > { %v4194_v47 = vmax.f32 %v4156_v41, 0.0  ;;  %v5580_v49 = vadd.f32 %v5525_v45, %v5230_v57  ;;  %v3939_v51 = vpop.f32.mrb[5].mxu0 }
 0x1fc   : > { %v4193_v54 = vmax.f32 %v4155_v43, 0.0  ;;  %v5581_v56 = vadd.f32 %v3939_v51, %v1689_v59 }
 0x1fd   : > { %4233 = vst.msk [vmem:[%s6818_s16 + $0x18] sm:$0xff] %vm4229_vm2, %v4194_v47  ;;  %v4158_v58 = vadd.f32 %v5580_v49, %v6812_v25 }
 0x1fe   : > { %4232 = vst.msk [vmem:[%s6818_s16 + $0x10] sm:$0xff] %vm4229_vm2, %v4193_v54  ;;  %v4157_v60 = vadd.f32 %v5581_v56, %v6812_v25  ;;  %v5528_v62 = vpop.f32.mrb[6].mxu0 }
 0x1ff   : > { %v4196_v1 = vmax.f32 %v4158_v58, 0.0  ;;  %v5582_v3 = vadd.f32 %v5528_v62, %v5233_v61  ;;  %v3949_v6 = vpop.f32.mrb[7].mxu0 }
 0x200   : > { %v4195_v8 = vmax.f32 %v4157_v60, 0.0  ;;  %v5583_v52 = vadd.f32 %v3949_v6, %v1699_v63 }
 0x201   : > { %4235 = vst.msk [vmem:[%s6818_s16 + $0x28] sm:$0xff] %vm4229_vm2, %v4196_v1  ;;  %v4160_v12 = vadd.f32 %v5582_v3, %v6812_v25 }
 0x202   : > { %4234 = vst.msk [vmem:[%s6818_s16 + $0x20] sm:$0xff] %vm4229_vm2, %v4195_v8  ;;  %v4159_v14 = vadd.f32 %v5583_v52, %v6812_v25  ;;  %v5531_v16 = vpop.f32.mrb[8].mxu0 }
 0x203   : > { %v4198_v18 = vmax.f32 %v4160_v12, 0.0  ;;  %v5584_v20 = vadd.f32 %v5531_v16, %v5236_v27  ;;  %v3959_v22 = vpop.f32.mrb[9].mxu0 }
 0x204   : > { %v4197_v24 = vmax.f32 %v4159_v14, 0.0  ;;  %v5585_v26 = vadd.f32 %v3959_v22, %v1709_v2 }
 0x205   : > { %4237 = vst.msk [vmem:[%s6818_s16 + $0x38] sm:$0xff] %vm4229_vm2, %v4198_v18  ;;  %v4162_v29 = vadd.f32 %v5584_v20, %v6812_v25 }
 0x206   : > { %4236 = vst.msk [vmem:[%s6818_s16 + $0x30] sm:$0xff] %vm4229_vm2, %v4197_v24  ;;  %v4161_v42 = vadd.f32 %v5585_v26, %v6812_v25  ;;  %v5534_v44 = vpop.f32.mrb[10].mxu0 }
 0x207   : > { %v4200_v31 = vmax.f32 %v4162_v29, 0.0  ;;  %v5586_v34 = vadd.f32 %v5534_v44, %v5239_v4  ;;  %v3969_v46 = vpop.f32.mrb[11].mxu0 }
 0x208   : > { %v4199_v38 = vmax.f32 %v4161_v42, 0.0  ;;  %v5587_v48 = vadd.f32 %v3969_v46, %v6790_v7 }
 0x209   : > { %4239 = vst.msk [vmem:[%s6818_s16 + $0x48] sm:$0xff] %vm4229_vm2, %v4200_v31  ;;  %v4164_v50 = vadd.f32 %v5586_v34, %v6812_v25 }
 0x20a   : > { %4238 = vst.msk [vmem:[%s6818_s16 + $0x40] sm:$0xff] %vm4229_vm2, %v4199_v38  ;;  %v4163_v53 = vadd.f32 %v5587_v48, %v6812_v25  ;;  %v5537_v55 = vpop.f32.mrb[12].mxu0 }
 0x20b   : > { %v4202_v57 = vmax.f32 %v4164_v50, 0.0  ;;  %v5588_v59 = vadd.f32 %v5537_v55, %v6792_v9  ;;  %v3979_v61 = vpop.f32.mrb[13].mxu0 }
 0x20c   : > { %v4201_v63 = vmax.f32 %v4163_v53, 0.0  ;;  %v5589_v27 = vadd.f32 %v3979_v61, %v6794_v10 }
 0x20d   : > { %4241 = vst.msk [vmem:[%s6818_s16 + $0x58] sm:$0xff] %vm4229_vm2, %v4202_v57  ;;  %v4166_v2 = vadd.f32 %v5588_v59, %v6812_v25 }
 0x20e   : > { %4240 = vst.msk [vmem:[%s6818_s16 + $0x50] sm:$0xff] %vm4229_vm2, %v4201_v63  ;;  %v4165_v4 = vadd.f32 %v5589_v27, %v6812_v25  ;;  %v5540_v7 = vpop.f32.mrb[14].mxu0 }
 0x20f   : > { %v4204_v23 = vmax.f32 %v4166_v2, 0.0  ;;  %v5590_v28 = vadd.f32 %v5540_v7, %v6796_v13  ;;  %v3989_v9 = vpop.f32.mrb[15].mxu0 }
 0x210   : > { %v4203_v30 = vmax.f32 %v4165_v4, 0.0  ;;  %v5591_v11 = vadd.f32 %v3989_v9, %v6798_v15 }
 0x211   : > { %4243 = vst.msk [vmem:[%s6818_s16 + $0x68] sm:$0xff] %vm4229_vm2, %v4204_v23  ;;  %v4168_v10 = vadd.f32 %v5590_v28, %v6812_v25 }
 0x212   : > { %4242 = vst.msk [vmem:[%s6818_s16 + $0x60] sm:$0xff] %vm4229_vm2, %v4203_v30  ;;  %v4167_v36 = vadd.f32 %v5591_v11, %v6812_v25  ;;  %v5543_v40 = vpop.f32.mrb[16].mxu0 }
 0x213   : > { %v4206_v0 = vmax.f32 %v4168_v10, 0.0  ;;  %v5592_v32 = vadd.f32 %v5543_v40, %v6800_v17  ;;  %v3999_v33 = vpop.f32.mrb[17].mxu0 }
 0x214   : > { %v4205_v13 = vmax.f32 %v4167_v36, 0.0  ;;  %v5593_v35 = vadd.f32 %v3999_v33, %v6802_v19 }
 0x215   : > { %4245 = vst.msk [vmem:[%s6818_s16 + $0x78] sm:$0xff] %vm4229_vm2, %v4206_v0  ;;  %v4170_v15 = vadd.f32 %v5592_v32, %v6812_v25 }
 0x216   : > { %4244 = vst.msk [vmem:[%s6818_s16 + $0x70] sm:$0xff] %vm4229_vm2, %v4205_v13  ;;  %v4169_v37 = vadd.f32 %v5593_v35, %v6812_v25  ;;  %v5313_v39 = vpop.f32.mrb[20].mxu1  ;;  %v5546_v41 = vpop.f32.mrb[18].mxu0 }
 0x217   : > { %v4208_v43 = vmax.f32 %v4170_v15, 0.0  ;;  %v5594_v45 = vadd.f32 %v5546_v41, %v6804_v5  ;;  %v2219_v17 = vpop.f32.mrb[21].mxu1  ;;  %v4009_v47 = vpop.f32.mrb[19].mxu0 }
 0x218   : > { %v4207_v49 = vmax.f32 %v4169_v37, 0.0  ;;  %v5595_v19 = vadd.f32 %v4009_v47, %v6806_v21 }
 0x219   : > { %4247 = vst.msk [vmem:[%s6818_s16 + $0x88] sm:$0xff] %vm4229_vm2, %v4208_v43  ;;  %v4172_v51 = vadd.f32 %v5594_v45, %v6812_v25 }
 0x21a   : > { %4246 = vst.msk [vmem:[%s6818_s16 + $0x80] sm:$0xff] %vm4229_vm2, %v4207_v49  ;;  %v4171_v54 = vadd.f32 %v5595_v19, %v6812_v25  ;;  %v5316_v56 = vpop.f32.mrb[22].mxu1  ;;  %v5549_v58 = vpop.f32.mrb[20].mxu0 }
 0x21b   : > { %v4210_v60 = vmax.f32 %v4172_v51, 0.0  ;;  %v5596_v62 = vadd.f32 %v5549_v58, %v5313_v39  ;;  %v2229_v5 = vpop.f32.mrb[23].mxu1  ;;  %v4019_v1 = vpop.f32.mrb[21].mxu0 }
 0x21c   : > { %v4209_v3 = vmax.f32 %v4171_v54, 0.0  ;;  %v5597_v6 = vadd.f32 %v4019_v1, %v2219_v17 }
 0x21d   : > { %4249 = vst.msk [vmem:[%s6818_s16 + $0x98] sm:$0xff] %vm4229_vm2, %v4210_v60  ;;  %v4174_v21 = vadd.f32 %v5596_v62, %v6812_v25 }
 0x21e   : > { %4248 = vst.msk [vmem:[%s6818_s16 + $0x90] sm:$0xff] %vm4229_vm2, %v4209_v3  ;;  %v4173_v8 = vadd.f32 %v5597_v6, %v6812_v25  ;;  %v5319_v52 = vpop.f32.mrb[24].mxu1  ;;  %v5552_v12 = vpop.f32.mrb[22].mxu0 }
 0x21f   : > { %v4212_v14 = vmax.f32 %v4174_v21, 0.0  ;;  %v5598_v16 = vadd.f32 %v5552_v12, %v5316_v56  ;;  %v2239_v18 = vpop.f32.mrb[25].mxu1  ;;  %v4029_v20 = vpop.f32.mrb[23].mxu0 }
 0x220   : > { %v4211_v22 = vmax.f32 %v4173_v8, 0.0  ;;  %v5599_v24 = vadd.f32 %v4029_v20, %v2229_v5 }
 0x221   : > { %4251 = vst.msk [vmem:[%s6818_s16 + $0xa8] sm:$0xff] %vm4229_vm2, %v4212_v14  ;;  %v4176_v26 = vadd.f32 %v5598_v16, %v6812_v25 }
 0x222   : > { %4250 = vst.msk [vmem:[%s6818_s16 + $0xa0] sm:$0xff] %vm4229_vm2, %v4211_v22  ;;  %v4175_v29 = vadd.f32 %v5599_v24, %v6812_v25  ;;  %v5322_v42 = vpop.f32.mrb[26].mxu1  ;;  %v5555_v44 = vpop.f32.mrb[24].mxu0 }
 0x223   : > { %v4214_v31 = vmax.f32 %v4176_v26, 0.0  ;;  %v5600_v34 = vadd.f32 %v5555_v44, %v5319_v52  ;;  %v2249_v46 = vpop.f32.mrb[27].mxu1  ;;  %v4039_v38 = vpop.f32.mrb[25].mxu0 }
 0x224   : > { %v4213_v48 = vmax.f32 %v4175_v29, 0.0  ;;  %v5601_v50 = vadd.f32 %v4039_v38, %v2239_v18 }
 0x225   : > { %4253 = vst.msk [vmem:[%s6818_s16 + $0xb8] sm:$0xff] %vm4229_vm2, %v4214_v31  ;;  %v4178_v53 = vadd.f32 %v5600_v34, %v6812_v25 }
 0x226   : > { %4252 = vst.msk [vmem:[%s6818_s16 + $0xb0] sm:$0xff] %vm4229_vm2, %v4213_v48  ;;  %v4177_v55 = vadd.f32 %v5601_v50, %v6812_v25  ;;  %v5325_v57 = vpop.f32.mrb[28].mxu1  ;;  %v5558_v59 = vpop.f32.mrb[26].mxu0 }
 0x227   : > { %v4216_v61 = vmax.f32 %v4178_v53, 0.0  ;;  %v5602_v63 = vadd.f32 %v5558_v59, %v5322_v42  ;;  %v2259_v27 = vpop.f32.mrb[29].mxu1  ;;  %v4049_v2 = vpop.f32.mrb[27].mxu0 }
 0x228   : > { %v4215_v4 = vmax.f32 %v4177_v55, 0.0  ;;  %v5603_v7 = vadd.f32 %v4049_v2, %v2249_v46 }
 0x229   : > { %4255 = vst.msk [vmem:[%s6818_s16 + $0xc8] sm:$0xff] %vm4229_vm2, %v4216_v61  ;;  %v4180_v23 = vadd.f32 %v5602_v63, %v6812_v25 }
 0x22a   : > { %4254 = vst.msk [vmem:[%s6818_s16 + $0xc0] sm:$0xff] %vm4229_vm2, %v4215_v4  ;;  %v4179_v28 = vadd.f32 %v5603_v7, %v6812_v25  ;;  %v5328_v9 = vpop.f32.mrb[30].mxu1  ;;  %v5561_v30 = vpop.f32.mrb[28].mxu0 }
 0x22b   : > { %v4218_v11 = vmax.f32 %v4180_v23, 0.0  ;;  %v5604_v10 = vadd.f32 %v5561_v30, %v5325_v57  ;;  %v2269_v36 = vpop.f32.mrb[31].mxu1  ;;  %v4059_v40 = vpop.f32.mrb[29].mxu0 }
 0x22c   : > { %v4217_v0 = vmax.f32 %v4179_v28, 0.0  ;;  %v5605_v32 = vadd.f32 %v4059_v40, %v2259_v27 }
 0x22d   : > { %4257 = vst.msk [vmem:[%s6818_s16 + $0xd8] sm:$0xff] %vm4229_vm2, %v4218_v11  ;;  %v4182_v33 = vadd.f32 %v5604_v10, %v6812_v25 }
 0x22e   : > { %4256 = vst.msk [vmem:[%s6818_s16 + $0xd0] sm:$0xff] %vm4229_vm2, %v4217_v0  ;;  %v4181_v13 = vadd.f32 %v5605_v32, %v6812_v25  ;;  %v5331_v35 = vpop.f32.mrb[32].mxu1  ;;  %v5564_v15 = vpop.f32.mrb[30].mxu0 }
 0x22f   : > { %v4220_v37 = vmax.f32 %v4182_v33, 0.0  ;;  %v5606_v39 = vadd.f32 %v5564_v15, %v5328_v9  ;;  %v2279_v41 = vpop.f32.mrb[33].mxu1  ;;  %v4069_v43 = vpop.f32.mrb[31].mxu0 }
 0x230   : > { %v4219_v45 = vmax.f32 %v4181_v13, 0.0  ;;  %v5607_v17 = vadd.f32 %v4069_v43, %v2269_v36 }
 0x231   : > { %4259 = vst.msk [vmem:[%s6818_s16 + $0xe8] sm:$0xff] %vm4229_vm2, %v4220_v37  ;;  %v4184_v47 = vadd.f32 %v5606_v39, %v6812_v25 }
 0x232   : > { %4258 = vst.msk [vmem:[%s6818_s16 + $0xe0] sm:$0xff] %vm4229_vm2, %v4219_v45  ;;  %v4183_v49 = vadd.f32 %v5607_v17, %v6812_v25  ;;  %v5334_v19 = vpop.f32.mrb[34].mxu1  ;;  %v5567_v51 = vpop.f32.mrb[32].mxu0 }
 0x233   : > { %v4222_v54 = vmax.f32 %v4184_v47, 0.0  ;;  %v5608_v56 = vadd.f32 %v5567_v51, %v5331_v35  ;;  %v2289_v58 = vpop.f32.mrb[35].mxu1  ;;  %v4079_v60 = vpop.f32.mrb[33].mxu0 }
 0x234   : > { %v4221_v62 = vmax.f32 %v4183_v49, 0.0  ;;  %v5609_v5 = vadd.f32 %v4079_v60, %v2279_v41 }
 0x235   : > { %4261 = vst.msk [vmem:[%s6818_s16 + $0xf8] sm:$0xff] %vm4229_vm2, %v4222_v54  ;;  %v4186_v1 = vadd.f32 %v5608_v56, %v6812_v25 }
 0x236   : > { %4260 = vst.msk [vmem:[%s6818_s16 + $0xf0] sm:$0xff] %vm4229_vm2, %v4221_v62  ;;  %v4185_v3 = vadd.f32 %v5609_v5, %v6812_v25  ;;  %v5337_v6 = vpop.f32.mrb[36].mxu1  ;;  %v5570_v21 = vpop.f32.mrb[34].mxu0 }
 0x237   : > { %v4224_v8 = vmax.f32 %v4186_v1, 0.0  ;;  %v5610_v52 = vadd.f32 %v5570_v21, %v5334_v19  ;;  %v2299_v12 = vpop.f32.mrb[37].mxu1  ;;  %v4089_v14 = vpop.f32.mrb[35].mxu0 }
 0x238   : > { %v4223_v16 = vmax.f32 %v4185_v3, 0.0  ;;  %v5611_v18 = vadd.f32 %v4089_v14, %v2289_v58 }
 0x239   : > { %4263 = vst.msk [vmem:[%s6818_s16 + $0x108] sm:$0xff] %vm4229_vm2, %v4224_v8  ;;  %v4188_v20 = vadd.f32 %v5610_v52, %v6812_v25 }
 0x23a   : > { %4262 = vst.msk [vmem:[%s6818_s16 + $0x100] sm:$0xff] %vm4229_vm2, %v4223_v16  ;;  %v4187_v22 = vadd.f32 %v5611_v18, %v6812_v25  ;;  %v5573_v24 = vpop.f32.mrb[36].mxu0 }
 0x23b   : > { %v4226_v26 = vmax.f32 %v4188_v20, 0.0  ;;  %v5612_v29 = vadd.f32 %v5573_v24, %v5337_v6  ;;  %v4099_v42 = vpop.f32.mrb[37].mxu0 }
 0x23c   : > { %v4225_v44 = vmax.f32 %v4187_v22, 0.0  ;;  %v5613_v31 = vadd.f32 %v4099_v42, %v2299_v12 }
 0x23d   : > { %4265 = vst.msk [vmem:[%s6818_s16 + $0x118] sm:$0xff] %vm4229_vm2, %v4226_v26  ;;  %v4190_v34 = vadd.f32 %v5612_v29, %v6812_v25 }
 0x23e   : > { %4264 = vst.msk [vmem:[%s6818_s16 + $0x110] sm:$0xff] %vm4229_vm2, %v4225_v44  ;;  %v4189_v46 = vadd.f32 %v5613_v31, %v6812_v25 }
 0x23f   : > { %v4228_v38 = vmax.f32 %v4190_v34, 0.0 }
 0x240   : > { %v4227_v48 = vmax.f32 %v4189_v46, 0.0 }
 0x241   : > { %4267 = vst.msk [vmem:[%s6818_s16 + $0x128] sm:$0xff] %vm4229_vm2, %v4228_v38 }
 0x242   : > { %4266 = vst.msk [vmem:[%s6818_s16 + $0x120] sm:$0xff] %vm4229_vm2, %v4227_v48 }
 0x243 PF: > { %s13_s12 = sadd.s32 1, %s5896_s12  }
 0x244   : > { %p10_p4 = scmp.ge.s32.totalorder %s13_s12, 8  }
 0x246   :  { %12 = sbr.rel (!%p10_p4) target bundleno = 1 (0x1), region = 70 }

// kernel: loss_forward.12
= control target key start
LH: loop header
LB: loop body
LE: loop exit
PB: predicated region body
PF: predicated region fallthrough
CT: control target
= control target key end

     0   :  { %12 = vsyncpa [#allocation3], 0  ;;  %s1587_s0 = inlined_call_operand.vmem [shape: f32[6,64,16], index: 0, kind: input, shape index: {}, may-alias: {0,1,2}]   ;;  %s1588_s1 = inlined_call_operand.vmem [shape: f32[6,64,16], index: 1, kind: input, shape index: {}, may-alias: {0,1,2}]   ;;  %s1589_s2 = inlined_call_operand.vmem [shape: f32[6,64,16], index: 2, kind: input, shape index: {}, may-alias: {0,1,2}]   ;;  %s1590_s3 = inlined_call_operand.hbm [shape: f32[1,1], index: 3, kind: output, shape index: {0}]   ;;  %s1591_s4 = inlined_call_operand.hbm [shape: f32[1,1], index: 4, kind: output, shape index: {1}]   ;;  %s1592_s5 = inlined_call_operand.hbm [shape: f32[1,1], index: 5, kind: output, shape index: {2}]   ;;  %s1593_s6 = inlined_call_operand.hbm [shape: f32[1,1], index: 6, kind: output, shape index: {3}]  }
   0x1   :  { %13 = vsyncpa [#allocation5], 0 }
   0x2   :  { %14 = vsyncpa [#allocation8], 0  ;;  %s1305_s21 = smov 0  }
   0x3 LB: > { %s1311_s22 = sadd.s32 4294967295, %s1263_s21   ;;  %p933_p0 = scmp.ge.s32.totalorder %s1263_s21, 1  ;;  %s1263_s21 = sphi %s1305_s21, %s20_s21  }
   0x4   : > { %p230_p1 = scmp.lt.s32.totalorder %s1263_s21, 3 }
   0x6   : > { %p231_p2 = pnand %p933_p0, %p230_p1 }
   0x7   : > { %p267_p3 = scmp.lt.s32.totalorder (!%p231_p2), %s1311_s22, 5  ;;  %s272_s23 = sadd.s32 (!%p231_p2), 2, %s1311_s22 }
   0x8   : > { %234 = sbr.rel (%p231_p2) target bundleno = 662 (0x296), region = 32  ;;  %p273_p4 = scmp.lt.s32.totalorder (!%p231_p2), %s272_s23, 5 }
   0x9   : > { %s279_s24 = sadd.s32 (!%p231_p2), 4, %s1311_s22  ;;  %p940_p6 = scmp.ne.s32.totalorder (!%p231_p2), %s1311_s22, 0 }
   0xa   : > { %p280_p5 = scmp.lt.s32.totalorder (!%p231_p2), %s279_s24, 5 }
   0xf   : > { %s268_s25 = scalar_select %p267_p3, %s1311_s22, 5 }
  0x10   : > { %s1595_s23 = smov (!%p273_p4, %s272_s23), 5  ;;  %s1597_s24 = smov (!%p280_p5, %s279_s24), 5 }
  0x11   : > { %s957_s26 = sshll.u32 %s268_s25, 6  ;;  %s958_s30 = sshll.u32 %s1595_s23, 6  ;;  %vm290_vm0 = vcmask (!%p940_p6), 0   ;;  %v1265_v0 = vmov (!%p940_p6), 0.0  }
  0x12   : > { %s1322_s29 = scalar_lea.vmem %s1587_s0, %s957_s26  ;;  %s1327_s9 = scalar_lea.vmem %s1588_s1, %s958_s30  ;;  %291 = vst.msk [vmem:[#allocation2] sm:$0x1] (!%p940_p6), %vm290_vm0, %v1265_v0  ;;  %292 = vst.msk [vmem:[#allocation4] sm:$0x1] (!%p940_p6), %vm290_vm0, %v1265_v0 }
  0x13   : > { %s959_s10 = sshll.u32 %s1597_s24, 6  ;;  %289 = sbr.rel (%p940_p6) target bundleno = 26 (0x1a), region = 36  ;;  %293 = vst.msk [vmem:[#allocation6] sm:$0x1] (!%p940_p6), %vm290_vm0, %v1265_v0  ;;  %294 = vst.msk [vmem:[#allocation7] sm:$0x1] (!%p940_p6), %vm290_vm0, %v1265_v0 }
  0x14   : > { %s1332_s13 = scalar_lea.vmem %s1589_s2, %s959_s10 }
  0x1a PF: > { %v295_v1 = vld [vmem:[%s1322_s29] sm:$0xff]  ;;  %v296_v2 = vld [vmem:[%s1322_s29 + $0x8] sm:$0xff]  ;;  %v297_v3 = vld [vmem:[%s1322_s29 + $0x10] sm:$0xff]  ;;  %vm336_vm1 = vcmask 130048   ;;  %vm441_vm2 = vcmask 523264   ;;  %vm363_vm3 = vcmask 0  }
  0x1b   : > { %409 = vxpose.xlu0.b32.start [1/8] (short) (narrow) %v295_v1, 16  ;;  %v1339_v4 = vld [vmem:[%s1322_s29 + $0x18] sm:$0xff]  ;;  %v1047_v5 = vpack.c.bf16 %v296_v2, %v295_v1  ;;  %v1342_v6 = vld [vmem:[%s1322_s29 + $0x20] sm:$0xff]  ;;  %v304_v10 = vld [vmem:[%s1327_s9 + $0x8] sm:$0xff]  ;;  %p1119_p7 = scmp.eq.s32.totalorder %s1311_s22, 1  ;;  %s1266_s16 = smov [#allocation4]  }
  0x1c   : > { %v303_v7 = vld [vmem:[%s1327_s9] sm:$0xff]  ;;  %v1051_v8 = vpack.c.bf16 %v1339_v4, %v297_v3  ;;  %v1351_v11 = vld [vmem:[%s1332_s13 + $0x8] sm:$0xff]  ;;  %v305_v17 = vld [vmem:[%s1327_s9 + $0x10] sm:$0xff]  ;;  %s813_s17 = sshll.u32 %s1266_s16, 4  ;;  %s814_s17 = int_to_ptr.vmem [resolvable:$true] %s813_s17 }
  0x1d   : > { %525 = vxpose.xlu1.b32.start [1/8] (short) (narrow) %v303_v7, 16  ;;  %v1347_v9 = vld [vmem:[%s1332_s13] sm:$0xff]  ;;  %1048 = vmatprep.subr.bf16.mxu0 %v1047_v5  ;;  %v1354_v12 = vld [vmem:[%s1322_s29 + $0x28] sm:$0xff]  ;;  %v321_v15 = vsub.f32 %v296_v2, %v1351_v11  ;;  %v367_v16 = vsub.f32 %v304_v10, %v1351_v11  ;;  %v1362_v18 = vld [vmem:[%s1332_s13 + $0x10] sm:$0xff]  ;;  %v1063_v53 = vpack.c.bf16 %v304_v10, %v303_v7  ;;  %s1141_s18 = scalar_lea.vmem %s814_s17, 16  ;;  %s1147_s19 = scalar_lea.vmem %s814_s17, 32 }
  0x1e   : > { %v366_v13 = vsub.f32 %v303_v7, %v1347_v9  ;;  %v320_v14 = vsub.f32 %v295_v1, %v1347_v9  ;;  %1050 = vmatpush3.bf16.msra.mxu0 %v1047_v5  ;;  %v322_v19 = vsub.f32 %v297_v3, %v1362_v18  ;;  %v368_v20 = vsub.f32 %v305_v17, %v1362_v18  ;;  %v1367_v21 = vld [vmem:[%s1327_s9 + $0x18] sm:$0xff]  ;;  %v1373_v23 = vld [vmem:[%s1332_s13 + $0x20] sm:$0xff]  ;;  %v1380_v29 = vld [vmem:[%s1322_s29 + $0x30] sm:$0xff]  ;;  %p1142_p8 = scmp.ne.s32.totalorder %s814_s17, %s1141_s18  ;;  %p1148_p11 = scmp.lt.s32.totalorder %s814_s17, %s814_s17 }
  0x1f   : > { %410 = vxpose.xlu0.b32.cont [2/8] (short) (narrow) %v296_v2, 16  ;;  %v1370_v22 = vld [vmem:[%s1332_s13 + $0x18] sm:$0xff]  ;;  %1052 = vmatprep.subr.bf16.mxu0 %v1051_v8  ;;  %v1055_v24 = vpack.c.bf16 %v1354_v12, %v1342_v6  ;;  %v329_v27 = vand.u32 2147483647, %v321_v15  ;;  %v375_v30 = vand.u32 2147483647, %v367_v16  ;;  %v324_v33 = vsub.f32 %v1342_v6, %v1373_v23  ;;  %p1149_p12 = scmp.lt.s32.totalorder %s1147_s19, %s1141_s18 }
  0x20   : > { %v374_v25 = vand.u32 2147483647, %v366_v13  ;;  %v328_v26 = vand.u32 2147483647, %v320_v14  ;;  %v323_v28 = vsub.f32 %v1339_v4, %v1370_v22  ;;  %v330_v31 = vand.u32 2147483647, %v322_v19  ;;  %1064 = vmatprep.subr.bf16.mxu1 %v1063_v53  ;;  %p1143_p9 = pnand %p1142_p8, %p1119_p7 }
  0x21   : > { %526 = vxpose.xlu1.b32.cont [2/8] (short) (narrow) %v304_v10, 16  ;;  %v369_v32 = vsub.f32 %v1367_v21, %v1370_v22  ;;  %v1387_v34 = vld [vmem:[%s1322_s29 + $0x38] sm:$0xff]  ;;  %v338_v37 = vsel %vm336_vm1, %v329_v27, 0.0  ;;  %v376_v38 = vand.u32 2147483647, %v368_v20  ;;  %v383_v39 = vsel %vm336_vm1, %v375_v30, 0.0  ;;  %1066 = vmatpush3.bf16.msra.mxu1 %v1063_v53  ;;  %p1150_p13 = por %p1149_p12, %p1148_p11 }
  0x22   : > { %v382_v35 = vsel %vm336_vm1, %v374_v25, 0.0  ;;  %v337_v36 = vsel %vm336_vm1, %v328_v26, 0.0  ;;  %1054 = vmatpush3.bf16.msra.mxu0 %v1051_v8  ;;  %v340_v41 = vsel %vm336_vm1, %v330_v31, 0.0  ;;  %v1059_v42 = vpack.c.bf16 %v1387_v34, %v1380_v29  ;;  %v1398_v45 = vld [vmem:[%s1327_s9 + $0x20] sm:$0xff]  ;;  %v1401_v46 = vld [vmem:[%s1332_s13 + $0x28] sm:$0xff]  ;;  %v1432_v59 = vld [vmem:[%s1327_s9 + $0x30] sm:$0xff]  ;;  %p1144_p10 = pneg %p1143_p9 }
  0x23   : > { %411 = vxpose.xlu0.b32.cont [3/8] (short) (narrow) %v297_v3, 16  ;;  %v339_v40 = vadd.f32 %v338_v37, %v337_v36  ;;  %1056 = vmatprep.subr.bf16.mxu0 %v1055_v24  ;;  %v384_v43 = vadd.f32 %v383_v39, %v382_v35  ;;  %v385_v44 = vsel %vm336_vm1, %v376_v38, 0.0  ;;  %v370_v48 = vsub.f32 %v1398_v45, %v1373_v23  ;;  %v1408_v49 = vld [vmem:[%s1327_s9 + $0x28] sm:$0xff]  ;;  %v1437_v60 = vld [vmem:[%s1327_s9 + $0x38] sm:$0xff]  ;;  %v317_v62 = vld [vmem:[%s1332_s13 + $0x30] sm:$0xff] }
  0x24   : > { %v325_v50 = vsub.f32 %v1354_v12, %v1401_v46  ;;  %v371_v52 = vsub.f32 %v1408_v49, %v1401_v46  ;;  %v1079_v54 = vpack.c.bf16 %v1351_v11, %v1347_v9  ;;  %v1067_v55 = vpack.c.bf16 %v1367_v21, %v305_v17  ;;  %v318_v63 = vld [vmem:[%s1332_s13 + $0x38] sm:$0xff]  ;;  %p1151_p0 = pnand %p1150_p13, %p1144_p10 }
  0x25   : > { %527 = vxpose.xlu1.b32.cont [3/8] (short) (narrow) %v305_v17, 16  ;;  %v1403_v47 = vadd.f32 %v340_v41, %v339_v40  ;;  %v1412_v51 = vadd.f32 %v385_v44, %v384_v43  ;;  %v1083_v56 = vpack.c.bf16 %v1370_v22, %v1362_v18  ;;  %v1087_v57 = vpack.c.bf16 %v1401_v46, %v1373_v23 }
  0x26   : > { %1058 = vmatpush3.bf16.msra.mxu0 %v1055_v24  ;;  %1068 = vmatprep.subr.bf16.mxu1 %v1067_v55  ;;  %v1071_v58 = vpack.c.bf16 %v1408_v49, %v1398_v45  ;;  %v1075_v61 = vpack.c.bf16 %v1437_v60, %v1432_v59  ;;  %v1091_v5 = vpack.c.bf16 %v318_v63, %v317_v62  ;;  %v333_v13 = vand.u32 2147483647, %v325_v50 }
  0x27   : > { %412 = vxpose.xlu0.b32.cont [4/8] (short) (narrow) %v1339_v4, 16  ;;  %1060 = vmatprep.subr.bf16.mxu0 %v1059_v42  ;;  %v377_v14 = vand.u32 2147483647, %v369_v32  ;;  %v326_v16 = vsub.f32 %v1380_v29, %v317_v62  ;;  %v379_v25 = vand.u32 2147483647, %v371_v52  ;;  %v372_v30 = vsub.f32 %v1432_v59, %v317_v62 }
  0x28   : > { %1070 = vmatpush3.bf16.msra.mxu1 %v1067_v55  ;;  %v373_v32 = vsub.f32 %v1437_v60, %v318_v63 }
  0x29   : > { %528 = vxpose.xlu1.b32.cont [4/8] (short) (narrow) %v1367_v21, 16  ;;  %1072 = vmatprep.subr.bf16.mxu1 %v1071_v58  ;;  %v334_v19 = vand.u32 2147483647, %v326_v16  ;;  %v387_v20 = vsel %vm336_vm1, %v377_v14, 0.0 }
  0x2a   : > { %1062 = vmatpush3.bf16.msra.mxu0 %v1059_v42  ;;  %v381_v36 = vand.u32 2147483647, %v373_v32 }
  0x2b   : > { %413 = vxpose.xlu0.b32.cont [5/8] (short) (narrow) %v1342_v6, 16  ;;  %1080 = vmatprep.subr.bf16.mxu0 %v1079_v54  ;;  %v346_v6 = vsel %vm336_vm1, %v333_v13, 0.0  ;;  %v348_v24 = vsel %vm336_vm1, %v334_v19, 0.0  ;;  %v319_v19 = vld [vmem:[#allocation2] sm:$0x1] }
  0x2c   : > { %1074 = vmatpush3.bf16.msra.mxu1 %v1071_v58  ;;  %v395_v39 = vsel %vm336_vm1, %v381_v36, 0.0 }
  0x2d   : > { %529 = vxpose.xlu1.b32.cont [5/8] (short) (narrow) %v1398_v45, 16  ;;  %1076 = vmatprep.subr.bf16.mxu1 %v1075_v61 }
  0x2f   : > { %414 = vxpose.xlu0.b32.cont [6/8] (short) (narrow) %v1354_v12, 16  ;;  %v378_v12 = vand.u32 2147483647, %v370_v48 }
  0x30   : > { %1078 = vmatpush3.bf16.msra.mxu1 %v1075_v61 }
  0x31   : > { %530 = vxpose.xlu1.b32.cont [6/8] (short) (narrow) %v1408_v49, 16  ;;  %v389_v31 = vsel %vm336_vm1, %v378_v12, 0.0  ;;  %v365_v12 = vld [vmem:[#allocation4] sm:$0x1] }
  0x33   : > { %415 = vxpose.xlu0.b32.cont [7/8] (short) (narrow) %v1380_v29, 16 }
  0x35   : > { %531 = vxpose.xlu1.b32.cont [7/8] (short) (narrow) %v1432_v59, 16 }
  0x37   : > { %416 = vxpose.xlu0.b32.end [8/8] (short) (narrow) %v1387_v34, 16 }
  0x39   : > { %532 = vxpose.xlu1.b32.end [8/8] (short) (narrow) %v1437_v60, 16 }
  0x3b   : > { %640 = vxpose.xlu0.b32.start [1/8] (short) (narrow) %v1347_v9, 16  ;;  %v331_v9 = vand.u32 2147483647, %v323_v28  ;;  %v388_v28 = vadd.f32 %v387_v20, %v1412_v51 }
  0x3d   : > { %v342_v10 = vsel %vm336_vm1, %v331_v9, 0.0 }
  0x3e   : > { %v343_v15 = vadd.f32 %v342_v10, %v1403_v47 }
  0x3f   : > { %641 = vxpose.xlu0.b32.cont [2/8] (short) (narrow) %v1351_v11, 16  ;;  %v332_v11 = vand.u32 2147483647, %v324_v33  ;;  %v380_v33 = vand.u32 2147483647, %v372_v30 }
  0x41   : > { %v344_v4 = vsel %vm336_vm1, %v332_v11, 0.0  ;;  %v393_v37 = vsel %vm336_vm1, %v380_v33, 0.0 }
  0x42   : > { %v345_v17 = vadd.f32 %v344_v4, %v343_v15 }
  0x43   : > { %642 = vxpose.xlu0.b32.cont [3/8] (short) (narrow) %v1362_v18, 16  ;;  %v327_v18 = vsub.f32 %v1387_v34, %v318_v63  ;;  %v391_v34 = vsel %vm336_vm1, %v379_v25, 0.0 }
  0x44   : > { %v347_v21 = vadd.f32 %v346_v6, %v345_v17 }
  0x46   : > { %v349_v26 = vadd.f32 %v348_v24, %v347_v21 }
  0x47   : > { %643 = vxpose.xlu0.b32.cont [4/8] (short) (narrow) %v1370_v22, 16  ;;  %v335_v22 = vand.u32 2147483647, %v327_v18 }
  0x49   : > { %v350_v27 = vsel %vm336_vm1, %v335_v22, 0.0 }
  0x4a   : > { %v351_v29 = vadd.f32 %v350_v27, %v349_v26 }
  0x4b   : > { %644 = vxpose.xlu0.b32.cont [5/8] (short) (narrow) %v1373_v23, 16  ;;  %v390_v23 = vadd.f32 %v389_v31, %v388_v28 }
  0x4d   : > { %v392_v35 = vadd.f32 %v391_v34, %v390_v23 }
  0x4f   : > { %645 = vxpose.xlu0.b32.cont [6/8] (short) (narrow) %v1401_v46, 16  ;;  %v394_v38 = vadd.f32 %v393_v37, %v392_v35 }
  0x51   : > { %v396_v40 = vadd.f32 %v395_v39, %v394_v38 }
  0x53   : > { %646 = vxpose.xlu0.b32.cont [7/8] (short) (narrow) %v317_v62, 16 }
  0x57   : > { %647 = vxpose.xlu0.b32.end [8/8] (short) (narrow) %v318_v63, 16 }
  0x60   : > { %352 = vadd.xlane.f32.xlu1 %v351_v29 }
  0x84   : > { %397 = vadd.xlane.f32.xlu0 %v396_v40 }
  0x9b   : > { %v425_v0 = vpop.trf.xlu0 }
  0x9c   : > { %1006 = vmatprep.mubr.msk.f32.mxu0 %vm441_vm2, %v425_v0 }
  0x9d   : > { %v541_v1 = vpop.trf.xlu1 }
  0x9e   : > { %1025 = vmatprep.mubr.msk.f32.mxu1 %vm441_vm2, %v541_v1 }
  0x9f   : > { %v426_v2 = vpop.trf.xlu0 }
  0xa0   : > { %1007 = vmatmul.mubr.msk.f32.vlgmr.msra.gmra.mrb[0].mxu0 %vm441_vm2, %v426_v2 }
  0xa1   : > { %1082 = vmatpush3.bf16.msra.mxu0 %v1079_v54  ;;  %v542_v3 = vpop.trf.xlu1 }
  0xa2   : > { %1084 = vmatprep.subr.bf16.mxu0 %v1083_v56  ;;  %1026 = vmatmul.mubr.msk.f32.vlgmr.msra.gmra.mrb[0].mxu1 %vm441_vm2, %v542_v3 }
  0xa5   : > { %1086 = vmatpush3.bf16.msra.mxu0 %v1083_v56 }
  0xa6   : > { %1088 = vmatprep.subr.bf16.mxu0 %v1087_v57 }
  0xa9   : > { %1090 = vmatpush3.bf16.msra.mxu0 %v1087_v57 }
  0xaa   : > { %1092 = vmatprep.subr.bf16.mxu0 %v1091_v5 }
  0xad   : > { %1094 = vmatpush3.bf16.msra.mxu0 %v1091_v5 }
  0xbb   : > { %v656_v7 = vpop.trf.xlu0 }
  0xbc   : > { %1044 = vmatprep.mubr.msk.f32.mxu0 %vm441_vm2, %v656_v7 }
  0xbf   : > { %v657_v8 = vpop.trf.xlu0 }
  0xc0   : > { %1045 = vmatmul.mubr.msk.f32.vlgmr.msra.gmra.mrb[2].mxu0 %vm441_vm2, %v657_v8 }
  0xed   : > { %v353_v3 = vpop.xlane.xlu1 %352 }
  0xee   : > { %v354_v5 = vrot.slane %v353_v3, 4 }
  0xf0   : > { %v355_v7 = vadd.f32 %v354_v5, %v353_v3 }
  0xf2   : > { %v356_v8 = vrot.slane %v355_v7, 2 }
  0xf4   : > { %v357_v10 = vadd.f32 %v356_v8, %v355_v7 }
  0xf6   : > { %v358_v13 = vrot.slane %v357_v10, 1 }
  0xf8   : > { %v359_v15 = vadd.f32 %v358_v13, %v357_v10 }
  0xfa   : > { %1095 = vpush %v359_v15 }
 0x111   : > { %v398_v9 = vpop.xlane.xlu0 %397 }
 0x112   : > { %v399_v11 = vrot.slane %v398_v9, 4 }
 0x114   : > { %v400_v14 = vadd.f32 %v399_v11, %v398_v9 }
 0x116   : > { %v401_v16 = vrot.slane %v400_v14, 2 }
 0x118   : > { %v402_v4 = vadd.f32 %v401_v16, %v400_v14 }
 0x11a   : > { %v403_v17 = vrot.slane %v402_v4, 1 }
 0x11c   : > { %v404_v18 = vadd.f32 %v403_v17, %v402_v4 }
 0x11e   : > { %1097 = vpush %v404_v18 }
 0x12b   : > { %s1096_s14 = spop %1095 }
 0x12c   : > { %v361_v6 = vstv %s1096_s14 }
 0x12d   : > { %v362_v20 = vadd.f32 %v361_v6, %v319_v19 }
 0x12f   : > { %364 = vst.msk [vmem:[#allocation2] sm:$0x1] %vm363_vm3, %v362_v20 }
 0x14f   : > { %s1098_s15 = spop %1097 }
 0x150   : > { %v406_v21 = vstv %s1098_s15 }
 0x151   : > { %v407_v22 = vadd.f32 %v406_v21, %v365_v12 }
 0x153   : > { %408 = vst.msk [vmem:[#allocation4] sm:$0x1] %vm363_vm3, %v407_v22 }
 0x173   : > { %v1008_v41 = vpop.f32.mrb[0].mxu0 }
 0x174   : > { %v514_v42 = vpop.f32.mrb[1].mxu0  ;;  %v524_v48 = vmul.f32 0.0009765625, %v1008_v41 }
 0x175   : > { %v1027_v43 = vpop.f32.mrb[0].mxu1  ;;  %v523_v51 = vmul.f32 0.0009765625, %v514_v42 }
 0x176   : > { %v629_v44 = vpop.f32.mrb[1].mxu1  ;;  %v639_v45 = vmul.f32 0.0009765625, %v1027_v43 }
 0x177   : > { %v638_v47 = vmul.f32 0.0009765625, %v629_v44 }
 0x193   : > { %v1046_v46 = vpop.f32.mrb[2].mxu0 }
 0x194   : > { %v754_v49 = vmul.f32 0.0009765625, %v1046_v46  ;;  %v744_v50 = vpop.f32.mrb[3].mxu0 }
 0x195   : > { %v753_v52 = vmul.f32 0.0009765625, %v744_v50 }
 0x196   : > { %v757_v53 = vsub.f32 %v524_v48, %v754_v49  ;;  %v777_v54 = vsub.f32 %v639_v45, %v754_v49 }
 0x197   : > { %v756_v55 = vsub.f32 %v523_v51, %v753_v52  ;;  %v776_v56 = vsub.f32 %v638_v47, %v753_v52 }
 0x198   : > { %v759_v57 = vand.u32 2147483647, %v757_v53  ;;  %v779_v58 = vand.u32 2147483647, %v777_v54 }
 0x199   : > { %v758_v59 = vand.u32 2147483647, %v756_v55  ;;  %v778_v60 = vand.u32 2147483647, %v776_v56 }
 0x19a   : > { %v761_v61 = vsel %vm336_vm1, %v759_v57, 0.0  ;;  %v781_v62 = vsel %vm336_vm1, %v779_v58, 0.0 }
 0x19b   : > { %v760_v63 = vsel %vm336_vm1, %v758_v59, 0.0  ;;  %v780_v0 = vsel %vm336_vm1, %v778_v60, 0.0 }
 0x19c   : > { %v762_v1 = vadd.f32 %v761_v61, %v760_v63  ;;  %v782_v2 = vadd.f32 %v781_v62, %v780_v0 }
 0x19e   : > { %763 = vadd.xlane.f32.xlu1 %v762_v1 }
 0x1a2   : > { %783 = vadd.xlane.f32.xlu1 %v782_v2 }
 0x1a3   : > { %1154 = shalt.err (!%p1151_p0)
}
 0x1a4   : > { %s1155_s24 = scalar_lea.hbm %s1591_s4, 16 }
 0x1a5   : > { %p1156_p1 = scmp.ne.s32.totalorder %s1591_s4, %s1155_s24  ;;  %p1161_p4 = scmp.lt.u32.totalorder %s1155_s24, %s1591_s4 }
 0x1a7   : > { %p1157_p2 = pnand %p1156_p1, %p1119_p7 }
 0x1a9   : > { %p1158_p3 = pneg %p1157_p2 }
 0x1ab   : > { %p1163_p5 = pnand %p1161_p4, %p1158_p3 }
 0x1ad   : > { %1166 = shalt.err (!%p1163_p5)
}
 0x1ae   : > { %1106 = dma.vmem_to_hbm [thread:$0]  (%p1119_p7), %s814_s17, 16, %s1591_s4, [#allocation5]  }
 0x1af   : > { %s1267_s7 = smov [#allocation2]  }
 0x1b0   : > { %s802_s8 = sshll.u32 %s1267_s7, 4  ;;  %s803_s8 = int_to_ptr.vmem [resolvable:$true] %s802_s8 }
 0x1b1   : > { %s1167_s9 = scalar_lea.vmem %s803_s8, 16  ;;  %s1173_s10 = scalar_lea.vmem %s803_s8, 32 }
 0x1b2   : > { %p1168_p6 = scmp.ne.s32.totalorder %s803_s8, %s1167_s9  ;;  %p1174_p10 = scmp.lt.s32.totalorder %s803_s8, %s803_s8 }
 0x1b3   : > { %p1175_p11 = scmp.lt.s32.totalorder %s1173_s10, %s1167_s9 }
 0x1b4   : > { %p1169_p8 = pnand %p1168_p6, %p1119_p7 }
 0x1b5   : > { %p1176_p12 = por %p1175_p11, %p1174_p10 }
 0x1b6   : > { %p1170_p9 = pneg %p1169_p8 }
 0x1b8   : > { %p1177_p13 = pnand %p1176_p12, %p1170_p9 }
 0x1ba   : > { %1180 = shalt.err (!%p1177_p13)
}
 0x1bb   : > { %s1181_s13 = scalar_lea.hbm %s1590_s3, 16 }
 0x1bc   : > { %p1182_p0 = scmp.ne.s32.totalorder %s1590_s3, %s1181_s13  ;;  %p1187_p3 = scmp.lt.u32.totalorder %s1181_s13, %s1590_s3 }
 0x1be   : > { %p1183_p1 = pnand %p1182_p0, %p1119_p7 }
 0x1c0   : > { %p1184_p2 = pneg %p1183_p1 }
 0x1c2   : > { %p1189_p4 = pnand %p1187_p3, %p1184_p2 }
 0x1c4   : > { %1192 = shalt.err (!%p1189_p4)
}
 0x1c5   : > { %1104 = dma.vmem_to_hbm [thread:$0]  (%p1119_p7), %s803_s8, 16, %s1590_s3, [#allocation3]   ;;  %v755_v37 = vld [vmem:[#allocation6] sm:$0x1]  ;;  %v775_v40 = vld [vmem:[#allocation7] sm:$0x1] }
 0x1c6   : > { %s1268_s20 = smov [#allocation6]   ;;  %s1269_s25 = smov [#allocation7]  }
 0x1c7   : > { %s824_s23 = sshll.u32 %s1268_s20, 4  ;;  %s835_s26 = sshll.u32 %s1269_s25, 4  ;;  %s825_s23 = int_to_ptr.vmem [resolvable:$true] %s824_s23  ;;  %s836_s26 = int_to_ptr.vmem [resolvable:$true] %s835_s26 }
 0x1c8   : > { %s1193_s28 = scalar_lea.vmem %s825_s23, 16  ;;  %s1199_s29 = scalar_lea.vmem %s825_s23, 32 }
 0x1c9   : > { %p1194_p5 = scmp.ne.s32.totalorder %s825_s23, %s1193_s28  ;;  %p1200_p9 = scmp.lt.s32.totalorder %s825_s23, %s825_s23 }
 0x1ca   : > { %p1201_p10 = scmp.lt.s32.totalorder %s1199_s29, %s1193_s28 }
 0x1cb   : > { %p1195_p6 = pnand %p1194_p5, %p1119_p7 }
 0x1cc   : > { %p1202_p11 = por %p1201_p10, %p1200_p9 }
 0x1cd   : > { %p1196_p8 = pneg %p1195_p6 }
 0x1cf   : > { %p1203_p12 = pnand %p1202_p11, %p1196_p8 }
 0x22b   : > { %v764_v24 = vpop.xlane.xlu1 %763 }
 0x22c   : > { %v765_v25 = vrot.slane %v764_v24, 4 }
 0x22e   : > { %v766_v26 = vadd.f32 %v765_v25, %v764_v24 }
 0x22f   : > { %v784_v27 = vpop.xlane.xlu1 %783 }
 0x230   : > { %v767_v28 = vrot.slane %v766_v26, 2  ;;  %v785_v29 = vrot.slane %v784_v27, 4 }
 0x232   : > { %v786_v30 = vadd.f32 %v785_v29, %v784_v27  ;;  %v768_v31 = vadd.f32 %v767_v28, %v766_v26 }
 0x234   : > { %v787_v23 = vrot.slane %v786_v30, 2  ;;  %v769_v32 = vrot.slane %v768_v31, 1 }
 0x236   : > { %v788_v33 = vadd.f32 %v787_v23, %v786_v30  ;;  %v770_v34 = vadd.f32 %v769_v32, %v768_v31 }
 0x238   : > { %1099 = vpush %v770_v34  ;;  %v789_v35 = vrot.slane %v788_v33, 1 }
 0x23a   : > { %v790_v36 = vadd.f32 %v789_v35, %v788_v33 }
 0x23c   : > { %1101 = vpush %v790_v36 }
 0x269   : > { %s1100_s24 = spop %1099 }
 0x26a   : > { %v772_v38 = vstv %s1100_s24 }
 0x26b   : > { %v773_v39 = vadd.f32 %v772_v38, %v755_v37 }
 0x26d   : > { %s1102_s27 = spop %1101  ;;  %774 = vst.msk [vmem:[#allocation6] sm:$0x1] %vm363_vm3, %v773_v39 }
 0x26e   : > { %v792_v41 = vstv %s1102_s27 }
 0x26f   : > { %1206 = shalt.err (!%p1203_p12)
}
 0x270   : > { %s1207_s8 = scalar_lea.hbm %s1592_s5, 16 }
 0x271   : > { %p1208_p13 = scmp.ne.s32.totalorder %s1592_s5, %s1207_s8  ;;  %p1213_p2 = scmp.lt.u32.totalorder %s1207_s8, %s1592_s5 }
 0x273   : > { %p1209_p0 = pnand %p1208_p13, %p1119_p7 }
 0x275   : > { %p1210_p1 = pneg %p1209_p0 }
 0x277   : > { %p1215_p3 = pnand %p1213_p2, %p1210_p1 }
 0x279   : > { %1218 = shalt.err (!%p1215_p3)
}
 0x27a   : > { %1108 = dma.vmem_to_hbm [thread:$0]  (%p1119_p7), %s825_s23, 16, %s1592_s5, [#allocation5]   ;;  %v793_v42 = vadd.f32 %v792_v41, %v775_v40 }
 0x27b   : > { %s1219_s15 = scalar_lea.vmem %s836_s26, 16  ;;  %s1225_s16 = scalar_lea.vmem %s836_s26, 32 }
 0x27c   : > { %794 = vst.msk [vmem:[#allocation7] sm:$0x1] %vm363_vm3, %v793_v42  ;;  %p1220_p4 = scmp.ne.s32.totalorder %s836_s26, %s1219_s15  ;;  %p1226_p8 = scmp.lt.s32.totalorder %s836_s26, %s836_s26 }
 0x27d   : > { %p1227_p9 = scmp.lt.s32.totalorder %s1225_s16, %s1219_s15 }
 0x27e   : > { %p1221_p5 = pnand %p1220_p4, %p1119_p7 }
 0x27f   : > { %p1228_p10 = por %p1227_p9, %p1226_p8 }
 0x280   : > { %p1222_p6 = pneg %p1221_p5 }
 0x282   : > { %p1229_p11 = pnand %p1228_p10, %p1222_p6 }
 0x284   : > { %1232 = shalt.err (!%p1229_p11)
}
 0x285   : > { %s1233_s19 = scalar_lea.hbm %s1593_s6, 16 }
 0x286   : > { %p1234_p12 = scmp.ne.s32.totalorder %s1593_s6, %s1233_s19  ;;  %p1239_p1 = scmp.lt.u32.totalorder %s1233_s19, %s1593_s6 }
 0x288   : > { %p1235_p13 = pnand %p1234_p12, %p1119_p7 }
 0x28a   : > { %p1236_p0 = pneg %p1235_p13 }
 0x28c   : > { %p1241_p2 = pnand %p1239_p1, %p1236_p0 }
 0x28e   : > { %1244 = shalt.err (!%p1241_p2)
}
 0x28f   : > { %1110 = dma.vmem_to_hbm [thread:$0]  (%p1119_p7), %s836_s26, 16, %s1593_s6, [#allocation8]  }
 0x290   : > { %1250 = dma.done.wait (%p1119_p7), [#allocation3], 16  }
 0x291   : > { %1252 = vsyncadd (%p1119_p7), [#allocation3], 4294967280 }
 0x292   : > { %1254 = dma.done.wait (%p1119_p7), [#allocation5], 32  }
 0x293   : > { %1256 = vsyncadd (%p1119_p7), [#allocation5], 4294967264 }
 0x294   : > { %1258 = dma.done.wait (%p1119_p7), [#allocation8], 16  }
 0x295   : > { %1260 = vsyncadd (%p1119_p7), [#allocation8], 4294967280 }
 0x296 PF: > { %s20_s21 = sadd.s32 1, %s1263_s21  }
 0x297   : > { %p17_p3 = scmp.ge.s32.totalorder %s20_s21, 4  }
 0x299   :  { %19 = sbr.rel (!%p17_p3) target bundleno = 3 (0x3), region = 93 }
 0x2a0   :  { %860 = vsyncpa [#allocation3], 1 }
 0x2a1   :  { %862 = vsyncpa [#allocation3 + $0x1], 1 }
 0x2a2   :  { %863 = vsyncpa [#allocation5], 1 }
 0x2a3   :  { %864 = vsyncpa [#allocation8], 1 }

// kernel: loss_forward.13
= control target key start
LH: loop header
LB: loop body
LE: loop exit
PB: predicated region body
PF: predicated region fallthrough
CT: control target
= control target key end

     0   :  { %12 = vsyncpa [#allocation3], 0  ;;  %s1382_s0 = inlined_call_operand.vmem [shape: f32[6,16,32], index: 0, kind: input, shape index: {}, may-alias: {0,1,2}]   ;;  %s1383_s1 = inlined_call_operand.vmem [shape: f32[6,16,32], index: 1, kind: input, shape index: {}, may-alias: {0,1,2}]   ;;  %s1384_s2 = inlined_call_operand.vmem [shape: f32[6,16,32], index: 2, kind: input, shape index: {}, may-alias: {0,1,2}]   ;;  %s1385_s3 = inlined_call_operand.hbm [shape: f32[1,1], index: 3, kind: output, shape index: {0}]   ;;  %s1386_s4 = inlined_call_operand.hbm [shape: f32[1,1], index: 4, kind: output, shape index: {1}]   ;;  %s1387_s5 = inlined_call_operand.hbm [shape: f32[1,1], index: 5, kind: output, shape index: {2}]   ;;  %s1388_s6 = inlined_call_operand.hbm [shape: f32[1,1], index: 6, kind: output, shape index: {3}]  }
   0x1   :  { %13 = vsyncpa [#allocation5], 0 }
   0x2   :  { %14 = vsyncpa [#allocation8], 0  ;;  %s1242_s21 = smov 0  }
   0x3 LB: > { %s1248_s22 = sadd.s32 4294967295, %s1200_s21   ;;  %p937_p0 = scmp.ge.s32.totalorder %s1200_s21, 1  ;;  %s1200_s21 = sphi %s1242_s21, %s20_s21  }
   0x4   : > { %p230_p1 = scmp.lt.s32.totalorder %s1200_s21, 3 }
   0x6   : > { %p231_p2 = pnand %p937_p0, %p230_p1 }
   0x7   : > { %p267_p3 = scmp.lt.s32.totalorder (!%p231_p2), %s1248_s22, 5  ;;  %s272_s23 = sadd.s32 (!%p231_p2), 2, %s1248_s22 }
   0x8   : > { %234 = sbr.rel (%p231_p2) target bundleno = 656 (0x290), region = 32  ;;  %p273_p4 = scmp.lt.s32.totalorder (!%p231_p2), %s272_s23, 5 }
   0x9   : > { %s279_s24 = sadd.s32 (!%p231_p2), 4, %s1248_s22  ;;  %p944_p6 = scmp.ne.s32.totalorder (!%p231_p2), %s1248_s22, 0 }
   0xa   : > { %p280_p5 = scmp.lt.s32.totalorder (!%p231_p2), %s279_s24, 5 }
   0xf   : > { %s268_s25 = scalar_select %p267_p3, %s1248_s22, 5 }
  0x10   : > { %s1390_s23 = smov (!%p273_p4, %s272_s23), 5  ;;  %s1392_s24 = smov (!%p280_p5, %s279_s24), 5 }
  0x11   : > { %s967_s26 = sshll.u32 %s268_s25, 4  ;;  %s968_s30 = sshll.u32 %s1390_s23, 4  ;;  %vm290_vm0 = vcmask (!%p944_p6), 0   ;;  %v1202_v0 = vmov (!%p944_p6), 0.0  }
  0x12   : > { %s271_s29 = scalar_lea.vmem %s1382_s0, %s967_s26  ;;  %s277_s9 = scalar_lea.vmem %s1383_s1, %s968_s30  ;;  %291 = vst.msk [vmem:[#allocation2] sm:$0x1] (!%p944_p6), %vm290_vm0, %v1202_v0  ;;  %292 = vst.msk [vmem:[#allocation4] sm:$0x1] (!%p944_p6), %vm290_vm0, %v1202_v0 }
  0x13   : > { %s969_s10 = sshll.u32 %s1392_s24, 4  ;;  %289 = sbr.rel (%p944_p6) target bundleno = 26 (0x1a), region = 36  ;;  %293 = vst.msk [vmem:[#allocation6] sm:$0x1] (!%p944_p6), %vm290_vm0, %v1202_v0  ;;  %294 = vst.msk [vmem:[#allocation7] sm:$0x1] (!%p944_p6), %vm290_vm0, %v1202_v0 }
  0x14   : > { %s284_s13 = scalar_lea.vmem %s1384_s2, %s969_s10 }
  0x1a PF: > { %v295_v1 = vld [vmem:[%s271_s29] sm:$0xff]  ;;  %v296_v2 = vld [vmem:[%s271_s29 + $0x8] sm:$0xff]  ;;  %vm375_vm1 = vcmask 130048   ;;  %vm306_vm2 = vcmask 261120   ;;  %vm321_vm3 = vcmask 0   ;;  %p1056_p7 = scmp.eq.s32.totalorder %s1248_s22, 1 }
  0x1b   : > { %v297_v3 = vld [vmem:[%s277_s9] sm:$0xff]  ;;  %343 = vxpose.xlu0.b32.start [1/2] (short) (narrow) %v295_v1, 32  ;;  %v1018_v4 = vpack.c.bf16 %v296_v2, %v295_v1  ;;  %v298_v5 = vld [vmem:[%s277_s9 + $0x8] sm:$0xff]  ;;  %s1203_s16 = smov [#allocation4]  }
  0x1c   : > { %477 = vxpose.xlu1.b32.start [1/2] (short) (narrow) %v297_v3, 32  ;;  %v299_v6 = vld [vmem:[%s284_s13] sm:$0xff]  ;;  %v300_v7 = vld [vmem:[%s284_s13 + $0x8] sm:$0xff]  ;;  %v1022_v8 = vpack.c.bf16 %v298_v5, %v297_v3  ;;  %s817_s17 = sshll.u32 %s1203_s16, 4  ;;  %s818_s17 = int_to_ptr.vmem [resolvable:$true] %s817_s17 }
  0x1d   : > { %1019 = vmatprep.subr.bf16.mxu0 %v1018_v4  ;;  %1030 = vmatprep.subr.bf16.mxu1 %v1018_v4  ;;  %v1026_v9 = vpack.c.bf16 %v300_v7, %v299_v6  ;;  %v302_v22 = vsub.f32 %v295_v1, %v299_v6  ;;  %v303_v23 = vsub.f32 %v296_v2, %v300_v7  ;;  %s1078_s18 = scalar_lea.vmem %s818_s17, 16  ;;  %s1084_s19 = scalar_lea.vmem %s818_s17, 32 }
  0x1e   : > { %1021 = vmatpush3.bf16.msra.mxu0 %v1018_v4  ;;  %1031 = vmatpush3.bf16.msra.mxu1 %v1018_v4  ;;  %v324_v29 = vsub.f32 %v297_v3, %v299_v6  ;;  %v325_v30 = vsub.f32 %v298_v5, %v300_v7  ;;  %p1079_p8 = scmp.ne.s32.totalorder %s818_s17, %s1078_s18  ;;  %p1085_p11 = scmp.lt.s32.totalorder %s818_s17, %s818_s17 }
  0x1f   : > { %344 = vxpose.xlu0.b32.end [2/2] (short) (narrow) %v296_v2, 32  ;;  %1023 = vmatprep.subr.bf16.mxu1 %v1022_v8  ;;  %v304_v24 = vand.u32 2147483647, %v302_v22  ;;  %v305_v25 = vand.u32 2147483647, %v303_v23  ;;  %p1086_p12 = scmp.lt.s32.totalorder %s1084_s19, %s1078_s18 }
  0x20   : > { %478 = vxpose.xlu1.b32.end [2/2] (short) (narrow) %v298_v5, 32  ;;  %1027 = vmatprep.subr.bf16.mxu0 %v1026_v9  ;;  %v326_v31 = vand.u32 2147483647, %v324_v29  ;;  %v327_v32 = vand.u32 2147483647, %v325_v30  ;;  %p1080_p9 = pnand %p1079_p8, %p1056_p7 }
  0x21   : > { %v307_v26 = vsel %vm306_vm2, %v304_v24, 0.0  ;;  %v308_v27 = vsel %vm306_vm2, %v305_v25, 0.0  ;;  %p1087_p13 = por %p1086_p12, %p1085_p11 }
  0x22   : > { %v309_v28 = vadd.f32 %v308_v27, %v307_v26  ;;  %v328_v33 = vsel %vm306_vm2, %v326_v31, 0.0  ;;  %v329_v34 = vsel %vm306_vm2, %v327_v32, 0.0  ;;  %p1081_p10 = pneg %p1080_p9 }
  0x23   : > { %v330_v35 = vadd.f32 %v329_v34, %v328_v33 }
  0x24   : > { %p1088_p0 = pnand %p1087_p13, %p1081_p10 }
  0x28   : > { %610 = vxpose.xlu0.b32.start [1/2] (short) (narrow) %v299_v6, 32 }
  0x2c   : > { %611 = vxpose.xlu0.b32.end [2/2] (short) (narrow) %v300_v7, 32 }
  0x4f   : > { %310 = vadd.xlane.f32.xlu1 %v309_v28 }
  0x61   : > { %331 = vadd.xlane.f32.xlu0 %v330_v35 }
  0x9b   : > { %v359_v10 = vpop.trf.xlu0 }
  0x9c   : > { %v493_v11 = vpop.trf.xlu1  ;;  %992 = vmatprep.mubr.msk.f32.mxu0 %vm375_vm1, %v359_v10 }
  0x9f   : > { %v360_v12 = vpop.trf.xlu0 }
  0xa0   : > { %993 = vmatmul.mubr.msk.f32.vlgmr.msra.gmra.mrb[0].mxu0 %vm375_vm1, %v360_v12  ;;  %v494_v13 = vpop.trf.xlu1 }
  0xa1   : > { %1029 = vmatpush3.bf16.msra.mxu0 %v1026_v9 }
  0xa3   : > { %v361_v14 = vpop.trf.xlu0 }
  0xa4   : > { %995 = vmatprep.mubr.msk.f32.mxu1 %vm375_vm1, %v361_v14  ;;  %v495_v16 = vpop.trf.xlu1 }
  0xa7   : > { %v362_v15 = vpop.trf.xlu0 }
  0xa8   : > { %996 = vmatmul.mubr.msk.f32.vlgmr.msra.gmra.mrb[0].mxu1 %vm375_vm1, %v362_v15  ;;  %v496_v18 = vpop.trf.xlu1 }
  0xa9   : > { %1025 = vmatpush3.bf16.msra.mxu1 %v1022_v8  ;;  %1002 = vmatprep.mubr.msk.f32.mxu1 %vm375_vm1, %v493_v11 }
  0xab   : > { %v626_v17 = vpop.trf.xlu0 }
  0xac   : > { %1012 = vmatprep.mubr.msk.f32.mxu0 %vm375_vm1, %v626_v17  ;;  %1003 = vmatmul.mubr.msk.f32.vlgmr.msra.gmra.mrb[2].mxu1 %vm375_vm1, %v494_v13 }
  0xad   : > { %1005 = vmatprep.mubr.msk.f32.mxu1 %vm375_vm1, %v495_v16 }
  0xaf   : > { %v627_v19 = vpop.trf.xlu0 }
  0xb0   : > { %1013 = vmatmul.mubr.msk.f32.vlgmr.msra.gmra.mrb[2].mxu0 %vm375_vm1, %v627_v19  ;;  %1006 = vmatmul.mubr.msk.f32.gmra.mrb[4].mxu1 %vm375_vm1, %v496_v18 }
  0xb3   : > { %v628_v20 = vpop.trf.xlu0 }
  0xb4   : > { %1015 = vmatprep.mubr.msk.f32.mxu0 %vm375_vm1, %v628_v20 }
  0xb7   : > { %v629_v21 = vpop.trf.xlu0 }
  0xb8   : > { %1016 = vmatmul.mubr.msk.f32.gmra.mrb[4].mxu0 %vm375_vm1, %v629_v21 }
  0xdc   : > { %v311_v26 = vpop.xlane.xlu1 %310 }
  0xdd   : > { %v312_v27 = vrot.slane %v311_v26, 4 }
  0xdf   : > { %v313_v28 = vadd.f32 %v312_v27, %v311_v26 }
  0xe1   : > { %v314_v29 = vrot.slane %v313_v28, 2 }
  0xe3   : > { %v315_v31 = vadd.f32 %v314_v29, %v313_v28 }
  0xe5   : > { %v316_v33 = vrot.slane %v315_v31, 1 }
  0xe7   : > { %v317_v35 = vadd.f32 %v316_v33, %v315_v31 }
  0xe9   : > { %1032 = vpush %v317_v35 }
  0xee   : > { %v332_v30 = vpop.xlane.xlu0 %331 }
  0xef   : > { %v333_v32 = vrot.slane %v332_v30, 4 }
  0xf1   : > { %v334_v34 = vadd.f32 %v333_v32, %v332_v30 }
 0x11a   : > { %s1033_s14 = spop %1032 }
 0x173   : > { %v994_v36 = vpop.f32.mrb[0].mxu0 }
 0x174   : > { %v454_v37 = vpop.f32.mrb[1].mxu0  ;;  %v474_v46 = vmul.f32 0.001953125, %v994_v36  ;;  %v335_v36 = vrot.slane %v334_v34, 2 }
 0x175   : > { %v473_v50 = vmul.f32 0.001953125, %v454_v37 }
 0x176   : > { %v336_v37 = vadd.f32 %v335_v36, %v334_v34 }
 0x17b   : > { %v997_v38 = vpop.f32.mrb[0].mxu1 }
 0x17c   : > { %v464_v39 = vpop.f32.mrb[1].mxu1  ;;  %v476_v3 = vmul.f32 0.001953125, %v997_v38  ;;  %v337_v38 = vrot.slane %v336_v37, 1 }
 0x17d   : > { %v475_v8 = vmul.f32 0.001953125, %v464_v39 }
 0x17e   : > { %v338_v39 = vadd.f32 %v337_v38, %v336_v37 }
 0x17f   : > { %v1004_v40 = vpop.f32.mrb[2].mxu1 }
 0x180   : > { %v587_v41 = vpop.f32.mrb[3].mxu1  ;;  %v607_v42 = vmul.f32 0.001953125, %v1004_v40  ;;  %1034 = vpush %v338_v39  ;;  %v301_v40 = vld [vmem:[#allocation2] sm:$0x1] }
 0x181   : > { %v606_v44 = vmul.f32 0.001953125, %v587_v41  ;;  %v319_v41 = vstv %s1033_s14 }
 0x183   : > { %v1014_v43 = vpop.f32.mrb[2].mxu0  ;;  %v1007_v45 = vpop.f32.mrb[4].mxu1 }
 0x184   : > { %v740_v47 = vmul.f32 0.001953125, %v1014_v43  ;;  %v720_v48 = vpop.f32.mrb[3].mxu0  ;;  %v597_v49 = vpop.f32.mrb[5].mxu1  ;;  %v609_v62 = vmul.f32 0.001953125, %v1007_v45  ;;  %v323_v43 = vld [vmem:[#allocation4] sm:$0x1] }
 0x185   : > { %v739_v51 = vmul.f32 0.001953125, %v720_v48  ;;  %v608_v2 = vmul.f32 0.001953125, %v597_v49 }
 0x186   : > { %v745_v52 = vsub.f32 %v474_v46, %v740_v47  ;;  %v773_v53 = vsub.f32 %v607_v42, %v740_v47  ;;  %v320_v42 = vadd.f32 %v319_v41, %v301_v40 }
 0x187   : > { %v744_v54 = vsub.f32 %v473_v50, %v739_v51  ;;  %v772_v55 = vsub.f32 %v606_v44, %v739_v51 }
 0x188   : > { %v749_v56 = vand.u32 2147483647, %v745_v52  ;;  %v777_v57 = vand.u32 2147483647, %v773_v53  ;;  %322 = vst.msk [vmem:[#allocation2] sm:$0x1] %vm321_vm3, %v320_v42 }
 0x189   : > { %v748_v58 = vand.u32 2147483647, %v744_v54  ;;  %v776_v59 = vand.u32 2147483647, %v772_v55 }
 0x18a   : > { %v753_v60 = vsel %vm306_vm2, %v749_v56, 0.0  ;;  %v781_v61 = vsel %vm306_vm2, %v777_v57, 0.0 }
 0x18b   : > { %v752_v63 = vsel %vm306_vm2, %v748_v58, 0.0  ;;  %v780_v0 = vsel %vm306_vm2, %v776_v59, 0.0  ;;  %v1017_v1 = vpop.f32.mrb[4].mxu0 }
 0x18c   : > { %v742_v4 = vmul.f32 0.001953125, %v1017_v1  ;;  %v730_v5 = vpop.f32.mrb[5].mxu0  ;;  %v754_v6 = vadd.f32 %v753_v60, %v752_v63  ;;  %v782_v7 = vadd.f32 %v781_v61, %v780_v0 }
 0x18d   : > { %v741_v9 = vmul.f32 0.001953125, %v730_v5 }
 0x18e   : > { %v747_v10 = vsub.f32 %v476_v3, %v742_v4  ;;  %v775_v11 = vsub.f32 %v609_v62, %v742_v4 }
 0x18f   : > { %v746_v12 = vsub.f32 %v475_v8, %v741_v9  ;;  %v774_v13 = vsub.f32 %v608_v2, %v741_v9 }
 0x190   : > { %v751_v14 = vand.u32 2147483647, %v747_v10  ;;  %v779_v15 = vand.u32 2147483647, %v775_v11 }
 0x191   : > { %v750_v16 = vand.u32 2147483647, %v746_v12  ;;  %v778_v17 = vand.u32 2147483647, %v774_v13 }
 0x192   : > { %v757_v22 = vsel %vm306_vm2, %v751_v14, 0.0  ;;  %v785_v23 = vsel %vm306_vm2, %v779_v15, 0.0 }
 0x193   : > { %v755_v18 = vsel %vm306_vm2, %v750_v16, 0.0  ;;  %v783_v19 = vsel %vm306_vm2, %v778_v17, 0.0 }
 0x194   : > { %v756_v20 = vadd.f32 %v755_v18, %v754_v6  ;;  %v784_v21 = vadd.f32 %v783_v19, %v782_v7 }
 0x196   : > { %v758_v24 = vadd.f32 %v757_v22, %v756_v20  ;;  %v786_v25 = vadd.f32 %v785_v23, %v784_v21 }
 0x198   : > { %759 = vadd.xlane.f32.xlu1 %v758_v24 }
 0x19c   : > { %787 = vadd.xlane.f32.xlu1 %v786_v25 }
 0x1b1   : > { %s1035_s15 = spop %1034 }
 0x1b2   : > { %v340_v44 = vstv %s1035_s15 }
 0x1b3   : > { %v341_v45 = vadd.f32 %v340_v44, %v323_v43 }
 0x1b5   : > { %342 = vst.msk [vmem:[#allocation4] sm:$0x1] %vm321_vm3, %v341_v45 }
 0x1b6   : > { %1091 = shalt.err (!%p1088_p0)
}
 0x1b7   : > { %s1092_s24 = scalar_lea.hbm %s1386_s4, 16 }
 0x1b8   : > { %p1093_p1 = scmp.ne.s32.totalorder %s1386_s4, %s1092_s24  ;;  %p1098_p4 = scmp.lt.u32.totalorder %s1092_s24, %s1386_s4 }
 0x1ba   : > { %p1094_p2 = pnand %p1093_p1, %p1056_p7 }
 0x1bc   : > { %p1095_p3 = pneg %p1094_p2 }
 0x1be   : > { %p1100_p5 = pnand %p1098_p4, %p1095_p3 }
 0x1c0   : > { %1103 = shalt.err (!%p1100_p5)
}
 0x1c1   : > { %1043 = dma.vmem_to_hbm [thread:$0]  (%p1056_p7), %s818_s17, 16, %s1386_s4, [#allocation5]  }
 0x1c2   : > { %s1204_s7 = smov [#allocation2]  }
 0x1c3   : > { %s806_s8 = sshll.u32 %s1204_s7, 4  ;;  %s807_s8 = int_to_ptr.vmem [resolvable:$true] %s806_s8 }
 0x1c4   : > { %s1104_s9 = scalar_lea.vmem %s807_s8, 16  ;;  %s1110_s10 = scalar_lea.vmem %s807_s8, 32 }
 0x1c5   : > { %p1105_p6 = scmp.ne.s32.totalorder %s807_s8, %s1104_s9  ;;  %p1111_p10 = scmp.lt.s32.totalorder %s807_s8, %s807_s8 }
 0x1c6   : > { %p1112_p11 = scmp.lt.s32.totalorder %s1110_s10, %s1104_s9 }
 0x1c7   : > { %p1106_p8 = pnand %p1105_p6, %p1056_p7 }
 0x1c8   : > { %p1113_p12 = por %p1112_p11, %p1111_p10 }
 0x1c9   : > { %p1107_p9 = pneg %p1106_p8 }
 0x1cb   : > { %p1114_p13 = pnand %p1113_p12, %p1107_p9 }
 0x1cd   : > { %1117 = shalt.err (!%p1114_p13)
}
 0x1ce   : > { %s1118_s13 = scalar_lea.hbm %s1385_s3, 16 }
 0x1cf   : > { %p1119_p0 = scmp.ne.s32.totalorder %s1385_s3, %s1118_s13  ;;  %p1124_p3 = scmp.lt.u32.totalorder %s1118_s13, %s1385_s3 }
 0x1d1   : > { %p1120_p1 = pnand %p1119_p0, %p1056_p7 }
 0x1d3   : > { %p1121_p2 = pneg %p1120_p1 }
 0x1d5   : > { %p1126_p4 = pnand %p1124_p3, %p1121_p2 }
 0x1d7   : > { %1129 = shalt.err (!%p1126_p4)
}
 0x1d8   : > { %1041 = dma.vmem_to_hbm [thread:$0]  (%p1056_p7), %s807_s8, 16, %s1385_s3, [#allocation3]   ;;  %v743_v60 = vld [vmem:[#allocation6] sm:$0x1]  ;;  %v771_v63 = vld [vmem:[#allocation7] sm:$0x1] }
 0x1d9   : > { %s1205_s20 = smov [#allocation6]   ;;  %s1206_s25 = smov [#allocation7]  }
 0x1da   : > { %s828_s23 = sshll.u32 %s1205_s20, 4  ;;  %s839_s26 = sshll.u32 %s1206_s25, 4  ;;  %s829_s23 = int_to_ptr.vmem [resolvable:$true] %s828_s23  ;;  %s840_s26 = int_to_ptr.vmem [resolvable:$true] %s839_s26 }
 0x1db   : > { %s1130_s28 = scalar_lea.vmem %s829_s23, 16  ;;  %s1136_s29 = scalar_lea.vmem %s829_s23, 32 }
 0x1dc   : > { %p1131_p5 = scmp.ne.s32.totalorder %s829_s23, %s1130_s28  ;;  %p1137_p9 = scmp.lt.s32.totalorder %s829_s23, %s829_s23 }
 0x1dd   : > { %p1138_p10 = scmp.lt.s32.totalorder %s1136_s29, %s1130_s28 }
 0x1de   : > { %p1132_p6 = pnand %p1131_p5, %p1056_p7 }
 0x1df   : > { %p1139_p11 = por %p1138_p10, %p1137_p9 }
 0x1e0   : > { %p1133_p8 = pneg %p1132_p6 }
 0x1e2   : > { %p1140_p12 = pnand %p1139_p11, %p1133_p8 }
 0x225   : > { %v760_v46 = vpop.xlane.xlu1 %759 }
 0x226   : > { %v761_v47 = vrot.slane %v760_v46, 4 }
 0x228   : > { %v762_v48 = vadd.f32 %v761_v47, %v760_v46 }
 0x229   : > { %v788_v49 = vpop.xlane.xlu1 %787 }
 0x22a   : > { %v763_v50 = vrot.slane %v762_v48, 2  ;;  %v789_v51 = vrot.slane %v788_v49, 4 }
 0x22c   : > { %v790_v52 = vadd.f32 %v789_v51, %v788_v49  ;;  %v764_v53 = vadd.f32 %v763_v50, %v762_v48 }
 0x22e   : > { %v791_v54 = vrot.slane %v790_v52, 2  ;;  %v765_v55 = vrot.slane %v764_v53, 1 }
 0x230   : > { %v792_v56 = vadd.f32 %v791_v54, %v790_v52  ;;  %v766_v57 = vadd.f32 %v765_v55, %v764_v53 }
 0x232   : > { %1036 = vpush %v766_v57  ;;  %v793_v58 = vrot.slane %v792_v56, 1 }
 0x234   : > { %v794_v59 = vadd.f32 %v793_v58, %v792_v56 }
 0x236   : > { %1038 = vpush %v794_v59 }
 0x263   : > { %s1037_s24 = spop %1036 }
 0x264   : > { %v768_v61 = vstv %s1037_s24 }
 0x265   : > { %v769_v62 = vadd.f32 %v768_v61, %v743_v60 }
 0x267   : > { %s1039_s27 = spop %1038  ;;  %770 = vst.msk [vmem:[#allocation6] sm:$0x1] %vm321_vm3, %v769_v62 }
 0x268   : > { %v796_v0 = vstv %s1039_s27 }
 0x269   : > { %1143 = shalt.err (!%p1140_p12)
}
 0x26a   : > { %s1144_s8 = scalar_lea.hbm %s1387_s5, 16 }
 0x26b   : > { %p1145_p13 = scmp.ne.s32.totalorder %s1387_s5, %s1144_s8  ;;  %p1150_p2 = scmp.lt.u32.totalorder %s1144_s8, %s1387_s5 }
 0x26d   : > { %p1146_p0 = pnand %p1145_p13, %p1056_p7 }
 0x26f   : > { %p1147_p1 = pneg %p1146_p0 }
 0x271   : > { %p1152_p3 = pnand %p1150_p2, %p1147_p1 }
 0x273   : > { %1155 = shalt.err (!%p1152_p3)
}
 0x274   : > { %1045 = dma.vmem_to_hbm [thread:$0]  (%p1056_p7), %s829_s23, 16, %s1387_s5, [#allocation5]   ;;  %v797_v1 = vadd.f32 %v796_v0, %v771_v63 }
 0x275   : > { %s1156_s15 = scalar_lea.vmem %s840_s26, 16  ;;  %s1162_s16 = scalar_lea.vmem %s840_s26, 32 }
 0x276   : > { %798 = vst.msk [vmem:[#allocation7] sm:$0x1] %vm321_vm3, %v797_v1  ;;  %p1157_p4 = scmp.ne.s32.totalorder %s840_s26, %s1156_s15  ;;  %p1163_p8 = scmp.lt.s32.totalorder %s840_s26, %s840_s26 }
 0x277   : > { %p1164_p9 = scmp.lt.s32.totalorder %s1162_s16, %s1156_s15 }
 0x278   : > { %p1158_p5 = pnand %p1157_p4, %p1056_p7 }
 0x279   : > { %p1165_p10 = por %p1164_p9, %p1163_p8 }
 0x27a   : > { %p1159_p6 = pneg %p1158_p5 }
 0x27c   : > { %p1166_p11 = pnand %p1165_p10, %p1159_p6 }
 0x27e   : > { %1169 = shalt.err (!%p1166_p11)
}
 0x27f   : > { %s1170_s19 = scalar_lea.hbm %s1388_s6, 16 }
 0x280   : > { %p1171_p12 = scmp.ne.s32.totalorder %s1388_s6, %s1170_s19  ;;  %p1176_p1 = scmp.lt.u32.totalorder %s1170_s19, %s1388_s6 }
 0x282   : > { %p1172_p13 = pnand %p1171_p12, %p1056_p7 }
 0x284   : > { %p1173_p0 = pneg %p1172_p13 }
 0x286   : > { %p1178_p2 = pnand %p1176_p1, %p1173_p0 }
 0x288   : > { %1181 = shalt.err (!%p1178_p2)
}
 0x289   : > { %1047 = dma.vmem_to_hbm [thread:$0]  (%p1056_p7), %s840_s26, 16, %s1388_s6, [#allocation8]  }
 0x28a   : > { %1187 = dma.done.wait (%p1056_p7), [#allocation3], 16  }
 0x28b   : > { %1189 = vsyncadd (%p1056_p7), [#allocation3], 4294967280 }
 0x28c   : > { %1191 = dma.done.wait (%p1056_p7), [#allocation5], 32  }
 0x28d   : > { %1193 = vsyncadd (%p1056_p7), [#allocation5], 4294967264 }
 0x28e   : > { %1195 = dma.done.wait (%p1056_p7), [#allocation8], 16  }
 0x28f   : > { %1197 = vsyncadd (%p1056_p7), [#allocation8], 4294967280 }
 0x290 PF: > { %s20_s21 = sadd.s32 1, %s1200_s21  }
 0x291   : > { %p17_p3 = scmp.ge.s32.totalorder %s20_s21, 4  }
 0x293   :  { %19 = sbr.rel (!%p17_p3) target bundleno = 3 (0x3), region = 93 }
 0x29a   :  { %864 = vsyncpa [#allocation3], 1 }
 0x29b   :  { %866 = vsyncpa [#allocation3 + $0x1], 1 }
 0x29c   :  { %867 = vsyncpa [#allocation5], 1 }
 0x29d   :  { %868 = vsyncpa [#allocation8], 1 }

// kernel: loss_forward.10
= control target key start
LH: loop header
LB: loop body
LE: loop exit
PB: predicated region body
PF: predicated region fallthrough
CT: control target
= control target key end

     0   :  { %s2496_s12 = smov 0   ;;  %s3073_s0 = inlined_call_operand.vmem [shape: f32[6,121,16], index: 0, kind: input, shape index: {}]   ;;  %s3074_s1 = inlined_call_operand.vmem [shape: f32[9,16,32], index: 1, kind: input, shape index: {}]   ;;  %s3075_s2 = inlined_call_operand.vmem [shape: f32[1,32], index: 2, kind: input, shape index: {}]   ;;  %s3076_s3 = inlined_call_operand.vmem [shape: f32[6,88,32], index: 3, kind: output, shape index: {}]  }
   0x1 LB: > { %s1847_s13 = sadd.s32 4294967295, %s2471_s12   ;;  %p1851_p0 = scmp.ge.s32.totalorder %s2471_s12, 1  ;;  %s2471_s12 = sphi %s2496_s12, %s13_s12  }
   0x2   : > { %p137_p1 = scmp.lt.s32.totalorder %s2471_s12, 7 }
   0x4   : > { %p138_p2 = pnand %p1851_p0, %p137_p1 }
   0x5   : > { %v1855_v0 = vld [vmem:[%s3074_s1 + $0x10] sm:$0xff] (!%p138_p2)  ;;  %v1856_v1 = vld [vmem:[%s3074_s1 + $0x18] sm:$0xff] (!%p138_p2)  ;;  %p161_p3 = scmp.lt.s32.totalorder (!%p138_p2), %s1847_s13, 5  ;;  %v2473_v2 = vmov (!%p138_p2), 0.0|0.0   ;;  %v1879_v4 = vld [vmem:[%s3074_s1 + $0x20] sm:$0xff] (!%p138_p2)  ;;  %vm2474_vm0 = vmmov (!%p138_p2), 0  }
   0x6   : > { %141 = sbr.rel (%p138_p2) target bundleno = 432 (0x1b0), region = 32  ;;  %2424 = vmatprep.subr.bf16.mxu0 (!%p138_p2), %v2473_v2  ;;  %2451 = vmatprep.subr.bf16.mxu1 (!%p138_p2), %v2473_v2  ;;  %v2425_v3 = vpack.c.bf16 (!%p138_p2), %v1856_v1, %v1855_v0  ;;  %v1880_v5 = vld [vmem:[%s3074_s1 + $0x28] sm:$0xff] (!%p138_p2)  ;;  %v182_v6 = vld [vmem:[%s3074_s1] sm:$0xff] (!%p138_p2)  ;;  %v2475_v7 = vmov (!%p138_p2), 0.0   ;;  %vm198_vm1 = vcmask (!%p138_p2), 130048   ;;  %v1892_v21 = vld [vmem:[%s3074_s1 + $0x30] sm:$0xff] (!%p138_p2) }
   0x7   : > { %2095 = vmatprep.mubr.msk.f32.mxu0 (!%p138_p2), %vm2474_vm0, %v2475_v7  ;;  %2113 = vmatprep.mubr.msk.f32.mxu1 (!%p138_p2), %vm2474_vm0, %v2475_v7  ;;  %v183_v8 = vld [vmem:[%s3074_s1 + $0x8] sm:$0xff] (!%p138_p2)  ;;  %v2431_v9 = vpack.c.bf16 (!%p138_p2), %v1880_v5, %v1879_v4  ;;  %v1893_v22 = vld [vmem:[%s3074_s1 + $0x38] sm:$0xff] (!%p138_p2)  ;;  %v1905_v26 = vld [vmem:[%s3074_s1 + $0x40] sm:$0xff] (!%p138_p2)  ;;  %vm1780_vm2 = vcmask (!%p138_p2), 261120  }
   0x8   : > { %2426 = vmatpush3.bf16.msra.mxu0 (!%p138_p2), %v2425_v3  ;;  %2452 = vmatpush3.bf16.msra.mxu1 (!%p138_p2), %v2425_v3  ;;  %v2428_v10 = vpack.c.bf16 (!%p138_p2), %v183_v8, %v182_v6  ;;  %v2434_v25 = vpack.c.bf16 (!%p138_p2), %v1893_v22, %v1892_v21  ;;  %v1906_v27 = vld [vmem:[%s3074_s1 + $0x48] sm:$0xff] (!%p138_p2)  ;;  %v1918_v49 = vld [vmem:[%s3074_s1 + $0x50] sm:$0xff] (!%p138_p2)  ;;  %v1919_v50 = vld [vmem:[%s3074_s1 + $0x58] sm:$0xff] (!%p138_p2) }
   0x9   : > { %2430 = vmatprep.subr.bf16.mxu0 (!%p138_p2), %v2473_v2  ;;  %2427 = vmatprep.subr.bf16.mxu1 (!%p138_p2), %v2473_v2  ;;  %v2437_v30 = vpack.c.bf16 (!%p138_p2), %v1906_v27, %v1905_v26  ;;  %v2440_v53 = vpack.c.bf16 (!%p138_p2), %v1919_v50, %v1918_v49  ;;  %v1931_v54 = vld [vmem:[%s3074_s1 + $0x60] sm:$0xff] (!%p138_p2)  ;;  %v1932_v55 = vld [vmem:[%s3074_s1 + $0x68] sm:$0xff] (!%p138_p2) }
   0xa   : > { %v2443_v58 = vpack.c.bf16 (!%p138_p2), %v1932_v55, %v1931_v54 }
   0xd   : > { %s3078_s13 = smov (!%p161_p3, %s1847_s13), 5 }
   0xe   : > { %s1973_s26 = sshll.u32 %s3078_s13, 7 }
   0xf   : > { %s2536_s29 = scalar_lea.vmem %s3073_s0, %s1973_s26 }
  0x10   : > { %v184_v11 = vld [vmem:[%s2536_s29 + $0x1] sm:$0xff]  ;;  %v190_v12 = vld [vmem:[%s2536_s29 + $0x31] sm:$0xff]  ;;  %v185_v13 = vld [vmem:[%s2536_s29 + $0x9] sm:$0xff] }
  0x11   : > { %2096 = vmatmul.mubr.msk.f32.vlgmr.msra.gmra.mrb[0].mxu0 %vm198_vm1, %v184_v11  ;;  %2114 = vmatmul.mubr.msk.f32.vlgmr.msra.gmra.mrb[0].mxu1 %vm198_vm1, %v190_v12  ;;  %v191_v14 = vld [vmem:[%s2536_s29 + $0x39] sm:$0xff]  ;;  %v186_v15 = vld [vmem:[%s2536_s29 + $0x11] sm:$0xff]  ;;  %v192_v16 = vld [vmem:[%s2536_s29 + $0x41] sm:$0xff] }
  0x12   : > { %2432 = vmatpush3.bf16.msra.mxu0 %v2431_v9  ;;  %2429 = vmatpush3.bf16.msra.mxu1 %v2428_v10  ;;  %v187_v17 = vld [vmem:[%s2536_s29 + $0x19] sm:$0xff]  ;;  %v193_v18 = vld [vmem:[%s2536_s29 + $0x49] sm:$0xff]  ;;  %v188_v19 = vld [vmem:[%s2536_s29 + $0x21] sm:$0xff] }
  0x13   : > { %2098 = vmatprep.mubr.msk.f32.mxu0 %vm2474_vm0, %v2475_v7  ;;  %2116 = vmatprep.mubr.msk.f32.mxu1 %vm2474_vm0, %v2475_v7  ;;  %v194_v20 = vld [vmem:[%s2536_s29 + $0x51] sm:$0xff]  ;;  %v189_v23 = vld [vmem:[%s2536_s29 + $0x29] sm:$0xff]  ;;  %v171_v24 = vld [vmem:[%s2536_s29] sm:$0xff] }
  0x14   : > { %2433 = vmatprep.subr.bf16.mxu1 %v2473_v2  ;;  %2436 = vmatprep.subr.bf16.mxu0 %v2473_v2  ;;  %v172_v28 = vld [vmem:[%s2536_s29 + $0x8] sm:$0xff]  ;;  %v173_v31 = vld [vmem:[%s2536_s29 + $0x10] sm:$0xff]  ;;  %v2619_v33 = vld [vmem:[%s2536_s29 + $0x18] sm:$0xff] }
  0x15   : > { %2099 = vmatmul.mubr.msk.f32.gmra.mrb[2].mxu0 %vm198_vm1, %v185_v13  ;;  %2117 = vmatmul.mubr.msk.f32.gmra.mrb[2].mxu1 %vm198_vm1, %v191_v14  ;;  %v505_v29 = vld [vmem:[%s2536_s29 + $0x2] sm:$0xff]  ;;  %v506_v32 = vld [vmem:[%s2536_s29 + $0xa] sm:$0xff]  ;;  %v507_v34 = vld [vmem:[%s2536_s29 + $0x12] sm:$0xff] }
  0x16   : > { %2101 = vmatprep.mubr.msk.f32.mxu0 %vm2474_vm0, %v2475_v7  ;;  %2119 = vmatprep.mubr.msk.f32.mxu1 %vm2474_vm0, %v2475_v7  ;;  %v2630_v35 = vld [vmem:[%s2536_s29 + $0x20] sm:$0xff]  ;;  %v2641_v37 = vld [vmem:[%s2536_s29 + $0x28] sm:$0xff]  ;;  %v2652_v39 = vld [vmem:[%s2536_s29 + $0x30] sm:$0xff] }
  0x17   : > { %v508_v36 = vld [vmem:[%s2536_s29 + $0x1a] sm:$0xff]  ;;  %v509_v38 = vld [vmem:[%s2536_s29 + $0x22] sm:$0xff]  ;;  %v510_v40 = vld [vmem:[%s2536_s29 + $0x2a] sm:$0xff] }
  0x18   : > { %v2663_v41 = vld [vmem:[%s2536_s29 + $0x38] sm:$0xff]  ;;  %v2674_v43 = vld [vmem:[%s2536_s29 + $0x40] sm:$0xff]  ;;  %v2685_v45 = vld [vmem:[%s2536_s29 + $0x48] sm:$0xff] }
  0x19   : > { %2102 = vmatmul.mubr.msk.f32.gmra.mrb[4].mxu0 %vm198_vm1, %v186_v15  ;;  %2120 = vmatmul.mubr.msk.f32.gmra.mrb[4].mxu1 %vm198_vm1, %v192_v16  ;;  %v511_v42 = vld [vmem:[%s2536_s29 + $0x32] sm:$0xff]  ;;  %v512_v44 = vld [vmem:[%s2536_s29 + $0x3a] sm:$0xff]  ;;  %v513_v46 = vld [vmem:[%s2536_s29 + $0x42] sm:$0xff] }
  0x1a   : > { %2104 = vmatprep.mubr.msk.f32.mxu0 %vm2474_vm0, %v2475_v7  ;;  %2122 = vmatprep.mubr.msk.f32.mxu1 %vm2474_vm0, %v2475_v7  ;;  %v2696_v47 = vld [vmem:[%s2536_s29 + $0x50] sm:$0xff]  ;;  %v685_v59 = vld [vmem:[%s2536_s29 + $0x1b] sm:$0xff]  ;;  %v686_v61 = vld [vmem:[%s2536_s29 + $0x23] sm:$0xff] }
  0x1b   : > { %v514_v48 = vld [vmem:[%s2536_s29 + $0x4a] sm:$0xff]  ;;  %v515_v51 = vld [vmem:[%s2536_s29 + $0x52] sm:$0xff]  ;;  %v863_v62 = vld [vmem:[%s2536_s29 + $0x1c] sm:$0xff] }
  0x1c   : > { %v683_v52 = vld [vmem:[%s2536_s29 + $0xb] sm:$0xff]  ;;  %v684_v56 = vld [vmem:[%s2536_s29 + $0x13] sm:$0xff]  ;;  %v689_v3 = vld [vmem:[%s2536_s29 + $0x3b] sm:$0xff] }
  0x1d   : > { %2105 = vmatmul.mubr.msk.f32.gmra.mrb[6].mxu0 %vm198_vm1, %v187_v17  ;;  %2123 = vmatmul.mubr.msk.f32.gmra.mrb[6].mxu1 %vm198_vm1, %v193_v18  ;;  %v861_v57 = vld [vmem:[%s2536_s29 + $0xc] sm:$0xff]  ;;  %v862_v60 = vld [vmem:[%s2536_s29 + $0x14] sm:$0xff]  ;;  %v864_v0 = vld [vmem:[%s2536_s29 + $0x24] sm:$0xff] }
  0x1e   : > { %2107 = vmatprep.mubr.msk.f32.mxu0 %vm2474_vm0, %v2475_v7  ;;  %2125 = vmatprep.mubr.msk.f32.mxu1 %vm2474_vm0, %v2475_v7  ;;  %v687_v63 = vld [vmem:[%s2536_s29 + $0x2b] sm:$0xff]  ;;  %v688_v1 = vld [vmem:[%s2536_s29 + $0x33] sm:$0xff]  ;;  %v690_v5 = vld [vmem:[%s2536_s29 + $0x43] sm:$0xff] }
  0x1f   : > { %v866_v4 = vld [vmem:[%s2536_s29 + $0x34] sm:$0xff]  ;;  %v867_v6 = vld [vmem:[%s2536_s29 + $0x3c] sm:$0xff]  ;;  %v691_v8 = vld [vmem:[%s2536_s29 + $0x4b] sm:$0xff] }
  0x20   : > { %v868_v9 = vld [vmem:[%s2536_s29 + $0x44] sm:$0xff]  ;;  %v692_v10 = vld [vmem:[%s2536_s29 + $0x53] sm:$0xff]  ;;  %v693_v12 = vld [vmem:[%s2536_s29 + $0x5b] sm:$0xff] }
  0x21   : > { %2108 = vmatmul.mubr.msk.f32.gmra.mrb[8].mxu0 %vm198_vm1, %v188_v19  ;;  %2126 = vmatmul.mubr.msk.f32.gmra.mrb[8].mxu1 %vm198_vm1, %v194_v20  ;;  %v869_v11 = vld [vmem:[%s2536_s29 + $0x4c] sm:$0xff]  ;;  %v870_v13 = vld [vmem:[%s2536_s29 + $0x54] sm:$0xff]  ;;  %v871_v16 = vld [vmem:[%s2536_s29 + $0x5c] sm:$0xff] }
  0x22   : > { %2110 = vmatprep.mubr.msk.f32.mxu0 %vm2474_vm0, %v2475_v7  ;;  %2132 = vmatprep.mubr.msk.f32.mxu1 %vm2474_vm0, %v2475_v7  ;;  %v1944_v14 = vld [vmem:[%s3074_s1 + $0x70] sm:$0xff]  ;;  %v1945_v15 = vld [vmem:[%s3074_s1 + $0x78] sm:$0xff]  ;;  %v1957_v19 = vld [vmem:[%s3074_s1 + $0x80] sm:$0xff] }
  0x23   : > { %v1039_v17 = vld [vmem:[%s2536_s29 + $0xd] sm:$0xff]  ;;  %v2446_v18 = vpack.c.bf16 %v1945_v15, %v1944_v14  ;;  %v1040_v21 = vld [vmem:[%s2536_s29 + $0x15] sm:$0xff]  ;;  %v1042_v26 = vld [vmem:[%s2536_s29 + $0x25] sm:$0xff] }
  0x24   : > { %v1958_v20 = vld [vmem:[%s3074_s1 + $0x88] sm:$0xff]  ;;  %v1217_v22 = vld [vmem:[%s2536_s29 + $0x16] sm:$0xff]  ;;  %v1226_v49 = vld [vmem:[%s2536_s29 + $0x5e] sm:$0xff] }
  0x25   : > { %2111 = vmatmul.mubr.msk.f32.gmra.mrb[10].mxu0 %vm198_vm1, %v189_v23  ;;  %2133 = vmatmul.mubr.msk.f32.vlgmr.msra.gmra.mrb[10].mxu1 %vm198_vm1, %v171_v24  ;;  %v2449_v23 = vpack.c.bf16 %v1958_v20, %v1957_v19  ;;  %v1041_v24 = vld [vmem:[%s2536_s29 + $0x1d] sm:$0xff]  ;;  %v1219_v27 = vld [vmem:[%s2536_s29 + $0x26] sm:$0xff] }
  0x26   : > { %2435 = vmatpush3.bf16.msra.mxu1 %v2434_v25  ;;  %2135 = vmatprep.mubr.msk.f32.mxu1 %vm2474_vm0, %v2475_v7  ;;  %v1218_v25 = vld [vmem:[%s2536_s29 + $0x1e] sm:$0xff]  ;;  %v1227_v50 = vld [vmem:[%s2536_s29 + $0x66] sm:$0xff] }
  0x27   : > { %2169 = vmatprep.mubr.msk.f32.mxu0 %vm2474_vm0, %v2475_v7  ;;  %2439 = vmatprep.subr.bf16.mxu1 %v2473_v2  ;;  %v1581_v54 = vld [vmem:[%s2536_s29 + $0x58] sm:$0xff]  ;;  %v1405_v55 = vld [vmem:[%s2536_s29 + $0x67] sm:$0xff] }
  0x29   : > { %2136 = vmatmul.mubr.msk.f32.gmra.mrb[12].mxu1 %vm198_vm1, %v172_v28  ;;  %2170 = vmatmul.mubr.msk.f32.vlgmr.msra.gmra.mrb[12].mxu0 %vm198_vm1, %v505_v29  ;;  %v1043_v28 = vld [vmem:[%s2536_s29 + $0x2d] sm:$0xff] }
  0x2a   : > { %2438 = vmatpush3.bf16.msra.mxu0 %v2437_v30  ;;  %2138 = vmatprep.mubr.msk.f32.mxu1 %vm2474_vm0, %v2475_v7  ;;  %v1220_v29 = vld [vmem:[%s2536_s29 + $0x2e] sm:$0xff] }
  0x2b   : > { %2172 = vmatprep.mubr.msk.f32.mxu0 %vm2474_vm0, %v2475_v7  ;;  %2442 = vmatprep.subr.bf16.mxu0 %v2473_v2  ;;  %v1044_v30 = vld [vmem:[%s2536_s29 + $0x35] sm:$0xff] }
  0x2d   : > { %2139 = vmatmul.mubr.msk.f32.gmra.mrb[14].mxu1 %vm198_vm1, %v173_v31  ;;  %2173 = vmatmul.mubr.msk.f32.gmra.mrb[14].mxu0 %vm198_vm1, %v506_v32  ;;  %v1221_v31 = vld [vmem:[%s2536_s29 + $0x36] sm:$0xff] }
  0x2e   : > { %2141 = vmatprep.mubr.msk.f32.mxu1 %vm2474_vm0, %v2475_v7  ;;  %2175 = vmatprep.mubr.msk.f32.mxu0 %vm2474_vm0, %v2475_v7  ;;  %v1045_v32 = vld [vmem:[%s2536_s29 + $0x3d] sm:$0xff] }
  0x31   : > { %2142 = vmatmul.mubr.msk.f32.gmra.mrb[16].mxu1 %vm198_vm1, %v2619_v33  ;;  %2176 = vmatmul.mubr.msk.f32.gmra.mrb[16].mxu0 %vm198_vm1, %v507_v34  ;;  %v1222_v34 = vld [vmem:[%s2536_s29 + $0x3e] sm:$0xff] }
  0x32   : > { %2144 = vmatprep.mubr.msk.f32.mxu1 %vm2474_vm0, %v2475_v7  ;;  %2178 = vmatprep.mubr.msk.f32.mxu0 %vm2474_vm0, %v2475_v7 }
  0x35   : > { %2145 = vmatmul.mubr.msk.f32.gmra.mrb[18].mxu1 %vm198_vm1, %v2630_v35  ;;  %2179 = vmatmul.mubr.msk.f32.gmra.mrb[18].mxu0 %vm198_vm1, %v508_v36  ;;  %v1046_v36 = vld [vmem:[%s2536_s29 + $0x45] sm:$0xff] }
  0x36   : > { %2147 = vmatprep.mubr.msk.f32.mxu1 %vm2474_vm0, %v2475_v7  ;;  %2181 = vmatprep.mubr.msk.f32.mxu0 %vm2474_vm0, %v2475_v7 }
  0x39   : > { %2148 = vmatmul.mubr.msk.f32.gmra.mrb[20].mxu1 %vm198_vm1, %v2641_v37  ;;  %2182 = vmatmul.mubr.msk.f32.gmra.mrb[20].mxu0 %vm198_vm1, %v509_v38  ;;  %v1223_v38 = vld [vmem:[%s2536_s29 + $0x46] sm:$0xff] }
  0x3a   : > { %2150 = vmatprep.mubr.msk.f32.mxu1 %vm2474_vm0, %v2475_v7  ;;  %2184 = vmatprep.mubr.msk.f32.mxu0 %vm2474_vm0, %v2475_v7 }
  0x3d   : > { %2151 = vmatmul.mubr.msk.f32.gmra.mrb[22].mxu1 %vm198_vm1, %v2652_v39  ;;  %2185 = vmatmul.mubr.msk.f32.gmra.mrb[22].mxu0 %vm198_vm1, %v510_v40  ;;  %v1047_v40 = vld [vmem:[%s2536_s29 + $0x4d] sm:$0xff] }
  0x3e   : > { %2153 = vmatprep.mubr.msk.f32.mxu1 %vm2474_vm0, %v2475_v7  ;;  %2187 = vmatprep.mubr.msk.f32.mxu0 %vm2474_vm0, %v2475_v7 }
  0x41   : > { %2154 = vmatmul.mubr.msk.f32.gmra.mrb[24].mxu1 %vm198_vm1, %v2663_v41  ;;  %2188 = vmatmul.mubr.msk.f32.gmra.mrb[24].mxu0 %vm198_vm1, %v511_v42  ;;  %v1224_v42 = vld [vmem:[%s2536_s29 + $0x4e] sm:$0xff] }
  0x42   : > { %2156 = vmatprep.mubr.msk.f32.mxu1 %vm2474_vm0, %v2475_v7  ;;  %2190 = vmatprep.mubr.msk.f32.mxu0 %vm2474_vm0, %v2475_v7 }
  0x45   : > { %2157 = vmatmul.mubr.msk.f32.gmra.mrb[26].mxu1 %vm198_vm1, %v2674_v43  ;;  %2191 = vmatmul.mubr.msk.f32.gmra.mrb[26].mxu0 %vm198_vm1, %v512_v44  ;;  %v1048_v44 = vld [vmem:[%s2536_s29 + $0x55] sm:$0xff] }
  0x46   : > { %2159 = vmatprep.mubr.msk.f32.mxu1 %vm2474_vm0, %v2475_v7  ;;  %2193 = vmatprep.mubr.msk.f32.mxu0 %vm2474_vm0, %v2475_v7 }
  0x49   : > { %2160 = vmatmul.mubr.msk.f32.gmra.mrb[28].mxu1 %vm198_vm1, %v2685_v45  ;;  %2194 = vmatmul.mubr.msk.f32.gmra.mrb[28].mxu0 %vm198_vm1, %v513_v46  ;;  %v1225_v46 = vld [vmem:[%s2536_s29 + $0x56] sm:$0xff] }
  0x4a   : > { %2162 = vmatprep.mubr.msk.f32.mxu1 %vm2474_vm0, %v2475_v7  ;;  %2196 = vmatprep.mubr.msk.f32.mxu0 %vm2474_vm0, %v2475_v7 }
  0x4d   : > { %2163 = vmatmul.mubr.msk.f32.gmra.mrb[30].mxu1 %vm198_vm1, %v2696_v47  ;;  %2197 = vmatmul.mubr.msk.f32.gmra.mrb[30].mxu0 %vm198_vm1, %v514_v48  ;;  %v1049_v48 = vld [vmem:[%s2536_s29 + $0x5d] sm:$0xff] }
  0x4e   : > { %2199 = vmatprep.mubr.msk.f32.mxu0 %vm2474_vm0, %v2475_v7  ;;  %2206 = vmatprep.mubr.msk.f32.mxu1 %vm2474_vm0, %v2475_v7 }
  0x51   : > { %2200 = vmatmul.mubr.msk.f32.gmra.mrb[32].mxu0 %vm198_vm1, %v515_v51  ;;  %2207 = vmatmul.mubr.msk.f32.vlgmr.msra.gmra.mrb[32].mxu1 %vm198_vm1, %v683_v52  ;;  %v1395_v51 = vld [vmem:[%s2536_s29 + $0x17] sm:$0xff]  ;;  %v1396_v52 = vld [vmem:[%s2536_s29 + $0x1f] sm:$0xff] }
  0x52   : > { %2441 = vmatpush3.bf16.msra.mxu1 %v2440_v53  ;;  %2209 = vmatprep.mubr.msk.f32.mxu1 %vm2474_vm0, %v2475_v7  ;;  %v1397_v53 = vld [vmem:[%s2536_s29 + $0x27] sm:$0xff] }
  0x53   : > { %2243 = vmatprep.mubr.msk.f32.mxu0 %vm2474_vm0, %v2475_v7  ;;  %2445 = vmatprep.subr.bf16.mxu1 %v2473_v2 }
  0x55   : > { %2210 = vmatmul.mubr.msk.f32.gmra.mrb[34].mxu1 %vm198_vm1, %v684_v56  ;;  %2244 = vmatmul.mubr.msk.f32.vlgmr.msra.gmra.mrb[34].mxu0 %vm198_vm1, %v861_v57  ;;  %v1583_v56 = vld [vmem:[%s2536_s29 + $0x68] sm:$0xff] }
  0x56   : > { %2444 = vmatpush3.bf16.msra.mxu0 %v2443_v58  ;;  %2212 = vmatprep.mubr.msk.f32.mxu1 %vm2474_vm0, %v2475_v7 }
  0x57   : > { %2246 = vmatprep.mubr.msk.f32.mxu0 %vm2474_vm0, %v2475_v7  ;;  %2448 = vmatprep.subr.bf16.mxu0 %v2473_v2  ;;  %v865_v2 = vld [vmem:[%s2536_s29 + $0x2c] sm:$0xff] }
  0x59   : > { %2213 = vmatmul.mubr.msk.f32.gmra.mrb[36].mxu1 %vm198_vm1, %v685_v59  ;;  %2247 = vmatmul.mubr.msk.f32.gmra.mrb[36].mxu0 %vm198_vm1, %v862_v60 }
  0x5a   : > { %2215 = vmatprep.mubr.msk.f32.mxu1 %vm2474_vm0, %v2475_v7  ;;  %2249 = vmatprep.mubr.msk.f32.mxu0 %vm2474_vm0, %v2475_v7 }
  0x5d   : > { %2216 = vmatmul.mubr.msk.f32.gmra.mrb[38].mxu1 %vm198_vm1, %v686_v61  ;;  %2250 = vmatmul.mubr.msk.f32.gmra.mrb[38].mxu0 %vm198_vm1, %v863_v62 }
  0x5e   : > { %2218 = vmatprep.mubr.msk.f32.mxu1 %vm2474_vm0, %v2475_v7  ;;  %2252 = vmatprep.mubr.msk.f32.mxu0 %vm2474_vm0, %v2475_v7 }
  0x61   : > { %2219 = vmatmul.mubr.msk.f32.gmra.mrb[40].mxu1 %vm198_vm1, %v687_v63  ;;  %2253 = vmatmul.mubr.msk.f32.gmra.mrb[40].mxu0 %vm198_vm1, %v864_v0 }
  0x62   : > { %2221 = vmatprep.mubr.msk.f32.mxu1 %vm2474_vm0, %v2475_v7  ;;  %2255 = vmatprep.mubr.msk.f32.mxu0 %vm2474_vm0, %v2475_v7 }
  0x65   : > { %2222 = vmatmul.mubr.msk.f32.gmra.mrb[42].mxu1 %vm198_vm1, %v688_v1  ;;  %2256 = vmatmul.mubr.msk.f32.gmra.mrb[42].mxu0 %vm198_vm1, %v865_v2 }
  0x66   : > { %2224 = vmatprep.mubr.msk.f32.mxu1 %vm2474_vm0, %v2475_v7  ;;  %2258 = vmatprep.mubr.msk.f32.mxu0 %vm2474_vm0, %v2475_v7 }
  0x69   : > { %2225 = vmatmul.mubr.msk.f32.gmra.mrb[44].mxu1 %vm198_vm1, %v689_v3  ;;  %2259 = vmatmul.mubr.msk.f32.gmra.mrb[44].mxu0 %vm198_vm1, %v866_v4 }
  0x6a   : > { %2227 = vmatprep.mubr.msk.f32.mxu1 %vm2474_vm0, %v2475_v7  ;;  %2261 = vmatprep.mubr.msk.f32.mxu0 %vm2474_vm0, %v2475_v7 }
  0x6d   : > { %2228 = vmatmul.mubr.msk.f32.gmra.mrb[46].mxu1 %vm198_vm1, %v690_v5  ;;  %2262 = vmatmul.mubr.msk.f32.gmra.mrb[46].mxu0 %vm198_vm1, %v867_v6 }
  0x6e   : > { %2230 = vmatprep.mubr.msk.f32.mxu1 %vm2474_vm0, %v2475_v7  ;;  %2264 = vmatprep.mubr.msk.f32.mxu0 %vm2474_vm0, %v2475_v7 }
  0x71   : > { %2231 = vmatmul.mubr.msk.f32.gmra.mrb[48].mxu1 %vm198_vm1, %v691_v8  ;;  %2265 = vmatmul.mubr.msk.f32.gmra.mrb[48].mxu0 %vm198_vm1, %v868_v9 }
  0x72   : > { %2233 = vmatprep.mubr.msk.f32.mxu1 %vm2474_vm0, %v2475_v7  ;;  %2267 = vmatprep.mubr.msk.f32.mxu0 %vm2474_vm0, %v2475_v7 }
  0x75   : > { %2234 = vmatmul.mubr.msk.f32.gmra.mrb[50].mxu1 %vm198_vm1, %v692_v10  ;;  %2268 = vmatmul.mubr.msk.f32.gmra.mrb[50].mxu0 %vm198_vm1, %v869_v11 }
  0x76   : > { %2236 = vmatprep.mubr.msk.f32.mxu1 %vm2474_vm0, %v2475_v7  ;;  %2270 = vmatprep.mubr.msk.f32.mxu0 %vm2474_vm0, %v2475_v7 }
  0x79   : > { %2237 = vmatmul.mubr.msk.f32.gmra.mrb[52].mxu1 %vm198_vm1, %v693_v12  ;;  %2271 = vmatmul.mubr.msk.f32.gmra.mrb[52].mxu0 %vm198_vm1, %v870_v13 }
  0x7a   : > { %2273 = vmatprep.mubr.msk.f32.mxu0 %vm2474_vm0, %v2475_v7  ;;  %2280 = vmatprep.mubr.msk.f32.mxu1 %vm2474_vm0, %v2475_v7 }
  0x7d   : > { %2274 = vmatmul.mubr.msk.f32.gmra.mrb[54].mxu0 %vm198_vm1, %v871_v16  ;;  %2281 = vmatmul.mubr.msk.f32.vlgmr.msra.gmra.mrb[54].mxu1 %vm198_vm1, %v1039_v17 }
  0x7e   : > { %2447 = vmatpush3.bf16.msra.mxu1 %v2446_v18  ;;  %2283 = vmatprep.mubr.msk.f32.mxu1 %vm2474_vm0, %v2475_v7 }
  0x7f   : > { %2317 = vmatprep.mubr.msk.f32.mxu0 %vm2474_vm0, %v2475_v7 }
  0x81   : > { %2284 = vmatmul.mubr.msk.f32.gmra.mrb[56].mxu1 %vm198_vm1, %v1040_v21  ;;  %2318 = vmatmul.mubr.msk.f32.vlgmr.msra.gmra.mrb[56].mxu0 %vm198_vm1, %v1217_v22 }
  0x82   : > { %2450 = vmatpush3.bf16.msra.mxu0 %v2449_v23  ;;  %2286 = vmatprep.mubr.msk.f32.mxu1 %vm2474_vm0, %v2475_v7 }
  0x83   : > { %2320 = vmatprep.mubr.msk.f32.mxu0 %vm2474_vm0, %v2475_v7 }
  0x85   : > { %2287 = vmatmul.mubr.msk.f32.gmra.mrb[58].mxu1 %vm198_vm1, %v1041_v24  ;;  %2321 = vmatmul.mubr.msk.f32.gmra.mrb[58].mxu0 %vm198_vm1, %v1218_v25 }
  0x86   : > { %2289 = vmatprep.mubr.msk.f32.mxu1 %vm2474_vm0, %v2475_v7  ;;  %2323 = vmatprep.mubr.msk.f32.mxu0 %vm2474_vm0, %v2475_v7 }
  0x89   : > { %2290 = vmatmul.mubr.msk.f32.gmra.mrb[60].mxu1 %vm198_vm1, %v1042_v26  ;;  %2324 = vmatmul.mubr.msk.f32.gmra.mrb[60].mxu0 %vm198_vm1, %v1219_v27 }
  0x8a   : > { %2292 = vmatprep.mubr.msk.f32.mxu1 %vm2474_vm0, %v2475_v7  ;;  %2326 = vmatprep.mubr.msk.f32.mxu0 %vm2474_vm0, %v2475_v7 }
  0x8d   : > { %2293 = vmatmul.mubr.msk.f32.gmra.mrb[62].mxu1 %vm198_vm1, %v1043_v28  ;;  %2327 = vmatmul.mubr.msk.f32.gmra.mrb[62].mxu0 %vm198_vm1, %v1220_v29 }
  0x8e   : > { %2295 = vmatprep.mubr.msk.f32.mxu1 %vm2474_vm0, %v2475_v7  ;;  %2329 = vmatprep.mubr.msk.f32.mxu0 %vm2474_vm0, %v2475_v7 }
  0x91   : > { %2296 = vmatmul.mubr.msk.f32.gmra.mrb[64].mxu1 %vm198_vm1, %v1044_v30  ;;  %2330 = vmatmul.mubr.msk.f32.gmra.mrb[64].mxu0 %vm198_vm1, %v1221_v31 }
  0x92   : > { %2298 = vmatprep.mubr.msk.f32.mxu1 %vm2474_vm0, %v2475_v7  ;;  %2332 = vmatprep.mubr.msk.f32.mxu0 %vm2474_vm0, %v2475_v7 }
  0x95   : > { %2299 = vmatmul.mubr.msk.f32.gmra.mrb[66].mxu1 %vm198_vm1, %v1045_v32  ;;  %2333 = vmatmul.mubr.msk.f32.gmra.mrb[66].mxu0 %vm198_vm1, %v1222_v34 }
  0x96   : > { %2301 = vmatprep.mubr.msk.f32.mxu1 %vm2474_vm0, %v2475_v7  ;;  %2335 = vmatprep.mubr.msk.f32.mxu0 %vm2474_vm0, %v2475_v7 }
  0x99   : > { %2302 = vmatmul.mubr.msk.f32.gmra.mrb[68].mxu1 %vm198_vm1, %v1046_v36  ;;  %2336 = vmatmul.mubr.msk.f32.gmra.mrb[68].mxu0 %vm198_vm1, %v1223_v38 }
  0x9a   : > { %2304 = vmatprep.mubr.msk.f32.mxu1 %vm2474_vm0, %v2475_v7  ;;  %2338 = vmatprep.mubr.msk.f32.mxu0 %vm2474_vm0, %v2475_v7 }
  0x9d   : > { %2305 = vmatmul.mubr.msk.f32.gmra.mrb[70].mxu1 %vm198_vm1, %v1047_v40  ;;  %2339 = vmatmul.mubr.msk.f32.gmra.mrb[70].mxu0 %vm198_vm1, %v1224_v42 }
  0x9e   : > { %2307 = vmatprep.mubr.msk.f32.mxu1 %vm2474_vm0, %v2475_v7  ;;  %2341 = vmatprep.mubr.msk.f32.mxu0 %vm2474_vm0, %v2475_v7 }
  0xa1   : > { %2308 = vmatmul.mubr.msk.f32.gmra.mrb[72].mxu1 %vm198_vm1, %v1048_v44  ;;  %2342 = vmatmul.mubr.msk.f32.gmra.mrb[72].mxu0 %vm198_vm1, %v1225_v46 }
  0xa2   : > { %2310 = vmatprep.mubr.msk.f32.mxu1 %vm2474_vm0, %v2475_v7  ;;  %2344 = vmatprep.mubr.msk.f32.mxu0 %vm2474_vm0, %v2475_v7 }
  0xa5   : > { %2311 = vmatmul.mubr.msk.f32.gmra.mrb[74].mxu1 %vm198_vm1, %v1049_v48  ;;  %2345 = vmatmul.mubr.msk.f32.gmra.mrb[74].mxu0 %vm198_vm1, %v1226_v49 }
  0xa6   : > { %2347 = vmatprep.mubr.msk.f32.mxu0 %vm2474_vm0, %v2475_v7  ;;  %2354 = vmatprep.mubr.msk.f32.mxu1 %vm2474_vm0, %v2475_v7 }
  0xa9   : > { %2348 = vmatmul.mubr.msk.f32.gmra.mrb[76].mxu0 %vm198_vm1, %v1227_v50  ;;  %2355 = vmatmul.mubr.msk.f32.vlgmr.msra.gmra.mrb[76].mxu1 %vm198_vm1, %v1395_v51 }
  0xaa   : > { %2357 = vmatprep.mubr.msk.f32.mxu1 %vm2474_vm0, %v2475_v7  ;;  %2391 = vmatprep.mubr.msk.f32.mxu0 %vm2474_vm0, %v2475_v7 }
  0xad   : > { %2358 = vmatmul.mubr.msk.f32.gmra.mrb[78].mxu1 %vm198_vm1, %v1396_v52  ;;  %2392 = vmatmul.mubr.msk.f32.vlgmr.msra.gmra.mrb[78].mxu0 %vm198_vm1, %v2619_v33  ;;  %v1398_v33 = vld [vmem:[%s2536_s29 + $0x2f] sm:$0xff] }
  0xae   : > { %2360 = vmatprep.mubr.msk.f32.mxu1 %vm2474_vm0, %v2475_v7  ;;  %2394 = vmatprep.mubr.msk.f32.mxu0 %vm2474_vm0, %v2475_v7 }
  0xb1   : > { %2361 = vmatmul.mubr.msk.f32.gmra.mrb[80].mxu1 %vm198_vm1, %v1397_v53  ;;  %2395 = vmatmul.mubr.msk.f32.gmra.mrb[80].mxu0 %vm198_vm1, %v2630_v35  ;;  %v1399_v35 = vld [vmem:[%s2536_s29 + $0x37] sm:$0xff] }
  0xb2   : > { %2363 = vmatprep.mubr.msk.f32.mxu1 %vm2474_vm0, %v2475_v7  ;;  %2397 = vmatprep.mubr.msk.f32.mxu0 %vm2474_vm0, %v2475_v7 }
  0xb5   : > { %2364 = vmatmul.mubr.msk.f32.gmra.mrb[82].mxu1 %vm198_vm1, %v1398_v33  ;;  %2398 = vmatmul.mubr.msk.f32.gmra.mrb[82].mxu0 %vm198_vm1, %v2641_v37  ;;  %v1400_v37 = vld [vmem:[%s2536_s29 + $0x3f] sm:$0xff] }
  0xb6   : > { %2366 = vmatprep.mubr.msk.f32.mxu1 %vm2474_vm0, %v2475_v7  ;;  %2400 = vmatprep.mubr.msk.f32.mxu0 %vm2474_vm0, %v2475_v7 }
  0xb9   : > { %2367 = vmatmul.mubr.msk.f32.gmra.mrb[84].mxu1 %vm198_vm1, %v1399_v35  ;;  %2401 = vmatmul.mubr.msk.f32.gmra.mrb[84].mxu0 %vm198_vm1, %v2652_v39  ;;  %v1401_v39 = vld [vmem:[%s2536_s29 + $0x47] sm:$0xff] }
  0xba   : > { %2369 = vmatprep.mubr.msk.f32.mxu1 %vm2474_vm0, %v2475_v7  ;;  %2403 = vmatprep.mubr.msk.f32.mxu0 %vm2474_vm0, %v2475_v7 }
  0xbd   : > { %2370 = vmatmul.mubr.msk.f32.gmra.mrb[86].mxu1 %vm198_vm1, %v1400_v37  ;;  %2404 = vmatmul.mubr.msk.f32.gmra.mrb[86].mxu0 %vm198_vm1, %v2663_v41  ;;  %v1402_v41 = vld [vmem:[%s2536_s29 + $0x4f] sm:$0xff] }
  0xbe   : > { %2372 = vmatprep.mubr.msk.f32.mxu1 %vm2474_vm0, %v2475_v7  ;;  %2406 = vmatprep.mubr.msk.f32.mxu0 %vm2474_vm0, %v2475_v7 }
  0xc1   : > { %2373 = vmatmul.mubr.msk.f32.gmra.mrb[88].mxu1 %vm198_vm1, %v1401_v39  ;;  %2407 = vmatmul.mubr.msk.f32.gmra.mrb[88].mxu0 %vm198_vm1, %v2674_v43  ;;  %v1403_v43 = vld [vmem:[%s2536_s29 + $0x57] sm:$0xff] }
  0xc2   : > { %2375 = vmatprep.mubr.msk.f32.mxu1 %vm2474_vm0, %v2475_v7  ;;  %2409 = vmatprep.mubr.msk.f32.mxu0 %vm2474_vm0, %v2475_v7 }
  0xc5   : > { %2376 = vmatmul.mubr.msk.f32.gmra.mrb[90].mxu1 %vm198_vm1, %v1402_v41  ;;  %2410 = vmatmul.mubr.msk.f32.gmra.mrb[90].mxu0 %vm198_vm1, %v2685_v45  ;;  %v1404_v45 = vld [vmem:[%s2536_s29 + $0x5f] sm:$0xff] }
  0xc6   : > { %2378 = vmatprep.mubr.msk.f32.mxu1 %vm2474_vm0, %v2475_v7  ;;  %2412 = vmatprep.mubr.msk.f32.mxu0 %vm2474_vm0, %v2475_v7 }
  0xc9   : > { %2379 = vmatmul.mubr.msk.f32.gmra.mrb[92].mxu1 %vm198_vm1, %v1403_v43  ;;  %2413 = vmatmul.mubr.msk.f32.gmra.mrb[92].mxu0 %vm198_vm1, %v2696_v47  ;;  %v1582_v47 = vld [vmem:[%s2536_s29 + $0x60] sm:$0xff]  ;;  %s2453_s29 = smul.u32 88, %s3078_s13 }
  0xca   : > { %2381 = vmatprep.mubr.msk.f32.mxu1 %vm2474_vm0, %v2475_v7  ;;  %2415 = vmatprep.mubr.msk.f32.mxu0 %vm2474_vm0, %v2475_v7 }
  0xcb   : > { %s3027_s7 = scalar_lea.vmem %s3076_s3, %s2453_s29 }
  0xcd   : > { %2382 = vmatmul.mubr.msk.f32.gmra.mrb[94].mxu1 %vm198_vm1, %v1404_v45  ;;  %2416 = vmatmul.mubr.msk.f32.gmra.mrb[94].mxu0 %vm198_vm1, %v1581_v54 }
  0xce   : > { %2384 = vmatprep.mubr.msk.f32.mxu1 %vm2474_vm0, %v2475_v7  ;;  %2418 = vmatprep.mubr.msk.f32.mxu0 %vm2474_vm0, %v2475_v7 }
  0xd1   : > { %2385 = vmatmul.mubr.msk.f32.gmra.mrb[96].mxu1 %vm198_vm1, %v1405_v55  ;;  %2419 = vmatmul.mubr.msk.f32.gmra.mrb[96].mxu0 %vm198_vm1, %v1582_v47 }
  0xd2   : > { %2421 = vmatprep.mubr.msk.f32.mxu0 %vm2474_vm0, %v2475_v7 }
  0xd5   : > { %2422 = vmatmul.mubr.msk.f32.gmra.mrb[98].mxu0 %vm198_vm1, %v1583_v56 }
  0xe4   : > { %v298_v57 = vpop.f32.mrb[0].mxu0  ;;  %v328_v58 = vpop.f32.mrb[0].mxu1 }
  0xe5   : > { %v2097_v59 = vpop.f32.mrb[1].mxu0  ;;  %v2115_v60 = vpop.f32.mrb[1].mxu1 }
  0xe8   : > { %v303_v61 = vpop.f32.mrb[2].mxu0  ;;  %v333_v62 = vpop.f32.mrb[2].mxu1 }
  0xe9   : > { %v2100_v63 = vpop.f32.mrb[3].mxu0  ;;  %v2118_v0 = vpop.f32.mrb[3].mxu1 }
  0xec   : > { %v308_v1 = vpop.f32.mrb[4].mxu0  ;;  %v338_v2 = vpop.f32.mrb[4].mxu1 }
  0xed   : > { %v2103_v3 = vpop.f32.mrb[5].mxu0  ;;  %v2121_v4 = vpop.f32.mrb[5].mxu1 }
  0xf0   : > { %v313_v5 = vpop.f32.mrb[6].mxu0  ;;  %v343_v6 = vpop.f32.mrb[6].mxu1 }
  0xf1   : > { %v2106_v8 = vpop.f32.mrb[7].mxu0  ;;  %v2124_v9 = vpop.f32.mrb[7].mxu1 }
  0xf4   : > { %v318_v7 = vpop.f32.mrb[8].mxu0  ;;  %v2996_v10 = vpop.f32.mrb[8].mxu1 }
  0xf5   : > { %v2109_v11 = vpop.f32.mrb[9].mxu0  ;;  %v2127_v12 = vpop.f32.mrb[9].mxu1 }
  0xf8   : > { %v323_v13 = vpop.f32.mrb[10].mxu0  ;;  %v451_v14 = vpop.f32.mrb[10].mxu1 }
  0xf9   : > { %v452_v15 = vadd.f32 %v451_v14, %v298_v57  ;;  %v2112_v16 = vpop.f32.mrb[11].mxu0  ;;  %v2134_v17 = vpop.f32.mrb[11].mxu1 }
  0xfc   : > { %v456_v18 = vpop.f32.mrb[12].mxu1  ;;  %v618_v19 = vpop.f32.mrb[12].mxu0 }
  0xfd   : > { %v457_v20 = vadd.f32 %v456_v18, %v303_v61  ;;  %v672_v21 = vadd.f32 %v618_v19, %v452_v15  ;;  %v2171_v22 = vpop.f32.mrb[13].mxu0  ;;  %v2137_v23 = vpop.f32.mrb[13].mxu1 }
 0x100   : > { %v461_v24 = vpop.f32.mrb[14].mxu1  ;;  %v623_v25 = vpop.f32.mrb[14].mxu0 }
 0x101   : > { %v462_v26 = vadd.f32 %v461_v24, %v308_v1  ;;  %v673_v27 = vadd.f32 %v623_v25, %v457_v20  ;;  %v2174_v28 = vpop.f32.mrb[15].mxu0  ;;  %v2140_v29 = vpop.f32.mrb[15].mxu1 }
 0x104   : > { %v466_v30 = vpop.f32.mrb[16].mxu1  ;;  %v628_v31 = vpop.f32.mrb[16].mxu0 }
 0x105   : > { %v467_v32 = vadd.f32 %v466_v30, %v313_v5  ;;  %v674_v34 = vadd.f32 %v628_v31, %v462_v26  ;;  %v2177_v36 = vpop.f32.mrb[17].mxu0  ;;  %v2143_v38 = vpop.f32.mrb[17].mxu1 }
 0x108   : > { %v471_v40 = vpop.f32.mrb[18].mxu1  ;;  %v633_v42 = vpop.f32.mrb[18].mxu0 }
 0x109   : > { %v472_v44 = vadd.f32 %v471_v40, %v318_v7  ;;  %v675_v46 = vadd.f32 %v633_v42, %v467_v32  ;;  %v2180_v48 = vpop.f32.mrb[19].mxu0  ;;  %v2146_v49 = vpop.f32.mrb[19].mxu1 }
 0x10c   : > { %v476_v50 = vpop.f32.mrb[20].mxu1  ;;  %v638_v51 = vpop.f32.mrb[20].mxu0 }
 0x10d   : > { %v477_v52 = vadd.f32 %v476_v50, %v323_v13  ;;  %v676_v53 = vadd.f32 %v638_v51, %v472_v44  ;;  %v2183_v33 = vpop.f32.mrb[21].mxu0  ;;  %v2149_v35 = vpop.f32.mrb[21].mxu1 }
 0x110   : > { %v481_v37 = vpop.f32.mrb[22].mxu1  ;;  %v643_v39 = vpop.f32.mrb[22].mxu0 }
 0x111   : > { %v482_v41 = vadd.f32 %v481_v37, %v328_v58  ;;  %v677_v43 = vadd.f32 %v643_v39, %v477_v52  ;;  %v2186_v45 = vpop.f32.mrb[23].mxu0  ;;  %v2152_v54 = vpop.f32.mrb[23].mxu1 }
 0x114   : > { %v486_v55 = vpop.f32.mrb[24].mxu1  ;;  %v648_v47 = vpop.f32.mrb[24].mxu0 }
 0x115   : > { %v487_v56 = vadd.f32 %v486_v55, %v333_v62  ;;  %v678_v57 = vadd.f32 %v648_v47, %v482_v41  ;;  %v2189_v59 = vpop.f32.mrb[25].mxu0  ;;  %v2155_v60 = vpop.f32.mrb[25].mxu1 }
 0x118   : > { %v491_v61 = vpop.f32.mrb[26].mxu1  ;;  %v653_v63 = vpop.f32.mrb[26].mxu0 }
 0x119   : > { %v492_v0 = vadd.f32 %v491_v61, %v338_v2  ;;  %v679_v1 = vadd.f32 %v653_v63, %v487_v56  ;;  %v2192_v3 = vpop.f32.mrb[27].mxu0  ;;  %v2158_v4 = vpop.f32.mrb[27].mxu1 }
 0x11c   : > { %v496_v5 = vpop.f32.mrb[28].mxu1  ;;  %v658_v8 = vpop.f32.mrb[28].mxu0 }
 0x11d   : > { %v497_v9 = vadd.f32 %v496_v5, %v343_v6  ;;  %v680_v7 = vadd.f32 %v658_v8, %v492_v0  ;;  %v2195_v58 = vpop.f32.mrb[29].mxu0  ;;  %v2161_v11 = vpop.f32.mrb[29].mxu1 }
 0x120   : > { %v501_v12 = vpop.f32.mrb[30].mxu1  ;;  %v663_v13 = vpop.f32.mrb[30].mxu0 }
 0x121   : > { %v502_v14 = vadd.f32 %v501_v12, %v2996_v10  ;;  %v681_v62 = vadd.f32 %v663_v13, %v497_v9  ;;  %v2198_v15 = vpop.f32.mrb[31].mxu0  ;;  %v2164_v16 = vpop.f32.mrb[31].mxu1 }
 0x124   : > { %v668_v17 = vpop.f32.mrb[32].mxu0  ;;  %v796_v18 = vpop.f32.mrb[32].mxu1 }
 0x125   : > { %v682_v19 = vadd.f32 %v668_v17, %v502_v14  ;;  %v850_v2 = vadd.f32 %v796_v18, %v672_v21  ;;  %v2201_v20 = vpop.f32.mrb[33].mxu0  ;;  %v2208_v22 = vpop.f32.mrb[33].mxu1 }
 0x128   : > { %v801_v23 = vpop.f32.mrb[34].mxu1  ;;  %v974_v24 = vpop.f32.mrb[34].mxu0 }
 0x129   : > { %v851_v25 = vadd.f32 %v801_v23, %v673_v27  ;;  %v1028_v6 = vadd.f32 %v974_v24, %v850_v2  ;;  %v2245_v26 = vpop.f32.mrb[35].mxu0  ;;  %v2211_v28 = vpop.f32.mrb[35].mxu1 }
 0x12c   : > { %v806_v29 = vpop.f32.mrb[36].mxu1  ;;  %v979_v30 = vpop.f32.mrb[36].mxu0 }
 0x12d   : > { %v852_v31 = vadd.f32 %v806_v29, %v674_v34  ;;  %v1029_v32 = vadd.f32 %v979_v30, %v851_v25  ;;  %v2248_v10 = vpop.f32.mrb[37].mxu0  ;;  %v2214_v36 = vpop.f32.mrb[37].mxu1 }
 0x130   : > { %v811_v38 = vpop.f32.mrb[38].mxu1  ;;  %v984_v40 = vpop.f32.mrb[38].mxu0 }
 0x131   : > { %v853_v42 = vadd.f32 %v811_v38, %v675_v46  ;;  %v1030_v44 = vadd.f32 %v984_v40, %v852_v31  ;;  %v2251_v48 = vpop.f32.mrb[39].mxu0  ;;  %v2217_v21 = vpop.f32.mrb[39].mxu1 }
 0x134   : > { %v816_v49 = vpop.f32.mrb[40].mxu1  ;;  %v989_v50 = vpop.f32.mrb[40].mxu0 }
 0x135   : > { %v854_v51 = vadd.f32 %v816_v49, %v676_v53  ;;  %v1031_v52 = vadd.f32 %v989_v50, %v853_v42  ;;  %v2254_v27 = vpop.f32.mrb[41].mxu0  ;;  %v2220_v33 = vpop.f32.mrb[41].mxu1 }
 0x138   : > { %v821_v35 = vpop.f32.mrb[42].mxu1  ;;  %v994_v37 = vpop.f32.mrb[42].mxu0 }
 0x139   : > { %v855_v39 = vadd.f32 %v821_v35, %v677_v43  ;;  %v1032_v41 = vadd.f32 %v994_v37, %v854_v51  ;;  %v2257_v34 = vpop.f32.mrb[43].mxu0  ;;  %v2223_v45 = vpop.f32.mrb[43].mxu1 }
 0x13c   : > { %v826_v54 = vpop.f32.mrb[44].mxu1  ;;  %v999_v55 = vpop.f32.mrb[44].mxu0 }
 0x13d   : > { %v856_v47 = vadd.f32 %v826_v54, %v678_v57  ;;  %v1033_v56 = vadd.f32 %v999_v55, %v855_v39  ;;  %v2260_v46 = vpop.f32.mrb[45].mxu0  ;;  %v2226_v59 = vpop.f32.mrb[45].mxu1 }
 0x140   : > { %v831_v60 = vpop.f32.mrb[46].mxu1  ;;  %v1004_v61 = vpop.f32.mrb[46].mxu0 }
 0x141   : > { %v857_v63 = vadd.f32 %v831_v60, %v679_v1  ;;  %v1034_v0 = vadd.f32 %v1004_v61, %v856_v47  ;;  %v2263_v53 = vpop.f32.mrb[47].mxu0  ;;  %v2229_v3 = vpop.f32.mrb[47].mxu1 }
 0x144   : > { %v836_v4 = vpop.f32.mrb[48].mxu1  ;;  %v1009_v5 = vpop.f32.mrb[48].mxu0 }
 0x145   : > { %v858_v8 = vadd.f32 %v836_v4, %v680_v7  ;;  %v1035_v9 = vadd.f32 %v1009_v5, %v857_v63  ;;  %v2266_v43 = vpop.f32.mrb[49].mxu0  ;;  %v2232_v58 = vpop.f32.mrb[49].mxu1 }
 0x148   : > { %v841_v11 = vpop.f32.mrb[50].mxu1  ;;  %v1014_v12 = vpop.f32.mrb[50].mxu0 }
 0x149   : > { %v859_v13 = vadd.f32 %v841_v11, %v681_v62  ;;  %v1036_v14 = vadd.f32 %v1014_v12, %v858_v8  ;;  %v2269_v57 = vpop.f32.mrb[51].mxu0  ;;  %v2235_v15 = vpop.f32.mrb[51].mxu1 }
 0x14c   : > { %v846_v16 = vpop.f32.mrb[52].mxu1  ;;  %v1019_v17 = vpop.f32.mrb[52].mxu0 }
 0x14d   : > { %v860_v18 = vadd.f32 %v846_v16, %v682_v19  ;;  %v1037_v2 = vadd.f32 %v1019_v17, %v859_v13  ;;  %v2272_v1 = vpop.f32.mrb[53].mxu0  ;;  %v2238_v20 = vpop.f32.mrb[53].mxu1 }
 0x150   : > { %v1024_v22 = vpop.f32.mrb[54].mxu0  ;;  %v1152_v23 = vpop.f32.mrb[54].mxu1 }
 0x151   : > { %v1038_v24 = vadd.f32 %v1024_v22, %v860_v18  ;;  %v1206_v25 = vadd.f32 %v1152_v23, %v1028_v6  ;;  %v2275_v7 = vpop.f32.mrb[55].mxu0  ;;  %v2282_v26 = vpop.f32.mrb[55].mxu1 }
 0x154   : > { %v1157_v28 = vpop.f32.mrb[56].mxu1  ;;  %v1330_v29 = vpop.f32.mrb[56].mxu0 }
 0x155   : > { %v1207_v30 = vadd.f32 %v1157_v28, %v1029_v32  ;;  %v1384_v31 = vadd.f32 %v1330_v29, %v1206_v25  ;;  %v2319_v62 = vpop.f32.mrb[57].mxu0  ;;  %v2285_v10 = vpop.f32.mrb[57].mxu1 }
 0x158   : > { %v1162_v36 = vpop.f32.mrb[58].mxu1  ;;  %v1335_v38 = vpop.f32.mrb[58].mxu0 }
 0x159   : > { %v1208_v40 = vadd.f32 %v1162_v36, %v1030_v44  ;;  %v1385_v42 = vadd.f32 %v1335_v38, %v1207_v30  ;;  %v2322_v19 = vpop.f32.mrb[59].mxu0  ;;  %v2288_v48 = vpop.f32.mrb[59].mxu1  ;;  %v3021_v36 = vld [vmem:[%s3075_s2] ss:$0 sm:$0xff] }
 0x15c   : > { %v1167_v21 = vpop.f32.mrb[60].mxu1  ;;  %v1340_v49 = vpop.f32.mrb[60].mxu0 }
 0x15d   : > { %v1209_v50 = vadd.f32 %v1167_v21, %v1031_v52  ;;  %v2999_v51 = vadd.f32 %v1340_v49, %v1208_v40  ;;  %v2325_v6 = vpop.f32.mrb[61].mxu0  ;;  %v2291_v27 = vpop.f32.mrb[61].mxu1 }
 0x160   : > { %v1172_v33 = vpop.f32.mrb[62].mxu1  ;;  %v1345_v35 = vpop.f32.mrb[62].mxu0 }
 0x161   : > { %v1210_v37 = vadd.f32 %v1172_v33, %v1032_v41  ;;  %v3001_v32 = vadd.f32 %v1345_v35, %v1209_v50  ;;  %v2328_v39 = vpop.f32.mrb[63].mxu0  ;;  %v2294_v34 = vpop.f32.mrb[63].mxu1 }
 0x164   : > { %v1177_v45 = vpop.f32.mrb[64].mxu1  ;;  %v1350_v54 = vpop.f32.mrb[64].mxu0 }
 0x165   : > { %v1211_v44 = vadd.f32 %v1177_v45, %v1033_v56  ;;  %v3003_v55 = vadd.f32 %v1350_v54, %v1210_v37  ;;  %v2331_v47 = vpop.f32.mrb[65].mxu0  ;;  %v2297_v46 = vpop.f32.mrb[65].mxu1 }
 0x168   : > { %v1182_v59 = vpop.f32.mrb[66].mxu1  ;;  %v1355_v52 = vpop.f32.mrb[66].mxu0 }
 0x169   : > { %v1212_v60 = vadd.f32 %v1182_v59, %v1034_v0  ;;  %v3005_v61 = vadd.f32 %v1355_v52, %v1211_v44  ;;  %v2334_v63 = vpop.f32.mrb[67].mxu0  ;;  %v2300_v53 = vpop.f32.mrb[67].mxu1 }
 0x16c   : > { %v1187_v3 = vpop.f32.mrb[68].mxu1  ;;  %v1360_v41 = vpop.f32.mrb[68].mxu0 }
 0x16d   : > { %v1213_v4 = vadd.f32 %v1187_v3, %v1035_v9  ;;  %v3007_v5 = vadd.f32 %v1360_v41, %v1212_v60  ;;  %v2337_v8 = vpop.f32.mrb[69].mxu0  ;;  %v2303_v43 = vpop.f32.mrb[69].mxu1 }
 0x170   : > { %v1192_v58 = vpop.f32.mrb[70].mxu1  ;;  %v1365_v56 = vpop.f32.mrb[70].mxu0 }
 0x171   : > { %v1214_v11 = vadd.f32 %v1192_v58, %v1036_v14  ;;  %v3009_v12 = vadd.f32 %v1365_v56, %v1213_v4  ;;  %v2340_v13 = vpop.f32.mrb[71].mxu0  ;;  %v2306_v57 = vpop.f32.mrb[71].mxu1 }
 0x174   : > { %v1197_v15 = vpop.f32.mrb[72].mxu1  ;;  %v1370_v0 = vpop.f32.mrb[72].mxu0 }
 0x175   : > { %v1215_v16 = vadd.f32 %v1197_v15, %v1037_v2  ;;  %v3011_v17 = vadd.f32 %v1370_v0, %v1214_v11  ;;  %v2343_v18 = vpop.f32.mrb[73].mxu0  ;;  %v2309_v1 = vpop.f32.mrb[73].mxu1 }
 0x178   : > { %v1202_v9 = vpop.f32.mrb[74].mxu1  ;;  %v1375_v20 = vpop.f32.mrb[74].mxu0 }
 0x179   : > { %v1216_v22 = vadd.f32 %v1202_v9, %v1038_v24  ;;  %v3013_v23 = vadd.f32 %v1375_v20, %v1215_v16  ;;  %v2346_v25 = vpop.f32.mrb[75].mxu0  ;;  %v2312_v7 = vpop.f32.mrb[75].mxu1 }
 0x17c   : > { %v1380_v14 = vpop.f32.mrb[76].mxu0  ;;  %v1508_v26 = vpop.f32.mrb[76].mxu1 }
 0x17d   : > { %v3015_v28 = vadd.f32 %v1380_v14, %v1216_v22  ;;  %v1562_v29 = vadd.f32 %v1508_v26, %v1384_v31  ;;  %v2349_v30 = vpop.f32.mrb[77].mxu0  ;;  %v2356_v62 = vpop.f32.mrb[77].mxu1 }
 0x180   : > { %v1513_v2 = vpop.f32.mrb[78].mxu1  ;;  %v1686_v10 = vpop.f32.mrb[78].mxu0 }
 0x181   : > { %v1563_v24 = vadd.f32 %v1513_v2, %v1385_v42  ;;  %v1740_v38 = vadd.f32 %v1686_v10, %v1562_v29  ;;  %v2393_v40 = vpop.f32.mrb[79].mxu0  ;;  %v2359_v19 = vpop.f32.mrb[79].mxu1 }
 0x183   : > { %v1758_v48 = vadd.f32 %v3021_v36, %v1740_v38 }
 0x184   : > { %v1518_v31 = vpop.f32.mrb[80].mxu1  ;;  %v1691_v21 = vpop.f32.mrb[80].mxu0 }
 0x185   : > { %v1769_v49 = vmax.f32 %v1758_v48, 0.0  ;;  %v1564_v50 = vadd.f32 %v1518_v31, %v2999_v51  ;;  %v1741_v6 = vadd.f32 %v1691_v21, %v1563_v24  ;;  %v2396_v42 = vpop.f32.mrb[81].mxu0  ;;  %v2362_v27 = vpop.f32.mrb[81].mxu1 }
 0x187   : > { %1781 = vst.msk [vmem:[%s3027_s7] sm:$0xff] %vm1780_vm2, %v1769_v49  ;;  %v1759_v33 = vadd.f32 %v3021_v36, %v1741_v6 }
 0x188   : > { %v1523_v35 = vpop.f32.mrb[82].mxu1  ;;  %v1696_v37 = vpop.f32.mrb[82].mxu0 }
 0x189   : > { %v1770_v39 = vmax.f32 %v1759_v33, 0.0  ;;  %v1565_v34 = vadd.f32 %v1523_v35, %v3001_v32  ;;  %v1742_v45 = vadd.f32 %v1696_v37, %v1564_v50  ;;  %v2399_v54 = vpop.f32.mrb[83].mxu0  ;;  %v2365_v44 = vpop.f32.mrb[83].mxu1 }
 0x18b   : > { %1782 = vst.msk [vmem:[%s3027_s7 + $0x8] sm:$0xff] %vm1780_vm2, %v1770_v39  ;;  %v1760_v51 = vadd.f32 %v3021_v36, %v1742_v45 }
 0x18c   : > { %v1528_v47 = vpop.f32.mrb[84].mxu1  ;;  %v1701_v46 = vpop.f32.mrb[84].mxu0 }
 0x18d   : > { %v1771_v59 = vmax.f32 %v1760_v51, 0.0  ;;  %v1566_v52 = vadd.f32 %v1528_v47, %v3003_v55  ;;  %v1743_v60 = vadd.f32 %v1701_v46, %v1565_v34  ;;  %v2402_v63 = vpop.f32.mrb[85].mxu0  ;;  %v2368_v53 = vpop.f32.mrb[85].mxu1 }
 0x18f   : > { %1783 = vst.msk [vmem:[%s3027_s7 + $0x10] sm:$0xff] %vm1780_vm2, %v1771_v59  ;;  %v1761_v32 = vadd.f32 %v3021_v36, %v1743_v60 }
 0x190   : > { %v1533_v3 = vpop.f32.mrb[86].mxu1  ;;  %v1706_v41 = vpop.f32.mrb[86].mxu0 }
 0x191   : > { %v1772_v4 = vmax.f32 %v1761_v32, 0.0  ;;  %v1567_v8 = vadd.f32 %v1533_v3, %v3005_v61  ;;  %v1744_v43 = vadd.f32 %v1706_v41, %v1566_v52  ;;  %v2405_v58 = vpop.f32.mrb[87].mxu0  ;;  %v2371_v56 = vpop.f32.mrb[87].mxu1 }
 0x193   : > { %1784 = vst.msk [vmem:[%s3027_s7 + $0x18] sm:$0xff] %vm1780_vm2, %v1772_v4  ;;  %v1762_v55 = vadd.f32 %v3021_v36, %v1744_v43 }
 0x194   : > { %v1538_v11 = vpop.f32.mrb[88].mxu1  ;;  %v1711_v13 = vpop.f32.mrb[88].mxu0 }
 0x195   : > { %v1773_v57 = vmax.f32 %v1762_v55, 0.0  ;;  %v1568_v15 = vadd.f32 %v1538_v11, %v3007_v5  ;;  %v1745_v0 = vadd.f32 %v1711_v13, %v1567_v8  ;;  %v2408_v16 = vpop.f32.mrb[89].mxu0  ;;  %v2374_v18 = vpop.f32.mrb[89].mxu1 }
 0x197   : > { %1785 = vst.msk [vmem:[%s3027_s7 + $0x20] sm:$0xff] %vm1780_vm2, %v1773_v57  ;;  %v1763_v61 = vadd.f32 %v3021_v36, %v1745_v0 }
 0x198   : > { %v1543_v1 = vpop.f32.mrb[90].mxu1  ;;  %v1716_v9 = vpop.f32.mrb[90].mxu0 }
 0x199   : > { %v1774_v20 = vmax.f32 %v1763_v61, 0.0  ;;  %v1569_v22 = vadd.f32 %v1543_v1, %v3009_v12  ;;  %v1746_v25 = vadd.f32 %v1716_v9, %v1568_v15  ;;  %v2411_v7 = vpop.f32.mrb[91].mxu0  ;;  %v2377_v14 = vpop.f32.mrb[91].mxu1 }
 0x19b   : > { %1786 = vst.msk [vmem:[%s3027_s7 + $0x28] sm:$0xff] %vm1780_vm2, %v1774_v20  ;;  %v1764_v5 = vadd.f32 %v3021_v36, %v1746_v25 }
 0x19c   : > { %v1548_v26 = vpop.f32.mrb[92].mxu1  ;;  %v1721_v29 = vpop.f32.mrb[92].mxu0 }
 0x19d   : > { %v1775_v30 = vmax.f32 %v1764_v5, 0.0  ;;  %v1570_v62 = vadd.f32 %v1548_v26, %v3011_v17  ;;  %v1747_v2 = vadd.f32 %v1721_v29, %v1569_v22  ;;  %v2414_v10 = vpop.f32.mrb[93].mxu0  ;;  %v2380_v24 = vpop.f32.mrb[93].mxu1 }
 0x19f   : > { %1787 = vst.msk [vmem:[%s3027_s7 + $0x30] sm:$0xff] %vm1780_vm2, %v1775_v30  ;;  %v1765_v12 = vadd.f32 %v3021_v36, %v1747_v2 }
 0x1a0   : > { %v1553_v38 = vpop.f32.mrb[94].mxu1  ;;  %v1726_v40 = vpop.f32.mrb[94].mxu0 }
 0x1a1   : > { %v1776_v19 = vmax.f32 %v1765_v12, 0.0  ;;  %v1571_v48 = vadd.f32 %v1553_v38, %v3013_v23  ;;  %v1748_v31 = vadd.f32 %v1726_v40, %v1570_v62  ;;  %v2417_v21 = vpop.f32.mrb[95].mxu0  ;;  %v2383_v49 = vpop.f32.mrb[95].mxu1 }
 0x1a3   : > { %1788 = vst.msk [vmem:[%s3027_s7 + $0x38] sm:$0xff] %vm1780_vm2, %v1776_v19  ;;  %v1766_v17 = vadd.f32 %v3021_v36, %v1748_v31 }
 0x1a4   : > { %v1558_v50 = vpop.f32.mrb[96].mxu1  ;;  %v1731_v6 = vpop.f32.mrb[96].mxu0 }
 0x1a5   : > { %v1777_v42 = vmax.f32 %v1766_v17, 0.0  ;;  %v1572_v27 = vadd.f32 %v1558_v50, %v3015_v28  ;;  %v1749_v33 = vadd.f32 %v1731_v6, %v1571_v48  ;;  %v2420_v35 = vpop.f32.mrb[97].mxu0  ;;  %v2386_v37 = vpop.f32.mrb[97].mxu1 }
 0x1a7   : > { %1789 = vst.msk [vmem:[%s3027_s7 + $0x40] sm:$0xff] %vm1780_vm2, %v1777_v42  ;;  %v1767_v23 = vadd.f32 %v3021_v36, %v1749_v33 }
 0x1a8   : > { %v1736_v39 = vpop.f32.mrb[98].mxu0 }
 0x1a9   : > { %v1778_v34 = vmax.f32 %v1767_v23, 0.0  ;;  %v1750_v45 = vadd.f32 %v1736_v39, %v1572_v27  ;;  %v2423_v54 = vpop.f32.mrb[99].mxu0 }
 0x1ab   : > { %1790 = vst.msk [vmem:[%s3027_s7 + $0x48] sm:$0xff] %vm1780_vm2, %v1778_v34  ;;  %v1768_v44 = vadd.f32 %v3021_v36, %v1750_v45 }
 0x1ad   : > { %v1779_v51 = vmax.f32 %v1768_v44, 0.0 }
 0x1af   : > { %1791 = vst.msk [vmem:[%s3027_s7 + $0x50] sm:$0xff] %vm1780_vm2, %v1779_v51 }
 0x1b0 PF: > { %s13_s12 = sadd.s32 1, %s2471_s12  }
 0x1b1   : > { %p10_p4 = scmp.ge.s32.totalorder %s13_s12, 8  }
 0x1b3   :  { %12 = sbr.rel (!%p10_p4) target bundleno = 1 (0x1), region = 70 }

// kernel: loss_forward.11
= control target key start
LH: loop header
LB: loop body
LE: loop exit
PB: predicated region body
PF: predicated region fallthrough
CT: control target
= control target key end

     0   :  { %s1652_s12 = smov 0   ;;  %s1859_s0 = inlined_call_operand.vmem [shape: f32[6,49,32], index: 0, kind: input, shape index: {}]   ;;  %s1860_s1 = inlined_call_operand.vmem [shape: f32[9,32,64], index: 1, kind: input, shape index: {}]   ;;  %s1861_s2 = inlined_call_operand.vmem [shape: f32[1,64], index: 2, kind: input, shape index: {}]   ;;  %s1862_s3 = inlined_call_operand.vmem [shape: f32[6,28,64], index: 3, kind: output, shape index: {}]  }
   0x1 LB: > { %s1229_s13 = sadd.s32 4294967295, %s1630_s12   ;;  %p1233_p0 = scmp.ge.s32.totalorder %s1630_s12, 1  ;;  %s1630_s12 = sphi %s1652_s12, %s13_s12  }
   0x2   : > { %p137_p1 = scmp.lt.s32.totalorder %s1630_s12, 7 }
   0x4   : > { %p138_p2 = pnand %p1233_p0, %p137_p1 }
   0x5   : > { %v1237_v0 = vld [vmem:[%s1860_s1 + $0x20] sm:$0xff] (!%p138_p2)  ;;  %v1238_v1 = vld [vmem:[%s1860_s1 + $0x28] sm:$0xff] (!%p138_p2)  ;;  %p161_p3 = scmp.lt.s32.totalorder (!%p138_p2), %s1229_s13, 5  ;;  %v1239_v5 = vld [vmem:[%s1860_s1 + $0x30] sm:$0xff] (!%p138_p2)  ;;  %vm188_vm0 = vcmask (!%p138_p2), 261120   ;;  %vm1172_vm1 = vcmask (!%p138_p2), 519168  }
   0x6   : > { %141 = sbr.rel (%p138_p2) target bundleno = 272 (0x110), region = 32  ;;  %v1265_v2 = vld [vmem:[%s1860_s1 + $0x80] sm:$0xff] (!%p138_p2)  ;;  %v1507_v3 = vpack.c.bf16 (!%p138_p2), %v1238_v1, %v1237_v0  ;;  %v1266_v4 = vld [vmem:[%s1860_s1 + $0x88] sm:$0xff] (!%p138_p2)  ;;  %v1240_v6 = vld [vmem:[%s1860_s1 + $0x38] sm:$0xff] (!%p138_p2)  ;;  %vm1168_vm2 = vcmask (!%p138_p2), 523264  }
   0x7   : > { %v1539_v7 = vpack.c.bf16 (!%p138_p2), %v1266_v4, %v1265_v2  ;;  %v1511_v8 = vpack.c.bf16 (!%p138_p2), %v1240_v6, %v1239_v5  ;;  %v1267_v9 = vld [vmem:[%s1860_s1 + $0x90] sm:$0xff] (!%p138_p2)  ;;  %v1268_v10 = vld [vmem:[%s1860_s1 + $0x98] sm:$0xff] (!%p138_p2)  ;;  %v175_v11 = vld [vmem:[%s1860_s1] sm:$0xff] (!%p138_p2) }
   0x8   : > { %1508 = vmatprep.subr.bf16.mxu1 (!%p138_p2), %v1507_v3  ;;  %v1543_v12 = vpack.c.bf16 (!%p138_p2), %v1268_v10, %v1267_v9  ;;  %v176_v13 = vld [vmem:[%s1860_s1 + $0x8] sm:$0xff] (!%p138_p2)  ;;  %v1273_v14 = vld [vmem:[%s1860_s1 + $0xa0] sm:$0xff] (!%p138_p2)  ;;  %v177_v18 = vld [vmem:[%s1860_s1 + $0x10] sm:$0xff] (!%p138_p2) }
   0x9   : > { %v1274_v15 = vld [vmem:[%s1860_s1 + $0xa8] sm:$0xff] (!%p138_p2)  ;;  %1540 = vmatprep.subr.bf16.mxu0 (!%p138_p2), %v1539_v7  ;;  %1510 = vmatpush3.bf16.msra.mxu1 (!%p138_p2), %v1507_v3  ;;  %v1515_v16 = vpack.c.bf16 (!%p138_p2), %v176_v13, %v175_v11  ;;  %v178_v21 = vld [vmem:[%s1860_s1 + $0x18] sm:$0xff] (!%p138_p2)  ;;  %v1275_v23 = vld [vmem:[%s1860_s1 + $0xb0] sm:$0xff] (!%p138_p2) }
   0xa   : > { %1542 = vmatpush3.bf16.msra.mxu0 (!%p138_p2), %v1539_v7  ;;  %1512 = vmatprep.subr.bf16.mxu1 (!%p138_p2), %v1511_v8  ;;  %v1547_v17 = vpack.c.bf16 (!%p138_p2), %v1274_v15, %v1273_v14  ;;  %v1276_v24 = vld [vmem:[%s1860_s1 + $0xb8] sm:$0xff] (!%p138_p2)  ;;  %v1519_v27 = vpack.c.bf16 (!%p138_p2), %v178_v21, %v177_v18  ;;  %v1249_v30 = vld [vmem:[%s1860_s1 + $0x40] sm:$0xff] (!%p138_p2)  ;;  %v1250_v31 = vld [vmem:[%s1860_s1 + $0x48] sm:$0xff] (!%p138_p2) }
   0xb   : > { %1544 = vmatprep.subr.bf16.mxu0 (!%p138_p2), %v1543_v12  ;;  %v1551_v29 = vpack.c.bf16 (!%p138_p2), %v1276_v24, %v1275_v23  ;;  %v1281_v33 = vld [vmem:[%s1860_s1 + $0xc0] sm:$0xff] (!%p138_p2)  ;;  %v1282_v34 = vld [vmem:[%s1860_s1 + $0xc8] sm:$0xff] (!%p138_p2)  ;;  %v1523_v37 = vpack.c.bf16 (!%p138_p2), %v1250_v31, %v1249_v30  ;;  %v1251_v39 = vld [vmem:[%s1860_s1 + $0x50] sm:$0xff] (!%p138_p2) }
   0xc   : > { %v1555_v38 = vpack.c.bf16 (!%p138_p2), %v1282_v34, %v1281_v33  ;;  %v1252_v40 = vld [vmem:[%s1860_s1 + $0x58] sm:$0xff] (!%p138_p2)  ;;  %v1283_v41 = vld [vmem:[%s1860_s1 + $0xd0] sm:$0xff] (!%p138_p2)  ;;  %v1257_v46 = vld [vmem:[%s1860_s1 + $0x60] sm:$0xff] (!%p138_p2) }
   0xd   : > { %s1864_s13 = smov (!%p161_p3, %s1229_s13), 5  ;;  %1514 = vmatpush3.bf16.msra.mxu1 %v1511_v8  ;;  %v1284_v42 = vld [vmem:[%s1860_s1 + $0xd8] sm:$0xff]  ;;  %v1527_v43 = vpack.c.bf16 %v1252_v40, %v1251_v39  ;;  %v1258_v47 = vld [vmem:[%s1860_s1 + $0x68] sm:$0xff]  ;;  %v1289_v49 = vld [vmem:[%s1860_s1 + $0xe0] sm:$0xff] }
   0xe   : > { %s1615_s11 = smul.u32 56, %s1864_s13  ;;  %1546 = vmatpush3.bf16.msra.mxu0 %v1543_v12  ;;  %1516 = vmatprep.subr.bf16.mxu1 %v1515_v16  ;;  %v1559_v45 = vpack.c.bf16 %v1284_v42, %v1283_v41  ;;  %v1290_v50 = vld [vmem:[%s1860_s1 + $0xe8] sm:$0xff]  ;;  %v1531_v53 = vpack.c.bf16 %v1258_v47, %v1257_v46  ;;  %v1259_v56 = vld [vmem:[%s1860_s1 + $0x70] sm:$0xff]  ;;  %v1260_v57 = vld [vmem:[%s1860_s1 + $0x78] sm:$0xff]  ;;  %s1308_s18 = sshll.u32 %s1864_s13, 5 }
   0xf   : > { %1548 = vmatprep.subr.bf16.mxu0 %v1547_v17  ;;  %v1563_v55 = vpack.c.bf16 %v1290_v50, %v1289_v49  ;;  %v1291_v59 = vld [vmem:[%s1860_s1 + $0xf0] sm:$0xff]  ;;  %v1292_v60 = vld [vmem:[%s1860_s1 + $0xf8] sm:$0xff]  ;;  %v1535_v63 = vpack.c.bf16 %v1260_v57, %v1259_v56  ;;  %v1297_v2 = vld [vmem:[%s1860_s1 + $0x100] sm:$0xff]  ;;  %s170_s21 = scalar_lea.vmem %s1862_s3, %s1308_s18 }
  0x10   : > { %s1702_s16 = scalar_lea.vmem %s1859_s0, %s1615_s11  ;;  %v1567_v1 = vpack.c.bf16 %v1292_v60, %v1291_v59  ;;  %v1298_v3 = vld [vmem:[%s1860_s1 + $0x108] sm:$0xff]  ;;  %v1299_v9 = vld [vmem:[%s1860_s1 + $0x110] sm:$0xff]  ;;  %v1300_v10 = vld [vmem:[%s1860_s1 + $0x118] sm:$0xff] }
  0x11   : > { %v179_v19 = vld [vmem:[%s1702_s16 + $0x1] sm:$0xff]  ;;  %v180_v22 = vld [vmem:[%s1702_s16 + $0x9] sm:$0xff]  ;;  %v181_v26 = vld [vmem:[%s1702_s16 + $0x11] sm:$0xff]  ;;  %v1571_v7 = vpack.c.bf16 %v1298_v3, %v1297_v2  ;;  %v1575_v12 = vpack.c.bf16 %v1300_v10, %v1299_v9 }
  0x12   : > { %v603_v20 = vld [vmem:[%s1702_s16 + $0x8] sm:$0xff]  ;;  %1389 = vmatprep.mubr.msk.f32.mxu1 %vm188_vm0, %v179_v19  ;;  %v1722_v25 = vld [vmem:[%s1702_s16 + $0x10] sm:$0xff]  ;;  %v1727_v28 = vld [vmem:[%s1702_s16 + $0x18] sm:$0xff] }
  0x13   : > { %1445 = vmatprep.mubr.msk.f32.mxu0 %vm188_vm0, %v603_v20  ;;  %1390 = vmatmul.mubr.msk.f32.vlgmr.msra.gmra.mrb[0].mxu1 %vm188_vm0, %v180_v22  ;;  %v182_v32 = vld [vmem:[%s1702_s16 + $0x19] sm:$0xf]  ;;  %v606_v35 = vld [vmem:[%s1702_s16 + $0x20] sm:$0xf]  ;;  %v823_v54 = vld [vmem:[%s1702_s16 + $0xe] sm:$0xff] }
  0x14   : > { %1446 = vmatmul.mubr.msk.f32.vlgmr.msra.gmra.mrb[0].mxu0 %vm188_vm0, %v1722_v25  ;;  %1518 = vmatpush3.bf16.msra.mxu1 %v1515_v16  ;;  %v171_v36 = vld [vmem:[%s1702_s16] sm:$0xff]  ;;  %v174_v48 = vld [vmem:[%s1702_s16 + $0x18] sm:$0xf]  ;;  %v384_v58 = vld [vmem:[%s1702_s16 + $0xa] sm:$0xff] }
  0x15   : > { %1550 = vmatpush3.bf16.msra.mxu0 %v1547_v17  ;;  %1392 = vmatprep.mubr.msk.f32.mxu1 %vm188_vm0, %v181_v26  ;;  %v715_v44 = vld [vmem:[%s1702_s16 + $0x19] sm:$0xff]  ;;  %v716_v51 = vld [vmem:[%s1702_s16 + $0x21] sm:$0xf]  ;;  %v826_v5 = vld [vmem:[%s1702_s16 + $0x26] sm:$0xf] }
  0x16   : > { %1448 = vmatprep.mubr.msk.f32.mxu0 %vm188_vm0, %v1727_v28  ;;  %1520 = vmatprep.subr.bf16.mxu1 %v1519_v27  ;;  %v383_v52 = vld [vmem:[%s1702_s16 + $0x2] sm:$0xff]  ;;  %v824_v61 = vld [vmem:[%s1702_s16 + $0x16] sm:$0xff] }
  0x17   : > { %1393 = vmatmul.mubr.msk.f32.gmra.mrb[2].mxu1 %vm188_vm0, %v182_v32  ;;  %1552 = vmatprep.subr.bf16.mxu0 %v1551_v29  ;;  %v385_v62 = vld [vmem:[%s1702_s16 + $0x12] sm:$0xff]  ;;  %v825_v0 = vld [vmem:[%s1702_s16 + $0x1e] sm:$0xff]  ;;  %v386_v4 = vld [vmem:[%s1702_s16 + $0x1a] sm:$0xf] }
  0x18   : > { %1449 = vmatmul.mubr.msk.f32.gmra.mrb[2].mxu0 %vm188_vm0, %v606_v35  ;;  %1522 = vmatpush3.bf16.msra.mxu1 %v1519_v27  ;;  %v493_v6 = vld [vmem:[%s1702_s16 + $0x7] sm:$0xff]  ;;  %v933_v8 = vld [vmem:[%s1702_s16 + $0xf] sm:$0xff]  ;;  %v934_v11 = vld [vmem:[%s1702_s16 + $0x17] sm:$0xff] }
  0x19   : > { %1554 = vmatpush3.bf16.msra.mxu0 %v1551_v29  ;;  %1403 = vmatprep.mubr.msk.f32.mxu1 %vm188_vm0, %v171_v36  ;;  %v935_v13 = vld [vmem:[%s1702_s16 + $0x1f] sm:$0xff]  ;;  %v936_v15 = vld [vmem:[%s1702_s16 + $0x27] sm:$0xf] }
  0x1a   : > { %1459 = vmatprep.mubr.msk.f32.mxu0 %vm188_vm0, %v180_v22  ;;  %1524 = vmatprep.subr.bf16.mxu1 %v1523_v37  ;;  %v496_v14 = vld [vmem:[%s1702_s16 + $0x1f] sm:$0xf]  ;;  %v1046_v17 = vld [vmem:[%s1702_s16 + $0x28] sm:$0xf] }
  0x1b   : > { %1404 = vmatmul.mubr.msk.f32.vlgmr.msra.gmra.mrb[0].mxu1 %vm188_vm0, %v603_v20  ;;  %1556 = vmatprep.subr.bf16.mxu0 %v1555_v38  ;;  %v1045_v16 = vld [vmem:[%s1702_s16 + $0x20] sm:$0xff] }
  0x1c   : > { %1460 = vmatmul.mubr.msk.f32.vlgmr.msra.gmra.mrb[0].mxu0 %vm188_vm0, %v181_v26  ;;  %1526 = vmatpush3.bf16.msra.mxu1 %v1523_v37  ;;  %v1305_v27 = vld [vmem:[%s1861_s2] ss:$0 sm:$0xff] }
  0x1d   : > { %1558 = vmatpush3.bf16.msra.mxu0 %v1555_v38  ;;  %1406 = vmatprep.mubr.msk.f32.mxu1 %vm188_vm0, %v1722_v25 }
  0x1e   : > { %1462 = vmatprep.mubr.msk.f32.mxu0 %vm188_vm0, %v715_v44  ;;  %1528 = vmatprep.subr.bf16.mxu1 %v1527_v43 }
  0x1f   : > { %1407 = vmatmul.mubr.msk.f32.gmra.mrb[2].mxu1 %vm188_vm0, %v174_v48  ;;  %1560 = vmatprep.subr.bf16.mxu0 %v1559_v45 }
  0x20   : > { %1463 = vmatmul.mubr.msk.f32.gmra.mrb[2].mxu0 %vm188_vm0, %v716_v51  ;;  %1530 = vmatpush3.bf16.msra.mxu1 %v1527_v43 }
  0x21   : > { %1562 = vmatpush3.bf16.msra.mxu0 %v1559_v45  ;;  %1417 = vmatprep.mubr.msk.f32.mxu1 %vm188_vm0, %v383_v52 }
  0x22   : > { %1473 = vmatprep.mubr.msk.f32.mxu0 %vm188_vm0, %v823_v54  ;;  %1532 = vmatprep.subr.bf16.mxu1 %v1531_v53 }
  0x23   : > { %1418 = vmatmul.mubr.msk.f32.vlgmr.msra.gmra.mrb[0].mxu1 %vm188_vm0, %v384_v58  ;;  %1564 = vmatprep.subr.bf16.mxu0 %v1563_v55 }
  0x24   : > { %1474 = vmatmul.mubr.msk.f32.vlgmr.msra.gmra.mrb[0].mxu0 %vm188_vm0, %v824_v61  ;;  %1534 = vmatpush3.bf16.msra.mxu1 %v1531_v53 }
  0x25   : > { %1566 = vmatpush3.bf16.msra.mxu0 %v1563_v55  ;;  %1420 = vmatprep.mubr.msk.f32.mxu1 %vm188_vm0, %v385_v62 }
  0x26   : > { %1476 = vmatprep.mubr.msk.f32.mxu0 %vm188_vm0, %v825_v0  ;;  %1536 = vmatprep.subr.bf16.mxu1 %v1535_v63 }
  0x27   : > { %1421 = vmatmul.mubr.msk.f32.gmra.mrb[2].mxu1 %vm188_vm0, %v386_v4  ;;  %1568 = vmatprep.subr.bf16.mxu0 %v1567_v1 }
  0x28   : > { %1477 = vmatmul.mubr.msk.f32.gmra.mrb[2].mxu0 %vm188_vm0, %v826_v5  ;;  %1538 = vmatpush3.bf16.msra.mxu1 %v1535_v63 }
  0x29   : > { %1570 = vmatpush3.bf16.msra.mxu0 %v1567_v1  ;;  %1431 = vmatprep.mubr.msk.f32.mxu1 %vm188_vm0, %v493_v6 }
  0x2a   : > { %1487 = vmatprep.mubr.msk.f32.mxu0 %vm188_vm0, %v933_v8  ;;  %1572 = vmatprep.subr.bf16.mxu0 %v1571_v7 }
  0x2b   : > { %1432 = vmatmul.mubr.msk.f32.vlgmr.msra.gmra.mrb[0].mxu1 %vm188_vm0, %v933_v8  ;;  %1579 = vmatprep.subr.bf16.mxu1 %v1571_v7 }
  0x2c   : > { %1488 = vmatmul.mubr.msk.f32.vlgmr.msra.gmra.mrb[0].mxu0 %vm188_vm0, %v934_v11  ;;  %1581 = vmatpush3.bf16.msra.mxu1 %v1571_v7 }
  0x2d   : > { %1574 = vmatpush3.bf16.msra.mxu0 %v1571_v7  ;;  %1434 = vmatprep.mubr.msk.f32.mxu1 %vm188_vm0, %v934_v11 }
  0x2e   : > { %1490 = vmatprep.mubr.msk.f32.mxu0 %vm188_vm0, %v935_v13  ;;  %1576 = vmatprep.subr.bf16.mxu0 %v1575_v12 }
  0x2f   : > { %1435 = vmatmul.mubr.msk.f32.gmra.mrb[2].mxu1 %vm188_vm0, %v496_v14  ;;  %1580 = vmatprep.subr.bf16.mxu1 %v1575_v12 }
  0x30   : > { %1491 = vmatmul.mubr.msk.f32.gmra.mrb[2].mxu0 %vm188_vm0, %v936_v15  ;;  %1582 = vmatpush3.bf16.msra.mxu1 %v1575_v12 }
  0x31   : > { %1578 = vmatpush3.bf16.msra.mxu0 %v1575_v12  ;;  %1501 = vmatprep.mubr.msk.f32.mxu0 %vm188_vm0, %v1722_v25 }
  0x32   : > { %1504 = vmatprep.mubr.msk.f32.mxu1 %vm188_vm0, %v1045_v16 }
  0x33   : > { %1505 = vmatmul.mubr.msk.f32.vlgmr.msra.gmra.mrb[4].mxu1 %vm188_vm0, %v1046_v17 }
  0x34   : > { %1502 = vmatmul.mubr.msk.f32.vlgmr.msra.gmra.mrb[0].mxu0 %vm188_vm0, %v1727_v28 }
  0xfe   : > { %v1433_v18 = vpop.f32.mrb[0].mxu1 }
  0xff   : > { %v580_v19 = vpop.f32.mrb[1].mxu1 }
 0x102   : > { %v1436_v20 = vpop.f32.mrb[2].mxu1 }
 0x103   : > { %v1492_v21 = vpop.f32.mrb[2].mxu0  ;;  %v590_v22 = vpop.f32.mrb[3].mxu1 }
 0x104   : > { %v1585_v23 = vadd.f32 %v1492_v21, %v1436_v20  ;;  %v1030_v24 = vpop.f32.mrb[3].mxu0 }
 0x105   : > { %v1587_v26 = vadd.f32 %v1030_v24, %v590_v22 }
 0x106   : > { %v1506_v25 = vpop.f32.mrb[4].mxu1 }
 0x107   : > { %v1503_v29 = vpop.f32.mrb[0].mxu0  ;;  %v1586_v30 = vadd.f32 %v1585_v23, %v1506_v25  ;;  %v1140_v31 = vpop.f32.mrb[5].mxu1 }
 0x108   : > { %v1583_v32 = vadd.f32 %v1503_v29, %v1433_v18  ;;  %v1130_v33 = vpop.f32.mrb[1].mxu0  ;;  %v1588_v28 = vadd.f32 %v1587_v26, %v1140_v31 }
 0x109   : > { %v1163_v34 = vadd.f32 %v1586_v30, %v1305_v27  ;;  %v1584_v35 = vadd.f32 %v1130_v33, %v580_v19 }
 0x10a   : > { %v1161_v36 = vadd.f32 %v1583_v32, %v1305_v27  ;;  %v1162_v37 = vadd.f32 %v1588_v28, %v1305_v27 }
 0x10b   : > { %v1167_v38 = vmax.f32 %v1163_v34, 0.0  ;;  %v1160_v39 = vadd.f32 %v1584_v35, %v1305_v27 }
 0x10c   : > { %v1165_v40 = vmax.f32 %v1161_v36, 0.0  ;;  %v1166_v41 = vmax.f32 %v1162_v37, 0.0 }
 0x10d   : > { %1173 = vst.msk [vmem:[%s170_s21 + $0x18] sm:$0xf] %vm1172_vm1, %v1167_v38  ;;  %v1164_v42 = vmax.f32 %v1160_v39, 0.0 }
 0x10e   : > { %1170 = vst.msk [vmem:[%s170_s21 + $0x8] sm:$0xff] %vm1168_vm2, %v1165_v40  ;;  %1171 = vst.msk [vmem:[%s170_s21 + $0x10] sm:$0xff] %vm1168_vm2, %v1166_v41 }
 0x10f   : > { %1169 = vst.msk [vmem:[%s170_s21] sm:$0xff] %vm1168_vm2, %v1164_v42 }
 0x110 PF: > { %s13_s12 = sadd.s32 1, %s1630_s12  }
 0x111   : > { %p10_p4 = scmp.ge.s32.totalorder %s13_s12, 8  }
 0x113   :  { %12 = sbr.rel (!%p10_p4) target bundleno = 1 (0x1), region = 70 }

// kernel: loss_forward.14
= control target key start
LH: loop header
LB: loop body
LE: loop exit
PB: predicated region body
PF: predicated region fallthrough
CT: control target
= control target key end

     0   :  { %12 = vsyncpa [#allocation3], 0  ;;  %s1604_s0 = inlined_call_operand.vmem [shape: f32[6,4,64], index: 0, kind: input, shape index: {}, may-alias: {0,1,2}]   ;;  %s1605_s1 = inlined_call_operand.vmem [shape: f32[6,4,64], index: 1, kind: input, shape index: {}, may-alias: {0,1,2}]   ;;  %s1606_s2 = inlined_call_operand.vmem [shape: f32[6,4,64], index: 2, kind: input, shape index: {}, may-alias: {0,1,2}]   ;;  %s1607_s3 = inlined_call_operand.hbm [shape: f32[1,1], index: 3, kind: output, shape index: {0}]   ;;  %s1608_s4 = inlined_call_operand.hbm [shape: f32[1,1], index: 4, kind: output, shape index: {1}]   ;;  %s1609_s5 = inlined_call_operand.hbm [shape: f32[1,1], index: 5, kind: output, shape index: {2}]   ;;  %s1610_s6 = inlined_call_operand.hbm [shape: f32[1,1], index: 6, kind: output, shape index: {3}]  }
   0x1   :  { %13 = vsyncpa [#allocation5], 0 }
   0x2   :  { %14 = vsyncpa [#allocation8], 0  ;;  %s1391_s21 = smov 0  }
   0x3 LB: > { %s1397_s22 = sadd.s32 4294967295, %s1349_s21   ;;  %p1068_p0 = scmp.ge.s32.totalorder %s1349_s21, 1  ;;  %s1349_s21 = sphi %s1391_s21, %s20_s21  }
   0x4   : > { %p227_p1 = scmp.lt.s32.totalorder %s1349_s21, 3 }
   0x6   : > { %p228_p2 = pnand %p1068_p0, %p227_p1 }
   0x7   : > { %p261_p3 = scmp.lt.s32.totalorder (!%p228_p2), %s1397_s22, 5  ;;  %s265_s23 = sadd.s32 (!%p228_p2), 2, %s1397_s22 }
   0x8   : > { %231 = sbr.rel (%p228_p2) target bundleno = 667 (0x29b), region = 32  ;;  %p266_p4 = scmp.lt.s32.totalorder (!%p228_p2), %s265_s23, 5 }
   0x9   : > { %s271_s24 = sadd.s32 (!%p228_p2), 4, %s1397_s22  ;;  %p1072_p6 = scmp.ne.s32.totalorder (!%p228_p2), %s1397_s22, 0 }
   0xa   : > { %p272_p5 = scmp.lt.s32.totalorder (!%p228_p2), %s271_s24, 5 }
   0xf   : > { %s262_s25 = scalar_select %p261_p3, %s1397_s22, 5 }
  0x10   : > { %s1612_s23 = smov (!%p266_p4, %s265_s23), 5  ;;  %s1614_s24 = smov (!%p272_p5, %s271_s24), 5 }
  0x11   : > { %s1069_s26 = sshll.u32 %s262_s25, 2  ;;  %s1070_s30 = sshll.u32 %s1612_s23, 2  ;;  %vm281_vm0 = vcmask (!%p1072_p6), 0   ;;  %v1351_v0 = vmov (!%p1072_p6), 0.0  }
  0x12   : > { %s264_s29 = scalar_lea.vmem %s1604_s0, %s1069_s26  ;;  %s269_s9 = scalar_lea.vmem %s1605_s1, %s1070_s30  ;;  %282 = vst.msk [vmem:[#allocation2] sm:$0x1] (!%p1072_p6), %vm281_vm0, %v1351_v0  ;;  %283 = vst.msk [vmem:[#allocation4] sm:$0x1] (!%p1072_p6), %vm281_vm0, %v1351_v0 }
  0x13   : > { %s1071_s10 = sshll.u32 %s1614_s24, 2  ;;  %280 = sbr.rel (%p1072_p6) target bundleno = 26 (0x1a), region = 36  ;;  %284 = vst.msk [vmem:[#allocation6] sm:$0x1] (!%p1072_p6), %vm281_vm0, %v1351_v0  ;;  %285 = vst.msk [vmem:[#allocation7] sm:$0x1] (!%p1072_p6), %vm281_vm0, %v1351_v0 }
  0x14   : > { %s275_s13 = scalar_lea.vmem %s1606_s2, %s1071_s10 }
  0x1a PF: > { %v1415_v1 = vld [vmem:[%s275_s13] sm:$0xf]  ;;  %vm380_vm1 = vcmask 1043456   ;;  %vm355_vm2 = vcmask 31744   ;;  %vm292_vm3 = vcmask 519168   ;;  %vm858_vm4 = vcmask 523264  }
  0x1b   : > { %v1417_v2 = vld [vmem:[%s264_s29] sm:$0xf]  ;;  %669 = vxpose.xlu1.b32.start.end [1/1] (short) (narrow) %v1415_v1, 64  ;;  %vm305_vm5 = vcmask 0   ;;  %p1205_p7 = scmp.eq.s32.totalorder %s1397_s22, 1  ;;  %s1352_s16 = smov [#allocation4]  }
  0x1c   : > { %323 = vxpose.xlu0.b32.start.end [1/1] (short) (narrow) %v1417_v2, 64  ;;  %1137 = vmatprep.subr.msk.mxu0 %vm380_vm1, %v1417_v2  ;;  %v1425_v3 = vld [vmem:[%s269_s9] sm:$0xf]  ;;  %v290_v28 = vsub.f32 %v1417_v2, %v1415_v1  ;;  %s948_s17 = sshll.u32 %s1352_s16, 4  ;;  %s949_s17 = int_to_ptr.vmem [resolvable:$true] %s948_s17 }
  0x1d   : > { %1179 = vmatprep.subr.msk.mxu1 %vm380_vm1, %v1417_v2  ;;  %1138 = vmatpush3.msk.msra.mxu0 %vm380_vm1, %v1417_v2  ;;  %v308_v31 = vsub.f32 %v1425_v3, %v1415_v1  ;;  %s1227_s18 = scalar_lea.vmem %s949_s17, 16  ;;  %s1233_s19 = scalar_lea.vmem %s949_s17, 32 }
  0x1e   : > { %1180 = vmatpush3.msk.msra.mxu1 %vm380_vm1, %v1417_v2  ;;  %1165 = vmatprep.subr.msk.mxu0 %vm380_vm1, %v1415_v1  ;;  %v291_v29 = vand.u32 2147483647, %v290_v28  ;;  %p1228_p8 = scmp.ne.s32.totalorder %s949_s17, %s1227_s18  ;;  %p1234_p11 = scmp.lt.s32.totalorder %s949_s17, %s949_s17 }
  0x1f   : > { %1151 = vmatprep.subr.msk.mxu1 %vm380_vm1, %v1425_v3  ;;  %v309_v32 = vand.u32 2147483647, %v308_v31  ;;  %p1235_p12 = scmp.lt.s32.totalorder %s1233_s19, %s1227_s18 }
  0x20   : > { %v293_v30 = vsel %vm292_vm3, %v291_v29, 0.0  ;;  %p1229_p9 = pnand %p1228_p8, %p1205_p7 }
  0x21   : > { %v310_v33 = vsel %vm292_vm3, %v309_v32, 0.0  ;;  %p1236_p13 = por %p1235_p12, %p1234_p11 }
  0x22   : > { %p1230_p10 = pneg %p1229_p9 }
  0x24   : > { %p1237_p0 = pnand %p1236_p13, %p1230_p10 }
  0x39   : > { %497 = vxpose.xlu0.b32.start.end [1/1] (short) (narrow) %v1425_v3, 64 }
  0x5e   : > { %294 = vadd.xlane.f32.xlu1 %v293_v30 }
  0x82   : > { %311 = vadd.xlane.f32.xlu0 %v310_v33 }
  0x9b   : > { %v685_v4 = vpop.trf.xlu1 }
  0x9c   : > { %v339_v5 = vpop.trf.xlu0 }
  0x9d   : > { %1139 = vmatprep.mubr.msk.f32.mxu0 %vm355_vm2, %v339_v5 }
  0x9f   : > { %v686_v6 = vpop.trf.xlu1 }
  0xa0   : > { %v340_v7 = vpop.trf.xlu0 }
  0xa1   : > { %1140 = vmatmul.mubr.msk.f32.vlgmr.msra.gmra.mrb[0].mxu0 %vm355_vm2, %v340_v7 }
  0xa2   : > { %1166 = vmatpush3.msk.msra.mxu0 %vm380_vm1, %v1415_v1 }
  0xa3   : > { %v687_v8 = vpop.trf.xlu1 }
  0xa4   : > { %v341_v9 = vpop.trf.xlu0 }
  0xa5   : > { %1142 = vmatprep.mubr.msk.f32.mxu0 %vm355_vm2, %v341_v9 }
  0xa7   : > { %v688_v10 = vpop.trf.xlu1 }
  0xa8   : > { %v342_v11 = vpop.trf.xlu0 }
  0xa9   : > { %1143 = vmatmul.mubr.msk.f32.gmra.mrb[2].mxu0 %vm355_vm2, %v342_v11 }
  0xaa   : > { %1167 = vmatprep.mubr.msk.f32.mxu0 %vm355_vm2, %v685_v4 }
  0xab   : > { %v689_v12 = vpop.trf.xlu1 }
  0xac   : > { %v343_v13 = vpop.trf.xlu0 }
  0xad   : > { %1145 = vmatprep.mubr.msk.f32.mxu1 %vm355_vm2, %v343_v13  ;;  %1168 = vmatmul.mubr.msk.f32.vlgmr.msra.gmra.mrb[4].mxu0 %vm355_vm2, %v686_v6 }
  0xae   : > { %1170 = vmatprep.mubr.msk.f32.mxu0 %vm355_vm2, %v687_v8 }
  0xaf   : > { %v690_v14 = vpop.trf.xlu1 }
  0xb0   : > { %v344_v15 = vpop.trf.xlu0 }
  0xb1   : > { %1146 = vmatmul.mubr.msk.f32.vlgmr.msra.gmra.mrb[0].mxu1 %vm355_vm2, %v344_v15  ;;  %1171 = vmatmul.mubr.msk.f32.gmra.mrb[6].mxu0 %vm355_vm2, %v688_v10 }
  0xb2   : > { %1173 = vmatprep.mubr.msk.f32.mxu0 %vm355_vm2, %v689_v12  ;;  %1152 = vmatpush3.msk.msra.mxu1 %vm380_vm1, %v1425_v3 }
  0xb3   : > { %v691_v16 = vpop.trf.xlu1 }
  0xb4   : > { %v345_v17 = vpop.trf.xlu0 }
  0xb5   : > { %1148 = vmatprep.mubr.msk.f32.mxu1 %vm355_vm2, %v345_v17  ;;  %1174 = vmatmul.mubr.msk.f32.gmra.mrb[8].mxu0 %vm355_vm2, %v690_v14 }
  0xb6   : > { %1176 = vmatprep.mubr.msk.f32.mxu0 %vm355_vm2, %v691_v16 }
  0xb7   : > { %v692_v18 = vpop.trf.xlu1 }
  0xb8   : > { %v346_v19 = vpop.trf.xlu0 }
  0xb9   : > { %1149 = vmatmul.mubr.msk.f32.gmra.mrb[2].mxu1 %vm355_vm2, %v346_v19  ;;  %1177 = vmatmul.mubr.msk.f32.gmra.mrb[10].mxu0 %vm355_vm2, %v692_v18 }
  0xbc   : > { %v513_v20 = vpop.trf.xlu0 }
  0xbd   : > { %1153 = vmatprep.mubr.msk.f32.mxu1 %vm355_vm2, %v513_v20 }
  0xc0   : > { %v514_v21 = vpop.trf.xlu0 }
  0xc1   : > { %1154 = vmatmul.mubr.msk.f32.vlgmr.msra.gmra.mrb[4].mxu1 %vm355_vm2, %v514_v21 }
  0xc4   : > { %v515_v22 = vpop.trf.xlu0 }
  0xc5   : > { %1156 = vmatprep.mubr.msk.f32.mxu1 %vm355_vm2, %v515_v22 }
  0xc8   : > { %v516_v23 = vpop.trf.xlu0 }
  0xc9   : > { %1157 = vmatmul.mubr.msk.f32.gmra.mrb[6].mxu1 %vm355_vm2, %v516_v23 }
  0xcc   : > { %v517_v24 = vpop.trf.xlu0 }
  0xcd   : > { %1159 = vmatprep.mubr.msk.f32.mxu1 %vm355_vm2, %v517_v24 }
  0xd0   : > { %v518_v25 = vpop.trf.xlu0 }
  0xd1   : > { %1160 = vmatmul.mubr.msk.f32.gmra.mrb[8].mxu1 %vm355_vm2, %v518_v25 }
  0xd4   : > { %v519_v26 = vpop.trf.xlu0 }
  0xd5   : > { %1162 = vmatprep.mubr.msk.f32.mxu1 %vm355_vm2, %v519_v26 }
  0xd8   : > { %v520_v27 = vpop.trf.xlu0 }
  0xd9   : > { %1163 = vmatmul.mubr.msk.f32.gmra.mrb[10].mxu1 %vm355_vm2, %v520_v27 }
 0x174   : > { %v1141_v34 = vpop.f32.mrb[0].mxu0 }
 0x175   : > { %v450_v35 = vpop.f32.mrb[1].mxu0  ;;  %v490_v39 = vmul.f32 0.00390625, %v1141_v34 }
 0x176   : > { %v489_v42 = vmul.f32 0.00390625, %v450_v35 }
 0x17c   : > { %v1144_v36 = vpop.f32.mrb[2].mxu0 }
 0x17d   : > { %v460_v37 = vpop.f32.mrb[3].mxu0  ;;  %v492_v48 = vmul.f32 0.00390625, %v1144_v36 }
 0x17e   : > { %v491_v53 = vmul.f32 0.00390625, %v460_v37 }
 0x180   : > { %v1169_v38 = vpop.f32.mrb[4].mxu0 }
 0x181   : > { %v1468_v40 = vmul.f32 0.00390625, %v1169_v38  ;;  %v794_v41 = vpop.f32.mrb[5].mxu0 }
 0x182   : > { %v1470_v43 = vmul.f32 0.00390625, %v794_v41 }
 0x183   : > { %v843_v44 = vsub.f32 %v490_v39, %v1468_v40 }
 0x184   : > { %v842_v45 = vsub.f32 %v489_v42, %v1470_v43  ;;  %v1147_v46 = vpop.f32.mrb[0].mxu1  ;;  %v1172_v47 = vpop.f32.mrb[6].mxu0 }
 0x185   : > { %v851_v49 = vand.u32 2147483647, %v843_v44  ;;  %v1474_v50 = vmul.f32 0.00390625, %v1172_v47  ;;  %v470_v51 = vpop.f32.mrb[1].mxu1  ;;  %v804_v52 = vpop.f32.mrb[7].mxu0  ;;  %v494_v62 = vmul.f32 0.00390625, %v1147_v46 }
 0x186   : > { %v850_v54 = vand.u32 2147483647, %v842_v45  ;;  %v835_v55 = vmul.f32 0.00390625, %v804_v52  ;;  %v493_v2 = vmul.f32 0.00390625, %v470_v51 }
 0x187   : > { %v860_v56 = vsel %vm858_vm4, %v851_v49, 0.0  ;;  %v845_v57 = vsub.f32 %v492_v48, %v1474_v50 }
 0x188   : > { %v859_v58 = vsel %vm858_vm4, %v850_v54, 0.0  ;;  %v844_v59 = vsub.f32 %v491_v53, %v835_v55  ;;  %v1175_v60 = vpop.f32.mrb[8].mxu0  ;;  %v295_v54 = vpop.xlane.xlu1 %294 }
 0x189   : > { %v861_v61 = vadd.f32 %v860_v56, %v859_v58  ;;  %v853_v63 = vand.u32 2147483647, %v845_v57  ;;  %v1479_v0 = vmul.f32 0.00390625, %v1175_v60  ;;  %v814_v1 = vpop.f32.mrb[9].mxu0  ;;  %v296_v56 = vrot.slane %v295_v54, 4 }
 0x18a   : > { %v852_v3 = vand.u32 2147483647, %v844_v59  ;;  %v1481_v4 = vmul.f32 0.00390625, %v814_v1  ;;  %v312_v1 = vpop.xlane.xlu0 %311 }
 0x18b   : > { %v847_v5 = vsub.f32 %v494_v62, %v1479_v0  ;;  %v864_v10 = vsel %vm858_vm4, %v853_v63, 0.0 }
 0x18c   : > { %v862_v6 = vsel %vm858_vm4, %v852_v3, 0.0  ;;  %v846_v7 = vsub.f32 %v493_v2, %v1481_v4  ;;  %v1150_v8 = vpop.f32.mrb[2].mxu1  ;;  %v1178_v9 = vpop.f32.mrb[10].mxu0 }
 0x18d   : > { %v863_v11 = vadd.f32 %v862_v6, %v861_v61  ;;  %v496_v12 = vmul.f32 0.00390625, %v1150_v8  ;;  %v1487_v13 = vmul.f32 0.00390625, %v1178_v9  ;;  %v480_v14 = vpop.f32.mrb[3].mxu1  ;;  %v824_v15 = vpop.f32.mrb[11].mxu0  ;;  %v855_v16 = vand.u32 2147483647, %v847_v5 }
 0x18e   : > { %v854_v17 = vand.u32 2147483647, %v846_v7  ;;  %v495_v18 = vmul.f32 0.00390625, %v480_v14  ;;  %v1489_v19 = vmul.f32 0.00390625, %v824_v15  ;;  %v297_v61 = vadd.f32 %v296_v56, %v295_v54 }
 0x18f   : > { %v865_v20 = vadd.f32 %v864_v10, %v863_v11  ;;  %v849_v21 = vsub.f32 %v496_v12, %v1487_v13  ;;  %v868_v25 = vsel %vm858_vm4, %v855_v16, 0.0 }
 0x190   : > { %v866_v22 = vsel %vm858_vm4, %v854_v17, 0.0  ;;  %v848_v23 = vsub.f32 %v495_v18, %v1489_v19 }
 0x191   : > { %v867_v24 = vadd.f32 %v866_v22, %v865_v20  ;;  %v857_v26 = vand.u32 2147483647, %v849_v21 }
 0x192   : > { %v856_v27 = vand.u32 2147483647, %v848_v23 }
 0x193   : > { %v869_v28 = vadd.f32 %v868_v25, %v867_v24  ;;  %v872_v35 = vsel %vm858_vm4, %v857_v26, 0.0 }
 0x194   : > { %v870_v29 = vsel %vm858_vm4, %v856_v27, 0.0  ;;  %v1155_v30 = vpop.f32.mrb[4].mxu1 }
 0x195   : > { %v662_v31 = vmul.f32 0.00390625, %v1155_v30  ;;  %v622_v32 = vpop.f32.mrb[5].mxu1  ;;  %v871_v33 = vadd.f32 %v870_v29, %v869_v28 }
 0x196   : > { %v661_v34 = vmul.f32 0.00390625, %v622_v32  ;;  %v289_v32 = vld [vmem:[#allocation2] sm:$0x1] }
 0x197   : > { %v888_v36 = vsub.f32 %v662_v31, %v1468_v40  ;;  %v873_v37 = vadd.f32 %v872_v35, %v871_v33  ;;  %v307_v33 = vld [vmem:[#allocation4] sm:$0x1] }
 0x198   : > { %v887_v38 = vsub.f32 %v661_v34, %v1470_v43 }
 0x199   : > { %v896_v39 = vand.u32 2147483647, %v888_v36  ;;  %874 = vadd.xlane.f32.xlu1 %v873_v37 }
 0x19a   : > { %v895_v41 = vand.u32 2147483647, %v887_v38 }
 0x19b   : > { %v904_v42 = vsel %vm858_vm4, %v896_v39, 0.0 }
 0x19c   : > { %v903_v44 = vsel %vm858_vm4, %v895_v41, 0.0  ;;  %v1158_v45 = vpop.f32.mrb[6].mxu1 }
 0x19d   : > { %v905_v46 = vadd.f32 %v904_v42, %v903_v44  ;;  %v664_v47 = vmul.f32 0.00390625, %v1158_v45  ;;  %v632_v48 = vpop.f32.mrb[7].mxu1 }
 0x19e   : > { %v663_v49 = vmul.f32 0.00390625, %v632_v48 }
 0x19f   : > { %v890_v51 = vsub.f32 %v664_v47, %v1474_v50  ;;  %v298_v50 = vrot.slane %v297_v61, 2 }
 0x1a0   : > { %v889_v52 = vsub.f32 %v663_v49, %v835_v55  ;;  %v313_v55 = vrot.slane %v312_v1, 4 }
 0x1a1   : > { %v898_v53 = vand.u32 2147483647, %v890_v51  ;;  %v299_v10 = vadd.f32 %v298_v50, %v297_v61 }
 0x1a2   : > { %v897_v40 = vand.u32 2147483647, %v889_v52  ;;  %v314_v6 = vadd.f32 %v313_v55, %v312_v1 }
 0x1a3   : > { %v908_v62 = vsel %vm858_vm4, %v898_v53, 0.0  ;;  %v300_v18 = vrot.slane %v299_v10, 1 }
 0x1a4   : > { %v906_v43 = vsel %vm858_vm4, %v897_v40, 0.0  ;;  %v1161_v57 = vpop.f32.mrb[8].mxu1  ;;  %v315_v9 = vrot.slane %v314_v6, 2 }
 0x1a5   : > { %v907_v58 = vadd.f32 %v906_v43, %v905_v46  ;;  %v666_v59 = vmul.f32 0.00390625, %v1161_v57  ;;  %v642_v60 = vpop.f32.mrb[9].mxu1 }
 0x1a6   : > { %v665_v63 = vmul.f32 0.00390625, %v642_v60  ;;  %v316_v17 = vadd.f32 %v315_v9, %v314_v6 }
 0x1a7   : > { %v892_v2 = vsub.f32 %v666_v59, %v1479_v0  ;;  %v909_v3 = vadd.f32 %v908_v62, %v907_v58 }
 0x1a8   : > { %v891_v5 = vsub.f32 %v665_v63, %v1481_v4  ;;  %v301_v4 = vadd.f32 %v300_v18, %v299_v10  ;;  %v317_v23 = vrot.slane %v316_v17, 1 }
 0x1a9   : > { %v900_v7 = vand.u32 2147483647, %v892_v2 }
 0x1aa   : > { %v899_v8 = vand.u32 2147483647, %v891_v5  ;;  %1181 = vpush %v301_v4  ;;  %v318_v25 = vadd.f32 %v317_v23, %v316_v17 }
 0x1ab   : > { %v912_v0 = vsel %vm858_vm4, %v900_v7, 0.0 }
 0x1ac   : > { %v910_v11 = vsel %vm858_vm4, %v899_v8, 0.0  ;;  %v1164_v12 = vpop.f32.mrb[10].mxu1  ;;  %1183 = vpush %v318_v25 }
 0x1ad   : > { %v911_v14 = vadd.f32 %v910_v11, %v909_v3  ;;  %v668_v15 = vmul.f32 0.00390625, %v1164_v12  ;;  %v652_v16 = vpop.f32.mrb[11].mxu1 }
 0x1ae   : > { %v667_v20 = vmul.f32 0.00390625, %v652_v16 }
 0x1af   : > { %v894_v21 = vsub.f32 %v668_v15, %v1487_v13  ;;  %v913_v22 = vadd.f32 %v912_v0, %v911_v14 }
 0x1b0   : > { %v893_v24 = vsub.f32 %v667_v20, %v1489_v19 }
 0x1b1   : > { %v902_v26 = vand.u32 2147483647, %v894_v21 }
 0x1b2   : > { %v901_v27 = vand.u32 2147483647, %v893_v24 }
 0x1b3   : > { %v916_v30 = vsel %vm858_vm4, %v902_v26, 0.0 }
 0x1b4   : > { %v914_v28 = vsel %vm858_vm4, %v901_v27, 0.0 }
 0x1b5   : > { %v915_v29 = vadd.f32 %v914_v28, %v913_v22 }
 0x1b7   : > { %v917_v31 = vadd.f32 %v916_v30, %v915_v29 }
 0x1b9   : > { %918 = vadd.xlane.f32.xlu1 %v917_v31 }
 0x1db   : > { %s1182_s14 = spop %1181 }
 0x1dc   : > { %v303_v13 = vstv %s1182_s14 }
 0x1dd   : > { %v304_v34 = vadd.f32 %v303_v13, %v289_v32  ;;  %s1184_s15 = spop %1183 }
 0x1de   : > { %v320_v19 = vstv %s1184_s15 }
 0x1df   : > { %v321_v35 = vadd.f32 %v320_v19, %v307_v33  ;;  %306 = vst.msk [vmem:[#allocation2] sm:$0x1] %vm305_vm5, %v304_v34 }
 0x1e1   : > { %322 = vst.msk [vmem:[#allocation4] sm:$0x1] %vm305_vm5, %v321_v35 }
 0x1e2   : > { %1240 = shalt.err (!%p1237_p0)
}
 0x1e3   : > { %s1241_s24 = scalar_lea.hbm %s1608_s4, 16 }
 0x1e4   : > { %p1242_p1 = scmp.ne.s32.totalorder %s1608_s4, %s1241_s24  ;;  %p1247_p4 = scmp.lt.u32.totalorder %s1241_s24, %s1608_s4 }
 0x1e6   : > { %p1243_p2 = pnand %p1242_p1, %p1205_p7 }
 0x1e8   : > { %p1244_p3 = pneg %p1243_p2 }
 0x1ea   : > { %p1249_p5 = pnand %p1247_p4, %p1244_p3 }
 0x1ec   : > { %1252 = shalt.err (!%p1249_p5)
}
 0x1ed   : > { %1192 = dma.vmem_to_hbm [thread:$0]  (%p1205_p7), %s949_s17, 16, %s1608_s4, [#allocation5]  }
 0x1ee   : > { %s1353_s7 = smov [#allocation2]  }
 0x1ef   : > { %s937_s8 = sshll.u32 %s1353_s7, 4  ;;  %s938_s8 = int_to_ptr.vmem [resolvable:$true] %s937_s8 }
 0x1f0   : > { %s1253_s9 = scalar_lea.vmem %s938_s8, 16  ;;  %s1259_s10 = scalar_lea.vmem %s938_s8, 32 }
 0x1f1   : > { %p1254_p6 = scmp.ne.s32.totalorder %s938_s8, %s1253_s9  ;;  %p1260_p10 = scmp.lt.s32.totalorder %s938_s8, %s938_s8 }
 0x1f2   : > { %p1261_p11 = scmp.lt.s32.totalorder %s1259_s10, %s1253_s9 }
 0x1f3   : > { %p1255_p8 = pnand %p1254_p6, %p1205_p7 }
 0x1f4   : > { %p1262_p12 = por %p1261_p11, %p1260_p10 }
 0x1f5   : > { %p1256_p9 = pneg %p1255_p8 }
 0x1f7   : > { %p1263_p13 = pnand %p1262_p12, %p1256_p9 }
 0x1f9   : > { %1266 = shalt.err (!%p1263_p13)
}
 0x1fa   : > { %s1267_s13 = scalar_lea.hbm %s1607_s3, 16 }
 0x1fb   : > { %p1268_p0 = scmp.ne.s32.totalorder %s1607_s3, %s1267_s13  ;;  %p1273_p3 = scmp.lt.u32.totalorder %s1267_s13, %s1607_s3 }
 0x1fd   : > { %p1269_p1 = pnand %p1268_p0, %p1205_p7 }
 0x1ff   : > { %p1270_p2 = pneg %p1269_p1 }
 0x201   : > { %p1275_p4 = pnand %p1273_p3, %p1270_p2 }
 0x203   : > { %1278 = shalt.err (!%p1275_p4)
}
 0x204   : > { %1190 = dma.vmem_to_hbm [thread:$0]  (%p1205_p7), %s938_s8, 16, %s1607_s3, [#allocation3]   ;;  %v841_v53 = vld [vmem:[#allocation6] sm:$0x1] }
 0x205   : > { %s1354_s20 = smov [#allocation6]  }
 0x206   : > { %s959_s23 = sshll.u32 %s1354_s20, 4  ;;  %s960_s23 = int_to_ptr.vmem [resolvable:$true] %s959_s23 }
 0x207   : > { %s1279_s25 = scalar_lea.vmem %s960_s23, 16  ;;  %s1285_s26 = scalar_lea.vmem %s960_s23, 32 }
 0x208   : > { %p1280_p5 = scmp.ne.s32.totalorder %s960_s23, %s1279_s25  ;;  %p1286_p9 = scmp.lt.s32.totalorder %s960_s23, %s960_s23 }
 0x209   : > { %p1287_p10 = scmp.lt.s32.totalorder %s1285_s26, %s1279_s25 }
 0x20a   : > { %p1281_p6 = pnand %p1280_p5, %p1205_p7 }
 0x20b   : > { %p1288_p11 = por %p1287_p10, %p1286_p9 }
 0x20c   : > { %p1282_p8 = pneg %p1281_p6 }
 0x20e   : > { %p1289_p12 = pnand %p1288_p11, %p1282_p8 }
 0x226   : > { %v875_v36 = vpop.xlane.xlu1 %874 }
 0x227   : > { %v876_v37 = vrot.slane %v875_v36, 4 }
 0x229   : > { %v877_v38 = vadd.f32 %v876_v37, %v875_v36 }
 0x22b   : > { %v878_v39 = vrot.slane %v877_v38, 2 }
 0x22d   : > { %v879_v41 = vadd.f32 %v878_v39, %v877_v38 }
 0x22f   : > { %v880_v42 = vrot.slane %v879_v41, 1 }
 0x231   : > { %v881_v44 = vadd.f32 %v880_v42, %v879_v41 }
 0x233   : > { %1185 = vpush %v881_v44 }
 0x246   : > { %v919_v45 = vpop.xlane.xlu1 %918 }
 0x247   : > { %v920_v46 = vrot.slane %v919_v45, 4 }
 0x249   : > { %v921_v47 = vadd.f32 %v920_v46, %v919_v45 }
 0x24b   : > { %v922_v48 = vrot.slane %v921_v47, 2 }
 0x24d   : > { %v923_v49 = vadd.f32 %v922_v48, %v921_v47 }
 0x24f   : > { %v924_v51 = vrot.slane %v923_v49, 1 }
 0x251   : > { %v925_v52 = vadd.f32 %v924_v51, %v923_v49 }
 0x253   : > { %1187 = vpush %v925_v52 }
 0x264   : > { %s1186_s24 = spop %1185 }
 0x265   : > { %v883_v40 = vstv %s1186_s24 }
 0x266   : > { %v884_v54 = vadd.f32 %v883_v40, %v841_v53 }
 0x268   : > { %885 = vst.msk [vmem:[#allocation6] sm:$0x1] %vm305_vm5, %v884_v54 }
 0x269   : > { %1292 = shalt.err (!%p1289_p12)
}
 0x26a   : > { %s1293_s29 = scalar_lea.hbm %s1609_s5, 16 }
 0x26b   : > { %p1294_p13 = scmp.ne.s32.totalorder %s1609_s5, %s1293_s29  ;;  %p1299_p2 = scmp.lt.u32.totalorder %s1293_s29, %s1609_s5 }
 0x26d   : > { %p1295_p0 = pnand %p1294_p13, %p1205_p7 }
 0x26f   : > { %p1296_p1 = pneg %p1295_p0 }
 0x271   : > { %p1301_p3 = pnand %p1299_p2, %p1296_p1 }
 0x273   : > { %1304 = shalt.err (!%p1301_p3)
}
 0x274   : > { %1194 = dma.vmem_to_hbm [thread:$0]  (%p1205_p7), %s960_s23, 16, %s1609_s5, [#allocation5]   ;;  %v886_v56 = vld [vmem:[#allocation7] sm:$0x1] }
 0x275   : > { %s1355_s12 = smov [#allocation7]  }
 0x276   : > { %s970_s13 = sshll.u32 %s1355_s12, 4  ;;  %s971_s13 = int_to_ptr.vmem [resolvable:$true] %s970_s13 }
 0x277   : > { %s1305_s15 = scalar_lea.vmem %s971_s13, 16  ;;  %s1311_s16 = scalar_lea.vmem %s971_s13, 32 }
 0x278   : > { %p1306_p4 = scmp.ne.s32.totalorder %s971_s13, %s1305_s15  ;;  %p1312_p8 = scmp.lt.s32.totalorder %s971_s13, %s971_s13 }
 0x279   : > { %p1313_p9 = scmp.lt.s32.totalorder %s1311_s16, %s1305_s15 }
 0x27a   : > { %p1307_p5 = pnand %p1306_p4, %p1205_p7 }
 0x27b   : > { %p1314_p10 = por %p1313_p9, %p1312_p8 }
 0x27c   : > { %p1308_p6 = pneg %p1307_p5 }
 0x27e   : > { %p1315_p11 = pnand %p1314_p10, %p1308_p6 }
 0x284   : > { %s1188_s14 = spop %1187 }
 0x285   : > { %v927_v43 = vstv %s1188_s14 }
 0x286   : > { %v928_v57 = vadd.f32 %v927_v43, %v886_v56 }
 0x288   : > { %929 = vst.msk [vmem:[#allocation7] sm:$0x1] %vm305_vm5, %v928_v57 }
 0x289   : > { %1318 = shalt.err (!%p1315_p11)
}
 0x28a   : > { %s1319_s19 = scalar_lea.hbm %s1610_s6, 16 }
 0x28b   : > { %p1320_p12 = scmp.ne.s32.totalorder %s1610_s6, %s1319_s19  ;;  %p1325_p1 = scmp.lt.u32.totalorder %s1319_s19, %s1610_s6 }
 0x28d   : > { %p1321_p13 = pnand %p1320_p12, %p1205_p7 }
 0x28f   : > { %p1322_p0 = pneg %p1321_p13 }
 0x291   : > { %p1327_p2 = pnand %p1325_p1, %p1322_p0 }
 0x293   : > { %1330 = shalt.err (!%p1327_p2)
}
 0x294   : > { %1196 = dma.vmem_to_hbm [thread:$0]  (%p1205_p7), %s971_s13, 16, %s1610_s6, [#allocation8]  }
 0x295   : > { %1336 = dma.done.wait (%p1205_p7), [#allocation3], 16  }
 0x296   : > { %1338 = vsyncadd (%p1205_p7), [#allocation3], 4294967280 }
 0x297   : > { %1340 = dma.done.wait (%p1205_p7), [#allocation5], 32  }
 0x298   : > { %1342 = vsyncadd (%p1205_p7), [#allocation5], 4294967264 }
 0x299   : > { %1344 = dma.done.wait (%p1205_p7), [#allocation8], 16  }
 0x29a   : > { %1346 = vsyncadd (%p1205_p7), [#allocation8], 4294967280 }
 0x29b PF: > { %s20_s21 = sadd.s32 1, %s1349_s21  }
 0x29c   : > { %p17_p3 = scmp.ge.s32.totalorder %s20_s21, 4  }
 0x29e   :  { %19 = sbr.rel (!%p17_p3) target bundleno = 3 (0x3), region = 93 }
 0x2a5   :  { %995 = vsyncpa [#allocation3], 1 }
 0x2a6   :  { %997 = vsyncpa [#allocation3 + $0x1], 1 }
 0x2a7   :  { %998 = vsyncpa [#allocation5], 1 }
 0x2a8   :  { %999 = vsyncpa [#allocation8], 1 }

</bundles_post_ra>
